<compile_context>
chip_gen: v7x
topology: tpu7x:2x2x1
jax: 0.10.0
libtpu: 0.0.40
codegen_flags: <defaults>
</compile_context>

<pallas_src>
import jax
import jax.numpy as jnp
from jax import lax
from jax.experimental import pallas as pl
from jax.experimental.pallas import tpu as pltpu


# ----------------------------------------------------------------------------
# Fused kernel: 2-layer bidirectional LSTM, time-major.
#   x_ref   : (T*B, C)    flattened time-major input (row = t*B + b)
#   w1_ref  : (C,  8H)    layer-1 [W_ih_fwd^T | W_ih_bwd^T]  (gate order i,f,o,g)
#   wh1_ref : (2H, 8H)    layer-1 block-diag [W_hh_fwd^T ; W_hh_bwd^T]
#   b1_ref  : (1,  8H)    layer-1 [b_fwd | b_bwd], b = b_ih + b_hh
#   w2_ref  : (2H, 8H)    layer-2 [W_ih_fwd^T | W_ih_bwd^T]
#   wh2_ref : (2H, 8H)    layer-2 block-diag recurrent weight
#   b2_ref  : (1,  8H)    layer-2 bias
#   out_ref : (T, B, 2H)  [h_fwd | h_bwd] per timestep (time-major)
# Scratch:
#   gx_ref  : (T, B, 8H)  precomputed input projection (reused between layers)
#   hf_ref  : (T, B, H)   per-timestep forward hidden states (reused)
#   hb_ref  : (T, B, H)   per-timestep backward hidden states (reused)
#   h_ref   : (B, 2H)     running [h_fwd | h_bwd]
#   c_ref   : (B, 2H)     running [c_fwd | c_bwd]
# Gate order inside each 4H block (after repack): i, f, o, g.
# ----------------------------------------------------------------------------
def _bilstm2_kernel(x_ref, w1_ref, wh1_ref, b1_ref, w2_ref, wh2_ref, b2_ref,
                    out_ref, gx_ref, hf_ref, hb_ref, h_ref, c_ref):
    T, B, H2 = out_ref.shape
    H = H2 // 2
    H3 = 3 * H
    H4 = 4 * H
    TB = T * B

    def lstm_cell(gates, c_prev):
        # gates: (B, 4H) in [i | f | o | g] column order (repacked host-side).
        sfo = jax.nn.sigmoid(gates[:, 0:H3])   # one contiguous EUP region: i,f,o
        g_t = jnp.tanh(gates[:, H3:H4])        # one contiguous EUP region: g
        i_g = sfo[:, 0:H]
        f_g = sfo[:, H:2 * H]
        o_g = sfo[:, 2 * H:H3]
        c_new = f_g * c_prev + i_g * g_t
        h_new = o_g * jnp.tanh(c_new)
        return h_new, c_new

    def run_layer(whh_ref):
        # Zero the recurrent state for this layer.
        h_ref[...] = jnp.zeros(h_ref.shape, h_ref.dtype)
        c_ref[...] = jnp.zeros(c_ref.shape, c_ref.dtype)
        whh = whh_ref[...]   # hoisted: load once per layer, live across the unroll

        def step(s, carry):
            # One MXU dot for BOTH directions: (B, 2H) @ (2H, 8H) -> (B, 8H).
            hdot = jnp.dot(h_ref[...], whh, preferred_element_type=jnp.float32)
            # fwd consumes input time s, bwd consumes input time T-1-s.
            gxs = gx_ref[s]            # (B, 8H)
            gxr = gx_ref[T - 1 - s]    # (B, 8H)
            g_f = hdot[:, 0:H4] + gxs[:, 0:H4]
            g_b = hdot[:, H4:2 * H4] + gxr[:, H4:2 * H4]
            c_all = c_ref[...]

            h_f, c_f = lstm_cell(g_f, c_all[:, 0:H])
            h_b, c_b = lstm_cell(g_b, c_all[:, H:2 * H])

            # Update running state (static lane slices, no concatenate).
            h_ref[:, 0:H] = h_f
            h_ref[:, H:2 * H] = h_b
            c_ref[:, 0:H] = c_f
            c_ref[:, H:2 * H] = c_b

            # Store per-timestep outputs; bwd written at its reversed position.
            hf_ref[s] = h_f
            hb_ref[T - 1 - s] = h_b
            return carry

        lax.fori_loop(0, T, step, 0, unroll=True)

    # ---- Layer 1: input projection for all timesteps & both dirs at once ----
    gx1 = jnp.dot(x_ref[...], w1_ref[...], preferred_element_type=jnp.float32)
    gx_ref[...] = (gx1 + b1_ref[...]).reshape(T, B, 2 * H4)
    run_layer(wh1_ref)

    # ---- Layer 2: input is [h1_fwd | h1_bwd]; avoid lane-concat by summing
    #      the two half-matmuls (rows 0:H of W2 -> fwd feats, H:2H -> bwd). ----
    hf_flat = hf_ref[...].reshape(TB, H)
    hb_flat = hb_ref[...].reshape(TB, H)
    w2 = w2_ref[...]
    gx2 = (jnp.dot(hf_flat, w2[0:H, :], preferred_element_type=jnp.float32) +
           jnp.dot(hb_flat, w2[H:2 * H, :], preferred_element_type=jnp.float32))
    gx_ref[...] = (gx2 + b2_ref[...]).reshape(T, B, 2 * H4)
    run_layer(wh2_ref)

    # ---- Final output: [h2_fwd | h2_bwd] per timestep (time-major). ----
    out_ref[:, :, 0:H] = hf_ref[...]
    out_ref[:, :, H:2 * H] = hb_ref[...]


# ----------------------------------------------------------------------------
# Host-side weight packing.
# ----------------------------------------------------------------------------
def _reorder_gates(w):
    """Reorder PyTorch gate blocks [i; f; g; o] -> [i; f; o; g] along axis 0."""
    H = w.shape[0] // 4
    return jnp.concatenate([w[0:2 * H], w[3 * H:4 * H], w[2 * H:3 * H]], axis=0)


def _pack_layer(layer_p, hidden_size):
    """Pack one bidirectional layer into fused [fwd | bwd] weight blocks."""
    H = hidden_size
    f, b = layer_p['fwd'], layer_p['bwd']
    w_in = jnp.concatenate([_reorder_gates(f['w_ih']).T,
                            _reorder_gates(b['w_ih']).T], axis=1)      # (Din, 8H)
    whh = jnp.zeros((2 * H, 8 * H), jnp.float32)                       # block-diag
    whh = whh.at[0:H, 0:4 * H].set(_reorder_gates(f['w_hh']).T)
    whh = whh.at[H:2 * H, 4 * H:8 * H].set(_reorder_gates(b['w_hh']).T)
    bias = jnp.concatenate([_reorder_gates(f['b_ih'] + f['b_hh']),
                            _reorder_gates(b['b_ih'] + b['b_hh'])])[None, :]  # (1,8H)
    return w_in, whh, bias


def sequence_encoder_rnn(x_nchw, params):
    """SequenceEncoder(encoder_type='rnn') forward: (B, C, 1, W) -> (B, W, 2H)."""
    B, C, Hsp, W = x_nchw.shape
    assert Hsp == 1
    H = params[0]['fwd']['w_hh'].shape[1]
    T = W

    # Im2Seq + time-major flatten: (B, C, 1, W) -> (T, B, C) -> (T*B, C)
    x_tbc = jnp.transpose(x_nchw[:, :, 0, :], (2, 0, 1))
    x_flat = x_tbc.reshape(T * B, C)

    w1, wh1, b1 = _pack_layer(params[0], H)
    w2, wh2, b2 = _pack_layer(params[1], H)

    out_tbd = pl.pallas_call(
        _bilstm2_kernel,
        out_shape=jax.ShapeDtypeStruct((T, B, 2 * H), jnp.float32),
        in_specs=[pl.BlockSpec(memory_space=pltpu.MemorySpace.VMEM)] * 7,
        out_specs=pl.BlockSpec(memory_space=pltpu.MemorySpace.VMEM),
        scratch_shapes=[
            pltpu.VMEM((T, B, 8 * H), jnp.float32),   # gx_ref (reused per layer)
            pltpu.VMEM((T, B, H), jnp.float32),       # hf_ref
            pltpu.VMEM((T, B, H), jnp.float32),       # hb_ref
            pltpu.VMEM((B, 2 * H), jnp.float32),      # h_ref
            pltpu.VMEM((B, 2 * H), jnp.float32),      # c_ref
        ],
    )(x_flat, w1, wh1, b1, w2, wh2, b2)

    # (T, B, 2H) -> (B, W, 2H)  (single tiny transpose; everything else fused)
    return jnp.transpose(out_tbd, (1, 0, 2))


# ----------------------------------------------------------------------------
# Deterministic parameter init (shapes match nn.LSTM(C, H, 2, bidirectional)).
# ----------------------------------------------------------------------------
def init_lstm_params(key, in_channels, hidden_size):
    bound = 1.0 / jnp.sqrt(jnp.float32(hidden_size))
    params = []
    din = in_channels
    for _ in range(2):                       # num_layers = 2
        layer_p = {}
        for d in ('fwd', 'bwd'):
            key, k1, k2, k3, k4 = jax.random.split(key, 5)
            layer_p[d] = {
                'w_ih': jax.random.uniform(k1, (4 * hidden_size, din),
                                           jnp.float32, -bound, bound),
                'w_hh': jax.random.uniform(k2, (4 * hidden_size, hidden_size),
                                           jnp.float32, -bound, bound),
                'b_ih': jax.random.uniform(k3, (4 * hidden_size,),
                                           jnp.float32, -bound, bound),
                'b_hh': jax.random.uniform(k4, (4 * hidden_size,),
                                           jnp.float32, -bound, bound),
            }
        params.append(layer_p)
        din = 2 * hidden_size
    return params


# ----------------------------------------------------------------------------
# Pure-JAX reference (mirrors PyTorch LSTM math) for a correctness check.
# ----------------------------------------------------------------------------
def _ref_direction(x_btd, p, reverse):
    B, T, _ = x_btd.shape
    H = p['w_hh'].shape[1]
    b = p['b_ih'] + p['b_hh']
    h = jnp.zeros((B, H), jnp.float32)
    c = jnp.zeros((B, H), jnp.float32)
    outs = [None] * T
    ts = list(range(T))[::-1] if reverse else list(range(T))
    for t in ts:
        g = x_btd[:, t, :] @ p['w_ih'].T + h @ p['w_hh'].T + b
        i_g = jax.nn.sigmoid(g[:, :H])
        f_g = jax.nn.sigmoid(g[:, H:2 * H])
        g_g = jnp.tanh(g[:, 2 * H:3 * H])
        o_g = jax.nn.sigmoid(g[:, 3 * H:])
        c = f_g * c + i_g * g_g
        h = o_g * jnp.tanh(c)
        outs[t] = h
    return jnp.stack(outs, axis=1)


def sequence_encoder_rnn_ref(x_nchw, params):
    seq = jnp.transpose(x_nchw[:, :, 0, :], (0, 2, 1))
    out = seq
    for layer_p in params:
        fwd = _ref_direction(out, layer_p['fwd'], reverse=False)
        bwd = _ref_direction(out, layer_p['bwd'], reverse=True)
        out = jnp.concatenate([fwd, bwd], axis=-1)
    return out


if __name__ == "__main__":
    B, C, W = 2, 64, 16          # input feature map (B, C, 1, W)
    hidden_size = 32             # LSTM hidden size -> out_channels = 64

    key = jax.random.PRNGKey(0)
    kx, kp = jax.random.split(key)
    x = jax.random.normal(kx, (B, C, 1, W), jnp.float32)
    params = init_lstm_params(kp, C, hidden_size)

    fwd_fn = jax.jit(sequence_encoder_rnn)
    out = jax.block_until_ready(fwd_fn(x, params))
    assert out.shape == (B, W, 2 * hidden_size), out.shape

    ref = jax.block_until_ready(sequence_encoder_rnn_ref(x, params))
    max_err = float(jnp.max(jnp.abs(out - ref)))
    assert max_err < 1e-3, f"mismatch vs reference: {max_err}"

    print("KERNEL_OK")
</pallas_src>

<mosaic_0001>
module attributes {stable_mosaic.version = 11 : i64} {
  func.func @_bilstm2_kernel(%arg0: memref<32x64xf32, #tpu.memory_space<vmem>>, %arg1: memref<64x256xf32, #tpu.memory_space<vmem>>, %arg2: memref<64x256xf32, #tpu.memory_space<vmem>>, %arg3: memref<1x256xf32, #tpu.memory_space<vmem>>, %arg4: memref<64x256xf32, #tpu.memory_space<vmem>>, %arg5: memref<64x256xf32, #tpu.memory_space<vmem>>, %arg6: memref<1x256xf32, #tpu.memory_space<vmem>>, %arg7: memref<16x2x64xf32, #tpu.memory_space<vmem>>, %arg8: memref<16x2x256xf32, #tpu.memory_space<vmem>>, %arg9: memref<16x2x32xf32, #tpu.memory_space<vmem>>, %arg10: memref<16x2x32xf32, #tpu.memory_space<vmem>>, %arg11: memref<2x64xf32, #tpu.memory_space<vmem>>, %arg12: memref<2x64xf32, #tpu.memory_space<vmem>>) attributes {dimension_semantics = [], scalar_prefetch = 0 : i64, scratch_operands = 5 : i64, tpu.core_type = #tpu.core_type<tc>} {
    %c0 = arith.constant 0 : index
    %c0_0 = arith.constant 0 : index
    %0 = vector.load %arg0[%c0, %c0_0] : memref<32x64xf32, #tpu.memory_space<vmem>>, vector<32x64xf32>
    %c0_1 = arith.constant 0 : index
    %c0_2 = arith.constant 0 : index
    %1 = vector.load %arg1[%c0_1, %c0_2] : memref<64x256xf32, #tpu.memory_space<vmem>>, vector<64x256xf32>
    %cst = arith.constant dense<0.000000e+00> : vector<32x256xf32>
    %2 = tpu.matmul %0, %1, %cst {dimension_numbers = #tpu.dot_dimension_numbers<[1], [0], [0], [1], [0, 0, 1, 1], [], []>} : vector<32x64xf32>, vector<64x256xf32>, vector<32x256xf32> -> vector<32x256xf32>
    %c0_3 = arith.constant 0 : index
    %c0_4 = arith.constant 0 : index
    %3 = vector.load %arg3[%c0_3, %c0_4] : memref<1x256xf32, #tpu.memory_space<vmem>>, vector<1x256xf32>
    %4 = vector.broadcast %3 : vector<1x256xf32> to vector<32x256xf32>
    %5 = arith.addf %2, %4 : vector<32x256xf32>
    %6 = vector.shape_cast %5 : vector<32x256xf32> to vector<16x2x256xf32>
    %c0_5 = arith.constant 0 : index
    %c0_6 = arith.constant 0 : index
    %c0_7 = arith.constant 0 : index
    %7 = vector.load %arg8[%c0_5, %c0_6, %c0_7] : memref<16x2x256xf32, #tpu.memory_space<vmem>>, vector<16x2x256xf32>
    tpu.vector_store %arg8[%c0_5, %c0_6, %c0_7], %6 {strides = array<i32>} : memref<16x2x256xf32, #tpu.memory_space<vmem>>, vector<16x2x256xf32>,
    %cst_8 = arith.constant 0.000000e+00 : f32
    %8 = vector.broadcast %cst_8 : f32 to vector<2x64xf32>
    %c0_9 = arith.constant 0 : index
    %c0_10 = arith.constant 0 : index
    %9 = vector.load %arg11[%c0_9, %c0_10] : memref<2x64xf32, #tpu.memory_space<vmem>>, vector<2x64xf32>
    tpu.vector_store %arg11[%c0_9, %c0_10], %8 {strides = array<i32>} : memref<2x64xf32, #tpu.memory_space<vmem>>, vector<2x64xf32>,
    %cst_11 = arith.constant 0.000000e+00 : f32
    %10 = vector.broadcast %cst_11 : f32 to vector<2x64xf32>
    %c0_12 = arith.constant 0 : index
    %c0_13 = arith.constant 0 : index
    %11 = vector.load %arg12[%c0_12, %c0_13] : memref<2x64xf32, #tpu.memory_space<vmem>>, vector<2x64xf32>
    tpu.vector_store %arg12[%c0_12, %c0_13], %10 {strides = array<i32>} : memref<2x64xf32, #tpu.memory_space<vmem>>, vector<2x64xf32>,
    %c0_14 = arith.constant 0 : index
    %c0_15 = arith.constant 0 : index
    %12 = vector.load %arg2[%c0_14, %c0_15] : memref<64x256xf32, #tpu.memory_space<vmem>>, vector<64x256xf32>
    %c0_i32 = arith.constant 0 : i32
    %c0_16 = arith.constant 0 : index
    %c0_17 = arith.constant 0 : index
    %13 = vector.load %arg11[%c0_16, %c0_17] : memref<2x64xf32, #tpu.memory_space<vmem>>, vector<2x64xf32>
    %cst_18 = arith.constant dense<0.000000e+00> : vector<2x256xf32>
    %14 = tpu.matmul %13, %12, %cst_18 {dimension_numbers = #tpu.dot_dimension_numbers<[1], [0], [0], [1], [0, 0, 1, 1], [], []>} : vector<2x64xf32>, vector<64x256xf32>, vector<2x256xf32> -> vector<2x256xf32>
    %15 = arith.index_cast %c0_i32 : i32 to index
    %c0_19 = arith.constant 0 : index
    %c0_20 = arith.constant 0 : index
    %16 = vector.load %arg8[%15, %c0_19, %c0_20] : memref<16x2x256xf32, #tpu.memory_space<vmem>>, vector<1x2x256xf32>
    %17 = vector.shape_cast %16 : vector<1x2x256xf32> to vector<2x256xf32>
    %c15_i32 = arith.constant 15 : i32
    %18 = arith.subi %c15_i32, %c0_i32 : i32
    %19 = arith.index_cast %18 : i32 to index
    %c0_21 = arith.constant 0 : index
    %c0_22 = arith.constant 0 : index
    %20 = vector.load %arg8[%19, %c0_21, %c0_22] : memref<16x2x256xf32, #tpu.memory_space<vmem>>, vector<1x2x256xf32>
    %21 = vector.shape_cast %20 : vector<1x2x256xf32> to vector<2x256xf32>
    %22 = vector.extract_strided_slice %14 {offsets = [0, 0], sizes = [2, 128], strides = [1, 1]} : vector<2x256xf32> to vector<2x128xf32>
    %23 = vector.extract_strided_slice %17 {offsets = [0, 0], sizes = [2, 128], strides = [1, 1]} : vector<2x256xf32> to vector<2x128xf32>
    %24 = arith.addf %22, %23 : vector<2x128xf32>
    %25 = vector.extract_strided_slice %14 {offsets = [0, 128], sizes = [2, 128], strides = [1, 1]} : vector<2x256xf32> to vector<2x128xf32>
    %26 = vector.extract_strided_slice %21 {offsets = [0, 128], sizes = [2, 128], strides = [1, 1]} : vector<2x256xf32> to vector<2x128xf32>
    %27 = arith.addf %25, %26 : vector<2x128xf32>
    %c0_23 = arith.constant 0 : index
    %c0_24 = arith.constant 0 : index
    %28 = vector.load %arg12[%c0_23, %c0_24] : memref<2x64xf32, #tpu.memory_space<vmem>>, vector<2x64xf32>
    %29 = vector.extract_strided_slice %28 {offsets = [0, 0], sizes = [2, 32], strides = [1, 1]} : vector<2x64xf32> to vector<2x32xf32>
    %30 = vector.extract_strided_slice %24 {offsets = [0, 0], sizes = [2, 96], strides = [1, 1]} : vector<2x128xf32> to vector<2x96xf32>
    %31 = arith.negf %30 : vector<2x96xf32>
    %32 = math.exp %31 : vector<2x96xf32>
    %cst_25 = arith.constant 1.000000e+00 : f32
    %33 = vector.broadcast %cst_25 : f32 to vector<2x96xf32>
    %34 = arith.addf %33, %32 : vector<2x96xf32>
    %35 = arith.divf %33, %34 : vector<2x96xf32>
    %36 = vector.extract_strided_slice %24 {offsets = [0, 96], sizes = [2, 32], strides = [1, 1]} : vector<2x128xf32> to vector<2x32xf32>
    %37 = math.tanh %36 : vector<2x32xf32>
    %38 = vector.extract_strided_slice %35 {offsets = [0, 0], sizes = [2, 32], strides = [1, 1]} : vector<2x96xf32> to vector<2x32xf32>
    %39 = vector.extract_strided_slice %35 {offsets = [0, 32], sizes = [2, 32], strides = [1, 1]} : vector<2x96xf32> to vector<2x32xf32>
    %40 = vector.extract_strided_slice %35 {offsets = [0, 64], sizes = [2, 32], strides = [1, 1]} : vector<2x96xf32> to vector<2x32xf32>
    %41 = arith.mulf %39, %29 : vector<2x32xf32>
    %42 = arith.mulf %38, %37 : vector<2x32xf32>
    %43 = arith.addf %41, %42 : vector<2x32xf32>
    %44 = math.tanh %43 : vector<2x32xf32>
    %45 = arith.mulf %40, %44 : vector<2x32xf32>
    %46 = vector.extract_strided_slice %28 {offsets = [0, 32], sizes = [2, 32], strides = [1, 1]} : vector<2x64xf32> to vector<2x32xf32>
    %47 = vector.extract_strided_slice %27 {offsets = [0, 0], sizes = [2, 96], strides = [1, 1]} : vector<2x128xf32> to vector<2x96xf32>
    %48 = arith.negf %47 : vector<2x96xf32>
    %49 = math.exp %48 : vector<2x96xf32>
    %cst_26 = arith.constant 1.000000e+00 : f32
    %50 = vector.broadcast %cst_26 : f32 to vector<2x96xf32>
    %51 = arith.addf %50, %49 : vector<2x96xf32>
    %52 = arith.divf %50, %51 : vector<2x96xf32>
    %53 = vector.extract_strided_slice %27 {offsets = [0, 96], sizes = [2, 32], strides = [1, 1]} : vector<2x128xf32> to vector<2x32xf32>
    %54 = math.tanh %53 : vector<2x32xf32>
    %55 = vector.extract_strided_slice %52 {offsets = [0, 0], sizes = [2, 32], strides = [1, 1]} : vector<2x96xf32> to vector<2x32xf32>
    %56 = vector.extract_strided_slice %52 {offsets = [0, 32], sizes = [2, 32], strides = [1, 1]} : vector<2x96xf32> to vector<2x32xf32>
    %57 = vector.extract_strided_slice %52 {offsets = [0, 64], sizes = [2, 32], strides = [1, 1]} : vector<2x96xf32> to vector<2x32xf32>
    %58 = arith.mulf %56, %46 : vector<2x32xf32>
    %59 = arith.mulf %55, %54 : vector<2x32xf32>
    %60 = arith.addf %58, %59 : vector<2x32xf32>
    %61 = math.tanh %60 : vector<2x32xf32>
    %62 = arith.mulf %57, %61 : vector<2x32xf32>
    %c0_27 = arith.constant 0 : index
    %c0_28 = arith.constant 0 : index
    %63 = vector.load %arg11[%c0_27, %c0_28] : memref<2x64xf32, #tpu.memory_space<vmem>>, vector<2x32xf32>
    tpu.vector_store %arg11[%c0_27, %c0_28], %45 {strides = array<i32>} : memref<2x64xf32, #tpu.memory_space<vmem>>, vector<2x32xf32>,
    %c0_29 = arith.constant 0 : index
    %c32 = arith.constant 32 : index
    %64 = vector.load %arg11[%c0_29, %c32] : memref<2x64xf32, #tpu.memory_space<vmem>>, vector<2x32xf32>
    tpu.vector_store %arg11[%c0_29, %c32], %62 {strides = array<i32>} : memref<2x64xf32, #tpu.memory_space<vmem>>, vector<2x32xf32>,
    %c0_30 = arith.constant 0 : index
    %c0_31 = arith.constant 0 : index
    %65 = vector.load %arg12[%c0_30, %c0_31] : memref<2x64xf32, #tpu.memory_space<vmem>>, vector<2x32xf32>
    tpu.vector_store %arg12[%c0_30, %c0_31], %43 {strides = array<i32>} : memref<2x64xf32, #tpu.memory_space<vmem>>, vector<2x32xf32>,
    %c0_32 = arith.constant 0 : index
    %c32_33 = arith.constant 32 : index
    %66 = vector.load %arg12[%c0_32, %c32_33] : memref<2x64xf32, #tpu.memory_space<vmem>>, vector<2x32xf32>
    tpu.vector_store %arg12[%c0_32, %c32_33], %60 {strides = array<i32>} : memref<2x64xf32, #tpu.memory_space<vmem>>, vector<2x32xf32>,
    %67 = arith.index_cast %c0_i32 : i32 to index
    %c0_34 = arith.constant 0 : index
    %c0_35 = arith.constant 0 : index
    %68 = vector.load %arg9[%67, %c0_34, %c0_35] : memref<16x2x32xf32, #tpu.memory_space<vmem>>, vector<1x2x32xf32>
    %69 = vector.shape_cast %68 : vector<1x2x32xf32> to vector<2x32xf32>
    %70 = vector.shape_cast %45 : vector<2x32xf32> to vector<1x2x32xf32>
    tpu.vector_store %arg9[%67, %c0_34, %c0_35], %70 {strides = array<i32>} : memref<16x2x32xf32, #tpu.memory_space<vmem>>, vector<1x2x32xf32>,
    %c15_i32_36 = arith.constant 15 : i32
    %71 = arith.subi %c15_i32_36, %c0_i32 : i32
    %72 = arith.index_cast %71 : i32 to index
    %c0_37 = arith.constant 0 : index
    %c0_38 = arith.constant 0 : index
    %73 = vector.load %arg10[%72, %c0_37, %c0_38] : memref<16x2x32xf32, #tpu.memory_space<vmem>>, vector<1x2x32xf32>
    %74 = vector.shape_cast %73 : vector<1x2x32xf32> to vector<2x32xf32>
    %75 = vector.shape_cast %62 : vector<2x32xf32> to vector<1x2x32xf32>
    tpu.vector_store %arg10[%72, %c0_37, %c0_38], %75 {strides = array<i32>} : memref<16x2x32xf32, #tpu.memory_space<vmem>>, vector<1x2x32xf32>,
    %c1_i32 = arith.constant 1 : i32
    %c0_39 = arith.constant 0 : index
    %c0_40 = arith.constant 0 : index
    %76 = vector.load %arg11[%c0_39, %c0_40] : memref<2x64xf32, #tpu.memory_space<vmem>>, vector<2x64xf32>
    %cst_41 = arith.constant dense<0.000000e+00> : vector<2x256xf32>
    %77 = tpu.matmul %76, %12, %cst_41 {dimension_numbers = #tpu.dot_dimension_numbers<[1], [0], [0], [1], [0, 0, 1, 1], [], []>} : vector<2x64xf32>, vector<64x256xf32>, vector<2x256xf32> -> vector<2x256xf32>
    %78 = arith.index_cast %c1_i32 : i32 to index
    %c0_42 = arith.constant 0 : index
    %c0_43 = arith.constant 0 : index
    %79 = vector.load %arg8[%78, %c0_42, %c0_43] : memref<16x2x256xf32, #tpu.memory_space<vmem>>, vector<1x2x256xf32>
    %80 = vector.shape_cast %79 : vector<1x2x256xf32> to vector<2x256xf32>
    %c15_i32_44 = arith.constant 15 : i32
    %81 = arith.subi %c15_i32_44, %c1_i32 : i32
    %82 = arith.index_cast %81 : i32 to index
    %c0_45 = arith.constant 0 : index
    %c0_46 = arith.constant 0 : index
    %83 = vector.load %arg8[%82, %c0_45, %c0_46] : memref<16x2x256xf32, #tpu.memory_space<vmem>>, vector<1x2x256xf32>
    %84 = vector.shape_cast %83 : vector<1x2x256xf32> to vector<2x256xf32>
    %85 = vector.extract_strided_slice %77 {offsets = [0, 0], sizes = [2, 128], strides = [1, 1]} : vector<2x256xf32> to vector<2x128xf32>
    %86 = vector.extract_strided_slice %80 {offsets = [0, 0], sizes = [2, 128], strides = [1, 1]} : vector<2x256xf32> to vector<2x128xf32>
    %87 = arith.addf %85, %86 : vector<2x128xf32>
    %88 = vector.extract_strided_slice %77 {offsets = [0, 128], sizes = [2, 128], strides = [1, 1]} : vector<2x256xf32> to vector<2x128xf32>
    %89 = vector.extract_strided_slice %84 {offsets = [0, 128], sizes = [2, 128], strides = [1, 1]} : vector<2x256xf32> to vector<2x128xf32>
    %90 = arith.addf %88, %89 : vector<2x128xf32>
    %c0_47 = arith.constant 0 : index
    %c0_48 = arith.constant 0 : index
    %91 = vector.load %arg12[%c0_47, %c0_48] : memref<2x64xf32, #tpu.memory_space<vmem>>, vector<2x64xf32>
    %92 = vector.extract_strided_slice %91 {offsets = [0, 0], sizes = [2, 32], strides = [1, 1]} : vector<2x64xf32> to vector<2x32xf32>
    %93 = vector.extract_strided_slice %87 {offsets = [0, 0], sizes = [2, 96], strides = [1, 1]} : vector<2x128xf32> to vector<2x96xf32>
    %94 = arith.negf %93 : vector<2x96xf32>
    %95 = math.exp %94 : vector<2x96xf32>
    %cst_49 = arith.constant 1.000000e+00 : f32
    %96 = vector.broadcast %cst_49 : f32 to vector<2x96xf32>
    %97 = arith.addf %96, %95 : vector<2x96xf32>
    %98 = arith.divf %96, %97 : vector<2x96xf32>
    %99 = vector.extract_strided_slice %87 {offsets = [0, 96], sizes = [2, 32], strides = [1, 1]} : vector<2x128xf32> to vector<2x32xf32>
    %100 = math.tanh %99 : vector<2x32xf32>
    %101 = vector.extract_strided_slice %98 {offsets = [0, 0], sizes = [2, 32], strides = [1, 1]} : vector<2x96xf32> to vector<2x32xf32>
    %102 = vector.extract_strided_slice %98 {offsets = [0, 32], sizes = [2, 32], strides = [1, 1]} : vector<2x96xf32> to vector<2x32xf32>
    %103 = vector.extract_strided_slice %98 {offsets = [0, 64], sizes = [2, 32], strides = [1, 1]} : vector<2x96xf32> to vector<2x32xf32>
    %104 = arith.mulf %102, %92 : vector<2x32xf32>
    %105 = arith.mulf %101, %100 : vector<2x32xf32>
    %106 = arith.addf %104, %105 : vector<2x32xf32>
    %107 = math.tanh %106 : vector<2x32xf32>
    %108 = arith.mulf %103, %107 : vector<2x32xf32>
    %109 = vector.extract_strided_slice %91 {offsets = [0, 32], sizes = [2, 32], strides = [1, 1]} : vector<2x64xf32> to vector<2x32xf32>
    %110 = vector.extract_strided_slice %90 {offsets = [0, 0], sizes = [2, 96], strides = [1, 1]} : vector<2x128xf32> to vector<2x96xf32>
    %111 = arith.negf %110 : vector<2x96xf32>
    %112 = math.exp %111 : vector<2x96xf32>
    %cst_50 = arith.constant 1.000000e+00 : f32
    %113 = vector.broadcast %cst_50 : f32 to vector<2x96xf32>
    %114 = arith.addf %113, %112 : vector<2x96xf32>
    %115 = arith.divf %113, %114 : vector<2x96xf32>
    %116 = vector.extract_strided_slice %90 {offsets = [0, 96], sizes = [2, 32], strides = [1, 1]} : vector<2x128xf32> to vector<2x32xf32>
    %117 = math.tanh %116 : vector<2x32xf32>
    %118 = vector.extract_strided_slice %115 {offsets = [0, 0], sizes = [2, 32], strides = [1, 1]} : vector<2x96xf32> to vector<2x32xf32>
    %119 = vector.extract_strided_slice %115 {offsets = [0, 32], sizes = [2, 32], strides = [1, 1]} : vector<2x96xf32> to vector<2x32xf32>
    %120 = vector.extract_strided_slice %115 {offsets = [0, 64], sizes = [2, 32], strides = [1, 1]} : vector<2x96xf32> to vector<2x32xf32>
    %121 = arith.mulf %119, %109 : vector<2x32xf32>
    %122 = arith.mulf %118, %117 : vector<2x32xf32>
    %123 = arith.addf %121, %122 : vector<2x32xf32>
    %124 = math.tanh %123 : vector<2x32xf32>
    %125 = arith.mulf %120, %124 : vector<2x32xf32>
    %c0_51 = arith.constant 0 : index
    %c0_52 = arith.constant 0 : index
    %126 = vector.load %arg11[%c0_51, %c0_52] : memref<2x64xf32, #tpu.memory_space<vmem>>, vector<2x32xf32>
    tpu.vector_store %arg11[%c0_51, %c0_52], %108 {strides = array<i32>} : memref<2x64xf32, #tpu.memory_space<vmem>>, vector<2x32xf32>,
    %c0_53 = arith.constant 0 : index
    %c32_54 = arith.constant 32 : index
    %127 = vector.load %arg11[%c0_53, %c32_54] : memref<2x64xf32, #tpu.memory_space<vmem>>, vector<2x32xf32>
    tpu.vector_store %arg11[%c0_53, %c32_54], %125 {strides = array<i32>} : memref<2x64xf32, #tpu.memory_space<vmem>>, vector<2x32xf32>,
    %c0_55 = arith.constant 0 : index
    %c0_56 = arith.constant 0 : index
    %128 = vector.load %arg12[%c0_55, %c0_56] : memref<2x64xf32, #tpu.memory_space<vmem>>, vector<2x32xf32>
    tpu.vector_store %arg12[%c0_55, %c0_56], %106 {strides = array<i32>} : memref<2x64xf32, #tpu.memory_space<vmem>>, vector<2x32xf32>,
    %c0_57 = arith.constant 0 : index
    %c32_58 = arith.constant 32 : index
    %129 = vector.load %arg12[%c0_57, %c32_58] : memref<2x64xf32, #tpu.memory_space<vmem>>, vector<2x32xf32>
    tpu.vector_store %arg12[%c0_57, %c32_58], %123 {strides = array<i32>} : memref<2x64xf32, #tpu.memory_space<vmem>>, vector<2x32xf32>,
    %130 = arith.index_cast %c1_i32 : i32 to index
    %c0_59 = arith.constant 0 : index
    %c0_60 = arith.constant 0 : index
    %131 = vector.load %arg9[%130, %c0_59, %c0_60] : memref<16x2x32xf32, #tpu.memory_space<vmem>>, vector<1x2x32xf32>
    %132 = vector.shape_cast %131 : vector<1x2x32xf32> to vector<2x32xf32>
    %133 = vector.shape_cast %108 : vector<2x32xf32> to vector<1x2x32xf32>
    tpu.vector_store %arg9[%130, %c0_59, %c0_60], %133 {strides = array<i32>} : memref<16x2x32xf32, #tpu.memory_space<vmem>>, vector<1x2x32xf32>,
    %c15_i32_61 = arith.constant 15 : i32
    %134 = arith.subi %c15_i32_61, %c1_i32 : i32
    %135 = arith.index_cast %134 : i32 to index
    %c0_62 = arith.constant 0 : index
    %c0_63 = arith.constant 0 : index
    %136 = vector.load %arg10[%135, %c0_62, %c0_63] : memref<16x2x32xf32, #tpu.memory_space<vmem>>, vector<1x2x32xf32>
    %137 = vector.shape_cast %136 : vector<1x2x32xf32> to vector<2x32xf32>
    %138 = vector.shape_cast %125 : vector<2x32xf32> to vector<1x2x32xf32>
    tpu.vector_store %arg10[%135, %c0_62, %c0_63], %138 {strides = array<i32>} : memref<16x2x32xf32, #tpu.memory_space<vmem>>, vector<1x2x32xf32>,
    %c2_i32 = arith.constant 2 : i32
    %c0_64 = arith.constant 0 : index
    %c0_65 = arith.constant 0 : index
    %139 = vector.load %arg11[%c0_64, %c0_65] : memref<2x64xf32, #tpu.memory_space<vmem>>, vector<2x64xf32>
    %cst_66 = arith.constant dense<0.000000e+00> : vector<2x256xf32>
    %140 = tpu.matmul %139, %12, %cst_66 {dimension_numbers = #tpu.dot_dimension_numbers<[1], [0], [0], [1], [0, 0, 1, 1], [], []>} : vector<2x64xf32>, vector<64x256xf32>, vector<2x256xf32> -> vector<2x256xf32>
    %141 = arith.index_cast %c2_i32 : i32 to index
    %c0_67 = arith.constant 0 : index
    %c0_68 = arith.constant 0 : index
    %142 = vector.load %arg8[%141, %c0_67, %c0_68] : memref<16x2x256xf32, #tpu.memory_space<vmem>>, vector<1x2x256xf32>
    %143 = vector.shape_cast %142 : vector<1x2x256xf32> to vector<2x256xf32>
    %c15_i32_69 = arith.constant 15 : i32
    %144 = arith.subi %c15_i32_69, %c2_i32 : i32
    %145 = arith.index_cast %144 : i32 to index
    %c0_70 = arith.constant 0 : index
    %c0_71 = arith.constant 0 : index
    %146 = vector.load %arg8[%145, %c0_70, %c0_71] : memref<16x2x256xf32, #tpu.memory_space<vmem>>, vector<1x2x256xf32>
    %147 = vector.shape_cast %146 : vector<1x2x256xf32> to vector<2x256xf32>
    %148 = vector.extract_strided_slice %140 {offsets = [0, 0], sizes = [2, 128], strides = [1, 1]} : vector<2x256xf32> to vector<2x128xf32>
    %149 = vector.extract_strided_slice %143 {offsets = [0, 0], sizes = [2, 128], strides = [1, 1]} : vector<2x256xf32> to vector<2x128xf32>
    %150 = arith.addf %148, %149 : vector<2x128xf32>
    %151 = vector.extract_strided_slice %140 {offsets = [0, 128], sizes = [2, 128], strides = [1, 1]} : vector<2x256xf32> to vector<2x128xf32>
    %152 = vector.extract_strided_slice %147 {offsets = [0, 128], sizes = [2, 128], strides = [1, 1]} : vector<2x256xf32> to vector<2x128xf32>
    %153 = arith.addf %151, %152 : vector<2x128xf32>
    %c0_72 = arith.constant 0 : index
    %c0_73 = arith.constant 0 : index
    %154 = vector.load %arg12[%c0_72, %c0_73] : memref<2x64xf32, #tpu.memory_space<vmem>>, vector<2x64xf32>
    %155 = vector.extract_strided_slice %154 {offsets = [0, 0], sizes = [2, 32], strides = [1, 1]} : vector<2x64xf32> to vector<2x32xf32>
    %156 = vector.extract_strided_slice %150 {offsets = [0, 0], sizes = [2, 96], strides = [1, 1]} : vector<2x128xf32> to vector<2x96xf32>
    %157 = arith.negf %156 : vector<2x96xf32>
    %158 = math.exp %157 : vector<2x96xf32>
    %cst_74 = arith.constant 1.000000e+00 : f32
    %159 = vector.broadcast %cst_74 : f32 to vector<2x96xf32>
    %160 = arith.addf %159, %158 : vector<2x96xf32>
    %161 = arith.divf %159, %160 : vector<2x96xf32>
    %162 = vector.extract_strided_slice %150 {offsets = [0, 96], sizes = [2, 32], strides = [1, 1]} : vector<2x128xf32> to vector<2x32xf32>
    %163 = math.tanh %162 : vector<2x32xf32>
    %164 = vector.extract_strided_slice %161 {offsets = [0, 0], sizes = [2, 32], strides = [1, 1]} : vector<2x96xf32> to vector<2x32xf32>
    %165 = vector.extract_strided_slice %161 {offsets = [0, 32], sizes = [2, 32], strides = [1, 1]} : vector<2x96xf32> to vector<2x32xf32>
    %166 = vector.extract_strided_slice %161 {offsets = [0, 64], sizes = [2, 32], strides = [1, 1]} : vector<2x96xf32> to vector<2x32xf32>
    %167 = arith.mulf %165, %155 : vector<2x32xf32>
    %168 = arith.mulf %164, %163 : vector<2x32xf32>
    %169 = arith.addf %167, %168 : vector<2x32xf32>
    %170 = math.tanh %169 : vector<2x32xf32>
    %171 = arith.mulf %166, %170 : vector<2x32xf32>
    %172 = vector.extract_strided_slice %154 {offsets = [0, 32], sizes = [2, 32], strides = [1, 1]} : vector<2x64xf32> to vector<2x32xf32>
    %173 = vector.extract_strided_slice %153 {offsets = [0, 0], sizes = [2, 96], strides = [1, 1]} : vector<2x128xf32> to vector<2x96xf32>
    %174 = arith.negf %173 : vector<2x96xf32>
    %175 = math.exp %174 : vector<2x96xf32>
    %cst_75 = arith.constant 1.000000e+00 : f32
    %176 = vector.broadcast %cst_75 : f32 to vector<2x96xf32>
    %177 = arith.addf %176, %175 : vector<2x96xf32>
    %178 = arith.divf %176, %177 : vector<2x96xf32>
    %179 = vector.extract_strided_slice %153 {offsets = [0, 96], sizes = [2, 32], strides = [1, 1]} : vector<2x128xf32> to vector<2x32xf32>
    %180 = math.tanh %179 : vector<2x32xf32>
    %181 = vector.extract_strided_slice %178 {offsets = [0, 0], sizes = [2, 32], strides = [1, 1]} : vector<2x96xf32> to vector<2x32xf32>
    %182 = vector.extract_strided_slice %178 {offsets = [0, 32], sizes = [2, 32], strides = [1, 1]} : vector<2x96xf32> to vector<2x32xf32>
    %183 = vector.extract_strided_slice %178 {offsets = [0, 64], sizes = [2, 32], strides = [1, 1]} : vector<2x96xf32> to vector<2x32xf32>
    %184 = arith.mulf %182, %172 : vector<2x32xf32>
    %185 = arith.mulf %181, %180 : vector<2x32xf32>
    %186 = arith.addf %184, %185 : vector<2x32xf32>
    %187 = math.tanh %186 : vector<2x32xf32>
    %188 = arith.mulf %183, %187 : vector<2x32xf32>
    %c0_76 = arith.constant 0 : index
    %c0_77 = arith.constant 0 : index
    %189 = vector.load %arg11[%c0_76, %c0_77] : memref<2x64xf32, #tpu.memory_space<vmem>>, vector<2x32xf32>
    tpu.vector_store %arg11[%c0_76, %c0_77], %171 {strides = array<i32>} : memref<2x64xf32, #tpu.memory_space<vmem>>, vector<2x32xf32>,
    %c0_78 = arith.constant 0 : index
    %c32_79 = arith.constant 32 : index
    %190 = vector.load %arg11[%c0_78, %c32_79] : memref<2x64xf32, #tpu.memory_space<vmem>>, vector<2x32xf32>
    tpu.vector_store %arg11[%c0_78, %c32_79], %188 {strides = array<i32>} : memref<2x64xf32, #tpu.memory_space<vmem>>, vector<2x32xf32>,
    %c0_80 = arith.constant 0 : index
    %c0_81 = arith.constant 0 : index
    %191 = vector.load %arg12[%c0_80, %c0_81] : memref<2x64xf32, #tpu.memory_space<vmem>>, vector<2x32xf32>
    tpu.vector_store %arg12[%c0_80, %c0_81], %169 {strides = array<i32>} : memref<2x64xf32, #tpu.memory_space<vmem>>, vector<2x32xf32>,
    %c0_82 = arith.constant 0 : index
    %c32_83 = arith.constant 32 : index
    %192 = vector.load %arg12[%c0_82, %c32_83] : memref<2x64xf32, #tpu.memory_space<vmem>>, vector<2x32xf32>
    tpu.vector_store %arg12[%c0_82, %c32_83], %186 {strides = array<i32>} : memref<2x64xf32, #tpu.memory_space<vmem>>, vector<2x32xf32>,
    %193 = arith.index_cast %c2_i32 : i32 to index
    %c0_84 = arith.constant 0 : index
    %c0_85 = arith.constant 0 : index
    %194 = vector.load %arg9[%193, %c0_84, %c0_85] : memref<16x2x32xf32, #tpu.memory_space<vmem>>, vector<1x2x32xf32>
    %195 = vector.shape_cast %194 : vector<1x2x32xf32> to vector<2x32xf32>
    %196 = vector.shape_cast %171 : vector<2x32xf32> to vector<1x2x32xf32>
    tpu.vector_store %arg9[%193, %c0_84, %c0_85], %196 {strides = array<i32>} : memref<16x2x32xf32, #tpu.memory_space<vmem>>, vector<1x2x32xf32>,
    %c15_i32_86 = arith.constant 15 : i32
    %197 = arith.subi %c15_i32_86, %c2_i32 : i32
    %198 = arith.index_cast %197 : i32 to index
    %c0_87 = arith.constant 0 : index
    %c0_88 = arith.constant 0 : index
    %199 = vector.load %arg10[%198, %c0_87, %c0_88] : memref<16x2x32xf32, #tpu.memory_space<vmem>>, vector<1x2x32xf32>
    %200 = vector.shape_cast %199 : vector<1x2x32xf32> to vector<2x32xf32>
    %201 = vector.shape_cast %188 : vector<2x32xf32> to vector<1x2x32xf32>
    tpu.vector_store %arg10[%198, %c0_87, %c0_88], %201 {strides = array<i32>} : memref<16x2x32xf32, #tpu.memory_space<vmem>>, vector<1x2x32xf32>,
    %c3_i32 = arith.constant 3 : i32
    %c0_89 = arith.constant 0 : index
    %c0_90 = arith.constant 0 : index
    %202 = vector.load %arg11[%c0_89, %c0_90] : memref<2x64xf32, #tpu.memory_space<vmem>>, vector<2x64xf32>
    %cst_91 = arith.constant dense<0.000000e+00> : vector<2x256xf32>
    %203 = tpu.matmul %202, %12, %cst_91 {dimension_numbers = #tpu.dot_dimension_numbers<[1], [0], [0], [1], [0, 0, 1, 1], [], []>} : vector<2x64xf32>, vector<64x256xf32>, vector<2x256xf32> -> vector<2x256xf32>
    %204 = arith.index_cast %c3_i32 : i32 to index
    %c0_92 = arith.constant 0 : index
    %c0_93 = arith.constant 0 : index
    %205 = vector.load %arg8[%204, %c0_92, %c0_93] : memref<16x2x256xf32, #tpu.memory_space<vmem>>, vector<1x2x256xf32>
    %206 = vector.shape_cast %205 : vector<1x2x256xf32> to vector<2x256xf32>
    %c15_i32_94 = arith.constant 15 : i32
    %207 = arith.subi %c15_i32_94, %c3_i32 : i32
    %208 = arith.index_cast %207 : i32 to index
    %c0_95 = arith.constant 0 : index
    %c0_96 = arith.constant 0 : index
    %209 = vector.load %arg8[%208, %c0_95, %c0_96] : memref<16x2x256xf32, #tpu.memory_space<vmem>>, vector<1x2x256xf32>
    %210 = vector.shape_cast %209 : vector<1x2x256xf32> to vector<2x256xf32>
    %211 = vector.extract_strided_slice %203 {offsets = [0, 0], sizes = [2, 128], strides = [1, 1]} : vector<2x256xf32> to vector<2x128xf32>
    %212 = vector.extract_strided_slice %206 {offsets = [0, 0], sizes = [2, 128], strides = [1, 1]} : vector<2x256xf32> to vector<2x128xf32>
    %213 = arith.addf %211, %212 : vector<2x128xf32>
    %214 = vector.extract_strided_slice %203 {offsets = [0, 128], sizes = [2, 128], strides = [1, 1]} : vector<2x256xf32> to vector<2x128xf32>
    %215 = vector.extract_strided_slice %210 {offsets = [0, 128], sizes = [2, 128], strides = [1, 1]} : vector<2x256xf32> to vector<2x128xf32>
    %216 = arith.addf %214, %215 : vector<2x128xf32>
    %c0_97 = arith.constant 0 : index
    %c0_98 = arith.constant 0 : index
    %217 = vector.load %arg12[%c0_97, %c0_98] : memref<2x64xf32, #tpu.memory_space<vmem>>, vector<2x64xf32>
    %218 = vector.extract_strided_slice %217 {offsets = [0, 0], sizes = [2, 32], strides = [1, 1]} : vector<2x64xf32> to vector<2x32xf32>
    %219 = vector.extract_strided_slice %213 {offsets = [0, 0], sizes = [2, 96], strides = [1, 1]} : vector<2x128xf32> to vector<2x96xf32>
    %220 = arith.negf %219 : vector<2x96xf32>
    %221 = math.exp %220 : vector<2x96xf32>
    %cst_99 = arith.constant 1.000000e+00 : f32
    %222 = vector.broadcast %cst_99 : f32 to vector<2x96xf32>
    %223 = arith.addf %222, %221 : vector<2x96xf32>
    %224 = arith.divf %222, %223 : vector<2x96xf32>
    %225 = vector.extract_strided_slice %213 {offsets = [0, 96], sizes = [2, 32], strides = [1, 1]} : vector<2x128xf32> to vector<2x32xf32>
    %226 = math.tanh %225 : vector<2x32xf32>
    %227 = vector.extract_strided_slice %224 {offsets = [0, 0], sizes = [2, 32], strides = [1, 1]} : vector<2x96xf32> to vector<2x32xf32>
    %228 = vector.extract_strided_slice %224 {offsets = [0, 32], sizes = [2, 32], strides = [1, 1]} : vector<2x96xf32> to vector<2x32xf32>
    %229 = vector.extract_strided_slice %224 {offsets = [0, 64], sizes = [2, 32], strides = [1, 1]} : vector<2x96xf32> to vector<2x32xf32>
    %230 = arith.mulf %228, %218 : vector<2x32xf32>
    %231 = arith.mulf %227, %226 : vector<2x32xf32>
    %232 = arith.addf %230, %231 : vector<2x32xf32>
    %233 = math.tanh %232 : vector<2x32xf32>
    %234 = arith.mulf %229, %233 : vector<2x32xf32>
    %235 = vector.extract_strided_slice %217 {offsets = [0, 32], sizes = [2, 32], strides = [1, 1]} : vector<2x64xf32> to vector<2x32xf32>
    %236 = vector.extract_strided_slice %216 {offsets = [0, 0], sizes = [2, 96], strides = [1, 1]} : vector<2x128xf32> to vector<2x96xf32>
    %237 = arith.negf %236 : vector<2x96xf32>
    %238 = math.exp %237 : vector<2x96xf32>
    %cst_100 = arith.constant 1.000000e+00 : f32
    %239 = vector.broadcast %cst_100 : f32 to vector<2x96xf32>
    %240 = arith.addf %239, %238 : vector<2x96xf32>
    %241 = arith.divf %239, %240 : vector<2x96xf32>
    %242 = vector.extract_strided_slice %216 {offsets = [0, 96], sizes = [2, 32], strides = [1, 1]} : vector<2x128xf32> to vector<2x32xf32>
    %243 = math.tanh %242 : vector<2x32xf32>
    %244 = vector.extract_strided_slice %241 {offsets = [0, 0], sizes = [2, 32], strides = [1, 1]} : vector<2x96xf32> to vector<2x32xf32>
    %245 = vector.extract_strided_slice %241 {offsets = [0, 32], sizes = [2, 32], strides = [1, 1]} : vector<2x96xf32> to vector<2x32xf32>
    %246 = vector.extract_strided_slice %241 {offsets = [0, 64], sizes = [2, 32], strides = [1, 1]} : vector<2x96xf32> to vector<2x32xf32>
    %247 = arith.mulf %245, %235 : vector<2x32xf32>
    %248 = arith.mulf %244, %243 : vector<2x32xf32>
    %249 = arith.addf %247, %248 : vector<2x32xf32>
    %250 = math.tanh %249 : vector<2x32xf32>
    %251 = arith.mulf %246, %250 : vector<2x32xf32>
    %c0_101 = arith.constant 0 : index
    %c0_102 = arith.constant 0 : index
    %252 = vector.load %arg11[%c0_101, %c0_102] : memref<2x64xf32, #tpu.memory_space<vmem>>, vector<2x32xf32>
    tpu.vector_store %arg11[%c0_101, %c0_102], %234 {strides = array<i32>} : memref<2x64xf32, #tpu.memory_space<vmem>>, vector<2x32xf32>,
    %c0_103 = arith.constant 0 : index
    %c32_104 = arith.constant 32 : index
    %253 = vector.load %arg11[%c0_103, %c32_104] : memref<2x64xf32, #tpu.memory_space<vmem>>, vector<2x32xf32>
    tpu.vector_store %arg11[%c0_103, %c32_104], %251 {strides = array<i32>} : memref<2x64xf32, #tpu.memory_space<vmem>>, vector<2x32xf32>,
    %c0_105 = arith.constant 0 : index
    %c0_106 = arith.constant 0 : index
    %254 = vector.load %arg12[%c0_105, %c0_106] : memref<2x64xf32, #tpu.memory_space<vmem>>, vector<2x32xf32>
    tpu.vector_store %arg12[%c0_105, %c0_106], %232 {strides = array<i32>} : memref<2x64xf32, #tpu.memory_space<vmem>>, vector<2x32xf32>,
    %c0_107 = arith.constant 0 : index
    %c32_108 = arith.constant 32 : index
    %255 = vector.load %arg12[%c0_107, %c32_108] : memref<2x64xf32, #tpu.memory_space<vmem>>, vector<2x32xf32>
    tpu.vector_store %arg12[%c0_107, %c32_108], %249 {strides = array<i32>} : memref<2x64xf32, #tpu.memory_space<vmem>>, vector<2x32xf32>,
    %256 = arith.index_cast %c3_i32 : i32 to index
    %c0_109 = arith.constant 0 : index
    %c0_110 = arith.constant 0 : index
    %257 = vector.load %arg9[%256, %c0_109, %c0_110] : memref<16x2x32xf32, #tpu.memory_space<vmem>>, vector<1x2x32xf32>
    %258 = vector.shape_cast %257 : vector<1x2x32xf32> to vector<2x32xf32>
    %259 = vector.shape_cast %234 : vector<2x32xf32> to vector<1x2x32xf32>
    tpu.vector_store %arg9[%256, %c0_109, %c0_110], %259 {strides = array<i32>} : memref<16x2x32xf32, #tpu.memory_space<vmem>>, vector<1x2x32xf32>,
    %c15_i32_111 = arith.constant 15 : i32
    %260 = arith.subi %c15_i32_111, %c3_i32 : i32
    %261 = arith.index_cast %260 : i32 to index
    %c0_112 = arith.constant 0 : index
    %c0_113 = arith.constant 0 : index
    %262 = vector.load %arg10[%261, %c0_112, %c0_113] : memref<16x2x32xf32, #tpu.memory_space<vmem>>, vector<1x2x32xf32>
    %263 = vector.shape_cast %262 : vector<1x2x32xf32> to vector<2x32xf32>
    %264 = vector.shape_cast %251 : vector<2x32xf32> to vector<1x2x32xf32>
    tpu.vector_store %arg10[%261, %c0_112, %c0_113], %264 {strides = array<i32>} : memref<16x2x32xf32, #tpu.memory_space<vmem>>, vector<1x2x32xf32>,
    %c4_i32 = arith.constant 4 : i32
    %c0_114 = arith.constant 0 : index
    %c0_115 = arith.constant 0 : index
    %265 = vector.load %arg11[%c0_114, %c0_115] : memref<2x64xf32, #tpu.memory_space<vmem>>, vector<2x64xf32>
    %cst_116 = arith.constant dense<0.000000e+00> : vector<2x256xf32>
    %266 = tpu.matmul %265, %12, %cst_116 {dimension_numbers = #tpu.dot_dimension_numbers<[1], [0], [0], [1], [0, 0, 1, 1], [], []>} : vector<2x64xf32>, vector<64x256xf32>, vector<2x256xf32> -> vector<2x256xf32>
    %267 = arith.index_cast %c4_i32 : i32 to index
    %c0_117 = arith.constant 0 : index
    %c0_118 = arith.constant 0 : index
    %268 = vector.load %arg8[%267, %c0_117, %c0_118] : memref<16x2x256xf32, #tpu.memory_space<vmem>>, vector<1x2x256xf32>
    %269 = vector.shape_cast %268 : vector<1x2x256xf32> to vector<2x256xf32>
    %c15_i32_119 = arith.constant 15 : i32
    %270 = arith.subi %c15_i32_119, %c4_i32 : i32
    %271 = arith.index_cast %270 : i32 to index
    %c0_120 = arith.constant 0 : index
    %c0_121 = arith.constant 0 : index
    %272 = vector.load %arg8[%271, %c0_120, %c0_121] : memref<16x2x256xf32, #tpu.memory_space<vmem>>, vector<1x2x256xf32>
    %273 = vector.shape_cast %272 : vector<1x2x256xf32> to vector<2x256xf32>
    %274 = vector.extract_strided_slice %266 {offsets = [0, 0], sizes = [2, 128], strides = [1, 1]} : vector<2x256xf32> to vector<2x128xf32>
    %275 = vector.extract_strided_slice %269 {offsets = [0, 0], sizes = [2, 128], strides = [1, 1]} : vector<2x256xf32> to vector<2x128xf32>
    %276 = arith.addf %274, %275 : vector<2x128xf32>
    %277 = vector.extract_strided_slice %266 {offsets = [0, 128], sizes = [2, 128], strides = [1, 1]} : vector<2x256xf32> to vector<2x128xf32>
    %278 = vector.extract_strided_slice %273 {offsets = [0, 128], sizes = [2, 128], strides = [1, 1]} : vector<2x256xf32> to vector<2x128xf32>
    %279 = arith.addf %277, %278 : vector<2x128xf32>
    %c0_122 = arith.constant 0 : index
    %c0_123 = arith.constant 0 : index
    %280 = vector.load %arg12[%c0_122, %c0_123] : memref<2x64xf32, #tpu.memory_space<vmem>>, vector<2x64xf32>
    %281 = vector.extract_strided_slice %280 {offsets = [0, 0], sizes = [2, 32], strides = [1, 1]} : vector<2x64xf32> to vector<2x32xf32>
    %282 = vector.extract_strided_slice %276 {offsets = [0, 0], sizes = [2, 96], strides = [1, 1]} : vector<2x128xf32> to vector<2x96xf32>
    %283 = arith.negf %282 : vector<2x96xf32>
    %284 = math.exp %283 : vector<2x96xf32>
    %cst_124 = arith.constant 1.000000e+00 : f32
    %285 = vector.broadcast %cst_124 : f32 to vector<2x96xf32>
    %286 = arith.addf %285, %284 : vector<2x96xf32>
    %287 = arith.divf %285, %286 : vector<2x96xf32>
    %288 = vector.extract_strided_slice %276 {offsets = [0, 96], sizes = [2, 32], strides = [1, 1]} : vector<2x128xf32> to vector<2x32xf32>
    %289 = math.tanh %288 : vector<2x32xf32>
    %290 = vector.extract_strided_slice %287 {offsets = [0, 0], sizes = [2, 32], strides = [1, 1]} : vector<2x96xf32> to vector<2x32xf32>
    %291 = vector.extract_strided_slice %287 {offsets = [0, 32], sizes = [2, 32], strides = [1, 1]} : vector<2x96xf32> to vector<2x32xf32>
    %292 = vector.extract_strided_slice %287 {offsets = [0, 64], sizes = [2, 32], strides = [1, 1]} : vector<2x96xf32> to vector<2x32xf32>
    %293 = arith.mulf %291, %281 : vector<2x32xf32>
    %294 = arith.mulf %290, %289 : vector<2x32xf32>
    %295 = arith.addf %293, %294 : vector<2x32xf32>
    %296 = math.tanh %295 : vector<2x32xf32>
    %297 = arith.mulf %292, %296 : vector<2x32xf32>
    %298 = vector.extract_strided_slice %280 {offsets = [0, 32], sizes = [2, 32], strides = [1, 1]} : vector<2x64xf32> to vector<2x32xf32>
    %299 = vector.extract_strided_slice %279 {offsets = [0, 0], sizes = [2, 96], strides = [1, 1]} : vector<2x128xf32> to vector<2x96xf32>
    %300 = arith.negf %299 : vector<2x96xf32>
    %301 = math.exp %300 : vector<2x96xf32>
    %cst_125 = arith.constant 1.000000e+00 : f32
    %302 = vector.broadcast %cst_125 : f32 to vector<2x96xf32>
    %303 = arith.addf %302, %301 : vector<2x96xf32>
    %304 = arith.divf %302, %303 : vector<2x96xf32>
    %305 = vector.extract_strided_slice %279 {offsets = [0, 96], sizes = [2, 32], strides = [1, 1]} : vector<2x128xf32> to vector<2x32xf32>
    %306 = math.tanh %305 : vector<2x32xf32>
    %307 = vector.extract_strided_slice %304 {offsets = [0, 0], sizes = [2, 32], strides = [1, 1]} : vector<2x96xf32> to vector<2x32xf32>
    %308 = vector.extract_strided_slice %304 {offsets = [0, 32], sizes = [2, 32], strides = [1, 1]} : vector<2x96xf32> to vector<2x32xf32>
    %309 = vector.extract_strided_slice %304 {offsets = [0, 64], sizes = [2, 32], strides = [1, 1]} : vector<2x96xf32> to vector<2x32xf32>
    %310 = arith.mulf %308, %298 : vector<2x32xf32>
    %311 = arith.mulf %307, %306 : vector<2x32xf32>
    %312 = arith.addf %310, %311 : vector<2x32xf32>
    %313 = math.tanh %312 : vector<2x32xf32>
    %314 = arith.mulf %309, %313 : vector<2x32xf32>
    %c0_126 = arith.constant 0 : index
    %c0_127 = arith.constant 0 : index
    %315 = vector.load %arg11[%c0_126, %c0_127] : memref<2x64xf32, #tpu.memory_space<vmem>>, vector<2x32xf32>
    tpu.vector_store %arg11[%c0_126, %c0_127], %297 {strides = array<i32>} : memref<2x64xf32, #tpu.memory_space<vmem>>, vector<2x32xf32>,
    %c0_128 = arith.constant 0 : index
    %c32_129 = arith.constant 32 : index
    %316 = vector.load %arg11[%c0_128, %c32_129] : memref<2x64xf32, #tpu.memory_space<vmem>>, vector<2x32xf32>
    tpu.vector_store %arg11[%c0_128, %c32_129], %314 {strides = array<i32>} : memref<2x64xf32, #tpu.memory_space<vmem>>, vector<2x32xf32>,
    %c0_130 = arith.constant 0 : index
    %c0_131 = arith.constant 0 : index
    %317 = vector.load %arg12[%c0_130, %c0_131] : memref<2x64xf32, #tpu.memory_space<vmem>>, vector<2x32xf32>
    tpu.vector_store %arg12[%c0_130, %c0_131], %295 {strides = array<i32>} : memref<2x64xf32, #tpu.memory_space<vmem>>, vector<2x32xf32>,
    %c0_132 = arith.constant 0 : index
    %c32_133 = arith.constant 32 : index
    %318 = vector.load %arg12[%c0_132, %c32_133] : memref<2x64xf32, #tpu.memory_space<vmem>>, vector<2x32xf32>
    tpu.vector_store %arg12[%c0_132, %c32_133], %312 {strides = array<i32>} : memref<2x64xf32, #tpu.memory_space<vmem>>, vector<2x32xf32>,
    %319 = arith.index_cast %c4_i32 : i32 to index
    %c0_134 = arith.constant 0 : index
    %c0_135 = arith.constant 0 : index
    %320 = vector.load %arg9[%319, %c0_134, %c0_135] : memref<16x2x32xf32, #tpu.memory_space<vmem>>, vector<1x2x32xf32>
    %321 = vector.shape_cast %320 : vector<1x2x32xf32> to vector<2x32xf32>
    %322 = vector.shape_cast %297 : vector<2x32xf32> to vector<1x2x32xf32>
    tpu.vector_store %arg9[%319, %c0_134, %c0_135], %322 {strides = array<i32>} : memref<16x2x32xf32, #tpu.memory_space<vmem>>, vector<1x2x32xf32>,
    %c15_i32_136 = arith.constant 15 : i32
    %323 = arith.subi %c15_i32_136, %c4_i32 : i32
    %324 = arith.index_cast %323 : i32 to index
    %c0_137 = arith.constant 0 : index
    %c0_138 = arith.constant 0 : index
    %325 = vector.load %arg10[%324, %c0_137, %c0_138] : memref<16x2x32xf32, #tpu.memory_space<vmem>>, vector<1x2x32xf32>
    %326 = vector.shape_cast %325 : vector<1x2x32xf32> to vector<2x32xf32>
    %327 = vector.shape_cast %314 : vector<2x32xf32> to vector<1x2x32xf32>
    tpu.vector_store %arg10[%324, %c0_137, %c0_138], %327 {strides = array<i32>} : memref<16x2x32xf32, #tpu.memory_space<vmem>>, vector<1x2x32xf32>,
    %c5_i32 = arith.constant 5 : i32
    %c0_139 = arith.constant 0 : index
    %c0_140 = arith.constant 0 : index
    %328 = vector.load %arg11[%c0_139, %c0_140] : memref<2x64xf32, #tpu.memory_space<vmem>>, vector<2x64xf32>
    %cst_141 = arith.constant dense<0.000000e+00> : vector<2x256xf32>
    %329 = tpu.matmul %328, %12, %cst_141 {dimension_numbers = #tpu.dot_dimension_numbers<[1], [0], [0], [1], [0, 0, 1, 1], [], []>} : vector<2x64xf32>, vector<64x256xf32>, vector<2x256xf32> -> vector<2x256xf32>
    %330 = arith.index_cast %c5_i32 : i32 to index
    %c0_142 = arith.constant 0 : index
    %c0_143 = arith.constant 0 : index
    %331 = vector.load %arg8[%330, %c0_142, %c0_143] : memref<16x2x256xf32, #tpu.memory_space<vmem>>, vector<1x2x256xf32>
    %332 = vector.shape_cast %331 : vector<1x2x256xf32> to vector<2x256xf32>
    %c15_i32_144 = arith.constant 15 : i32
    %333 = arith.subi %c15_i32_144, %c5_i32 : i32
    %334 = arith.index_cast %333 : i32 to index
    %c0_145 = arith.constant 0 : index
    %c0_146 = arith.constant 0 : index
    %335 = vector.load %arg8[%334, %c0_145, %c0_146] : memref<16x2x256xf32, #tpu.memory_space<vmem>>, vector<1x2x256xf32>
    %336 = vector.shape_cast %335 : vector<1x2x256xf32> to vector<2x256xf32>
    %337 = vector.extract_strided_slice %329 {offsets = [0, 0], sizes = [2, 128], strides = [1, 1]} : vector<2x256xf32> to vector<2x128xf32>
    %338 = vector.extract_strided_slice %332 {offsets = [0, 0], sizes = [2, 128], strides = [1, 1]} : vector<2x256xf32> to vector<2x128xf32>
    %339 = arith.addf %337, %338 : vector<2x128xf32>
    %340 = vector.extract_strided_slice %329 {offsets = [0, 128], sizes = [2, 128], strides = [1, 1]} : vector<2x256xf32> to vector<2x128xf32>
    %341 = vector.extract_strided_slice %336 {offsets = [0, 128], sizes = [2, 128], strides = [1, 1]} : vector<2x256xf32> to vector<2x128xf32>
    %342 = arith.addf %340, %341 : vector<2x128xf32>
    %c0_147 = arith.constant 0 : index
    %c0_148 = arith.constant 0 : index
    %343 = vector.load %arg12[%c0_147, %c0_148] : memref<2x64xf32, #tpu.memory_space<vmem>>, vector<2x64xf32>
    %344 = vector.extract_strided_slice %343 {offsets = [0, 0], sizes = [2, 32], strides = [1, 1]} : vector<2x64xf32> to vector<2x32xf32>
    %345 = vector.extract_strided_slice %339 {offsets = [0, 0], sizes = [2, 96], strides = [1, 1]} : vector<2x128xf32> to vector<2x96xf32>
    %346 = arith.negf %345 : vector<2x96xf32>
    %347 = math.exp %346 : vector<2x96xf32>
    %cst_149 = arith.constant 1.000000e+00 : f32
    %348 = vector.broadcast %cst_149 : f32 to vector<2x96xf32>
    %349 = arith.addf %348, %347 : vector<2x96xf32>
    %350 = arith.divf %348, %349 : vector<2x96xf32>
    %351 = vector.extract_strided_slice %339 {offsets = [0, 96], sizes = [2, 32], strides = [1, 1]} : vector<2x128xf32> to vector<2x32xf32>
    %352 = math.tanh %351 : vector<2x32xf32>
    %353 = vector.extract_strided_slice %350 {offsets = [0, 0], sizes = [2, 32], strides = [1, 1]} : vector<2x96xf32> to vector<2x32xf32>
    %354 = vector.extract_strided_slice %350 {offsets = [0, 32], sizes = [2, 32], strides = [1, 1]} : vector<2x96xf32> to vector<2x32xf32>
    %355 = vector.extract_strided_slice %350 {offsets = [0, 64], sizes = [2, 32], strides = [1, 1]} : vector<2x96xf32> to vector<2x32xf32>
    %356 = arith.mulf %354, %344 : vector<2x32xf32>
    %357 = arith.mulf %353, %352 : vector<2x32xf32>
    %358 = arith.addf %356, %357 : vector<2x32xf32>
    %359 = math.tanh %358 : vector<2x32xf32>
    %360 = arith.mulf %355, %359 : vector<2x32xf32>
    %361 = vector.extract_strided_slice %343 {offsets = [0, 32], sizes = [2, 32], strides = [1, 1]} : vector<2x64xf32> to vector<2x32xf32>
    %362 = vector.extract_strided_slice %342 {offsets = [0, 0], sizes = [2, 96], strides = [1, 1]} : vector<2x128xf32> to vector<2x96xf32>
    %363 = arith.negf %362 : vector<2x96xf32>
    %364 = math.exp %363 : vector<2x96xf32>
    %cst_150 = arith.constant 1.000000e+00 : f32
    %365 = vector.broadcast %cst_150 : f32 to vector<2x96xf32>
    %366 = arith.addf %365, %364 : vector<2x96xf32>
    %367 = arith.divf %365, %366 : vector<2x96xf32>
    %368 = vector.extract_strided_slice %342 {offsets = [0, 96], sizes = [2, 32], strides = [1, 1]} : vector<2x128xf32> to vector<2x32xf32>
    %369 = math.tanh %368 : vector<2x32xf32>
    %370 = vector.extract_strided_slice %367 {offsets = [0, 0], sizes = [2, 32], strides = [1, 1]} : vector<2x96xf32> to vector<2x32xf32>
    %371 = vector.extract_strided_slice %367 {offsets = [0, 32], sizes = [2, 32], strides = [1, 1]} : vector<2x96xf32> to vector<2x32xf32>
    %372 = vector.extract_strided_slice %367 {offsets = [0, 64], sizes = [2, 32], strides = [1, 1]} : vector<2x96xf32> to vector<2x32xf32>
    %373 = arith.mulf %371, %361 : vector<2x32xf32>
    %374 = arith.mulf %370, %369 : vector<2x32xf32>
    %375 = arith.addf %373, %374 : vector<2x32xf32>
    %376 = math.tanh %375 : vector<2x32xf32>
    %377 = arith.mulf %372, %376 : vector<2x32xf32>
    %c0_151 = arith.constant 0 : index
    %c0_152 = arith.constant 0 : index
    %378 = vector.load %arg11[%c0_151, %c0_152] : memref<2x64xf32, #tpu.memory_space<vmem>>, vector<2x32xf32>
    tpu.vector_store %arg11[%c0_151, %c0_152], %360 {strides = array<i32>} : memref<2x64xf32, #tpu.memory_space<vmem>>, vector<2x32xf32>,
    %c0_153 = arith.constant 0 : index
    %c32_154 = arith.constant 32 : index
    %379 = vector.load %arg11[%c0_153, %c32_154] : memref<2x64xf32, #tpu.memory_space<vmem>>, vector<2x32xf32>
    tpu.vector_store %arg11[%c0_153, %c32_154], %377 {strides = array<i32>} : memref<2x64xf32, #tpu.memory_space<vmem>>, vector<2x32xf32>,
    %c0_155 = arith.constant 0 : index
    %c0_156 = arith.constant 0 : index
    %380 = vector.load %arg12[%c0_155, %c0_156] : memref<2x64xf32, #tpu.memory_space<vmem>>, vector<2x32xf32>
    tpu.vector_store %arg12[%c0_155, %c0_156], %358 {strides = array<i32>} : memref<2x64xf32, #tpu.memory_space<vmem>>, vector<2x32xf32>,
    %c0_157 = arith.constant 0 : index
    %c32_158 = arith.constant 32 : index
    %381 = vector.load %arg12[%c0_157, %c32_158] : memref<2x64xf32, #tpu.memory_space<vmem>>, vector<2x32xf32>
    tpu.vector_store %arg12[%c0_157, %c32_158], %375 {strides = array<i32>} : memref<2x64xf32, #tpu.memory_space<vmem>>, vector<2x32xf32>,
    %382 = arith.index_cast %c5_i32 : i32 to index
    %c0_159 = arith.constant 0 : index
    %c0_160 = arith.constant 0 : index
    %383 = vector.load %arg9[%382, %c0_159, %c0_160] : memref<16x2x32xf32, #tpu.memory_space<vmem>>, vector<1x2x32xf32>
    %384 = vector.shape_cast %383 : vector<1x2x32xf32> to vector<2x32xf32>
    %385 = vector.shape_cast %360 : vector<2x32xf32> to vector<1x2x32xf32>
    tpu.vector_store %arg9[%382, %c0_159, %c0_160], %385 {strides = array<i32>} : memref<16x2x32xf32, #tpu.memory_space<vmem>>, vector<1x2x32xf32>,
    %c15_i32_161 = arith.constant 15 : i32
    %386 = arith.subi %c15_i32_161, %c5_i32 : i32
    %387 = arith.index_cast %386 : i32 to index
    %c0_162 = arith.constant 0 : index
    %c0_163 = arith.constant 0 : index
    %388 = vector.load %arg10[%387, %c0_162, %c0_163] : memref<16x2x32xf32, #tpu.memory_space<vmem>>, vector<1x2x32xf32>
    %389 = vector.shape_cast %388 : vector<1x2x32xf32> to vector<2x32xf32>
    %390 = vector.shape_cast %377 : vector<2x32xf32> to vector<1x2x32xf32>
    tpu.vector_store %arg10[%387, %c0_162, %c0_163], %390 {strides = array<i32>} : memref<16x2x32xf32, #tpu.memory_space<vmem>>, vector<1x2x32xf32>,
    %c6_i32 = arith.constant 6 : i32
    %c0_164 = arith.constant 0 : index
    %c0_165 = arith.constant 0 : index
    %391 = vector.load %arg11[%c0_164, %c0_165] : memref<2x64xf32, #tpu.memory_space<vmem>>, vector<2x64xf32>
    %cst_166 = arith.constant dense<0.000000e+00> : vector<2x256xf32>
    %392 = tpu.matmul %391, %12, %cst_166 {dimension_numbers = #tpu.dot_dimension_numbers<[1], [0], [0], [1], [0, 0, 1, 1], [], []>} : vector<2x64xf32>, vector<64x256xf32>, vector<2x256xf32> -> vector<2x256xf32>
    %393 = arith.index_cast %c6_i32 : i32 to index
    %c0_167 = arith.constant 0 : index
    %c0_168 = arith.constant 0 : index
    %394 = vector.load %arg8[%393, %c0_167, %c0_168] : memref<16x2x256xf32, #tpu.memory_space<vmem>>, vector<1x2x256xf32>
    %395 = vector.shape_cast %394 : vector<1x2x256xf32> to vector<2x256xf32>
    %c15_i32_169 = arith.constant 15 : i32
    %396 = arith.subi %c15_i32_169, %c6_i32 : i32
    %397 = arith.index_cast %396 : i32 to index
    %c0_170 = arith.constant 0 : index
    %c0_171 = arith.constant 0 : index
    %398 = vector.load %arg8[%397, %c0_170, %c0_171] : memref<16x2x256xf32, #tpu.memory_space<vmem>>, vector<1x2x256xf32>
    %399 = vector.shape_cast %398 : vector<1x2x256xf32> to vector<2x256xf32>
    %400 = vector.extract_strided_slice %392 {offsets = [0, 0], sizes = [2, 128], strides = [1, 1]} : vector<2x256xf32> to vector<2x128xf32>
    %401 = vector.extract_strided_slice %395 {offsets = [0, 0], sizes = [2, 128], strides = [1, 1]} : vector<2x256xf32> to vector<2x128xf32>
    %402 = arith.addf %400, %401 : vector<2x128xf32>
    %403 = vector.extract_strided_slice %392 {offsets = [0, 128], sizes = [2, 128], strides = [1, 1]} : vector<2x256xf32> to vector<2x128xf32>
    %404 = vector.extract_strided_slice %399 {offsets = [0, 128], sizes = [2, 128], strides = [1, 1]} : vector<2x256xf32> to vector<2x128xf32>
    %405 = arith.addf %403, %404 : vector<2x128xf32>
    %c0_172 = arith.constant 0 : index
    %c0_173 = arith.constant 0 : index
    %406 = vector.load %arg12[%c0_172, %c0_173] : memref<2x64xf32, #tpu.memory_space<vmem>>, vector<2x64xf32>
    %407 = vector.extract_strided_slice %406 {offsets = [0, 0], sizes = [2, 32], strides = [1, 1]} : vector<2x64xf32> to vector<2x32xf32>
    %408 = vector.extract_strided_slice %402 {offsets = [0, 0], sizes = [2, 96], strides = [1, 1]} : vector<2x128xf32> to vector<2x96xf32>
    %409 = arith.negf %408 : vector<2x96xf32>
    %410 = math.exp %409 : vector<2x96xf32>
    %cst_174 = arith.constant 1.000000e+00 : f32
    %411 = vector.broadcast %cst_174 : f32 to vector<2x96xf32>
    %412 = arith.addf %411, %410 : vector<2x96xf32>
    %413 = arith.divf %411, %412 : vector<2x96xf32>
    %414 = vector.extract_strided_slice %402 {offsets = [0, 96], sizes = [2, 32], strides = [1, 1]} : vector<2x128xf32> to vector<2x32xf32>
    %415 = math.tanh %414 : vector<2x32xf32>
    %416 = vector.extract_strided_slice %413 {offsets = [0, 0], sizes = [2, 32], strides = [1, 1]} : vector<2x96xf32> to vector<2x32xf32>
    %417 = vector.extract_strided_slice %413 {offsets = [0, 32], sizes = [2, 32], strides = [1, 1]} : vector<2x96xf32> to vector<2x32xf32>
    %418 = vector.extract_strided_slice %413 {offsets = [0, 64], sizes = [2, 32], strides = [1, 1]} : vector<2x96xf32> to vector<2x32xf32>
    %419 = arith.mulf %417, %407 : vector<2x32xf32>
    %420 = arith.mulf %416, %415 : vector<2x32xf32>
    %421 = arith.addf %419, %420 : vector<2x32xf32>
    %422 = math.tanh %421 : vector<2x32xf32>
    %423 = arith.mulf %418, %422 : vector<2x32xf32>
    %424 = vector.extract_strided_slice %406 {offsets = [0, 32], sizes = [2, 32], strides = [1, 1]} : vector<2x64xf32> to vector<2x32xf32>
    %425 = vector.extract_strided_slice %405 {offsets = [0, 0], sizes = [2, 96], strides = [1, 1]} : vector<2x128xf32> to vector<2x96xf32>
    %426 = arith.negf %425 : vector<2x96xf32>
    %427 = math.exp %426 : vector<2x96xf32>
    %cst_175 = arith.constant 1.000000e+00 : f32
    %428 = vector.broadcast %cst_175 : f32 to vector<2x96xf32>
    %429 = arith.addf %428, %427 : vector<2x96xf32>
    %430 = arith.divf %428, %429 : vector<2x96xf32>
    %431 = vector.extract_strided_slice %405 {offsets = [0, 96], sizes = [2, 32], strides = [1, 1]} : vector<2x128xf32> to vector<2x32xf32>
    %432 = math.tanh %431 : vector<2x32xf32>
    %433 = vector.extract_strided_slice %430 {offsets = [0, 0], sizes = [2, 32], strides = [1, 1]} : vector<2x96xf32> to vector<2x32xf32>
    %434 = vector.extract_strided_slice %430 {offsets = [0, 32], sizes = [2, 32], strides = [1, 1]} : vector<2x96xf32> to vector<2x32xf32>
    %435 = vector.extract_strided_slice %430 {offsets = [0, 64], sizes = [2, 32], strides = [1, 1]} : vector<2x96xf32> to vector<2x32xf32>
    %436 = arith.mulf %434, %424 : vector<2x32xf32>
    %437 = arith.mulf %433, %432 : vector<2x32xf32>
    %438 = arith.addf %436, %437 : vector<2x32xf32>
    %439 = math.tanh %438 : vector<2x32xf32>
    %440 = arith.mulf %435, %439 : vector<2x32xf32>
    %c0_176 = arith.constant 0 : index
    %c0_177 = arith.constant 0 : index
    %441 = vector.load %arg11[%c0_176, %c0_177] : memref<2x64xf32, #tpu.memory_space<vmem>>, vector<2x32xf32>
    tpu.vector_store %arg11[%c0_176, %c0_177], %423 {strides = array<i32>} : memref<2x64xf32, #tpu.memory_space<vmem>>, vector<2x32xf32>,
    %c0_178 = arith.constant 0 : index
    %c32_179 = arith.constant 32 : index
    %442 = vector.load %arg11[%c0_178, %c32_179] : memref<2x64xf32, #tpu.memory_space<vmem>>, vector<2x32xf32>
    tpu.vector_store %arg11[%c0_178, %c32_179], %440 {strides = array<i32>} : memref<2x64xf32, #tpu.memory_space<vmem>>, vector<2x32xf32>,
    %c0_180 = arith.constant 0 : index
    %c0_181 = arith.constant 0 : index
    %443 = vector.load %arg12[%c0_180, %c0_181] : memref<2x64xf32, #tpu.memory_space<vmem>>, vector<2x32xf32>
    tpu.vector_store %arg12[%c0_180, %c0_181], %421 {strides = array<i32>} : memref<2x64xf32, #tpu.memory_space<vmem>>, vector<2x32xf32>,
    %c0_182 = arith.constant 0 : index
    %c32_183 = arith.constant 32 : index
    %444 = vector.load %arg12[%c0_182, %c32_183] : memref<2x64xf32, #tpu.memory_space<vmem>>, vector<2x32xf32>
    tpu.vector_store %arg12[%c0_182, %c32_183], %438 {strides = array<i32>} : memref<2x64xf32, #tpu.memory_space<vmem>>, vector<2x32xf32>,
    %445 = arith.index_cast %c6_i32 : i32 to index
    %c0_184 = arith.constant 0 : index
    %c0_185 = arith.constant 0 : index
    %446 = vector.load %arg9[%445, %c0_184, %c0_185] : memref<16x2x32xf32, #tpu.memory_space<vmem>>, vector<1x2x32xf32>
    %447 = vector.shape_cast %446 : vector<1x2x32xf32> to vector<2x32xf32>
    %448 = vector.shape_cast %423 : vector<2x32xf32> to vector<1x2x32xf32>
    tpu.vector_store %arg9[%445, %c0_184, %c0_185], %448 {strides = array<i32>} : memref<16x2x32xf32, #tpu.memory_space<vmem>>, vector<1x2x32xf32>,
    %c15_i32_186 = arith.constant 15 : i32
    %449 = arith.subi %c15_i32_186, %c6_i32 : i32
    %450 = arith.index_cast %449 : i32 to index
    %c0_187 = arith.constant 0 : index
    %c0_188 = arith.constant 0 : index
    %451 = vector.load %arg10[%450, %c0_187, %c0_188] : memref<16x2x32xf32, #tpu.memory_space<vmem>>, vector<1x2x32xf32>
    %452 = vector.shape_cast %451 : vector<1x2x32xf32> to vector<2x32xf32>
    %453 = vector.shape_cast %440 : vector<2x32xf32> to vector<1x2x32xf32>
    tpu.vector_store %arg10[%450, %c0_187, %c0_188], %453 {strides = array<i32>} : memref<16x2x32xf32, #tpu.memory_space<vmem>>, vector<1x2x32xf32>,
    %c7_i32 = arith.constant 7 : i32
    %c0_189 = arith.constant 0 : index
    %c0_190 = arith.constant 0 : index
    %454 = vector.load %arg11[%c0_189, %c0_190] : memref<2x64xf32, #tpu.memory_space<vmem>>, vector<2x64xf32>
    %cst_191 = arith.constant dense<0.000000e+00> : vector<2x256xf32>
    %455 = tpu.matmul %454, %12, %cst_191 {dimension_numbers = #tpu.dot_dimension_numbers<[1], [0], [0], [1], [0, 0, 1, 1], [], []>} : vector<2x64xf32>, vector<64x256xf32>, vector<2x256xf32> -> vector<2x256xf32>
    %456 = arith.index_cast %c7_i32 : i32 to index
    %c0_192 = arith.constant 0 : index
    %c0_193 = arith.constant 0 : index
    %457 = vector.load %arg8[%456, %c0_192, %c0_193] : memref<16x2x256xf32, #tpu.memory_space<vmem>>, vector<1x2x256xf32>
    %458 = vector.shape_cast %457 : vector<1x2x256xf32> to vector<2x256xf32>
    %c15_i32_194 = arith.constant 15 : i32
    %459 = arith.subi %c15_i32_194, %c7_i32 : i32
    %460 = arith.index_cast %459 : i32 to index
    %c0_195 = arith.constant 0 : index
    %c0_196 = arith.constant 0 : index
    %461 = vector.load %arg8[%460, %c0_195, %c0_196] : memref<16x2x256xf32, #tpu.memory_space<vmem>>, vector<1x2x256xf32>
    %462 = vector.shape_cast %461 : vector<1x2x256xf32> to vector<2x256xf32>
    %463 = vector.extract_strided_slice %455 {offsets = [0, 0], sizes = [2, 128], strides = [1, 1]} : vector<2x256xf32> to vector<2x128xf32>
    %464 = vector.extract_strided_slice %458 {offsets = [0, 0], sizes = [2, 128], strides = [1, 1]} : vector<2x256xf32> to vector<2x128xf32>
    %465 = arith.addf %463, %464 : vector<2x128xf32>
    %466 = vector.extract_strided_slice %455 {offsets = [0, 128], sizes = [2, 128], strides = [1, 1]} : vector<2x256xf32> to vector<2x128xf32>
    %467 = vector.extract_strided_slice %462 {offsets = [0, 128], sizes = [2, 128], strides = [1, 1]} : vector<2x256xf32> to vector<2x128xf32>
    %468 = arith.addf %466, %467 : vector<2x128xf32>
    %c0_197 = arith.constant 0 : index
    %c0_198 = arith.constant 0 : index
    %469 = vector.load %arg12[%c0_197, %c0_198] : memref<2x64xf32, #tpu.memory_space<vmem>>, vector<2x64xf32>
    %470 = vector.extract_strided_slice %469 {offsets = [0, 0], sizes = [2, 32], strides = [1, 1]} : vector<2x64xf32> to vector<2x32xf32>
    %471 = vector.extract_strided_slice %465 {offsets = [0, 0], sizes = [2, 96], strides = [1, 1]} : vector<2x128xf32> to vector<2x96xf32>
    %472 = arith.negf %471 : vector<2x96xf32>
    %473 = math.exp %472 : vector<2x96xf32>
    %cst_199 = arith.constant 1.000000e+00 : f32
    %474 = vector.broadcast %cst_199 : f32 to vector<2x96xf32>
    %475 = arith.addf %474, %473 : vector<2x96xf32>
    %476 = arith.divf %474, %475 : vector<2x96xf32>
    %477 = vector.extract_strided_slice %465 {offsets = [0, 96], sizes = [2, 32], strides = [1, 1]} : vector<2x128xf32> to vector<2x32xf32>
    %478 = math.tanh %477 : vector<2x32xf32>
    %479 = vector.extract_strided_slice %476 {offsets = [0, 0], sizes = [2, 32], strides = [1, 1]} : vector<2x96xf32> to vector<2x32xf32>
    %480 = vector.extract_strided_slice %476 {offsets = [0, 32], sizes = [2, 32], strides = [1, 1]} : vector<2x96xf32> to vector<2x32xf32>
    %481 = vector.extract_strided_slice %476 {offsets = [0, 64], sizes = [2, 32], strides = [1, 1]} : vector<2x96xf32> to vector<2x32xf32>
    %482 = arith.mulf %480, %470 : vector<2x32xf32>
    %483 = arith.mulf %479, %478 : vector<2x32xf32>
    %484 = arith.addf %482, %483 : vector<2x32xf32>
    %485 = math.tanh %484 : vector<2x32xf32>
    %486 = arith.mulf %481, %485 : vector<2x32xf32>
    %487 = vector.extract_strided_slice %469 {offsets = [0, 32], sizes = [2, 32], strides = [1, 1]} : vector<2x64xf32> to vector<2x32xf32>
    %488 = vector.extract_strided_slice %468 {offsets = [0, 0], sizes = [2, 96], strides = [1, 1]} : vector<2x128xf32> to vector<2x96xf32>
    %489 = arith.negf %488 : vector<2x96xf32>
    %490 = math.exp %489 : vector<2x96xf32>
    %cst_200 = arith.constant 1.000000e+00 : f32
    %491 = vector.broadcast %cst_200 : f32 to vector<2x96xf32>
    %492 = arith.addf %491, %490 : vector<2x96xf32>
    %493 = arith.divf %491, %492 : vector<2x96xf32>
    %494 = vector.extract_strided_slice %468 {offsets = [0, 96], sizes = [2, 32], strides = [1, 1]} : vector<2x128xf32> to vector<2x32xf32>
    %495 = math.tanh %494 : vector<2x32xf32>
    %496 = vector.extract_strided_slice %493 {offsets = [0, 0], sizes = [2, 32], strides = [1, 1]} : vector<2x96xf32> to vector<2x32xf32>
    %497 = vector.extract_strided_slice %493 {offsets = [0, 32], sizes = [2, 32], strides = [1, 1]} : vector<2x96xf32> to vector<2x32xf32>
    %498 = vector.extract_strided_slice %493 {offsets = [0, 64], sizes = [2, 32], strides = [1, 1]} : vector<2x96xf32> to vector<2x32xf32>
    %499 = arith.mulf %497, %487 : vector<2x32xf32>
    %500 = arith.mulf %496, %495 : vector<2x32xf32>
    %501 = arith.addf %499, %500 : vector<2x32xf32>
    %502 = math.tanh %501 : vector<2x32xf32>
    %503 = arith.mulf %498, %502 : vector<2x32xf32>
    %c0_201 = arith.constant 0 : index
    %c0_202 = arith.constant 0 : index
    %504 = vector.load %arg11[%c0_201, %c0_202] : memref<2x64xf32, #tpu.memory_space<vmem>>, vector<2x32xf32>
    tpu.vector_store %arg11[%c0_201, %c0_202], %486 {strides = array<i32>} : memref<2x64xf32, #tpu.memory_space<vmem>>, vector<2x32xf32>,
    %c0_203 = arith.constant 0 : index
    %c32_204 = arith.constant 32 : index
    %505 = vector.load %arg11[%c0_203, %c32_204] : memref<2x64xf32, #tpu.memory_space<vmem>>, vector<2x32xf32>
    tpu.vector_store %arg11[%c0_203, %c32_204], %503 {strides = array<i32>} : memref<2x64xf32, #tpu.memory_space<vmem>>, vector<2x32xf32>,
    %c0_205 = arith.constant 0 : index
    %c0_206 = arith.constant 0 : index
    %506 = vector.load %arg12[%c0_205, %c0_206] : memref<2x64xf32, #tpu.memory_space<vmem>>, vector<2x32xf32>
    tpu.vector_store %arg12[%c0_205, %c0_206], %484 {strides = array<i32>} : memref<2x64xf32, #tpu.memory_space<vmem>>, vector<2x32xf32>,
    %c0_207 = arith.constant 0 : index
    %c32_208 = arith.constant 32 : index
    %507 = vector.load %arg12[%c0_207, %c32_208] : memref<2x64xf32, #tpu.memory_space<vmem>>, vector<2x32xf32>
    tpu.vector_store %arg12[%c0_207, %c32_208], %501 {strides = array<i32>} : memref<2x64xf32, #tpu.memory_space<vmem>>, vector<2x32xf32>,
    %508 = arith.index_cast %c7_i32 : i32 to index
    %c0_209 = arith.constant 0 : index
    %c0_210 = arith.constant 0 : index
    %509 = vector.load %arg9[%508, %c0_209, %c0_210] : memref<16x2x32xf32, #tpu.memory_space<vmem>>, vector<1x2x32xf32>
    %510 = vector.shape_cast %509 : vector<1x2x32xf32> to vector<2x32xf32>
    %511 = vector.shape_cast %486 : vector<2x32xf32> to vector<1x2x32xf32>
    tpu.vector_store %arg9[%508, %c0_209, %c0_210], %511 {strides = array<i32>} : memref<16x2x32xf32, #tpu.memory_space<vmem>>, vector<1x2x32xf32>,
    %c15_i32_211 = arith.constant 15 : i32
    %512 = arith.subi %c15_i32_211, %c7_i32 : i32
    %513 = arith.index_cast %512 : i32 to index
    %c0_212 = arith.constant 0 : index
    %c0_213 = arith.constant 0 : index
    %514 = vector.load %arg10[%513, %c0_212, %c0_213] : memref<16x2x32xf32, #tpu.memory_space<vmem>>, vector<1x2x32xf32>
    %515 = vector.shape_cast %514 : vector<1x2x32xf32> to vector<2x32xf32>
    %516 = vector.shape_cast %503 : vector<2x32xf32> to vector<1x2x32xf32>
    tpu.vector_store %arg10[%513, %c0_212, %c0_213], %516 {strides = array<i32>} : memref<16x2x32xf32, #tpu.memory_space<vmem>>, vector<1x2x32xf32>,
    %c8_i32 = arith.constant 8 : i32
    %c0_214 = arith.constant 0 : index
    %c0_215 = arith.constant 0 : index
    %517 = vector.load %arg11[%c0_214, %c0_215] : memref<2x64xf32, #tpu.memory_space<vmem>>, vector<2x64xf32>
    %cst_216 = arith.constant dense<0.000000e+00> : vector<2x256xf32>
    %518 = tpu.matmul %517, %12, %cst_216 {dimension_numbers = #tpu.dot_dimension_numbers<[1], [0], [0], [1], [0, 0, 1, 1], [], []>} : vector<2x64xf32>, vector<64x256xf32>, vector<2x256xf32> -> vector<2x256xf32>
    %519 = arith.index_cast %c8_i32 : i32 to index
    %c0_217 = arith.constant 0 : index
    %c0_218 = arith.constant 0 : index
    %520 = vector.load %arg8[%519, %c0_217, %c0_218] : memref<16x2x256xf32, #tpu.memory_space<vmem>>, vector<1x2x256xf32>
    %521 = vector.shape_cast %520 : vector<1x2x256xf32> to vector<2x256xf32>
    %c15_i32_219 = arith.constant 15 : i32
    %522 = arith.subi %c15_i32_219, %c8_i32 : i32
    %523 = arith.index_cast %522 : i32 to index
    %c0_220 = arith.constant 0 : index
    %c0_221 = arith.constant 0 : index
    %524 = vector.load %arg8[%523, %c0_220, %c0_221] : memref<16x2x256xf32, #tpu.memory_space<vmem>>, vector<1x2x256xf32>
    %525 = vector.shape_cast %524 : vector<1x2x256xf32> to vector<2x256xf32>
    %526 = vector.extract_strided_slice %518 {offsets = [0, 0], sizes = [2, 128], strides = [1, 1]} : vector<2x256xf32> to vector<2x128xf32>
    %527 = vector.extract_strided_slice %521 {offsets = [0, 0], sizes = [2, 128], strides = [1, 1]} : vector<2x256xf32> to vector<2x128xf32>
    %528 = arith.addf %526, %527 : vector<2x128xf32>
    %529 = vector.extract_strided_slice %518 {offsets = [0, 128], sizes = [2, 128], strides = [1, 1]} : vector<2x256xf32> to vector<2x128xf32>
    %530 = vector.extract_strided_slice %525 {offsets = [0, 128], sizes = [2, 128], strides = [1, 1]} : vector<2x256xf32> to vector<2x128xf32>
    %531 = arith.addf %529, %530 : vector<2x128xf32>
    %c0_222 = arith.constant 0 : index
    %c0_223 = arith.constant 0 : index
    %532 = vector.load %arg12[%c0_222, %c0_223] : memref<2x64xf32, #tpu.memory_space<vmem>>, vector<2x64xf32>
    %533 = vector.extract_strided_slice %532 {offsets = [0, 0], sizes = [2, 32], strides = [1, 1]} : vector<2x64xf32> to vector<2x32xf32>
    %534 = vector.extract_strided_slice %528 {offsets = [0, 0], sizes = [2, 96], strides = [1, 1]} : vector<2x128xf32> to vector<2x96xf32>
    %535 = arith.negf %534 : vector<2x96xf32>
    %536 = math.exp %535 : vector<2x96xf32>
    %cst_224 = arith.constant 1.000000e+00 : f32
    %537 = vector.broadcast %cst_224 : f32 to vector<2x96xf32>
    %538 = arith.addf %537, %536 : vector<2x96xf32>
    %539 = arith.divf %537, %538 : vector<2x96xf32>
    %540 = vector.extract_strided_slice %528 {offsets = [0, 96], sizes = [2, 32], strides = [1, 1]} : vector<2x128xf32> to vector<2x32xf32>
    %541 = math.tanh %540 : vector<2x32xf32>
    %542 = vector.extract_strided_slice %539 {offsets = [0, 0], sizes = [2, 32], strides = [1, 1]} : vector<2x96xf32> to vector<2x32xf32>
    %543 = vector.extract_strided_slice %539 {offsets = [0, 32], sizes = [2, 32], strides = [1, 1]} : vector<2x96xf32> to vector<2x32xf32>
    %544 = vector.extract_strided_slice %539 {offsets = [0, 64], sizes = [2, 32], strides = [1, 1]} : vector<2x96xf32> to vector<2x32xf32>
    %545 = arith.mulf %543, %533 : vector<2x32xf32>
    %546 = arith.mulf %542, %541 : vector<2x32xf32>
    %547 = arith.addf %545, %546 : vector<2x32xf32>
    %548 = math.tanh %547 : vector<2x32xf32>
    %549 = arith.mulf %544, %548 : vector<2x32xf32>
    %550 = vector.extract_strided_slice %532 {offsets = [0, 32], sizes = [2, 32], strides = [1, 1]} : vector<2x64xf32> to vector<2x32xf32>
    %551 = vector.extract_strided_slice %531 {offsets = [0, 0], sizes = [2, 96], strides = [1, 1]} : vector<2x128xf32> to vector<2x96xf32>
    %552 = arith.negf %551 : vector<2x96xf32>
    %553 = math.exp %552 : vector<2x96xf32>
    %cst_225 = arith.constant 1.000000e+00 : f32
    %554 = vector.broadcast %cst_225 : f32 to vector<2x96xf32>
    %555 = arith.addf %554, %553 : vector<2x96xf32>
    %556 = arith.divf %554, %555 : vector<2x96xf32>
    %557 = vector.extract_strided_slice %531 {offsets = [0, 96], sizes = [2, 32], strides = [1, 1]} : vector<2x128xf32> to vector<2x32xf32>
    %558 = math.tanh %557 : vector<2x32xf32>
    %559 = vector.extract_strided_slice %556 {offsets = [0, 0], sizes = [2, 32], strides = [1, 1]} : vector<2x96xf32> to vector<2x32xf32>
    %560 = vector.extract_strided_slice %556 {offsets = [0, 32], sizes = [2, 32], strides = [1, 1]} : vector<2x96xf32> to vector<2x32xf32>
    %561 = vector.extract_strided_slice %556 {offsets = [0, 64], sizes = [2, 32], strides = [1, 1]} : vector<2x96xf32> to vector<2x32xf32>
    %562 = arith.mulf %560, %550 : vector<2x32xf32>
    %563 = arith.mulf %559, %558 : vector<2x32xf32>
    %564 = arith.addf %562, %563 : vector<2x32xf32>
    %565 = math.tanh %564 : vector<2x32xf32>
    %566 = arith.mulf %561, %565 : vector<2x32xf32>
    %c0_226 = arith.constant 0 : index
    %c0_227 = arith.constant 0 : index
    %567 = vector.load %arg11[%c0_226, %c0_227] : memref<2x64xf32, #tpu.memory_space<vmem>>, vector<2x32xf32>
    tpu.vector_store %arg11[%c0_226, %c0_227], %549 {strides = array<i32>} : memref<2x64xf32, #tpu.memory_space<vmem>>, vector<2x32xf32>,
    %c0_228 = arith.constant 0 : index
    %c32_229 = arith.constant 32 : index
    %568 = vector.load %arg11[%c0_228, %c32_229] : memref<2x64xf32, #tpu.memory_space<vmem>>, vector<2x32xf32>
    tpu.vector_store %arg11[%c0_228, %c32_229], %566 {strides = array<i32>} : memref<2x64xf32, #tpu.memory_space<vmem>>, vector<2x32xf32>,
    %c0_230 = arith.constant 0 : index
    %c0_231 = arith.constant 0 : index
    %569 = vector.load %arg12[%c0_230, %c0_231] : memref<2x64xf32, #tpu.memory_space<vmem>>, vector<2x32xf32>
    tpu.vector_store %arg12[%c0_230, %c0_231], %547 {strides = array<i32>} : memref<2x64xf32, #tpu.memory_space<vmem>>, vector<2x32xf32>,
    %c0_232 = arith.constant 0 : index
    %c32_233 = arith.constant 32 : index
    %570 = vector.load %arg12[%c0_232, %c32_233] : memref<2x64xf32, #tpu.memory_space<vmem>>, vector<2x32xf32>
    tpu.vector_store %arg12[%c0_232, %c32_233], %564 {strides = array<i32>} : memref<2x64xf32, #tpu.memory_space<vmem>>, vector<2x32xf32>,
    %571 = arith.index_cast %c8_i32 : i32 to index
    %c0_234 = arith.constant 0 : index
    %c0_235 = arith.constant 0 : index
    %572 = vector.load %arg9[%571, %c0_234, %c0_235] : memref<16x2x32xf32, #tpu.memory_space<vmem>>, vector<1x2x32xf32>
    %573 = vector.shape_cast %572 : vector<1x2x32xf32> to vector<2x32xf32>
    %574 = vector.shape_cast %549 : vector<2x32xf32> to vector<1x2x32xf32>
    tpu.vector_store %arg9[%571, %c0_234, %c0_235], %574 {strides = array<i32>} : memref<16x2x32xf32, #tpu.memory_space<vmem>>, vector<1x2x32xf32>,
    %c15_i32_236 = arith.constant 15 : i32
    %575 = arith.subi %c15_i32_236, %c8_i32 : i32
    %576 = arith.index_cast %575 : i32 to index
    %c0_237 = arith.constant 0 : index
    %c0_238 = arith.constant 0 : index
    %577 = vector.load %arg10[%576, %c0_237, %c0_238] : memref<16x2x32xf32, #tpu.memory_space<vmem>>, vector<1x2x32xf32>
    %578 = vector.shape_cast %577 : vector<1x2x32xf32> to vector<2x32xf32>
    %579 = vector.shape_cast %566 : vector<2x32xf32> to vector<1x2x32xf32>
    tpu.vector_store %arg10[%576, %c0_237, %c0_238], %579 {strides = array<i32>} : memref<16x2x32xf32, #tpu.memory_space<vmem>>, vector<1x2x32xf32>,
    %c9_i32 = arith.constant 9 : i32
    %c0_239 = arith.constant 0 : index
    %c0_240 = arith.constant 0 : index
    %580 = vector.load %arg11[%c0_239, %c0_240] : memref<2x64xf32, #tpu.memory_space<vmem>>, vector<2x64xf32>
    %cst_241 = arith.constant dense<0.000000e+00> : vector<2x256xf32>
    %581 = tpu.matmul %580, %12, %cst_241 {dimension_numbers = #tpu.dot_dimension_numbers<[1], [0], [0], [1], [0, 0, 1, 1], [], []>} : vector<2x64xf32>, vector<64x256xf32>, vector<2x256xf32> -> vector<2x256xf32>
    %582 = arith.index_cast %c9_i32 : i32 to index
    %c0_242 = arith.constant 0 : index
    %c0_243 = arith.constant 0 : index
    %583 = vector.load %arg8[%582, %c0_242, %c0_243] : memref<16x2x256xf32, #tpu.memory_space<vmem>>, vector<1x2x256xf32>
    %584 = vector.shape_cast %583 : vector<1x2x256xf32> to vector<2x256xf32>
    %c15_i32_244 = arith.constant 15 : i32
    %585 = arith.subi %c15_i32_244, %c9_i32 : i32
    %586 = arith.index_cast %585 : i32 to index
    %c0_245 = arith.constant 0 : index
    %c0_246 = arith.constant 0 : index
    %587 = vector.load %arg8[%586, %c0_245, %c0_246] : memref<16x2x256xf32, #tpu.memory_space<vmem>>, vector<1x2x256xf32>
    %588 = vector.shape_cast %587 : vector<1x2x256xf32> to vector<2x256xf32>
    %589 = vector.extract_strided_slice %581 {offsets = [0, 0], sizes = [2, 128], strides = [1, 1]} : vector<2x256xf32> to vector<2x128xf32>
    %590 = vector.extract_strided_slice %584 {offsets = [0, 0], sizes = [2, 128], strides = [1, 1]} : vector<2x256xf32> to vector<2x128xf32>
    %591 = arith.addf %589, %590 : vector<2x128xf32>
    %592 = vector.extract_strided_slice %581 {offsets = [0, 128], sizes = [2, 128], strides = [1, 1]} : vector<2x256xf32> to vector<2x128xf32>
    %593 = vector.extract_strided_slice %588 {offsets = [0, 128], sizes = [2, 128], strides = [1, 1]} : vector<2x256xf32> to vector<2x128xf32>
    %594 = arith.addf %592, %593 : vector<2x128xf32>
    %c0_247 = arith.constant 0 : index
    %c0_248 = arith.constant 0 : index
    %595 = vector.load %arg12[%c0_247, %c0_248] : memref<2x64xf32, #tpu.memory_space<vmem>>, vector<2x64xf32>
    %596 = vector.extract_strided_slice %595 {offsets = [0, 0], sizes = [2, 32], strides = [1, 1]} : vector<2x64xf32> to vector<2x32xf32>
    %597 = vector.extract_strided_slice %591 {offsets = [0, 0], sizes = [2, 96], strides = [1, 1]} : vector<2x128xf32> to vector<2x96xf32>
    %598 = arith.negf %597 : vector<2x96xf32>
    %599 = math.exp %598 : vector<2x96xf32>
    %cst_249 = arith.constant 1.000000e+00 : f32
    %600 = vector.broadcast %cst_249 : f32 to vector<2x96xf32>
    %601 = arith.addf %600, %599 : vector<2x96xf32>
    %602 = arith.divf %600, %601 : vector<2x96xf32>
    %603 = vector.extract_strided_slice %591 {offsets = [0, 96], sizes = [2, 32], strides = [1, 1]} : vector<2x128xf32> to vector<2x32xf32>
    %604 = math.tanh %603 : vector<2x32xf32>
    %605 = vector.extract_strided_slice %602 {offsets = [0, 0], sizes = [2, 32], strides = [1, 1]} : vector<2x96xf32> to vector<2x32xf32>
    %606 = vector.extract_strided_slice %602 {offsets = [0, 32], sizes = [2, 32], strides = [1, 1]} : vector<2x96xf32> to vector<2x32xf32>
    %607 = vector.extract_strided_slice %602 {offsets = [0, 64], sizes = [2, 32], strides = [1, 1]} : vector<2x96xf32> to vector<2x32xf32>
    %608 = arith.mulf %606, %596 : vector<2x32xf32>
    %609 = arith.mulf %605, %604 : vector<2x32xf32>
    %610 = arith.addf %608, %609 : vector<2x32xf32>
    %611 = math.tanh %610 : vector<2x32xf32>
    %612 = arith.mulf %607, %611 : vector<2x32xf32>
    %613 = vector.extract_strided_slice %595 {offsets = [0, 32], sizes = [2, 32], strides = [1, 1]} : vector<2x64xf32> to vector<2x32xf32>
    %614 = vector.extract_strided_slice %594 {offsets = [0, 0], sizes = [2, 96], strides = [1, 1]} : vector<2x128xf32> to vector<2x96xf32>
    %615 = arith.negf %614 : vector<2x96xf32>
    %616 = math.exp %615 : vector<2x96xf32>
    %cst_250 = arith.constant 1.000000e+00 : f32
    %617 = vector.broadcast %cst_250 : f32 to vector<2x96xf32>
    %618 = arith.addf %617, %616 : vector<2x96xf32>
    %619 = arith.divf %617, %618 : vector<2x96xf32>
    %620 = vector.extract_strided_slice %594 {offsets = [0, 96], sizes = [2, 32], strides = [1, 1]} : vector<2x128xf32> to vector<2x32xf32>
    %621 = math.tanh %620 : vector<2x32xf32>
    %622 = vector.extract_strided_slice %619 {offsets = [0, 0], sizes = [2, 32], strides = [1, 1]} : vector<2x96xf32> to vector<2x32xf32>
    %623 = vector.extract_strided_slice %619 {offsets = [0, 32], sizes = [2, 32], strides = [1, 1]} : vector<2x96xf32> to vector<2x32xf32>
    %624 = vector.extract_strided_slice %619 {offsets = [0, 64], sizes = [2, 32], strides = [1, 1]} : vector<2x96xf32> to vector<2x32xf32>
    %625 = arith.mulf %623, %613 : vector<2x32xf32>
    %626 = arith.mulf %622, %621 : vector<2x32xf32>
    %627 = arith.addf %625, %626 : vector<2x32xf32>
    %628 = math.tanh %627 : vector<2x32xf32>
    %629 = arith.mulf %624, %628 : vector<2x32xf32>
    %c0_251 = arith.constant 0 : index
    %c0_252 = arith.constant 0 : index
    %630 = vector.load %arg11[%c0_251, %c0_252] : memref<2x64xf32, #tpu.memory_space<vmem>>, vector<2x32xf32>
    tpu.vector_store %arg11[%c0_251, %c0_252], %612 {strides = array<i32>} : memref<2x64xf32, #tpu.memory_space<vmem>>, vector<2x32xf32>,
    %c0_253 = arith.constant 0 : index
    %c32_254 = arith.constant 32 : index
    %631 = vector.load %arg11[%c0_253, %c32_254] : memref<2x64xf32, #tpu.memory_space<vmem>>, vector<2x32xf32>
    tpu.vector_store %arg11[%c0_253, %c32_254], %629 {strides = array<i32>} : memref<2x64xf32, #tpu.memory_space<vmem>>, vector<2x32xf32>,
    %c0_255 = arith.constant 0 : index
    %c0_256 = arith.constant 0 : index
    %632 = vector.load %arg12[%c0_255, %c0_256] : memref<2x64xf32, #tpu.memory_space<vmem>>, vector<2x32xf32>
    tpu.vector_store %arg12[%c0_255, %c0_256], %610 {strides = array<i32>} : memref<2x64xf32, #tpu.memory_space<vmem>>, vector<2x32xf32>,
    %c0_257 = arith.constant 0 : index
    %c32_258 = arith.constant 32 : index
    %633 = vector.load %arg12[%c0_257, %c32_258] : memref<2x64xf32, #tpu.memory_space<vmem>>, vector<2x32xf32>
    tpu.vector_store %arg12[%c0_257, %c32_258], %627 {strides = array<i32>} : memref<2x64xf32, #tpu.memory_space<vmem>>, vector<2x32xf32>,
    %634 = arith.index_cast %c9_i32 : i32 to index
    %c0_259 = arith.constant 0 : index
    %c0_260 = arith.constant 0 : index
    %635 = vector.load %arg9[%634, %c0_259, %c0_260] : memref<16x2x32xf32, #tpu.memory_space<vmem>>, vector<1x2x32xf32>
    %636 = vector.shape_cast %635 : vector<1x2x32xf32> to vector<2x32xf32>
    %637 = vector.shape_cast %612 : vector<2x32xf32> to vector<1x2x32xf32>
    tpu.vector_store %arg9[%634, %c0_259, %c0_260], %637 {strides = array<i32>} : memref<16x2x32xf32, #tpu.memory_space<vmem>>, vector<1x2x32xf32>,
    %c15_i32_261 = arith.constant 15 : i32
    %638 = arith.subi %c15_i32_261, %c9_i32 : i32
    %639 = arith.index_cast %638 : i32 to index
    %c0_262 = arith.constant 0 : index
    %c0_263 = arith.constant 0 : index
    %640 = vector.load %arg10[%639, %c0_262, %c0_263] : memref<16x2x32xf32, #tpu.memory_space<vmem>>, vector<1x2x32xf32>
    %641 = vector.shape_cast %640 : vector<1x2x32xf32> to vector<2x32xf32>
    %642 = vector.shape_cast %629 : vector<2x32xf32> to vector<1x2x32xf32>
    tpu.vector_store %arg10[%639, %c0_262, %c0_263], %642 {strides = array<i32>} : memref<16x2x32xf32, #tpu.memory_space<vmem>>, vector<1x2x32xf32>,
    %c10_i32 = arith.constant 10 : i32
    %c0_264 = arith.constant 0 : index
    %c0_265 = arith.constant 0 : index
    %643 = vector.load %arg11[%c0_264, %c0_265] : memref<2x64xf32, #tpu.memory_space<vmem>>, vector<2x64xf32>
    %cst_266 = arith.constant dense<0.000000e+00> : vector<2x256xf32>
    %644 = tpu.matmul %643, %12, %cst_266 {dimension_numbers = #tpu.dot_dimension_numbers<[1], [0], [0], [1], [0, 0, 1, 1], [], []>} : vector<2x64xf32>, vector<64x256xf32>, vector<2x256xf32> -> vector<2x256xf32>
    %645 = arith.index_cast %c10_i32 : i32 to index
    %c0_267 = arith.constant 0 : index
    %c0_268 = arith.constant 0 : index
    %646 = vector.load %arg8[%645, %c0_267, %c0_268] : memref<16x2x256xf32, #tpu.memory_space<vmem>>, vector<1x2x256xf32>
    %647 = vector.shape_cast %646 : vector<1x2x256xf32> to vector<2x256xf32>
    %c15_i32_269 = arith.constant 15 : i32
    %648 = arith.subi %c15_i32_269, %c10_i32 : i32
    %649 = arith.index_cast %648 : i32 to index
    %c0_270 = arith.constant 0 : index
    %c0_271 = arith.constant 0 : index
    %650 = vector.load %arg8[%649, %c0_270, %c0_271] : memref<16x2x256xf32, #tpu.memory_space<vmem>>, vector<1x2x256xf32>
    %651 = vector.shape_cast %650 : vector<1x2x256xf32> to vector<2x256xf32>
    %652 = vector.extract_strided_slice %644 {offsets = [0, 0], sizes = [2, 128], strides = [1, 1]} : vector<2x256xf32> to vector<2x128xf32>
    %653 = vector.extract_strided_slice %647 {offsets = [0, 0], sizes = [2, 128], strides = [1, 1]} : vector<2x256xf32> to vector<2x128xf32>
    %654 = arith.addf %652, %653 : vector<2x128xf32>
    %655 = vector.extract_strided_slice %644 {offsets = [0, 128], sizes = [2, 128], strides = [1, 1]} : vector<2x256xf32> to vector<2x128xf32>
    %656 = vector.extract_strided_slice %651 {offsets = [0, 128], sizes = [2, 128], strides = [1, 1]} : vector<2x256xf32> to vector<2x128xf32>
    %657 = arith.addf %655, %656 : vector<2x128xf32>
    %c0_272 = arith.constant 0 : index
    %c0_273 = arith.constant 0 : index
    %658 = vector.load %arg12[%c0_272, %c0_273] : memref<2x64xf32, #tpu.memory_space<vmem>>, vector<2x64xf32>
    %659 = vector.extract_strided_slice %658 {offsets = [0, 0], sizes = [2, 32], strides = [1, 1]} : vector<2x64xf32> to vector<2x32xf32>
    %660 = vector.extract_strided_slice %654 {offsets = [0, 0], sizes = [2, 96], strides = [1, 1]} : vector<2x128xf32> to vector<2x96xf32>
    %661 = arith.negf %660 : vector<2x96xf32>
    %662 = math.exp %661 : vector<2x96xf32>
    %cst_274 = arith.constant 1.000000e+00 : f32
    %663 = vector.broadcast %cst_274 : f32 to vector<2x96xf32>
    %664 = arith.addf %663, %662 : vector<2x96xf32>
    %665 = arith.divf %663, %664 : vector<2x96xf32>
    %666 = vector.extract_strided_slice %654 {offsets = [0, 96], sizes = [2, 32], strides = [1, 1]} : vector<2x128xf32> to vector<2x32xf32>
    %667 = math.tanh %666 : vector<2x32xf32>
    %668 = vector.extract_strided_slice %665 {offsets = [0, 0], sizes = [2, 32], strides = [1, 1]} : vector<2x96xf32> to vector<2x32xf32>
    %669 = vector.extract_strided_slice %665 {offsets = [0, 32], sizes = [2, 32], strides = [1, 1]} : vector<2x96xf32> to vector<2x32xf32>
    %670 = vector.extract_strided_slice %665 {offsets = [0, 64], sizes = [2, 32], strides = [1, 1]} : vector<2x96xf32> to vector<2x32xf32>
    %671 = arith.mulf %669, %659 : vector<2x32xf32>
    %672 = arith.mulf %668, %667 : vector<2x32xf32>
    %673 = arith.addf %671, %672 : vector<2x32xf32>
    %674 = math.tanh %673 : vector<2x32xf32>
    %675 = arith.mulf %670, %674 : vector<2x32xf32>
    %676 = vector.extract_strided_slice %658 {offsets = [0, 32], sizes = [2, 32], strides = [1, 1]} : vector<2x64xf32> to vector<2x32xf32>
    %677 = vector.extract_strided_slice %657 {offsets = [0, 0], sizes = [2, 96], strides = [1, 1]} : vector<2x128xf32> to vector<2x96xf32>
    %678 = arith.negf %677 : vector<2x96xf32>
    %679 = math.exp %678 : vector<2x96xf32>
    %cst_275 = arith.constant 1.000000e+00 : f32
    %680 = vector.broadcast %cst_275 : f32 to vector<2x96xf32>
    %681 = arith.addf %680, %679 : vector<2x96xf32>
    %682 = arith.divf %680, %681 : vector<2x96xf32>
    %683 = vector.extract_strided_slice %657 {offsets = [0, 96], sizes = [2, 32], strides = [1, 1]} : vector<2x128xf32> to vector<2x32xf32>
    %684 = math.tanh %683 : vector<2x32xf32>
    %685 = vector.extract_strided_slice %682 {offsets = [0, 0], sizes = [2, 32], strides = [1, 1]} : vector<2x96xf32> to vector<2x32xf32>
    %686 = vector.extract_strided_slice %682 {offsets = [0, 32], sizes = [2, 32], strides = [1, 1]} : vector<2x96xf32> to vector<2x32xf32>
    %687 = vector.extract_strided_slice %682 {offsets = [0, 64], sizes = [2, 32], strides = [1, 1]} : vector<2x96xf32> to vector<2x32xf32>
    %688 = arith.mulf %686, %676 : vector<2x32xf32>
    %689 = arith.mulf %685, %684 : vector<2x32xf32>
    %690 = arith.addf %688, %689 : vector<2x32xf32>
    %691 = math.tanh %690 : vector<2x32xf32>
    %692 = arith.mulf %687, %691 : vector<2x32xf32>
    %c0_276 = arith.constant 0 : index
    %c0_277 = arith.constant 0 : index
    %693 = vector.load %arg11[%c0_276, %c0_277] : memref<2x64xf32, #tpu.memory_space<vmem>>, vector<2x32xf32>
    tpu.vector_store %arg11[%c0_276, %c0_277], %675 {strides = array<i32>} : memref<2x64xf32, #tpu.memory_space<vmem>>, vector<2x32xf32>,
    %c0_278 = arith.constant 0 : index
    %c32_279 = arith.constant 32 : index
    %694 = vector.load %arg11[%c0_278, %c32_279] : memref<2x64xf32, #tpu.memory_space<vmem>>, vector<2x32xf32>
    tpu.vector_store %arg11[%c0_278, %c32_279], %692 {strides = array<i32>} : memref<2x64xf32, #tpu.memory_space<vmem>>, vector<2x32xf32>,
    %c0_280 = arith.constant 0 : index
    %c0_281 = arith.constant 0 : index
    %695 = vector.load %arg12[%c0_280, %c0_281] : memref<2x64xf32, #tpu.memory_space<vmem>>, vector<2x32xf32>
    tpu.vector_store %arg12[%c0_280, %c0_281], %673 {strides = array<i32>} : memref<2x64xf32, #tpu.memory_space<vmem>>, vector<2x32xf32>,
    %c0_282 = arith.constant 0 : index
    %c32_283 = arith.constant 32 : index
    %696 = vector.load %arg12[%c0_282, %c32_283] : memref<2x64xf32, #tpu.memory_space<vmem>>, vector<2x32xf32>
    tpu.vector_store %arg12[%c0_282, %c32_283], %690 {strides = array<i32>} : memref<2x64xf32, #tpu.memory_space<vmem>>, vector<2x32xf32>,
    %697 = arith.index_cast %c10_i32 : i32 to index
    %c0_284 = arith.constant 0 : index
    %c0_285 = arith.constant 0 : index
    %698 = vector.load %arg9[%697, %c0_284, %c0_285] : memref<16x2x32xf32, #tpu.memory_space<vmem>>, vector<1x2x32xf32>
    %699 = vector.shape_cast %698 : vector<1x2x32xf32> to vector<2x32xf32>
    %700 = vector.shape_cast %675 : vector<2x32xf32> to vector<1x2x32xf32>
    tpu.vector_store %arg9[%697, %c0_284, %c0_285], %700 {strides = array<i32>} : memref<16x2x32xf32, #tpu.memory_space<vmem>>, vector<1x2x32xf32>,
    %c15_i32_286 = arith.constant 15 : i32
    %701 = arith.subi %c15_i32_286, %c10_i32 : i32
    %702 = arith.index_cast %701 : i32 to index
    %c0_287 = arith.constant 0 : index
    %c0_288 = arith.constant 0 : index
    %703 = vector.load %arg10[%702, %c0_287, %c0_288] : memref<16x2x32xf32, #tpu.memory_space<vmem>>, vector<1x2x32xf32>
    %704 = vector.shape_cast %703 : vector<1x2x32xf32> to vector<2x32xf32>
    %705 = vector.shape_cast %692 : vector<2x32xf32> to vector<1x2x32xf32>
    tpu.vector_store %arg10[%702, %c0_287, %c0_288], %705 {strides = array<i32>} : memref<16x2x32xf32, #tpu.memory_space<vmem>>, vector<1x2x32xf32>,
    %c11_i32 = arith.constant 11 : i32
    %c0_289 = arith.constant 0 : index
    %c0_290 = arith.constant 0 : index
    %706 = vector.load %arg11[%c0_289, %c0_290] : memref<2x64xf32, #tpu.memory_space<vmem>>, vector<2x64xf32>
    %cst_291 = arith.constant dense<0.000000e+00> : vector<2x256xf32>
    %707 = tpu.matmul %706, %12, %cst_291 {dimension_numbers = #tpu.dot_dimension_numbers<[1], [0], [0], [1], [0, 0, 1, 1], [], []>} : vector<2x64xf32>, vector<64x256xf32>, vector<2x256xf32> -> vector<2x256xf32>
    %708 = arith.index_cast %c11_i32 : i32 to index
    %c0_292 = arith.constant 0 : index
    %c0_293 = arith.constant 0 : index
    %709 = vector.load %arg8[%708, %c0_292, %c0_293] : memref<16x2x256xf32, #tpu.memory_space<vmem>>, vector<1x2x256xf32>
    %710 = vector.shape_cast %709 : vector<1x2x256xf32> to vector<2x256xf32>
    %c15_i32_294 = arith.constant 15 : i32
    %711 = arith.subi %c15_i32_294, %c11_i32 : i32
    %712 = arith.index_cast %711 : i32 to index
    %c0_295 = arith.constant 0 : index
    %c0_296 = arith.constant 0 : index
    %713 = vector.load %arg8[%712, %c0_295, %c0_296] : memref<16x2x256xf32, #tpu.memory_space<vmem>>, vector<1x2x256xf32>
    %714 = vector.shape_cast %713 : vector<1x2x256xf32> to vector<2x256xf32>
    %715 = vector.extract_strided_slice %707 {offsets = [0, 0], sizes = [2, 128], strides = [1, 1]} : vector<2x256xf32> to vector<2x128xf32>
    %716 = vector.extract_strided_slice %710 {offsets = [0, 0], sizes = [2, 128], strides = [1, 1]} : vector<2x256xf32> to vector<2x128xf32>
    %717 = arith.addf %715, %716 : vector<2x128xf32>
    %718 = vector.extract_strided_slice %707 {offsets = [0, 128], sizes = [2, 128], strides = [1, 1]} : vector<2x256xf32> to vector<2x128xf32>
    %719 = vector.extract_strided_slice %714 {offsets = [0, 128], sizes = [2, 128], strides = [1, 1]} : vector<2x256xf32> to vector<2x128xf32>
    %720 = arith.addf %718, %719 : vector<2x128xf32>
    %c0_297 = arith.constant 0 : index
    %c0_298 = arith.constant 0 : index
    %721 = vector.load %arg12[%c0_297, %c0_298] : memref<2x64xf32, #tpu.memory_space<vmem>>, vector<2x64xf32>
    %722 = vector.extract_strided_slice %721 {offsets = [0, 0], sizes = [2, 32], strides = [1, 1]} : vector<2x64xf32> to vector<2x32xf32>
    %723 = vector.extract_strided_slice %717 {offsets = [0, 0], sizes = [2, 96], strides = [1, 1]} : vector<2x128xf32> to vector<2x96xf32>
    %724 = arith.negf %723 : vector<2x96xf32>
    %725 = math.exp %724 : vector<2x96xf32>
    %cst_299 = arith.constant 1.000000e+00 : f32
    %726 = vector.broadcast %cst_299 : f32 to vector<2x96xf32>
    %727 = arith.addf %726, %725 : vector<2x96xf32>
    %728 = arith.divf %726, %727 : vector<2x96xf32>
    %729 = vector.extract_strided_slice %717 {offsets = [0, 96], sizes = [2, 32], strides = [1, 1]} : vector<2x128xf32> to vector<2x32xf32>
    %730 = math.tanh %729 : vector<2x32xf32>
    %731 = vector.extract_strided_slice %728 {offsets = [0, 0], sizes = [2, 32], strides = [1, 1]} : vector<2x96xf32> to vector<2x32xf32>
    %732 = vector.extract_strided_slice %728 {offsets = [0, 32], sizes = [2, 32], strides = [1, 1]} : vector<2x96xf32> to vector<2x32xf32>
    %733 = vector.extract_strided_slice %728 {offsets = [0, 64], sizes = [2, 32], strides = [1, 1]} : vector<2x96xf32> to vector<2x32xf32>
    %734 = arith.mulf %732, %722 : vector<2x32xf32>
    %735 = arith.mulf %731, %730 : vector<2x32xf32>
    %736 = arith.addf %734, %735 : vector<2x32xf32>
    %737 = math.tanh %736 : vector<2x32xf32>
    %738 = arith.mulf %733, %737 : vector<2x32xf32>
    %739 = vector.extract_strided_slice %721 {offsets = [0, 32], sizes = [2, 32], strides = [1, 1]} : vector<2x64xf32> to vector<2x32xf32>
    %740 = vector.extract_strided_slice %720 {offsets = [0, 0], sizes = [2, 96], strides = [1, 1]} : vector<2x128xf32> to vector<2x96xf32>
    %741 = arith.negf %740 : vector<2x96xf32>
    %742 = math.exp %741 : vector<2x96xf32>
    %cst_300 = arith.constant 1.000000e+00 : f32
    %743 = vector.broadcast %cst_300 : f32 to vector<2x96xf32>
    %744 = arith.addf %743, %742 : vector<2x96xf32>
    %745 = arith.divf %743, %744 : vector<2x96xf32>
    %746 = vector.extract_strided_slice %720 {offsets = [0, 96], sizes = [2, 32], strides = [1, 1]} : vector<2x128xf32> to vector<2x32xf32>
    %747 = math.tanh %746 : vector<2x32xf32>
    %748 = vector.extract_strided_slice %745 {offsets = [0, 0], sizes = [2, 32], strides = [1, 1]} : vector<2x96xf32> to vector<2x32xf32>
    %749 = vector.extract_strided_slice %745 {offsets = [0, 32], sizes = [2, 32], strides = [1, 1]} : vector<2x96xf32> to vector<2x32xf32>
    %750 = vector.extract_strided_slice %745 {offsets = [0, 64], sizes = [2, 32], strides = [1, 1]} : vector<2x96xf32> to vector<2x32xf32>
    %751 = arith.mulf %749, %739 : vector<2x32xf32>
    %752 = arith.mulf %748, %747 : vector<2x32xf32>
    %753 = arith.addf %751, %752 : vector<2x32xf32>
    %754 = math.tanh %753 : vector<2x32xf32>
    %755 = arith.mulf %750, %754 : vector<2x32xf32>
    %c0_301 = arith.constant 0 : index
    %c0_302 = arith.constant 0 : index
    %756 = vector.load %arg11[%c0_301, %c0_302] : memref<2x64xf32, #tpu.memory_space<vmem>>, vector<2x32xf32>
    tpu.vector_store %arg11[%c0_301, %c0_302], %738 {strides = array<i32>} : memref<2x64xf32, #tpu.memory_space<vmem>>, vector<2x32xf32>,
    %c0_303 = arith.constant 0 : index
    %c32_304 = arith.constant 32 : index
    %757 = vector.load %arg11[%c0_303, %c32_304] : memref<2x64xf32, #tpu.memory_space<vmem>>, vector<2x32xf32>
    tpu.vector_store %arg11[%c0_303, %c32_304], %755 {strides = array<i32>} : memref<2x64xf32, #tpu.memory_space<vmem>>, vector<2x32xf32>,
    %c0_305 = arith.constant 0 : index
    %c0_306 = arith.constant 0 : index
    %758 = vector.load %arg12[%c0_305, %c0_306] : memref<2x64xf32, #tpu.memory_space<vmem>>, vector<2x32xf32>
    tpu.vector_store %arg12[%c0_305, %c0_306], %736 {strides = array<i32>} : memref<2x64xf32, #tpu.memory_space<vmem>>, vector<2x32xf32>,
    %c0_307 = arith.constant 0 : index
    %c32_308 = arith.constant 32 : index
    %759 = vector.load %arg12[%c0_307, %c32_308] : memref<2x64xf32, #tpu.memory_space<vmem>>, vector<2x32xf32>
    tpu.vector_store %arg12[%c0_307, %c32_308], %753 {strides = array<i32>} : memref<2x64xf32, #tpu.memory_space<vmem>>, vector<2x32xf32>,
    %760 = arith.index_cast %c11_i32 : i32 to index
    %c0_309 = arith.constant 0 : index
    %c0_310 = arith.constant 0 : index
    %761 = vector.load %arg9[%760, %c0_309, %c0_310] : memref<16x2x32xf32, #tpu.memory_space<vmem>>, vector<1x2x32xf32>
    %762 = vector.shape_cast %761 : vector<1x2x32xf32> to vector<2x32xf32>
    %763 = vector.shape_cast %738 : vector<2x32xf32> to vector<1x2x32xf32>
    tpu.vector_store %arg9[%760, %c0_309, %c0_310], %763 {strides = array<i32>} : memref<16x2x32xf32, #tpu.memory_space<vmem>>, vector<1x2x32xf32>,
    %c15_i32_311 = arith.constant 15 : i32
    %764 = arith.subi %c15_i32_311, %c11_i32 : i32
    %765 = arith.index_cast %764 : i32 to index
    %c0_312 = arith.constant 0 : index
    %c0_313 = arith.constant 0 : index
    %766 = vector.load %arg10[%765, %c0_312, %c0_313] : memref<16x2x32xf32, #tpu.memory_space<vmem>>, vector<1x2x32xf32>
    %767 = vector.shape_cast %766 : vector<1x2x32xf32> to vector<2x32xf32>
    %768 = vector.shape_cast %755 : vector<2x32xf32> to vector<1x2x32xf32>
    tpu.vector_store %arg10[%765, %c0_312, %c0_313], %768 {strides = array<i32>} : memref<16x2x32xf32, #tpu.memory_space<vmem>>, vector<1x2x32xf32>,
    %c12_i32 = arith.constant 12 : i32
    %c0_314 = arith.constant 0 : index
    %c0_315 = arith.constant 0 : index
    %769 = vector.load %arg11[%c0_314, %c0_315] : memref<2x64xf32, #tpu.memory_space<vmem>>, vector<2x64xf32>
    %cst_316 = arith.constant dense<0.000000e+00> : vector<2x256xf32>
    %770 = tpu.matmul %769, %12, %cst_316 {dimension_numbers = #tpu.dot_dimension_numbers<[1], [0], [0], [1], [0, 0, 1, 1], [], []>} : vector<2x64xf32>, vector<64x256xf32>, vector<2x256xf32> -> vector<2x256xf32>
    %771 = arith.index_cast %c12_i32 : i32 to index
    %c0_317 = arith.constant 0 : index
    %c0_318 = arith.constant 0 : index
    %772 = vector.load %arg8[%771, %c0_317, %c0_318] : memref<16x2x256xf32, #tpu.memory_space<vmem>>, vector<1x2x256xf32>
    %773 = vector.shape_cast %772 : vector<1x2x256xf32> to vector<2x256xf32>
    %c15_i32_319 = arith.constant 15 : i32
    %774 = arith.subi %c15_i32_319, %c12_i32 : i32
    %775 = arith.index_cast %774 : i32 to index
    %c0_320 = arith.constant 0 : index
    %c0_321 = arith.constant 0 : index
    %776 = vector.load %arg8[%775, %c0_320, %c0_321] : memref<16x2x256xf32, #tpu.memory_space<vmem>>, vector<1x2x256xf32>
    %777 = vector.shape_cast %776 : vector<1x2x256xf32> to vector<2x256xf32>
    %778 = vector.extract_strided_slice %770 {offsets = [0, 0], sizes = [2, 128], strides = [1, 1]} : vector<2x256xf32> to vector<2x128xf32>
    %779 = vector.extract_strided_slice %773 {offsets = [0, 0], sizes = [2, 128], strides = [1, 1]} : vector<2x256xf32> to vector<2x128xf32>
    %780 = arith.addf %778, %779 : vector<2x128xf32>
    %781 = vector.extract_strided_slice %770 {offsets = [0, 128], sizes = [2, 128], strides = [1, 1]} : vector<2x256xf32> to vector<2x128xf32>
    %782 = vector.extract_strided_slice %777 {offsets = [0, 128], sizes = [2, 128], strides = [1, 1]} : vector<2x256xf32> to vector<2x128xf32>
    %783 = arith.addf %781, %782 : vector<2x128xf32>
    %c0_322 = arith.constant 0 : index
    %c0_323 = arith.constant 0 : index
    %784 = vector.load %arg12[%c0_322, %c0_323] : memref<2x64xf32, #tpu.memory_space<vmem>>, vector<2x64xf32>
    %785 = vector.extract_strided_slice %784 {offsets = [0, 0], sizes = [2, 32], strides = [1, 1]} : vector<2x64xf32> to vector<2x32xf32>
    %786 = vector.extract_strided_slice %780 {offsets = [0, 0], sizes = [2, 96], strides = [1, 1]} : vector<2x128xf32> to vector<2x96xf32>
    %787 = arith.negf %786 : vector<2x96xf32>
    %788 = math.exp %787 : vector<2x96xf32>
    %cst_324 = arith.constant 1.000000e+00 : f32
    %789 = vector.broadcast %cst_324 : f32 to vector<2x96xf32>
    %790 = arith.addf %789, %788 : vector<2x96xf32>
    %791 = arith.divf %789, %790 : vector<2x96xf32>
    %792 = vector.extract_strided_slice %780 {offsets = [0, 96], sizes = [2, 32], strides = [1, 1]} : vector<2x128xf32> to vector<2x32xf32>
    %793 = math.tanh %792 : vector<2x32xf32>
    %794 = vector.extract_strided_slice %791 {offsets = [0, 0], sizes = [2, 32], strides = [1, 1]} : vector<2x96xf32> to vector<2x32xf32>
    %795 = vector.extract_strided_slice %791 {offsets = [0, 32], sizes = [2, 32], strides = [1, 1]} : vector<2x96xf32> to vector<2x32xf32>
    %796 = vector.extract_strided_slice %791 {offsets = [0, 64], sizes = [2, 32], strides = [1, 1]} : vector<2x96xf32> to vector<2x32xf32>
    %797 = arith.mulf %795, %785 : vector<2x32xf32>
    %798 = arith.mulf %794, %793 : vector<2x32xf32>
    %799 = arith.addf %797, %798 : vector<2x32xf32>
    %800 = math.tanh %799 : vector<2x32xf32>
    %801 = arith.mulf %796, %800 : vector<2x32xf32>
    %802 = vector.extract_strided_slice %784 {offsets = [0, 32], sizes = [2, 32], strides = [1, 1]} : vector<2x64xf32> to vector<2x32xf32>
    %803 = vector.extract_strided_slice %783 {offsets = [0, 0], sizes = [2, 96], strides = [1, 1]} : vector<2x128xf32> to vector<2x96xf32>
    %804 = arith.negf %803 : vector<2x96xf32>
    %805 = math.exp %804 : vector<2x96xf32>
    %cst_325 = arith.constant 1.000000e+00 : f32
    %806 = vector.broadcast %cst_325 : f32 to vector<2x96xf32>
    %807 = arith.addf %806, %805 : vector<2x96xf32>
    %808 = arith.divf %806, %807 : vector<2x96xf32>
    %809 = vector.extract_strided_slice %783 {offsets = [0, 96], sizes = [2, 32], strides = [1, 1]} : vector<2x128xf32> to vector<2x32xf32>
    %810 = math.tanh %809 : vector<2x32xf32>
    %811 = vector.extract_strided_slice %808 {offsets = [0, 0], sizes = [2, 32], strides = [1, 1]} : vector<2x96xf32> to vector<2x32xf32>
    %812 = vector.extract_strided_slice %808 {offsets = [0, 32], sizes = [2, 32], strides = [1, 1]} : vector<2x96xf32> to vector<2x32xf32>
    %813 = vector.extract_strided_slice %808 {offsets = [0, 64], sizes = [2, 32], strides = [1, 1]} : vector<2x96xf32> to vector<2x32xf32>
    %814 = arith.mulf %812, %802 : vector<2x32xf32>
    %815 = arith.mulf %811, %810 : vector<2x32xf32>
    %816 = arith.addf %814, %815 : vector<2x32xf32>
    %817 = math.tanh %816 : vector<2x32xf32>
    %818 = arith.mulf %813, %817 : vector<2x32xf32>
    %c0_326 = arith.constant 0 : index
    %c0_327 = arith.constant 0 : index
    %819 = vector.load %arg11[%c0_326, %c0_327] : memref<2x64xf32, #tpu.memory_space<vmem>>, vector<2x32xf32>
    tpu.vector_store %arg11[%c0_326, %c0_327], %801 {strides = array<i32>} : memref<2x64xf32, #tpu.memory_space<vmem>>, vector<2x32xf32>,
    %c0_328 = arith.constant 0 : index
    %c32_329 = arith.constant 32 : index
    %820 = vector.load %arg11[%c0_328, %c32_329] : memref<2x64xf32, #tpu.memory_space<vmem>>, vector<2x32xf32>
    tpu.vector_store %arg11[%c0_328, %c32_329], %818 {strides = array<i32>} : memref<2x64xf32, #tpu.memory_space<vmem>>, vector<2x32xf32>,
    %c0_330 = arith.constant 0 : index
    %c0_331 = arith.constant 0 : index
    %821 = vector.load %arg12[%c0_330, %c0_331] : memref<2x64xf32, #tpu.memory_space<vmem>>, vector<2x32xf32>
    tpu.vector_store %arg12[%c0_330, %c0_331], %799 {strides = array<i32>} : memref<2x64xf32, #tpu.memory_space<vmem>>, vector<2x32xf32>,
    %c0_332 = arith.constant 0 : index
    %c32_333 = arith.constant 32 : index
    %822 = vector.load %arg12[%c0_332, %c32_333] : memref<2x64xf32, #tpu.memory_space<vmem>>, vector<2x32xf32>
    tpu.vector_store %arg12[%c0_332, %c32_333], %816 {strides = array<i32>} : memref<2x64xf32, #tpu.memory_space<vmem>>, vector<2x32xf32>,
    %823 = arith.index_cast %c12_i32 : i32 to index
    %c0_334 = arith.constant 0 : index
    %c0_335 = arith.constant 0 : index
    %824 = vector.load %arg9[%823, %c0_334, %c0_335] : memref<16x2x32xf32, #tpu.memory_space<vmem>>, vector<1x2x32xf32>
    %825 = vector.shape_cast %824 : vector<1x2x32xf32> to vector<2x32xf32>
    %826 = vector.shape_cast %801 : vector<2x32xf32> to vector<1x2x32xf32>
    tpu.vector_store %arg9[%823, %c0_334, %c0_335], %826 {strides = array<i32>} : memref<16x2x32xf32, #tpu.memory_space<vmem>>, vector<1x2x32xf32>,
    %c15_i32_336 = arith.constant 15 : i32
    %827 = arith.subi %c15_i32_336, %c12_i32 : i32
    %828 = arith.index_cast %827 : i32 to index
    %c0_337 = arith.constant 0 : index
    %c0_338 = arith.constant 0 : index
    %829 = vector.load %arg10[%828, %c0_337, %c0_338] : memref<16x2x32xf32, #tpu.memory_space<vmem>>, vector<1x2x32xf32>
    %830 = vector.shape_cast %829 : vector<1x2x32xf32> to vector<2x32xf32>
    %831 = vector.shape_cast %818 : vector<2x32xf32> to vector<1x2x32xf32>
    tpu.vector_store %arg10[%828, %c0_337, %c0_338], %831 {strides = array<i32>} : memref<16x2x32xf32, #tpu.memory_space<vmem>>, vector<1x2x32xf32>,
    %c13_i32 = arith.constant 13 : i32
    %c0_339 = arith.constant 0 : index
    %c0_340 = arith.constant 0 : index
    %832 = vector.load %arg11[%c0_339, %c0_340] : memref<2x64xf32, #tpu.memory_space<vmem>>, vector<2x64xf32>
    %cst_341 = arith.constant dense<0.000000e+00> : vector<2x256xf32>
    %833 = tpu.matmul %832, %12, %cst_341 {dimension_numbers = #tpu.dot_dimension_numbers<[1], [0], [0], [1], [0, 0, 1, 1], [], []>} : vector<2x64xf32>, vector<64x256xf32>, vector<2x256xf32> -> vector<2x256xf32>
    %834 = arith.index_cast %c13_i32 : i32 to index
    %c0_342 = arith.constant 0 : index
    %c0_343 = arith.constant 0 : index
    %835 = vector.load %arg8[%834, %c0_342, %c0_343] : memref<16x2x256xf32, #tpu.memory_space<vmem>>, vector<1x2x256xf32>
    %836 = vector.shape_cast %835 : vector<1x2x256xf32> to vector<2x256xf32>
    %c15_i32_344 = arith.constant 15 : i32
    %837 = arith.subi %c15_i32_344, %c13_i32 : i32
    %838 = arith.index_cast %837 : i32 to index
    %c0_345 = arith.constant 0 : index
    %c0_346 = arith.constant 0 : index
    %839 = vector.load %arg8[%838, %c0_345, %c0_346] : memref<16x2x256xf32, #tpu.memory_space<vmem>>, vector<1x2x256xf32>
    %840 = vector.shape_cast %839 : vector<1x2x256xf32> to vector<2x256xf32>
    %841 = vector.extract_strided_slice %833 {offsets = [0, 0], sizes = [2, 128], strides = [1, 1]} : vector<2x256xf32> to vector<2x128xf32>
    %842 = vector.extract_strided_slice %836 {offsets = [0, 0], sizes = [2, 128], strides = [1, 1]} : vector<2x256xf32> to vector<2x128xf32>
    %843 = arith.addf %841, %842 : vector<2x128xf32>
    %844 = vector.extract_strided_slice %833 {offsets = [0, 128], sizes = [2, 128], strides = [1, 1]} : vector<2x256xf32> to vector<2x128xf32>
    %845 = vector.extract_strided_slice %840 {offsets = [0, 128], sizes = [2, 128], strides = [1, 1]} : vector<2x256xf32> to vector<2x128xf32>
    %846 = arith.addf %844, %845 : vector<2x128xf32>
    %c0_347 = arith.constant 0 : index
    %c0_348 = arith.constant 0 : index
    %847 = vector.load %arg12[%c0_347, %c0_348] : memref<2x64xf32, #tpu.memory_space<vmem>>, vector<2x64xf32>
    %848 = vector.extract_strided_slice %847 {offsets = [0, 0], sizes = [2, 32], strides = [1, 1]} : vector<2x64xf32> to vector<2x32xf32>
    %849 = vector.extract_strided_slice %843 {offsets = [0, 0], sizes = [2, 96], strides = [1, 1]} : vector<2x128xf32> to vector<2x96xf32>
    %850 = arith.negf %849 : vector<2x96xf32>
    %851 = math.exp %850 : vector<2x96xf32>
    %cst_349 = arith.constant 1.000000e+00 : f32
    %852 = vector.broadcast %cst_349 : f32 to vector<2x96xf32>
    %853 = arith.addf %852, %851 : vector<2x96xf32>
    %854 = arith.divf %852, %853 : vector<2x96xf32>
    %855 = vector.extract_strided_slice %843 {offsets = [0, 96], sizes = [2, 32], strides = [1, 1]} : vector<2x128xf32> to vector<2x32xf32>
    %856 = math.tanh %855 : vector<2x32xf32>
    %857 = vector.extract_strided_slice %854 {offsets = [0, 0], sizes = [2, 32], strides = [1, 1]} : vector<2x96xf32> to vector<2x32xf32>
    %858 = vector.extract_strided_slice %854 {offsets = [0, 32], sizes = [2, 32], strides = [1, 1]} : vector<2x96xf32> to vector<2x32xf32>
    %859 = vector.extract_strided_slice %854 {offsets = [0, 64], sizes = [2, 32], strides = [1, 1]} : vector<2x96xf32> to vector<2x32xf32>
    %860 = arith.mulf %858, %848 : vector<2x32xf32>
    %861 = arith.mulf %857, %856 : vector<2x32xf32>
    %862 = arith.addf %860, %861 : vector<2x32xf32>
    %863 = math.tanh %862 : vector<2x32xf32>
    %864 = arith.mulf %859, %863 : vector<2x32xf32>
    %865 = vector.extract_strided_slice %847 {offsets = [0, 32], sizes = [2, 32], strides = [1, 1]} : vector<2x64xf32> to vector<2x32xf32>
    %866 = vector.extract_strided_slice %846 {offsets = [0, 0], sizes = [2, 96], strides = [1, 1]} : vector<2x128xf32> to vector<2x96xf32>
    %867 = arith.negf %866 : vector<2x96xf32>
    %868 = math.exp %867 : vector<2x96xf32>
    %cst_350 = arith.constant 1.000000e+00 : f32
    %869 = vector.broadcast %cst_350 : f32 to vector<2x96xf32>
    %870 = arith.addf %869, %868 : vector<2x96xf32>
    %871 = arith.divf %869, %870 : vector<2x96xf32>
    %872 = vector.extract_strided_slice %846 {offsets = [0, 96], sizes = [2, 32], strides = [1, 1]} : vector<2x128xf32> to vector<2x32xf32>
    %873 = math.tanh %872 : vector<2x32xf32>
    %874 = vector.extract_strided_slice %871 {offsets = [0, 0], sizes = [2, 32], strides = [1, 1]} : vector<2x96xf32> to vector<2x32xf32>
    %875 = vector.extract_strided_slice %871 {offsets = [0, 32], sizes = [2, 32], strides = [1, 1]} : vector<2x96xf32> to vector<2x32xf32>
    %876 = vector.extract_strided_slice %871 {offsets = [0, 64], sizes = [2, 32], strides = [1, 1]} : vector<2x96xf32> to vector<2x32xf32>
    %877 = arith.mulf %875, %865 : vector<2x32xf32>
    %878 = arith.mulf %874, %873 : vector<2x32xf32>
    %879 = arith.addf %877, %878 : vector<2x32xf32>
    %880 = math.tanh %879 : vector<2x32xf32>
    %881 = arith.mulf %876, %880 : vector<2x32xf32>
    %c0_351 = arith.constant 0 : index
    %c0_352 = arith.constant 0 : index
    %882 = vector.load %arg11[%c0_351, %c0_352] : memref<2x64xf32, #tpu.memory_space<vmem>>, vector<2x32xf32>
    tpu.vector_store %arg11[%c0_351, %c0_352], %864 {strides = array<i32>} : memref<2x64xf32, #tpu.memory_space<vmem>>, vector<2x32xf32>,
    %c0_353 = arith.constant 0 : index
    %c32_354 = arith.constant 32 : index
    %883 = vector.load %arg11[%c0_353, %c32_354] : memref<2x64xf32, #tpu.memory_space<vmem>>, vector<2x32xf32>
    tpu.vector_store %arg11[%c0_353, %c32_354], %881 {strides = array<i32>} : memref<2x64xf32, #tpu.memory_space<vmem>>, vector<2x32xf32>,
    %c0_355 = arith.constant 0 : index
    %c0_356 = arith.constant 0 : index
    %884 = vector.load %arg12[%c0_355, %c0_356] : memref<2x64xf32, #tpu.memory_space<vmem>>, vector<2x32xf32>
    tpu.vector_store %arg12[%c0_355, %c0_356], %862 {strides = array<i32>} : memref<2x64xf32, #tpu.memory_space<vmem>>, vector<2x32xf32>,
    %c0_357 = arith.constant 0 : index
    %c32_358 = arith.constant 32 : index
    %885 = vector.load %arg12[%c0_357, %c32_358] : memref<2x64xf32, #tpu.memory_space<vmem>>, vector<2x32xf32>
    tpu.vector_store %arg12[%c0_357, %c32_358], %879 {strides = array<i32>} : memref<2x64xf32, #tpu.memory_space<vmem>>, vector<2x32xf32>,
    %886 = arith.index_cast %c13_i32 : i32 to index
    %c0_359 = arith.constant 0 : index
    %c0_360 = arith.constant 0 : index
    %887 = vector.load %arg9[%886, %c0_359, %c0_360] : memref<16x2x32xf32, #tpu.memory_space<vmem>>, vector<1x2x32xf32>
    %888 = vector.shape_cast %887 : vector<1x2x32xf32> to vector<2x32xf32>
    %889 = vector.shape_cast %864 : vector<2x32xf32> to vector<1x2x32xf32>
    tpu.vector_store %arg9[%886, %c0_359, %c0_360], %889 {strides = array<i32>} : memref<16x2x32xf32, #tpu.memory_space<vmem>>, vector<1x2x32xf32>,
    %c15_i32_361 = arith.constant 15 : i32
    %890 = arith.subi %c15_i32_361, %c13_i32 : i32
    %891 = arith.index_cast %890 : i32 to index
    %c0_362 = arith.constant 0 : index
    %c0_363 = arith.constant 0 : index
    %892 = vector.load %arg10[%891, %c0_362, %c0_363] : memref<16x2x32xf32, #tpu.memory_space<vmem>>, vector<1x2x32xf32>
    %893 = vector.shape_cast %892 : vector<1x2x32xf32> to vector<2x32xf32>
    %894 = vector.shape_cast %881 : vector<2x32xf32> to vector<1x2x32xf32>
    tpu.vector_store %arg10[%891, %c0_362, %c0_363], %894 {strides = array<i32>} : memref<16x2x32xf32, #tpu.memory_space<vmem>>, vector<1x2x32xf32>,
    %c14_i32 = arith.constant 14 : i32
    %c0_364 = arith.constant 0 : index
    %c0_365 = arith.constant 0 : index
    %895 = vector.load %arg11[%c0_364, %c0_365] : memref<2x64xf32, #tpu.memory_space<vmem>>, vector<2x64xf32>
    %cst_366 = arith.constant dense<0.000000e+00> : vector<2x256xf32>
    %896 = tpu.matmul %895, %12, %cst_366 {dimension_numbers = #tpu.dot_dimension_numbers<[1], [0], [0], [1], [0, 0, 1, 1], [], []>} : vector<2x64xf32>, vector<64x256xf32>, vector<2x256xf32> -> vector<2x256xf32>
    %897 = arith.index_cast %c14_i32 : i32 to index
    %c0_367 = arith.constant 0 : index
    %c0_368 = arith.constant 0 : index
    %898 = vector.load %arg8[%897, %c0_367, %c0_368] : memref<16x2x256xf32, #tpu.memory_space<vmem>>, vector<1x2x256xf32>
    %899 = vector.shape_cast %898 : vector<1x2x256xf32> to vector<2x256xf32>
    %c15_i32_369 = arith.constant 15 : i32
    %900 = arith.subi %c15_i32_369, %c14_i32 : i32
    %901 = arith.index_cast %900 : i32 to index
    %c0_370 = arith.constant 0 : index
    %c0_371 = arith.constant 0 : index
    %902 = vector.load %arg8[%901, %c0_370, %c0_371] : memref<16x2x256xf32, #tpu.memory_space<vmem>>, vector<1x2x256xf32>
    %903 = vector.shape_cast %902 : vector<1x2x256xf32> to vector<2x256xf32>
    %904 = vector.extract_strided_slice %896 {offsets = [0, 0], sizes = [2, 128], strides = [1, 1]} : vector<2x256xf32> to vector<2x128xf32>
    %905 = vector.extract_strided_slice %899 {offsets = [0, 0], sizes = [2, 128], strides = [1, 1]} : vector<2x256xf32> to vector<2x128xf32>
    %906 = arith.addf %904, %905 : vector<2x128xf32>
    %907 = vector.extract_strided_slice %896 {offsets = [0, 128], sizes = [2, 128], strides = [1, 1]} : vector<2x256xf32> to vector<2x128xf32>
    %908 = vector.extract_strided_slice %903 {offsets = [0, 128], sizes = [2, 128], strides = [1, 1]} : vector<2x256xf32> to vector<2x128xf32>
    %909 = arith.addf %907, %908 : vector<2x128xf32>
    %c0_372 = arith.constant 0 : index
    %c0_373 = arith.constant 0 : index
    %910 = vector.load %arg12[%c0_372, %c0_373] : memref<2x64xf32, #tpu.memory_space<vmem>>, vector<2x64xf32>
    %911 = vector.extract_strided_slice %910 {offsets = [0, 0], sizes = [2, 32], strides = [1, 1]} : vector<2x64xf32> to vector<2x32xf32>
    %912 = vector.extract_strided_slice %906 {offsets = [0, 0], sizes = [2, 96], strides = [1, 1]} : vector<2x128xf32> to vector<2x96xf32>
    %913 = arith.negf %912 : vector<2x96xf32>
    %914 = math.exp %913 : vector<2x96xf32>
    %cst_374 = arith.constant 1.000000e+00 : f32
    %915 = vector.broadcast %cst_374 : f32 to vector<2x96xf32>
    %916 = arith.addf %915, %914 : vector<2x96xf32>
    %917 = arith.divf %915, %916 : vector<2x96xf32>
    %918 = vector.extract_strided_slice %906 {offsets = [0, 96], sizes = [2, 32], strides = [1, 1]} : vector<2x128xf32> to vector<2x32xf32>
    %919 = math.tanh %918 : vector<2x32xf32>
    %920 = vector.extract_strided_slice %917 {offsets = [0, 0], sizes = [2, 32], strides = [1, 1]} : vector<2x96xf32> to vector<2x32xf32>
    %921 = vector.extract_strided_slice %917 {offsets = [0, 32], sizes = [2, 32], strides = [1, 1]} : vector<2x96xf32> to vector<2x32xf32>
    %922 = vector.extract_strided_slice %917 {offsets = [0, 64], sizes = [2, 32], strides = [1, 1]} : vector<2x96xf32> to vector<2x32xf32>
    %923 = arith.mulf %921, %911 : vector<2x32xf32>
    %924 = arith.mulf %920, %919 : vector<2x32xf32>
    %925 = arith.addf %923, %924 : vector<2x32xf32>
    %926 = math.tanh %925 : vector<2x32xf32>
    %927 = arith.mulf %922, %926 : vector<2x32xf32>
    %928 = vector.extract_strided_slice %910 {offsets = [0, 32], sizes = [2, 32], strides = [1, 1]} : vector<2x64xf32> to vector<2x32xf32>
    %929 = vector.extract_strided_slice %909 {offsets = [0, 0], sizes = [2, 96], strides = [1, 1]} : vector<2x128xf32> to vector<2x96xf32>
    %930 = arith.negf %929 : vector<2x96xf32>
    %931 = math.exp %930 : vector<2x96xf32>
    %cst_375 = arith.constant 1.000000e+00 : f32
    %932 = vector.broadcast %cst_375 : f32 to vector<2x96xf32>
    %933 = arith.addf %932, %931 : vector<2x96xf32>
    %934 = arith.divf %932, %933 : vector<2x96xf32>
    %935 = vector.extract_strided_slice %909 {offsets = [0, 96], sizes = [2, 32], strides = [1, 1]} : vector<2x128xf32> to vector<2x32xf32>
    %936 = math.tanh %935 : vector<2x32xf32>
    %937 = vector.extract_strided_slice %934 {offsets = [0, 0], sizes = [2, 32], strides = [1, 1]} : vector<2x96xf32> to vector<2x32xf32>
    %938 = vector.extract_strided_slice %934 {offsets = [0, 32], sizes = [2, 32], strides = [1, 1]} : vector<2x96xf32> to vector<2x32xf32>
    %939 = vector.extract_strided_slice %934 {offsets = [0, 64], sizes = [2, 32], strides = [1, 1]} : vector<2x96xf32> to vector<2x32xf32>
    %940 = arith.mulf %938, %928 : vector<2x32xf32>
    %941 = arith.mulf %937, %936 : vector<2x32xf32>
    %942 = arith.addf %940, %941 : vector<2x32xf32>
    %943 = math.tanh %942 : vector<2x32xf32>
    %944 = arith.mulf %939, %943 : vector<2x32xf32>
    %c0_376 = arith.constant 0 : index
    %c0_377 = arith.constant 0 : index
    %945 = vector.load %arg11[%c0_376, %c0_377] : memref<2x64xf32, #tpu.memory_space<vmem>>, vector<2x32xf32>
    tpu.vector_store %arg11[%c0_376, %c0_377], %927 {strides = array<i32>} : memref<2x64xf32, #tpu.memory_space<vmem>>, vector<2x32xf32>,
    %c0_378 = arith.constant 0 : index
    %c32_379 = arith.constant 32 : index
    %946 = vector.load %arg11[%c0_378, %c32_379] : memref<2x64xf32, #tpu.memory_space<vmem>>, vector<2x32xf32>
    tpu.vector_store %arg11[%c0_378, %c32_379], %944 {strides = array<i32>} : memref<2x64xf32, #tpu.memory_space<vmem>>, vector<2x32xf32>,
    %c0_380 = arith.constant 0 : index
    %c0_381 = arith.constant 0 : index
    %947 = vector.load %arg12[%c0_380, %c0_381] : memref<2x64xf32, #tpu.memory_space<vmem>>, vector<2x32xf32>
    tpu.vector_store %arg12[%c0_380, %c0_381], %925 {strides = array<i32>} : memref<2x64xf32, #tpu.memory_space<vmem>>, vector<2x32xf32>,
    %c0_382 = arith.constant 0 : index
    %c32_383 = arith.constant 32 : index
    %948 = vector.load %arg12[%c0_382, %c32_383] : memref<2x64xf32, #tpu.memory_space<vmem>>, vector<2x32xf32>
    tpu.vector_store %arg12[%c0_382, %c32_383], %942 {strides = array<i32>} : memref<2x64xf32, #tpu.memory_space<vmem>>, vector<2x32xf32>,
    %949 = arith.index_cast %c14_i32 : i32 to index
    %c0_384 = arith.constant 0 : index
    %c0_385 = arith.constant 0 : index
    %950 = vector.load %arg9[%949, %c0_384, %c0_385] : memref<16x2x32xf32, #tpu.memory_space<vmem>>, vector<1x2x32xf32>
    %951 = vector.shape_cast %950 : vector<1x2x32xf32> to vector<2x32xf32>
    %952 = vector.shape_cast %927 : vector<2x32xf32> to vector<1x2x32xf32>
    tpu.vector_store %arg9[%949, %c0_384, %c0_385], %952 {strides = array<i32>} : memref<16x2x32xf32, #tpu.memory_space<vmem>>, vector<1x2x32xf32>,
    %c15_i32_386 = arith.constant 15 : i32
    %953 = arith.subi %c15_i32_386, %c14_i32 : i32
    %954 = arith.index_cast %953 : i32 to index
    %c0_387 = arith.constant 0 : index
    %c0_388 = arith.constant 0 : index
    %955 = vector.load %arg10[%954, %c0_387, %c0_388] : memref<16x2x32xf32, #tpu.memory_space<vmem>>, vector<1x2x32xf32>
    %956 = vector.shape_cast %955 : vector<1x2x32xf32> to vector<2x32xf32>
    %957 = vector.shape_cast %944 : vector<2x32xf32> to vector<1x2x32xf32>
    tpu.vector_store %arg10[%954, %c0_387, %c0_388], %957 {strides = array<i32>} : memref<16x2x32xf32, #tpu.memory_space<vmem>>, vector<1x2x32xf32>,
    %c15_i32_389 = arith.constant 15 : i32
    %c0_390 = arith.constant 0 : index
    %c0_391 = arith.constant 0 : index
    %958 = vector.load %arg11[%c0_390, %c0_391] : memref<2x64xf32, #tpu.memory_space<vmem>>, vector<2x64xf32>
    %cst_392 = arith.constant dense<0.000000e+00> : vector<2x256xf32>
    %959 = tpu.matmul %958, %12, %cst_392 {dimension_numbers = #tpu.dot_dimension_numbers<[1], [0], [0], [1], [0, 0, 1, 1], [], []>} : vector<2x64xf32>, vector<64x256xf32>, vector<2x256xf32> -> vector<2x256xf32>
    %960 = arith.index_cast %c15_i32_389 : i32 to index
    %c0_393 = arith.constant 0 : index
    %c0_394 = arith.constant 0 : index
    %961 = vector.load %arg8[%960, %c0_393, %c0_394] : memref<16x2x256xf32, #tpu.memory_space<vmem>>, vector<1x2x256xf32>
    %962 = vector.shape_cast %961 : vector<1x2x256xf32> to vector<2x256xf32>
    %c15_i32_395 = arith.constant 15 : i32
    %963 = arith.subi %c15_i32_395, %c15_i32_389 : i32
    %964 = arith.index_cast %963 : i32 to index
    %c0_396 = arith.constant 0 : index
    %c0_397 = arith.constant 0 : index
    %965 = vector.load %arg8[%964, %c0_396, %c0_397] : memref<16x2x256xf32, #tpu.memory_space<vmem>>, vector<1x2x256xf32>
    %966 = vector.shape_cast %965 : vector<1x2x256xf32> to vector<2x256xf32>
    %967 = vector.extract_strided_slice %959 {offsets = [0, 0], sizes = [2, 128], strides = [1, 1]} : vector<2x256xf32> to vector<2x128xf32>
    %968 = vector.extract_strided_slice %962 {offsets = [0, 0], sizes = [2, 128], strides = [1, 1]} : vector<2x256xf32> to vector<2x128xf32>
    %969 = arith.addf %967, %968 : vector<2x128xf32>
    %970 = vector.extract_strided_slice %959 {offsets = [0, 128], sizes = [2, 128], strides = [1, 1]} : vector<2x256xf32> to vector<2x128xf32>
    %971 = vector.extract_strided_slice %966 {offsets = [0, 128], sizes = [2, 128], strides = [1, 1]} : vector<2x256xf32> to vector<2x128xf32>
    %972 = arith.addf %970, %971 : vector<2x128xf32>
    %c0_398 = arith.constant 0 : index
    %c0_399 = arith.constant 0 : index
    %973 = vector.load %arg12[%c0_398, %c0_399] : memref<2x64xf32, #tpu.memory_space<vmem>>, vector<2x64xf32>
    %974 = vector.extract_strided_slice %973 {offsets = [0, 0], sizes = [2, 32], strides = [1, 1]} : vector<2x64xf32> to vector<2x32xf32>
    %975 = vector.extract_strided_slice %969 {offsets = [0, 0], sizes = [2, 96], strides = [1, 1]} : vector<2x128xf32> to vector<2x96xf32>
    %976 = arith.negf %975 : vector<2x96xf32>
    %977 = math.exp %976 : vector<2x96xf32>
    %cst_400 = arith.constant 1.000000e+00 : f32
    %978 = vector.broadcast %cst_400 : f32 to vector<2x96xf32>
    %979 = arith.addf %978, %977 : vector<2x96xf32>
    %980 = arith.divf %978, %979 : vector<2x96xf32>
    %981 = vector.extract_strided_slice %969 {offsets = [0, 96], sizes = [2, 32], strides = [1, 1]} : vector<2x128xf32> to vector<2x32xf32>
    %982 = math.tanh %981 : vector<2x32xf32>
    %983 = vector.extract_strided_slice %980 {offsets = [0, 0], sizes = [2, 32], strides = [1, 1]} : vector<2x96xf32> to vector<2x32xf32>
    %984 = vector.extract_strided_slice %980 {offsets = [0, 32], sizes = [2, 32], strides = [1, 1]} : vector<2x96xf32> to vector<2x32xf32>
    %985 = vector.extract_strided_slice %980 {offsets = [0, 64], sizes = [2, 32], strides = [1, 1]} : vector<2x96xf32> to vector<2x32xf32>
    %986 = arith.mulf %984, %974 : vector<2x32xf32>
    %987 = arith.mulf %983, %982 : vector<2x32xf32>
    %988 = arith.addf %986, %987 : vector<2x32xf32>
    %989 = math.tanh %988 : vector<2x32xf32>
    %990 = arith.mulf %985, %989 : vector<2x32xf32>
    %991 = vector.extract_strided_slice %973 {offsets = [0, 32], sizes = [2, 32], strides = [1, 1]} : vector<2x64xf32> to vector<2x32xf32>
    %992 = vector.extract_strided_slice %972 {offsets = [0, 0], sizes = [2, 96], strides = [1, 1]} : vector<2x128xf32> to vector<2x96xf32>
    %993 = arith.negf %992 : vector<2x96xf32>
    %994 = math.exp %993 : vector<2x96xf32>
    %cst_401 = arith.constant 1.000000e+00 : f32
    %995 = vector.broadcast %cst_401 : f32 to vector<2x96xf32>
    %996 = arith.addf %995, %994 : vector<2x96xf32>
    %997 = arith.divf %995, %996 : vector<2x96xf32>
    %998 = vector.extract_strided_slice %972 {offsets = [0, 96], sizes = [2, 32], strides = [1, 1]} : vector<2x128xf32> to vector<2x32xf32>
    %999 = math.tanh %998 : vector<2x32xf32>
    %1000 = vector.extract_strided_slice %997 {offsets = [0, 0], sizes = [2, 32], strides = [1, 1]} : vector<2x96xf32> to vector<2x32xf32>
    %1001 = vector.extract_strided_slice %997 {offsets = [0, 32], sizes = [2, 32], strides = [1, 1]} : vector<2x96xf32> to vector<2x32xf32>
    %1002 = vector.extract_strided_slice %997 {offsets = [0, 64], sizes = [2, 32], strides = [1, 1]} : vector<2x96xf32> to vector<2x32xf32>
    %1003 = arith.mulf %1001, %991 : vector<2x32xf32>
    %1004 = arith.mulf %1000, %999 : vector<2x32xf32>
    %1005 = arith.addf %1003, %1004 : vector<2x32xf32>
    %1006 = math.tanh %1005 : vector<2x32xf32>
    %1007 = arith.mulf %1002, %1006 : vector<2x32xf32>
    %c0_402 = arith.constant 0 : index
    %c0_403 = arith.constant 0 : index
    %1008 = vector.load %arg11[%c0_402, %c0_403] : memref<2x64xf32, #tpu.memory_space<vmem>>, vector<2x32xf32>
    tpu.vector_store %arg11[%c0_402, %c0_403], %990 {strides = array<i32>} : memref<2x64xf32, #tpu.memory_space<vmem>>, vector<2x32xf32>,
    %c0_404 = arith.constant 0 : index
    %c32_405 = arith.constant 32 : index
    %1009 = vector.load %arg11[%c0_404, %c32_405] : memref<2x64xf32, #tpu.memory_space<vmem>>, vector<2x32xf32>
    tpu.vector_store %arg11[%c0_404, %c32_405], %1007 {strides = array<i32>} : memref<2x64xf32, #tpu.memory_space<vmem>>, vector<2x32xf32>,
    %c0_406 = arith.constant 0 : index
    %c0_407 = arith.constant 0 : index
    %1010 = vector.load %arg12[%c0_406, %c0_407] : memref<2x64xf32, #tpu.memory_space<vmem>>, vector<2x32xf32>
    tpu.vector_store %arg12[%c0_406, %c0_407], %988 {strides = array<i32>} : memref<2x64xf32, #tpu.memory_space<vmem>>, vector<2x32xf32>,
    %c0_408 = arith.constant 0 : index
    %c32_409 = arith.constant 32 : index
    %1011 = vector.load %arg12[%c0_408, %c32_409] : memref<2x64xf32, #tpu.memory_space<vmem>>, vector<2x32xf32>
    tpu.vector_store %arg12[%c0_408, %c32_409], %1005 {strides = array<i32>} : memref<2x64xf32, #tpu.memory_space<vmem>>, vector<2x32xf32>,
    %1012 = arith.index_cast %c15_i32_389 : i32 to index
    %c0_410 = arith.constant 0 : index
    %c0_411 = arith.constant 0 : index
    %1013 = vector.load %arg9[%1012, %c0_410, %c0_411] : memref<16x2x32xf32, #tpu.memory_space<vmem>>, vector<1x2x32xf32>
    %1014 = vector.shape_cast %1013 : vector<1x2x32xf32> to vector<2x32xf32>
    %1015 = vector.shape_cast %990 : vector<2x32xf32> to vector<1x2x32xf32>
    tpu.vector_store %arg9[%1012, %c0_410, %c0_411], %1015 {strides = array<i32>} : memref<16x2x32xf32, #tpu.memory_space<vmem>>, vector<1x2x32xf32>,
    %c15_i32_412 = arith.constant 15 : i32
    %1016 = arith.subi %c15_i32_412, %c15_i32_389 : i32
    %1017 = arith.index_cast %1016 : i32 to index
    %c0_413 = arith.constant 0 : index
    %c0_414 = arith.constant 0 : index
    %1018 = vector.load %arg10[%1017, %c0_413, %c0_414] : memref<16x2x32xf32, #tpu.memory_space<vmem>>, vector<1x2x32xf32>
    %1019 = vector.shape_cast %1018 : vector<1x2x32xf32> to vector<2x32xf32>
    %1020 = vector.shape_cast %1007 : vector<2x32xf32> to vector<1x2x32xf32>
    tpu.vector_store %arg10[%1017, %c0_413, %c0_414], %1020 {strides = array<i32>} : memref<16x2x32xf32, #tpu.memory_space<vmem>>, vector<1x2x32xf32>,
    %c16_i32 = arith.constant 16 : i32
    %c0_415 = arith.constant 0 : index
    %c0_416 = arith.constant 0 : index
    %c0_417 = arith.constant 0 : index
    %1021 = vector.load %arg9[%c0_415, %c0_416, %c0_417] : memref<16x2x32xf32, #tpu.memory_space<vmem>>, vector<16x2x32xf32>
    %1022 = vector.shape_cast %1021 : vector<16x2x32xf32> to vector<32x32xf32>
    %c0_418 = arith.constant 0 : index
    %c0_419 = arith.constant 0 : index
    %c0_420 = arith.constant 0 : index
    %1023 = vector.load %arg10[%c0_418, %c0_419, %c0_420] : memref<16x2x32xf32, #tpu.memory_space<vmem>>, vector<16x2x32xf32>
    %1024 = vector.shape_cast %1023 : vector<16x2x32xf32> to vector<32x32xf32>
    %c0_421 = arith.constant 0 : index
    %c0_422 = arith.constant 0 : index
    %1025 = vector.load %arg4[%c0_421, %c0_422] : memref<64x256xf32, #tpu.memory_space<vmem>>, vector<64x256xf32>
    %1026 = vector.extract_strided_slice %1025 {offsets = [0, 0], sizes = [32, 256], strides = [1, 1]} : vector<64x256xf32> to vector<32x256xf32>
    %cst_423 = arith.constant dense<0.000000e+00> : vector<32x256xf32>
    %1027 = tpu.matmul %1022, %1026, %cst_423 {dimension_numbers = #tpu.dot_dimension_numbers<[1], [0], [0], [1], [0, 0, 1, 1], [], []>} : vector<32x32xf32>, vector<32x256xf32>, vector<32x256xf32> -> vector<32x256xf32>
    %1028 = vector.extract_strided_slice %1025 {offsets = [32, 0], sizes = [32, 256], strides = [1, 1]} : vector<64x256xf32> to vector<32x256xf32>
    %cst_424 = arith.constant dense<0.000000e+00> : vector<32x256xf32>
    %1029 = tpu.matmul %1024, %1028, %cst_424 {dimension_numbers = #tpu.dot_dimension_numbers<[1], [0], [0], [1], [0, 0, 1, 1], [], []>} : vector<32x32xf32>, vector<32x256xf32>, vector<32x256xf32> -> vector<32x256xf32>
    %1030 = arith.addf %1027, %1029 : vector<32x256xf32>
    %c0_425 = arith.constant 0 : index
    %c0_426 = arith.constant 0 : index
    %1031 = vector.load %arg6[%c0_425, %c0_426] : memref<1x256xf32, #tpu.memory_space<vmem>>, vector<1x256xf32>
    %1032 = vector.broadcast %1031 : vector<1x256xf32> to vector<32x256xf32>
    %1033 = arith.addf %1030, %1032 : vector<32x256xf32>
    %1034 = vector.shape_cast %1033 : vector<32x256xf32> to vector<16x2x256xf32>
    %c0_427 = arith.constant 0 : index
    %c0_428 = arith.constant 0 : index
    %c0_429 = arith.constant 0 : index
    %1035 = vector.load %arg8[%c0_427, %c0_428, %c0_429] : memref<16x2x256xf32, #tpu.memory_space<vmem>>, vector<16x2x256xf32>
    tpu.vector_store %arg8[%c0_427, %c0_428, %c0_429], %1034 {strides = array<i32>} : memref<16x2x256xf32, #tpu.memory_space<vmem>>, vector<16x2x256xf32>,
    %cst_430 = arith.constant 0.000000e+00 : f32
    %1036 = vector.broadcast %cst_430 : f32 to vector<2x64xf32>
    %c0_431 = arith.constant 0 : index
    %c0_432 = arith.constant 0 : index
    %1037 = vector.load %arg11[%c0_431, %c0_432] : memref<2x64xf32, #tpu.memory_space<vmem>>, vector<2x64xf32>
    tpu.vector_store %arg11[%c0_431, %c0_432], %1036 {strides = array<i32>} : memref<2x64xf32, #tpu.memory_space<vmem>>, vector<2x64xf32>,
    %cst_433 = arith.constant 0.000000e+00 : f32
    %1038 = vector.broadcast %cst_433 : f32 to vector<2x64xf32>
    %c0_434 = arith.constant 0 : index
    %c0_435 = arith.constant 0 : index
    %1039 = vector.load %arg12[%c0_434, %c0_435] : memref<2x64xf32, #tpu.memory_space<vmem>>, vector<2x64xf32>
    tpu.vector_store %arg12[%c0_434, %c0_435], %1038 {strides = array<i32>} : memref<2x64xf32, #tpu.memory_space<vmem>>, vector<2x64xf32>,
    %c0_436 = arith.constant 0 : index
    %c0_437 = arith.constant 0 : index
    %1040 = vector.load %arg5[%c0_436, %c0_437] : memref<64x256xf32, #tpu.memory_space<vmem>>, vector<64x256xf32>
    %c0_i32_438 = arith.constant 0 : i32
    %c0_439 = arith.constant 0 : index
    %c0_440 = arith.constant 0 : index
    %1041 = vector.load %arg11[%c0_439, %c0_440] : memref<2x64xf32, #tpu.memory_space<vmem>>, vector<2x64xf32>
    %cst_441 = arith.constant dense<0.000000e+00> : vector<2x256xf32>
    %1042 = tpu.matmul %1041, %1040, %cst_441 {dimension_numbers = #tpu.dot_dimension_numbers<[1], [0], [0], [1], [0, 0, 1, 1], [], []>} : vector<2x64xf32>, vector<64x256xf32>, vector<2x256xf32> -> vector<2x256xf32>
    %1043 = arith.index_cast %c0_i32_438 : i32 to index
    %c0_442 = arith.constant 0 : index
    %c0_443 = arith.constant 0 : index
    %1044 = vector.load %arg8[%1043, %c0_442, %c0_443] : memref<16x2x256xf32, #tpu.memory_space<vmem>>, vector<1x2x256xf32>
    %1045 = vector.shape_cast %1044 : vector<1x2x256xf32> to vector<2x256xf32>
    %c15_i32_444 = arith.constant 15 : i32
    %1046 = arith.subi %c15_i32_444, %c0_i32_438 : i32
    %1047 = arith.index_cast %1046 : i32 to index
    %c0_445 = arith.constant 0 : index
    %c0_446 = arith.constant 0 : index
    %1048 = vector.load %arg8[%1047, %c0_445, %c0_446] : memref<16x2x256xf32, #tpu.memory_space<vmem>>, vector<1x2x256xf32>
    %1049 = vector.shape_cast %1048 : vector<1x2x256xf32> to vector<2x256xf32>
    %1050 = vector.extract_strided_slice %1042 {offsets = [0, 0], sizes = [2, 128], strides = [1, 1]} : vector<2x256xf32> to vector<2x128xf32>
    %1051 = vector.extract_strided_slice %1045 {offsets = [0, 0], sizes = [2, 128], strides = [1, 1]} : vector<2x256xf32> to vector<2x128xf32>
    %1052 = arith.addf %1050, %1051 : vector<2x128xf32>
    %1053 = vector.extract_strided_slice %1042 {offsets = [0, 128], sizes = [2, 128], strides = [1, 1]} : vector<2x256xf32> to vector<2x128xf32>
    %1054 = vector.extract_strided_slice %1049 {offsets = [0, 128], sizes = [2, 128], strides = [1, 1]} : vector<2x256xf32> to vector<2x128xf32>
    %1055 = arith.addf %1053, %1054 : vector<2x128xf32>
    %c0_447 = arith.constant 0 : index
    %c0_448 = arith.constant 0 : index
    %1056 = vector.load %arg12[%c0_447, %c0_448] : memref<2x64xf32, #tpu.memory_space<vmem>>, vector<2x64xf32>
    %1057 = vector.extract_strided_slice %1056 {offsets = [0, 0], sizes = [2, 32], strides = [1, 1]} : vector<2x64xf32> to vector<2x32xf32>
    %1058 = vector.extract_strided_slice %1052 {offsets = [0, 0], sizes = [2, 96], strides = [1, 1]} : vector<2x128xf32> to vector<2x96xf32>
    %1059 = arith.negf %1058 : vector<2x96xf32>
    %1060 = math.exp %1059 : vector<2x96xf32>
    %cst_449 = arith.constant 1.000000e+00 : f32
    %1061 = vector.broadcast %cst_449 : f32 to vector<2x96xf32>
    %1062 = arith.addf %1061, %1060 : vector<2x96xf32>
    %1063 = arith.divf %1061, %1062 : vector<2x96xf32>
    %1064 = vector.extract_strided_slice %1052 {offsets = [0, 96], sizes = [2, 32], strides = [1, 1]} : vector<2x128xf32> to vector<2x32xf32>
    %1065 = math.tanh %1064 : vector<2x32xf32>
    %1066 = vector.extract_strided_slice %1063 {offsets = [0, 0], sizes = [2, 32], strides = [1, 1]} : vector<2x96xf32> to vector<2x32xf32>
    %1067 = vector.extract_strided_slice %1063 {offsets = [0, 32], sizes = [2, 32], strides = [1, 1]} : vector<2x96xf32> to vector<2x32xf32>
    %1068 = vector.extract_strided_slice %1063 {offsets = [0, 64], sizes = [2, 32], strides = [1, 1]} : vector<2x96xf32> to vector<2x32xf32>
    %1069 = arith.mulf %1067, %1057 : vector<2x32xf32>
    %1070 = arith.mulf %1066, %1065 : vector<2x32xf32>
    %1071 = arith.addf %1069, %1070 : vector<2x32xf32>
    %1072 = math.tanh %1071 : vector<2x32xf32>
    %1073 = arith.mulf %1068, %1072 : vector<2x32xf32>
    %1074 = vector.extract_strided_slice %1056 {offsets = [0, 32], sizes = [2, 32], strides = [1, 1]} : vector<2x64xf32> to vector<2x32xf32>
    %1075 = vector.extract_strided_slice %1055 {offsets = [0, 0], sizes = [2, 96], strides = [1, 1]} : vector<2x128xf32> to vector<2x96xf32>
    %1076 = arith.negf %1075 : vector<2x96xf32>
    %1077 = math.exp %1076 : vector<2x96xf32>
    %cst_450 = arith.constant 1.000000e+00 : f32
    %1078 = vector.broadcast %cst_450 : f32 to vector<2x96xf32>
    %1079 = arith.addf %1078, %1077 : vector<2x96xf32>
    %1080 = arith.divf %1078, %1079 : vector<2x96xf32>
    %1081 = vector.extract_strided_slice %1055 {offsets = [0, 96], sizes = [2, 32], strides = [1, 1]} : vector<2x128xf32> to vector<2x32xf32>
    %1082 = math.tanh %1081 : vector<2x32xf32>
    %1083 = vector.extract_strided_slice %1080 {offsets = [0, 0], sizes = [2, 32], strides = [1, 1]} : vector<2x96xf32> to vector<2x32xf32>
    %1084 = vector.extract_strided_slice %1080 {offsets = [0, 32], sizes = [2, 32], strides = [1, 1]} : vector<2x96xf32> to vector<2x32xf32>
    %1085 = vector.extract_strided_slice %1080 {offsets = [0, 64], sizes = [2, 32], strides = [1, 1]} : vector<2x96xf32> to vector<2x32xf32>
    %1086 = arith.mulf %1084, %1074 : vector<2x32xf32>
    %1087 = arith.mulf %1083, %1082 : vector<2x32xf32>
    %1088 = arith.addf %1086, %1087 : vector<2x32xf32>
    %1089 = math.tanh %1088 : vector<2x32xf32>
    %1090 = arith.mulf %1085, %1089 : vector<2x32xf32>
    %c0_451 = arith.constant 0 : index
    %c0_452 = arith.constant 0 : index
    %1091 = vector.load %arg11[%c0_451, %c0_452] : memref<2x64xf32, #tpu.memory_space<vmem>>, vector<2x32xf32>
    tpu.vector_store %arg11[%c0_451, %c0_452], %1073 {strides = array<i32>} : memref<2x64xf32, #tpu.memory_space<vmem>>, vector<2x32xf32>,
    %c0_453 = arith.constant 0 : index
    %c32_454 = arith.constant 32 : index
    %1092 = vector.load %arg11[%c0_453, %c32_454] : memref<2x64xf32, #tpu.memory_space<vmem>>, vector<2x32xf32>
    tpu.vector_store %arg11[%c0_453, %c32_454], %1090 {strides = array<i32>} : memref<2x64xf32, #tpu.memory_space<vmem>>, vector<2x32xf32>,
    %c0_455 = arith.constant 0 : index
    %c0_456 = arith.constant 0 : index
    %1093 = vector.load %arg12[%c0_455, %c0_456] : memref<2x64xf32, #tpu.memory_space<vmem>>, vector<2x32xf32>
    tpu.vector_store %arg12[%c0_455, %c0_456], %1071 {strides = array<i32>} : memref<2x64xf32, #tpu.memory_space<vmem>>, vector<2x32xf32>,
    %c0_457 = arith.constant 0 : index
    %c32_458 = arith.constant 32 : index
    %1094 = vector.load %arg12[%c0_457, %c32_458] : memref<2x64xf32, #tpu.memory_space<vmem>>, vector<2x32xf32>
    tpu.vector_store %arg12[%c0_457, %c32_458], %1088 {strides = array<i32>} : memref<2x64xf32, #tpu.memory_space<vmem>>, vector<2x32xf32>,
    %1095 = arith.index_cast %c0_i32_438 : i32 to index
    %c0_459 = arith.constant 0 : index
    %c0_460 = arith.constant 0 : index
    %1096 = vector.load %arg9[%1095, %c0_459, %c0_460] : memref<16x2x32xf32, #tpu.memory_space<vmem>>, vector<1x2x32xf32>
    %1097 = vector.shape_cast %1096 : vector<1x2x32xf32> to vector<2x32xf32>
    %1098 = vector.shape_cast %1073 : vector<2x32xf32> to vector<1x2x32xf32>
    tpu.vector_store %arg9[%1095, %c0_459, %c0_460], %1098 {strides = array<i32>} : memref<16x2x32xf32, #tpu.memory_space<vmem>>, vector<1x2x32xf32>,
    %c15_i32_461 = arith.constant 15 : i32
    %1099 = arith.subi %c15_i32_461, %c0_i32_438 : i32
    %1100 = arith.index_cast %1099 : i32 to index
    %c0_462 = arith.constant 0 : index
    %c0_463 = arith.constant 0 : index
    %1101 = vector.load %arg10[%1100, %c0_462, %c0_463] : memref<16x2x32xf32, #tpu.memory_space<vmem>>, vector<1x2x32xf32>
    %1102 = vector.shape_cast %1101 : vector<1x2x32xf32> to vector<2x32xf32>
    %1103 = vector.shape_cast %1090 : vector<2x32xf32> to vector<1x2x32xf32>
    tpu.vector_store %arg10[%1100, %c0_462, %c0_463], %1103 {strides = array<i32>} : memref<16x2x32xf32, #tpu.memory_space<vmem>>, vector<1x2x32xf32>,
    %c1_i32_464 = arith.constant 1 : i32
    %c0_465 = arith.constant 0 : index
    %c0_466 = arith.constant 0 : index
    %1104 = vector.load %arg11[%c0_465, %c0_466] : memref<2x64xf32, #tpu.memory_space<vmem>>, vector<2x64xf32>
    %cst_467 = arith.constant dense<0.000000e+00> : vector<2x256xf32>
    %1105 = tpu.matmul %1104, %1040, %cst_467 {dimension_numbers = #tpu.dot_dimension_numbers<[1], [0], [0], [1], [0, 0, 1, 1], [], []>} : vector<2x64xf32>, vector<64x256xf32>, vector<2x256xf32> -> vector<2x256xf32>
    %1106 = arith.index_cast %c1_i32_464 : i32 to index
    %c0_468 = arith.constant 0 : index
    %c0_469 = arith.constant 0 : index
    %1107 = vector.load %arg8[%1106, %c0_468, %c0_469] : memref<16x2x256xf32, #tpu.memory_space<vmem>>, vector<1x2x256xf32>
    %1108 = vector.shape_cast %1107 : vector<1x2x256xf32> to vector<2x256xf32>
    %c15_i32_470 = arith.constant 15 : i32
    %1109 = arith.subi %c15_i32_470, %c1_i32_464 : i32
    %1110 = arith.index_cast %1109 : i32 to index
    %c0_471 = arith.constant 0 : index
    %c0_472 = arith.constant 0 : index
    %1111 = vector.load %arg8[%1110, %c0_471, %c0_472] : memref<16x2x256xf32, #tpu.memory_space<vmem>>, vector<1x2x256xf32>
    %1112 = vector.shape_cast %1111 : vector<1x2x256xf32> to vector<2x256xf32>
    %1113 = vector.extract_strided_slice %1105 {offsets = [0, 0], sizes = [2, 128], strides = [1, 1]} : vector<2x256xf32> to vector<2x128xf32>
    %1114 = vector.extract_strided_slice %1108 {offsets = [0, 0], sizes = [2, 128], strides = [1, 1]} : vector<2x256xf32> to vector<2x128xf32>
    %1115 = arith.addf %1113, %1114 : vector<2x128xf32>
    %1116 = vector.extract_strided_slice %1105 {offsets = [0, 128], sizes = [2, 128], strides = [1, 1]} : vector<2x256xf32> to vector<2x128xf32>
    %1117 = vector.extract_strided_slice %1112 {offsets = [0, 128], sizes = [2, 128], strides = [1, 1]} : vector<2x256xf32> to vector<2x128xf32>
    %1118 = arith.addf %1116, %1117 : vector<2x128xf32>
    %c0_473 = arith.constant 0 : index
    %c0_474 = arith.constant 0 : index
    %1119 = vector.load %arg12[%c0_473, %c0_474] : memref<2x64xf32, #tpu.memory_space<vmem>>, vector<2x64xf32>
    %1120 = vector.extract_strided_slice %1119 {offsets = [0, 0], sizes = [2, 32], strides = [1, 1]} : vector<2x64xf32> to vector<2x32xf32>
    %1121 = vector.extract_strided_slice %1115 {offsets = [0, 0], sizes = [2, 96], strides = [1, 1]} : vector<2x128xf32> to vector<2x96xf32>
    %1122 = arith.negf %1121 : vector<2x96xf32>
    %1123 = math.exp %1122 : vector<2x96xf32>
    %cst_475 = arith.constant 1.000000e+00 : f32
    %1124 = vector.broadcast %cst_475 : f32 to vector<2x96xf32>
    %1125 = arith.addf %1124, %1123 : vector<2x96xf32>
    %1126 = arith.divf %1124, %1125 : vector<2x96xf32>
    %1127 = vector.extract_strided_slice %1115 {offsets = [0, 96], sizes = [2, 32], strides = [1, 1]} : vector<2x128xf32> to vector<2x32xf32>
    %1128 = math.tanh %1127 : vector<2x32xf32>
    %1129 = vector.extract_strided_slice %1126 {offsets = [0, 0], sizes = [2, 32], strides = [1, 1]} : vector<2x96xf32> to vector<2x32xf32>
    %1130 = vector.extract_strided_slice %1126 {offsets = [0, 32], sizes = [2, 32], strides = [1, 1]} : vector<2x96xf32> to vector<2x32xf32>
    %1131 = vector.extract_strided_slice %1126 {offsets = [0, 64], sizes = [2, 32], strides = [1, 1]} : vector<2x96xf32> to vector<2x32xf32>
    %1132 = arith.mulf %1130, %1120 : vector<2x32xf32>
    %1133 = arith.mulf %1129, %1128 : vector<2x32xf32>
    %1134 = arith.addf %1132, %1133 : vector<2x32xf32>
    %1135 = math.tanh %1134 : vector<2x32xf32>
    %1136 = arith.mulf %1131, %1135 : vector<2x32xf32>
    %1137 = vector.extract_strided_slice %1119 {offsets = [0, 32], sizes = [2, 32], strides = [1, 1]} : vector<2x64xf32> to vector<2x32xf32>
    %1138 = vector.extract_strided_slice %1118 {offsets = [0, 0], sizes = [2, 96], strides = [1, 1]} : vector<2x128xf32> to vector<2x96xf32>
    %1139 = arith.negf %1138 : vector<2x96xf32>
    %1140 = math.exp %1139 : vector<2x96xf32>
    %cst_476 = arith.constant 1.000000e+00 : f32
    %1141 = vector.broadcast %cst_476 : f32 to vector<2x96xf32>
    %1142 = arith.addf %1141, %1140 : vector<2x96xf32>
    %1143 = arith.divf %1141, %1142 : vector<2x96xf32>
    %1144 = vector.extract_strided_slice %1118 {offsets = [0, 96], sizes = [2, 32], strides = [1, 1]} : vector<2x128xf32> to vector<2x32xf32>
    %1145 = math.tanh %1144 : vector<2x32xf32>
    %1146 = vector.extract_strided_slice %1143 {offsets = [0, 0], sizes = [2, 32], strides = [1, 1]} : vector<2x96xf32> to vector<2x32xf32>
    %1147 = vector.extract_strided_slice %1143 {offsets = [0, 32], sizes = [2, 32], strides = [1, 1]} : vector<2x96xf32> to vector<2x32xf32>
    %1148 = vector.extract_strided_slice %1143 {offsets = [0, 64], sizes = [2, 32], strides = [1, 1]} : vector<2x96xf32> to vector<2x32xf32>
    %1149 = arith.mulf %1147, %1137 : vector<2x32xf32>
    %1150 = arith.mulf %1146, %1145 : vector<2x32xf32>
    %1151 = arith.addf %1149, %1150 : vector<2x32xf32>
    %1152 = math.tanh %1151 : vector<2x32xf32>
    %1153 = arith.mulf %1148, %1152 : vector<2x32xf32>
    %c0_477 = arith.constant 0 : index
    %c0_478 = arith.constant 0 : index
    %1154 = vector.load %arg11[%c0_477, %c0_478] : memref<2x64xf32, #tpu.memory_space<vmem>>, vector<2x32xf32>
    tpu.vector_store %arg11[%c0_477, %c0_478], %1136 {strides = array<i32>} : memref<2x64xf32, #tpu.memory_space<vmem>>, vector<2x32xf32>,
    %c0_479 = arith.constant 0 : index
    %c32_480 = arith.constant 32 : index
    %1155 = vector.load %arg11[%c0_479, %c32_480] : memref<2x64xf32, #tpu.memory_space<vmem>>, vector<2x32xf32>
    tpu.vector_store %arg11[%c0_479, %c32_480], %1153 {strides = array<i32>} : memref<2x64xf32, #tpu.memory_space<vmem>>, vector<2x32xf32>,
    %c0_481 = arith.constant 0 : index
    %c0_482 = arith.constant 0 : index
    %1156 = vector.load %arg12[%c0_481, %c0_482] : memref<2x64xf32, #tpu.memory_space<vmem>>, vector<2x32xf32>
    tpu.vector_store %arg12[%c0_481, %c0_482], %1134 {strides = array<i32>} : memref<2x64xf32, #tpu.memory_space<vmem>>, vector<2x32xf32>,
    %c0_483 = arith.constant 0 : index
    %c32_484 = arith.constant 32 : index
    %1157 = vector.load %arg12[%c0_483, %c32_484] : memref<2x64xf32, #tpu.memory_space<vmem>>, vector<2x32xf32>
    tpu.vector_store %arg12[%c0_483, %c32_484], %1151 {strides = array<i32>} : memref<2x64xf32, #tpu.memory_space<vmem>>, vector<2x32xf32>,
    %1158 = arith.index_cast %c1_i32_464 : i32 to index
    %c0_485 = arith.constant 0 : index
    %c0_486 = arith.constant 0 : index
    %1159 = vector.load %arg9[%1158, %c0_485, %c0_486] : memref<16x2x32xf32, #tpu.memory_space<vmem>>, vector<1x2x32xf32>
    %1160 = vector.shape_cast %1159 : vector<1x2x32xf32> to vector<2x32xf32>
    %1161 = vector.shape_cast %1136 : vector<2x32xf32> to vector<1x2x32xf32>
    tpu.vector_store %arg9[%1158, %c0_485, %c0_486], %1161 {strides = array<i32>} : memref<16x2x32xf32, #tpu.memory_space<vmem>>, vector<1x2x32xf32>,
    %c15_i32_487 = arith.constant 15 : i32
    %1162 = arith.subi %c15_i32_487, %c1_i32_464 : i32
    %1163 = arith.index_cast %1162 : i32 to index
    %c0_488 = arith.constant 0 : index
    %c0_489 = arith.constant 0 : index
    %1164 = vector.load %arg10[%1163, %c0_488, %c0_489] : memref<16x2x32xf32, #tpu.memory_space<vmem>>, vector<1x2x32xf32>
    %1165 = vector.shape_cast %1164 : vector<1x2x32xf32> to vector<2x32xf32>
    %1166 = vector.shape_cast %1153 : vector<2x32xf32> to vector<1x2x32xf32>
    tpu.vector_store %arg10[%1163, %c0_488, %c0_489], %1166 {strides = array<i32>} : memref<16x2x32xf32, #tpu.memory_space<vmem>>, vector<1x2x32xf32>,
    %c2_i32_490 = arith.constant 2 : i32
    %c0_491 = arith.constant 0 : index
    %c0_492 = arith.constant 0 : index
    %1167 = vector.load %arg11[%c0_491, %c0_492] : memref<2x64xf32, #tpu.memory_space<vmem>>, vector<2x64xf32>
    %cst_493 = arith.constant dense<0.000000e+00> : vector<2x256xf32>
    %1168 = tpu.matmul %1167, %1040, %cst_493 {dimension_numbers = #tpu.dot_dimension_numbers<[1], [0], [0], [1], [0, 0, 1, 1], [], []>} : vector<2x64xf32>, vector<64x256xf32>, vector<2x256xf32> -> vector<2x256xf32>
    %1169 = arith.index_cast %c2_i32_490 : i32 to index
    %c0_494 = arith.constant 0 : index
    %c0_495 = arith.constant 0 : index
    %1170 = vector.load %arg8[%1169, %c0_494, %c0_495] : memref<16x2x256xf32, #tpu.memory_space<vmem>>, vector<1x2x256xf32>
    %1171 = vector.shape_cast %1170 : vector<1x2x256xf32> to vector<2x256xf32>
    %c15_i32_496 = arith.constant 15 : i32
    %1172 = arith.subi %c15_i32_496, %c2_i32_490 : i32
    %1173 = arith.index_cast %1172 : i32 to index
    %c0_497 = arith.constant 0 : index
    %c0_498 = arith.constant 0 : index
    %1174 = vector.load %arg8[%1173, %c0_497, %c0_498] : memref<16x2x256xf32, #tpu.memory_space<vmem>>, vector<1x2x256xf32>
    %1175 = vector.shape_cast %1174 : vector<1x2x256xf32> to vector<2x256xf32>
    %1176 = vector.extract_strided_slice %1168 {offsets = [0, 0], sizes = [2, 128], strides = [1, 1]} : vector<2x256xf32> to vector<2x128xf32>
    %1177 = vector.extract_strided_slice %1171 {offsets = [0, 0], sizes = [2, 128], strides = [1, 1]} : vector<2x256xf32> to vector<2x128xf32>
    %1178 = arith.addf %1176, %1177 : vector<2x128xf32>
    %1179 = vector.extract_strided_slice %1168 {offsets = [0, 128], sizes = [2, 128], strides = [1, 1]} : vector<2x256xf32> to vector<2x128xf32>
    %1180 = vector.extract_strided_slice %1175 {offsets = [0, 128], sizes = [2, 128], strides = [1, 1]} : vector<2x256xf32> to vector<2x128xf32>
    %1181 = arith.addf %1179, %1180 : vector<2x128xf32>
    %c0_499 = arith.constant 0 : index
    %c0_500 = arith.constant 0 : index
    %1182 = vector.load %arg12[%c0_499, %c0_500] : memref<2x64xf32, #tpu.memory_space<vmem>>, vector<2x64xf32>
    %1183 = vector.extract_strided_slice %1182 {offsets = [0, 0], sizes = [2, 32], strides = [1, 1]} : vector<2x64xf32> to vector<2x32xf32>
    %1184 = vector.extract_strided_slice %1178 {offsets = [0, 0], sizes = [2, 96], strides = [1, 1]} : vector<2x128xf32> to vector<2x96xf32>
    %1185 = arith.negf %1184 : vector<2x96xf32>
    %1186 = math.exp %1185 : vector<2x96xf32>
    %cst_501 = arith.constant 1.000000e+00 : f32
    %1187 = vector.broadcast %cst_501 : f32 to vector<2x96xf32>
    %1188 = arith.addf %1187, %1186 : vector<2x96xf32>
    %1189 = arith.divf %1187, %1188 : vector<2x96xf32>
    %1190 = vector.extract_strided_slice %1178 {offsets = [0, 96], sizes = [2, 32], strides = [1, 1]} : vector<2x128xf32> to vector<2x32xf32>
    %1191 = math.tanh %1190 : vector<2x32xf32>
    %1192 = vector.extract_strided_slice %1189 {offsets = [0, 0], sizes = [2, 32], strides = [1, 1]} : vector<2x96xf32> to vector<2x32xf32>
    %1193 = vector.extract_strided_slice %1189 {offsets = [0, 32], sizes = [2, 32], strides = [1, 1]} : vector<2x96xf32> to vector<2x32xf32>
    %1194 = vector.extract_strided_slice %1189 {offsets = [0, 64], sizes = [2, 32], strides = [1, 1]} : vector<2x96xf32> to vector<2x32xf32>
    %1195 = arith.mulf %1193, %1183 : vector<2x32xf32>
    %1196 = arith.mulf %1192, %1191 : vector<2x32xf32>
    %1197 = arith.addf %1195, %1196 : vector<2x32xf32>
    %1198 = math.tanh %1197 : vector<2x32xf32>
    %1199 = arith.mulf %1194, %1198 : vector<2x32xf32>
    %1200 = vector.extract_strided_slice %1182 {offsets = [0, 32], sizes = [2, 32], strides = [1, 1]} : vector<2x64xf32> to vector<2x32xf32>
    %1201 = vector.extract_strided_slice %1181 {offsets = [0, 0], sizes = [2, 96], strides = [1, 1]} : vector<2x128xf32> to vector<2x96xf32>
    %1202 = arith.negf %1201 : vector<2x96xf32>
    %1203 = math.exp %1202 : vector<2x96xf32>
    %cst_502 = arith.constant 1.000000e+00 : f32
    %1204 = vector.broadcast %cst_502 : f32 to vector<2x96xf32>
    %1205 = arith.addf %1204, %1203 : vector<2x96xf32>
    %1206 = arith.divf %1204, %1205 : vector<2x96xf32>
    %1207 = vector.extract_strided_slice %1181 {offsets = [0, 96], sizes = [2, 32], strides = [1, 1]} : vector<2x128xf32> to vector<2x32xf32>
    %1208 = math.tanh %1207 : vector<2x32xf32>
    %1209 = vector.extract_strided_slice %1206 {offsets = [0, 0], sizes = [2, 32], strides = [1, 1]} : vector<2x96xf32> to vector<2x32xf32>
    %1210 = vector.extract_strided_slice %1206 {offsets = [0, 32], sizes = [2, 32], strides = [1, 1]} : vector<2x96xf32> to vector<2x32xf32>
    %1211 = vector.extract_strided_slice %1206 {offsets = [0, 64], sizes = [2, 32], strides = [1, 1]} : vector<2x96xf32> to vector<2x32xf32>
    %1212 = arith.mulf %1210, %1200 : vector<2x32xf32>
    %1213 = arith.mulf %1209, %1208 : vector<2x32xf32>
    %1214 = arith.addf %1212, %1213 : vector<2x32xf32>
    %1215 = math.tanh %1214 : vector<2x32xf32>
    %1216 = arith.mulf %1211, %1215 : vector<2x32xf32>
    %c0_503 = arith.constant 0 : index
    %c0_504 = arith.constant 0 : index
    %1217 = vector.load %arg11[%c0_503, %c0_504] : memref<2x64xf32, #tpu.memory_space<vmem>>, vector<2x32xf32>
    tpu.vector_store %arg11[%c0_503, %c0_504], %1199 {strides = array<i32>} : memref<2x64xf32, #tpu.memory_space<vmem>>, vector<2x32xf32>,
    %c0_505 = arith.constant 0 : index
    %c32_506 = arith.constant 32 : index
    %1218 = vector.load %arg11[%c0_505, %c32_506] : memref<2x64xf32, #tpu.memory_space<vmem>>, vector<2x32xf32>
    tpu.vector_store %arg11[%c0_505, %c32_506], %1216 {strides = array<i32>} : memref<2x64xf32, #tpu.memory_space<vmem>>, vector<2x32xf32>,
    %c0_507 = arith.constant 0 : index
    %c0_508 = arith.constant 0 : index
    %1219 = vector.load %arg12[%c0_507, %c0_508] : memref<2x64xf32, #tpu.memory_space<vmem>>, vector<2x32xf32>
    tpu.vector_store %arg12[%c0_507, %c0_508], %1197 {strides = array<i32>} : memref<2x64xf32, #tpu.memory_space<vmem>>, vector<2x32xf32>,
    %c0_509 = arith.constant 0 : index
    %c32_510 = arith.constant 32 : index
    %1220 = vector.load %arg12[%c0_509, %c32_510] : memref<2x64xf32, #tpu.memory_space<vmem>>, vector<2x32xf32>
    tpu.vector_store %arg12[%c0_509, %c32_510], %1214 {strides = array<i32>} : memref<2x64xf32, #tpu.memory_space<vmem>>, vector<2x32xf32>,
    %1221 = arith.index_cast %c2_i32_490 : i32 to index
    %c0_511 = arith.constant 0 : index
    %c0_512 = arith.constant 0 : index
    %1222 = vector.load %arg9[%1221, %c0_511, %c0_512] : memref<16x2x32xf32, #tpu.memory_space<vmem>>, vector<1x2x32xf32>
    %1223 = vector.shape_cast %1222 : vector<1x2x32xf32> to vector<2x32xf32>
    %1224 = vector.shape_cast %1199 : vector<2x32xf32> to vector<1x2x32xf32>
    tpu.vector_store %arg9[%1221, %c0_511, %c0_512], %1224 {strides = array<i32>} : memref<16x2x32xf32, #tpu.memory_space<vmem>>, vector<1x2x32xf32>,
    %c15_i32_513 = arith.constant 15 : i32
    %1225 = arith.subi %c15_i32_513, %c2_i32_490 : i32
    %1226 = arith.index_cast %1225 : i32 to index
    %c0_514 = arith.constant 0 : index
    %c0_515 = arith.constant 0 : index
    %1227 = vector.load %arg10[%1226, %c0_514, %c0_515] : memref<16x2x32xf32, #tpu.memory_space<vmem>>, vector<1x2x32xf32>
    %1228 = vector.shape_cast %1227 : vector<1x2x32xf32> to vector<2x32xf32>
    %1229 = vector.shape_cast %1216 : vector<2x32xf32> to vector<1x2x32xf32>
    tpu.vector_store %arg10[%1226, %c0_514, %c0_515], %1229 {strides = array<i32>} : memref<16x2x32xf32, #tpu.memory_space<vmem>>, vector<1x2x32xf32>,
    %c3_i32_516 = arith.constant 3 : i32
    %c0_517 = arith.constant 0 : index
    %c0_518 = arith.constant 0 : index
    %1230 = vector.load %arg11[%c0_517, %c0_518] : memref<2x64xf32, #tpu.memory_space<vmem>>, vector<2x64xf32>
    %cst_519 = arith.constant dense<0.000000e+00> : vector<2x256xf32>
    %1231 = tpu.matmul %1230, %1040, %cst_519 {dimension_numbers = #tpu.dot_dimension_numbers<[1], [0], [0], [1], [0, 0, 1, 1], [], []>} : vector<2x64xf32>, vector<64x256xf32>, vector<2x256xf32> -> vector<2x256xf32>
    %1232 = arith.index_cast %c3_i32_516 : i32 to index
    %c0_520 = arith.constant 0 : index
    %c0_521 = arith.constant 0 : index
    %1233 = vector.load %arg8[%1232, %c0_520, %c0_521] : memref<16x2x256xf32, #tpu.memory_space<vmem>>, vector<1x2x256xf32>
    %1234 = vector.shape_cast %1233 : vector<1x2x256xf32> to vector<2x256xf32>
    %c15_i32_522 = arith.constant 15 : i32
    %1235 = arith.subi %c15_i32_522, %c3_i32_516 : i32
    %1236 = arith.index_cast %1235 : i32 to index
    %c0_523 = arith.constant 0 : index
    %c0_524 = arith.constant 0 : index
    %1237 = vector.load %arg8[%1236, %c0_523, %c0_524] : memref<16x2x256xf32, #tpu.memory_space<vmem>>, vector<1x2x256xf32>
    %1238 = vector.shape_cast %1237 : vector<1x2x256xf32> to vector<2x256xf32>
    %1239 = vector.extract_strided_slice %1231 {offsets = [0, 0], sizes = [2, 128], strides = [1, 1]} : vector<2x256xf32> to vector<2x128xf32>
    %1240 = vector.extract_strided_slice %1234 {offsets = [0, 0], sizes = [2, 128], strides = [1, 1]} : vector<2x256xf32> to vector<2x128xf32>
    %1241 = arith.addf %1239, %1240 : vector<2x128xf32>
    %1242 = vector.extract_strided_slice %1231 {offsets = [0, 128], sizes = [2, 128], strides = [1, 1]} : vector<2x256xf32> to vector<2x128xf32>
    %1243 = vector.extract_strided_slice %1238 {offsets = [0, 128], sizes = [2, 128], strides = [1, 1]} : vector<2x256xf32> to vector<2x128xf32>
    %1244 = arith.addf %1242, %1243 : vector<2x128xf32>
    %c0_525 = arith.constant 0 : index
    %c0_526 = arith.constant 0 : index
    %1245 = vector.load %arg12[%c0_525, %c0_526] : memref<2x64xf32, #tpu.memory_space<vmem>>, vector<2x64xf32>
    %1246 = vector.extract_strided_slice %1245 {offsets = [0, 0], sizes = [2, 32], strides = [1, 1]} : vector<2x64xf32> to vector<2x32xf32>
    %1247 = vector.extract_strided_slice %1241 {offsets = [0, 0], sizes = [2, 96], strides = [1, 1]} : vector<2x128xf32> to vector<2x96xf32>
    %1248 = arith.negf %1247 : vector<2x96xf32>
    %1249 = math.exp %1248 : vector<2x96xf32>
    %cst_527 = arith.constant 1.000000e+00 : f32
    %1250 = vector.broadcast %cst_527 : f32 to vector<2x96xf32>
    %1251 = arith.addf %1250, %1249 : vector<2x96xf32>
    %1252 = arith.divf %1250, %1251 : vector<2x96xf32>
    %1253 = vector.extract_strided_slice %1241 {offsets = [0, 96], sizes = [2, 32], strides = [1, 1]} : vector<2x128xf32> to vector<2x32xf32>
    %1254 = math.tanh %1253 : vector<2x32xf32>
    %1255 = vector.extract_strided_slice %1252 {offsets = [0, 0], sizes = [2, 32], strides = [1, 1]} : vector<2x96xf32> to vector<2x32xf32>
    %1256 = vector.extract_strided_slice %1252 {offsets = [0, 32], sizes = [2, 32], strides = [1, 1]} : vector<2x96xf32> to vector<2x32xf32>
    %1257 = vector.extract_strided_slice %1252 {offsets = [0, 64], sizes = [2, 32], strides = [1, 1]} : vector<2x96xf32> to vector<2x32xf32>
    %1258 = arith.mulf %1256, %1246 : vector<2x32xf32>
    %1259 = arith.mulf %1255, %1254 : vector<2x32xf32>
    %1260 = arith.addf %1258, %1259 : vector<2x32xf32>
    %1261 = math.tanh %1260 : vector<2x32xf32>
    %1262 = arith.mulf %1257, %1261 : vector<2x32xf32>
    %1263 = vector.extract_strided_slice %1245 {offsets = [0, 32], sizes = [2, 32], strides = [1, 1]} : vector<2x64xf32> to vector<2x32xf32>
    %1264 = vector.extract_strided_slice %1244 {offsets = [0, 0], sizes = [2, 96], strides = [1, 1]} : vector<2x128xf32> to vector<2x96xf32>
    %1265 = arith.negf %1264 : vector<2x96xf32>
    %1266 = math.exp %1265 : vector<2x96xf32>
    %cst_528 = arith.constant 1.000000e+00 : f32
    %1267 = vector.broadcast %cst_528 : f32 to vector<2x96xf32>
    %1268 = arith.addf %1267, %1266 : vector<2x96xf32>
    %1269 = arith.divf %1267, %1268 : vector<2x96xf32>
    %1270 = vector.extract_strided_slice %1244 {offsets = [0, 96], sizes = [2, 32], strides = [1, 1]} : vector<2x128xf32> to vector<2x32xf32>
    %1271 = math.tanh %1270 : vector<2x32xf32>
    %1272 = vector.extract_strided_slice %1269 {offsets = [0, 0], sizes = [2, 32], strides = [1, 1]} : vector<2x96xf32> to vector<2x32xf32>
    %1273 = vector.extract_strided_slice %1269 {offsets = [0, 32], sizes = [2, 32], strides = [1, 1]} : vector<2x96xf32> to vector<2x32xf32>
    %1274 = vector.extract_strided_slice %1269 {offsets = [0, 64], sizes = [2, 32], strides = [1, 1]} : vector<2x96xf32> to vector<2x32xf32>
    %1275 = arith.mulf %1273, %1263 : vector<2x32xf32>
    %1276 = arith.mulf %1272, %1271 : vector<2x32xf32>
    %1277 = arith.addf %1275, %1276 : vector<2x32xf32>
    %1278 = math.tanh %1277 : vector<2x32xf32>
    %1279 = arith.mulf %1274, %1278 : vector<2x32xf32>
    %c0_529 = arith.constant 0 : index
    %c0_530 = arith.constant 0 : index
    %1280 = vector.load %arg11[%c0_529, %c0_530] : memref<2x64xf32, #tpu.memory_space<vmem>>, vector<2x32xf32>
    tpu.vector_store %arg11[%c0_529, %c0_530], %1262 {strides = array<i32>} : memref<2x64xf32, #tpu.memory_space<vmem>>, vector<2x32xf32>,
    %c0_531 = arith.constant 0 : index
    %c32_532 = arith.constant 32 : index
    %1281 = vector.load %arg11[%c0_531, %c32_532] : memref<2x64xf32, #tpu.memory_space<vmem>>, vector<2x32xf32>
    tpu.vector_store %arg11[%c0_531, %c32_532], %1279 {strides = array<i32>} : memref<2x64xf32, #tpu.memory_space<vmem>>, vector<2x32xf32>,
    %c0_533 = arith.constant 0 : index
    %c0_534 = arith.constant 0 : index
    %1282 = vector.load %arg12[%c0_533, %c0_534] : memref<2x64xf32, #tpu.memory_space<vmem>>, vector<2x32xf32>
    tpu.vector_store %arg12[%c0_533, %c0_534], %1260 {strides = array<i32>} : memref<2x64xf32, #tpu.memory_space<vmem>>, vector<2x32xf32>,
    %c0_535 = arith.constant 0 : index
    %c32_536 = arith.constant 32 : index
    %1283 = vector.load %arg12[%c0_535, %c32_536] : memref<2x64xf32, #tpu.memory_space<vmem>>, vector<2x32xf32>
    tpu.vector_store %arg12[%c0_535, %c32_536], %1277 {strides = array<i32>} : memref<2x64xf32, #tpu.memory_space<vmem>>, vector<2x32xf32>,
    %1284 = arith.index_cast %c3_i32_516 : i32 to index
    %c0_537 = arith.constant 0 : index
    %c0_538 = arith.constant 0 : index
    %1285 = vector.load %arg9[%1284, %c0_537, %c0_538] : memref<16x2x32xf32, #tpu.memory_space<vmem>>, vector<1x2x32xf32>
    %1286 = vector.shape_cast %1285 : vector<1x2x32xf32> to vector<2x32xf32>
    %1287 = vector.shape_cast %1262 : vector<2x32xf32> to vector<1x2x32xf32>
    tpu.vector_store %arg9[%1284, %c0_537, %c0_538], %1287 {strides = array<i32>} : memref<16x2x32xf32, #tpu.memory_space<vmem>>, vector<1x2x32xf32>,
    %c15_i32_539 = arith.constant 15 : i32
    %1288 = arith.subi %c15_i32_539, %c3_i32_516 : i32
    %1289 = arith.index_cast %1288 : i32 to index
    %c0_540 = arith.constant 0 : index
    %c0_541 = arith.constant 0 : index
    %1290 = vector.load %arg10[%1289, %c0_540, %c0_541] : memref<16x2x32xf32, #tpu.memory_space<vmem>>, vector<1x2x32xf32>
    %1291 = vector.shape_cast %1290 : vector<1x2x32xf32> to vector<2x32xf32>
    %1292 = vector.shape_cast %1279 : vector<2x32xf32> to vector<1x2x32xf32>
    tpu.vector_store %arg10[%1289, %c0_540, %c0_541], %1292 {strides = array<i32>} : memref<16x2x32xf32, #tpu.memory_space<vmem>>, vector<1x2x32xf32>,
    %c4_i32_542 = arith.constant 4 : i32
    %c0_543 = arith.constant 0 : index
    %c0_544 = arith.constant 0 : index
    %1293 = vector.load %arg11[%c0_543, %c0_544] : memref<2x64xf32, #tpu.memory_space<vmem>>, vector<2x64xf32>
    %cst_545 = arith.constant dense<0.000000e+00> : vector<2x256xf32>
    %1294 = tpu.matmul %1293, %1040, %cst_545 {dimension_numbers = #tpu.dot_dimension_numbers<[1], [0], [0], [1], [0, 0, 1, 1], [], []>} : vector<2x64xf32>, vector<64x256xf32>, vector<2x256xf32> -> vector<2x256xf32>
    %1295 = arith.index_cast %c4_i32_542 : i32 to index
    %c0_546 = arith.constant 0 : index
    %c0_547 = arith.constant 0 : index
    %1296 = vector.load %arg8[%1295, %c0_546, %c0_547] : memref<16x2x256xf32, #tpu.memory_space<vmem>>, vector<1x2x256xf32>
    %1297 = vector.shape_cast %1296 : vector<1x2x256xf32> to vector<2x256xf32>
    %c15_i32_548 = arith.constant 15 : i32
    %1298 = arith.subi %c15_i32_548, %c4_i32_542 : i32
    %1299 = arith.index_cast %1298 : i32 to index
    %c0_549 = arith.constant 0 : index
    %c0_550 = arith.constant 0 : index
    %1300 = vector.load %arg8[%1299, %c0_549, %c0_550] : memref<16x2x256xf32, #tpu.memory_space<vmem>>, vector<1x2x256xf32>
    %1301 = vector.shape_cast %1300 : vector<1x2x256xf32> to vector<2x256xf32>
    %1302 = vector.extract_strided_slice %1294 {offsets = [0, 0], sizes = [2, 128], strides = [1, 1]} : vector<2x256xf32> to vector<2x128xf32>
    %1303 = vector.extract_strided_slice %1297 {offsets = [0, 0], sizes = [2, 128], strides = [1, 1]} : vector<2x256xf32> to vector<2x128xf32>
    %1304 = arith.addf %1302, %1303 : vector<2x128xf32>
    %1305 = vector.extract_strided_slice %1294 {offsets = [0, 128], sizes = [2, 128], strides = [1, 1]} : vector<2x256xf32> to vector<2x128xf32>
    %1306 = vector.extract_strided_slice %1301 {offsets = [0, 128], sizes = [2, 128], strides = [1, 1]} : vector<2x256xf32> to vector<2x128xf32>
    %1307 = arith.addf %1305, %1306 : vector<2x128xf32>
    %c0_551 = arith.constant 0 : index
    %c0_552 = arith.constant 0 : index
    %1308 = vector.load %arg12[%c0_551, %c0_552] : memref<2x64xf32, #tpu.memory_space<vmem>>, vector<2x64xf32>
    %1309 = vector.extract_strided_slice %1308 {offsets = [0, 0], sizes = [2, 32], strides = [1, 1]} : vector<2x64xf32> to vector<2x32xf32>
    %1310 = vector.extract_strided_slice %1304 {offsets = [0, 0], sizes = [2, 96], strides = [1, 1]} : vector<2x128xf32> to vector<2x96xf32>
    %1311 = arith.negf %1310 : vector<2x96xf32>
    %1312 = math.exp %1311 : vector<2x96xf32>
    %cst_553 = arith.constant 1.000000e+00 : f32
    %1313 = vector.broadcast %cst_553 : f32 to vector<2x96xf32>
    %1314 = arith.addf %1313, %1312 : vector<2x96xf32>
    %1315 = arith.divf %1313, %1314 : vector<2x96xf32>
    %1316 = vector.extract_strided_slice %1304 {offsets = [0, 96], sizes = [2, 32], strides = [1, 1]} : vector<2x128xf32> to vector<2x32xf32>
    %1317 = math.tanh %1316 : vector<2x32xf32>
    %1318 = vector.extract_strided_slice %1315 {offsets = [0, 0], sizes = [2, 32], strides = [1, 1]} : vector<2x96xf32> to vector<2x32xf32>
    %1319 = vector.extract_strided_slice %1315 {offsets = [0, 32], sizes = [2, 32], strides = [1, 1]} : vector<2x96xf32> to vector<2x32xf32>
    %1320 = vector.extract_strided_slice %1315 {offsets = [0, 64], sizes = [2, 32], strides = [1, 1]} : vector<2x96xf32> to vector<2x32xf32>
    %1321 = arith.mulf %1319, %1309 : vector<2x32xf32>
    %1322 = arith.mulf %1318, %1317 : vector<2x32xf32>
    %1323 = arith.addf %1321, %1322 : vector<2x32xf32>
    %1324 = math.tanh %1323 : vector<2x32xf32>
    %1325 = arith.mulf %1320, %1324 : vector<2x32xf32>
    %1326 = vector.extract_strided_slice %1308 {offsets = [0, 32], sizes = [2, 32], strides = [1, 1]} : vector<2x64xf32> to vector<2x32xf32>
    %1327 = vector.extract_strided_slice %1307 {offsets = [0, 0], sizes = [2, 96], strides = [1, 1]} : vector<2x128xf32> to vector<2x96xf32>
    %1328 = arith.negf %1327 : vector<2x96xf32>
    %1329 = math.exp %1328 : vector<2x96xf32>
    %cst_554 = arith.constant 1.000000e+00 : f32
    %1330 = vector.broadcast %cst_554 : f32 to vector<2x96xf32>
    %1331 = arith.addf %1330, %1329 : vector<2x96xf32>
    %1332 = arith.divf %1330, %1331 : vector<2x96xf32>
    %1333 = vector.extract_strided_slice %1307 {offsets = [0, 96], sizes = [2, 32], strides = [1, 1]} : vector<2x128xf32> to vector<2x32xf32>
    %1334 = math.tanh %1333 : vector<2x32xf32>
    %1335 = vector.extract_strided_slice %1332 {offsets = [0, 0], sizes = [2, 32], strides = [1, 1]} : vector<2x96xf32> to vector<2x32xf32>
    %1336 = vector.extract_strided_slice %1332 {offsets = [0, 32], sizes = [2, 32], strides = [1, 1]} : vector<2x96xf32> to vector<2x32xf32>
    %1337 = vector.extract_strided_slice %1332 {offsets = [0, 64], sizes = [2, 32], strides = [1, 1]} : vector<2x96xf32> to vector<2x32xf32>
    %1338 = arith.mulf %1336, %1326 : vector<2x32xf32>
    %1339 = arith.mulf %1335, %1334 : vector<2x32xf32>
    %1340 = arith.addf %1338, %1339 : vector<2x32xf32>
    %1341 = math.tanh %1340 : vector<2x32xf32>
    %1342 = arith.mulf %1337, %1341 : vector<2x32xf32>
    %c0_555 = arith.constant 0 : index
    %c0_556 = arith.constant 0 : index
    %1343 = vector.load %arg11[%c0_555, %c0_556] : memref<2x64xf32, #tpu.memory_space<vmem>>, vector<2x32xf32>
    tpu.vector_store %arg11[%c0_555, %c0_556], %1325 {strides = array<i32>} : memref<2x64xf32, #tpu.memory_space<vmem>>, vector<2x32xf32>,
    %c0_557 = arith.constant 0 : index
    %c32_558 = arith.constant 32 : index
    %1344 = vector.load %arg11[%c0_557, %c32_558] : memref<2x64xf32, #tpu.memory_space<vmem>>, vector<2x32xf32>
    tpu.vector_store %arg11[%c0_557, %c32_558], %1342 {strides = array<i32>} : memref<2x64xf32, #tpu.memory_space<vmem>>, vector<2x32xf32>,
    %c0_559 = arith.constant 0 : index
    %c0_560 = arith.constant 0 : index
    %1345 = vector.load %arg12[%c0_559, %c0_560] : memref<2x64xf32, #tpu.memory_space<vmem>>, vector<2x32xf32>
    tpu.vector_store %arg12[%c0_559, %c0_560], %1323 {strides = array<i32>} : memref<2x64xf32, #tpu.memory_space<vmem>>, vector<2x32xf32>,
    %c0_561 = arith.constant 0 : index
    %c32_562 = arith.constant 32 : index
    %1346 = vector.load %arg12[%c0_561, %c32_562] : memref<2x64xf32, #tpu.memory_space<vmem>>, vector<2x32xf32>
    tpu.vector_store %arg12[%c0_561, %c32_562], %1340 {strides = array<i32>} : memref<2x64xf32, #tpu.memory_space<vmem>>, vector<2x32xf32>,
    %1347 = arith.index_cast %c4_i32_542 : i32 to index
    %c0_563 = arith.constant 0 : index
    %c0_564 = arith.constant 0 : index
    %1348 = vector.load %arg9[%1347, %c0_563, %c0_564] : memref<16x2x32xf32, #tpu.memory_space<vmem>>, vector<1x2x32xf32>
    %1349 = vector.shape_cast %1348 : vector<1x2x32xf32> to vector<2x32xf32>
    %1350 = vector.shape_cast %1325 : vector<2x32xf32> to vector<1x2x32xf32>
    tpu.vector_store %arg9[%1347, %c0_563, %c0_564], %1350 {strides = array<i32>} : memref<16x2x32xf32, #tpu.memory_space<vmem>>, vector<1x2x32xf32>,
    %c15_i32_565 = arith.constant 15 : i32
    %1351 = arith.subi %c15_i32_565, %c4_i32_542 : i32
    %1352 = arith.index_cast %1351 : i32 to index
    %c0_566 = arith.constant 0 : index
    %c0_567 = arith.constant 0 : index
    %1353 = vector.load %arg10[%1352, %c0_566, %c0_567] : memref<16x2x32xf32, #tpu.memory_space<vmem>>, vector<1x2x32xf32>
    %1354 = vector.shape_cast %1353 : vector<1x2x32xf32> to vector<2x32xf32>
    %1355 = vector.shape_cast %1342 : vector<2x32xf32> to vector<1x2x32xf32>
    tpu.vector_store %arg10[%1352, %c0_566, %c0_567], %1355 {strides = array<i32>} : memref<16x2x32xf32, #tpu.memory_space<vmem>>, vector<1x2x32xf32>,
    %c5_i32_568 = arith.constant 5 : i32
    %c0_569 = arith.constant 0 : index
    %c0_570 = arith.constant 0 : index
    %1356 = vector.load %arg11[%c0_569, %c0_570] : memref<2x64xf32, #tpu.memory_space<vmem>>, vector<2x64xf32>
    %cst_571 = arith.constant dense<0.000000e+00> : vector<2x256xf32>
    %1357 = tpu.matmul %1356, %1040, %cst_571 {dimension_numbers = #tpu.dot_dimension_numbers<[1], [0], [0], [1], [0, 0, 1, 1], [], []>} : vector<2x64xf32>, vector<64x256xf32>, vector<2x256xf32> -> vector<2x256xf32>
    %1358 = arith.index_cast %c5_i32_568 : i32 to index
    %c0_572 = arith.constant 0 : index
    %c0_573 = arith.constant 0 : index
    %1359 = vector.load %arg8[%1358, %c0_572, %c0_573] : memref<16x2x256xf32, #tpu.memory_space<vmem>>, vector<1x2x256xf32>
    %1360 = vector.shape_cast %1359 : vector<1x2x256xf32> to vector<2x256xf32>
    %c15_i32_574 = arith.constant 15 : i32
    %1361 = arith.subi %c15_i32_574, %c5_i32_568 : i32
    %1362 = arith.index_cast %1361 : i32 to index
    %c0_575 = arith.constant 0 : index
    %c0_576 = arith.constant 0 : index
    %1363 = vector.load %arg8[%1362, %c0_575, %c0_576] : memref<16x2x256xf32, #tpu.memory_space<vmem>>, vector<1x2x256xf32>
    %1364 = vector.shape_cast %1363 : vector<1x2x256xf32> to vector<2x256xf32>
    %1365 = vector.extract_strided_slice %1357 {offsets = [0, 0], sizes = [2, 128], strides = [1, 1]} : vector<2x256xf32> to vector<2x128xf32>
    %1366 = vector.extract_strided_slice %1360 {offsets = [0, 0], sizes = [2, 128], strides = [1, 1]} : vector<2x256xf32> to vector<2x128xf32>
    %1367 = arith.addf %1365, %1366 : vector<2x128xf32>
    %1368 = vector.extract_strided_slice %1357 {offsets = [0, 128], sizes = [2, 128], strides = [1, 1]} : vector<2x256xf32> to vector<2x128xf32>
    %1369 = vector.extract_strided_slice %1364 {offsets = [0, 128], sizes = [2, 128], strides = [1, 1]} : vector<2x256xf32> to vector<2x128xf32>
    %1370 = arith.addf %1368, %1369 : vector<2x128xf32>
    %c0_577 = arith.constant 0 : index
    %c0_578 = arith.constant 0 : index
    %1371 = vector.load %arg12[%c0_577, %c0_578] : memref<2x64xf32, #tpu.memory_space<vmem>>, vector<2x64xf32>
    %1372 = vector.extract_strided_slice %1371 {offsets = [0, 0], sizes = [2, 32], strides = [1, 1]} : vector<2x64xf32> to vector<2x32xf32>
    %1373 = vector.extract_strided_slice %1367 {offsets = [0, 0], sizes = [2, 96], strides = [1, 1]} : vector<2x128xf32> to vector<2x96xf32>
    %1374 = arith.negf %1373 : vector<2x96xf32>
    %1375 = math.exp %1374 : vector<2x96xf32>
    %cst_579 = arith.constant 1.000000e+00 : f32
    %1376 = vector.broadcast %cst_579 : f32 to vector<2x96xf32>
    %1377 = arith.addf %1376, %1375 : vector<2x96xf32>
    %1378 = arith.divf %1376, %1377 : vector<2x96xf32>
    %1379 = vector.extract_strided_slice %1367 {offsets = [0, 96], sizes = [2, 32], strides = [1, 1]} : vector<2x128xf32> to vector<2x32xf32>
    %1380 = math.tanh %1379 : vector<2x32xf32>
    %1381 = vector.extract_strided_slice %1378 {offsets = [0, 0], sizes = [2, 32], strides = [1, 1]} : vector<2x96xf32> to vector<2x32xf32>
    %1382 = vector.extract_strided_slice %1378 {offsets = [0, 32], sizes = [2, 32], strides = [1, 1]} : vector<2x96xf32> to vector<2x32xf32>
    %1383 = vector.extract_strided_slice %1378 {offsets = [0, 64], sizes = [2, 32], strides = [1, 1]} : vector<2x96xf32> to vector<2x32xf32>
    %1384 = arith.mulf %1382, %1372 : vector<2x32xf32>
    %1385 = arith.mulf %1381, %1380 : vector<2x32xf32>
    %1386 = arith.addf %1384, %1385 : vector<2x32xf32>
    %1387 = math.tanh %1386 : vector<2x32xf32>
    %1388 = arith.mulf %1383, %1387 : vector<2x32xf32>
    %1389 = vector.extract_strided_slice %1371 {offsets = [0, 32], sizes = [2, 32], strides = [1, 1]} : vector<2x64xf32> to vector<2x32xf32>
    %1390 = vector.extract_strided_slice %1370 {offsets = [0, 0], sizes = [2, 96], strides = [1, 1]} : vector<2x128xf32> to vector<2x96xf32>
    %1391 = arith.negf %1390 : vector<2x96xf32>
    %1392 = math.exp %1391 : vector<2x96xf32>
    %cst_580 = arith.constant 1.000000e+00 : f32
    %1393 = vector.broadcast %cst_580 : f32 to vector<2x96xf32>
    %1394 = arith.addf %1393, %1392 : vector<2x96xf32>
    %1395 = arith.divf %1393, %1394 : vector<2x96xf32>
    %1396 = vector.extract_strided_slice %1370 {offsets = [0, 96], sizes = [2, 32], strides = [1, 1]} : vector<2x128xf32> to vector<2x32xf32>
    %1397 = math.tanh %1396 : vector<2x32xf32>
    %1398 = vector.extract_strided_slice %1395 {offsets = [0, 0], sizes = [2, 32], strides = [1, 1]} : vector<2x96xf32> to vector<2x32xf32>
    %1399 = vector.extract_strided_slice %1395 {offsets = [0, 32], sizes = [2, 32], strides = [1, 1]} : vector<2x96xf32> to vector<2x32xf32>
    %1400 = vector.extract_strided_slice %1395 {offsets = [0, 64], sizes = [2, 32], strides = [1, 1]} : vector<2x96xf32> to vector<2x32xf32>
    %1401 = arith.mulf %1399, %1389 : vector<2x32xf32>
    %1402 = arith.mulf %1398, %1397 : vector<2x32xf32>
    %1403 = arith.addf %1401, %1402 : vector<2x32xf32>
    %1404 = math.tanh %1403 : vector<2x32xf32>
    %1405 = arith.mulf %1400, %1404 : vector<2x32xf32>
    %c0_581 = arith.constant 0 : index
    %c0_582 = arith.constant 0 : index
    %1406 = vector.load %arg11[%c0_581, %c0_582] : memref<2x64xf32, #tpu.memory_space<vmem>>, vector<2x32xf32>
    tpu.vector_store %arg11[%c0_581, %c0_582], %1388 {strides = array<i32>} : memref<2x64xf32, #tpu.memory_space<vmem>>, vector<2x32xf32>,
    %c0_583 = arith.constant 0 : index
    %c32_584 = arith.constant 32 : index
    %1407 = vector.load %arg11[%c0_583, %c32_584] : memref<2x64xf32, #tpu.memory_space<vmem>>, vector<2x32xf32>
    tpu.vector_store %arg11[%c0_583, %c32_584], %1405 {strides = array<i32>} : memref<2x64xf32, #tpu.memory_space<vmem>>, vector<2x32xf32>,
    %c0_585 = arith.constant 0 : index
    %c0_586 = arith.constant 0 : index
    %1408 = vector.load %arg12[%c0_585, %c0_586] : memref<2x64xf32, #tpu.memory_space<vmem>>, vector<2x32xf32>
    tpu.vector_store %arg12[%c0_585, %c0_586], %1386 {strides = array<i32>} : memref<2x64xf32, #tpu.memory_space<vmem>>, vector<2x32xf32>,
    %c0_587 = arith.constant 0 : index
    %c32_588 = arith.constant 32 : index
    %1409 = vector.load %arg12[%c0_587, %c32_588] : memref<2x64xf32, #tpu.memory_space<vmem>>, vector<2x32xf32>
    tpu.vector_store %arg12[%c0_587, %c32_588], %1403 {strides = array<i32>} : memref<2x64xf32, #tpu.memory_space<vmem>>, vector<2x32xf32>,
    %1410 = arith.index_cast %c5_i32_568 : i32 to index
    %c0_589 = arith.constant 0 : index
    %c0_590 = arith.constant 0 : index
    %1411 = vector.load %arg9[%1410, %c0_589, %c0_590] : memref<16x2x32xf32, #tpu.memory_space<vmem>>, vector<1x2x32xf32>
    %1412 = vector.shape_cast %1411 : vector<1x2x32xf32> to vector<2x32xf32>
    %1413 = vector.shape_cast %1388 : vector<2x32xf32> to vector<1x2x32xf32>
    tpu.vector_store %arg9[%1410, %c0_589, %c0_590], %1413 {strides = array<i32>} : memref<16x2x32xf32, #tpu.memory_space<vmem>>, vector<1x2x32xf32>,
    %c15_i32_591 = arith.constant 15 : i32
    %1414 = arith.subi %c15_i32_591, %c5_i32_568 : i32
    %1415 = arith.index_cast %1414 : i32 to index
    %c0_592 = arith.constant 0 : index
    %c0_593 = arith.constant 0 : index
    %1416 = vector.load %arg10[%1415, %c0_592, %c0_593] : memref<16x2x32xf32, #tpu.memory_space<vmem>>, vector<1x2x32xf32>
    %1417 = vector.shape_cast %1416 : vector<1x2x32xf32> to vector<2x32xf32>
    %1418 = vector.shape_cast %1405 : vector<2x32xf32> to vector<1x2x32xf32>
    tpu.vector_store %arg10[%1415, %c0_592, %c0_593], %1418 {strides = array<i32>} : memref<16x2x32xf32, #tpu.memory_space<vmem>>, vector<1x2x32xf32>,
    %c6_i32_594 = arith.constant 6 : i32
    %c0_595 = arith.constant 0 : index
    %c0_596 = arith.constant 0 : index
    %1419 = vector.load %arg11[%c0_595, %c0_596] : memref<2x64xf32, #tpu.memory_space<vmem>>, vector<2x64xf32>
    %cst_597 = arith.constant dense<0.000000e+00> : vector<2x256xf32>
    %1420 = tpu.matmul %1419, %1040, %cst_597 {dimension_numbers = #tpu.dot_dimension_numbers<[1], [0], [0], [1], [0, 0, 1, 1], [], []>} : vector<2x64xf32>, vector<64x256xf32>, vector<2x256xf32> -> vector<2x256xf32>
    %1421 = arith.index_cast %c6_i32_594 : i32 to index
    %c0_598 = arith.constant 0 : index
    %c0_599 = arith.constant 0 : index
    %1422 = vector.load %arg8[%1421, %c0_598, %c0_599] : memref<16x2x256xf32, #tpu.memory_space<vmem>>, vector<1x2x256xf32>
    %1423 = vector.shape_cast %1422 : vector<1x2x256xf32> to vector<2x256xf32>
    %c15_i32_600 = arith.constant 15 : i32
    %1424 = arith.subi %c15_i32_600, %c6_i32_594 : i32
    %1425 = arith.index_cast %1424 : i32 to index
    %c0_601 = arith.constant 0 : index
    %c0_602 = arith.constant 0 : index
    %1426 = vector.load %arg8[%1425, %c0_601, %c0_602] : memref<16x2x256xf32, #tpu.memory_space<vmem>>, vector<1x2x256xf32>
    %1427 = vector.shape_cast %1426 : vector<1x2x256xf32> to vector<2x256xf32>
    %1428 = vector.extract_strided_slice %1420 {offsets = [0, 0], sizes = [2, 128], strides = [1, 1]} : vector<2x256xf32> to vector<2x128xf32>
    %1429 = vector.extract_strided_slice %1423 {offsets = [0, 0], sizes = [2, 128], strides = [1, 1]} : vector<2x256xf32> to vector<2x128xf32>
    %1430 = arith.addf %1428, %1429 : vector<2x128xf32>
    %1431 = vector.extract_strided_slice %1420 {offsets = [0, 128], sizes = [2, 128], strides = [1, 1]} : vector<2x256xf32> to vector<2x128xf32>
    %1432 = vector.extract_strided_slice %1427 {offsets = [0, 128], sizes = [2, 128], strides = [1, 1]} : vector<2x256xf32> to vector<2x128xf32>
    %1433 = arith.addf %1431, %1432 : vector<2x128xf32>
    %c0_603 = arith.constant 0 : index
    %c0_604 = arith.constant 0 : index
    %1434 = vector.load %arg12[%c0_603, %c0_604] : memref<2x64xf32, #tpu.memory_space<vmem>>, vector<2x64xf32>
    %1435 = vector.extract_strided_slice %1434 {offsets = [0, 0], sizes = [2, 32], strides = [1, 1]} : vector<2x64xf32> to vector<2x32xf32>
    %1436 = vector.extract_strided_slice %1430 {offsets = [0, 0], sizes = [2, 96], strides = [1, 1]} : vector<2x128xf32> to vector<2x96xf32>
    %1437 = arith.negf %1436 : vector<2x96xf32>
    %1438 = math.exp %1437 : vector<2x96xf32>
    %cst_605 = arith.constant 1.000000e+00 : f32
    %1439 = vector.broadcast %cst_605 : f32 to vector<2x96xf32>
    %1440 = arith.addf %1439, %1438 : vector<2x96xf32>
    %1441 = arith.divf %1439, %1440 : vector<2x96xf32>
    %1442 = vector.extract_strided_slice %1430 {offsets = [0, 96], sizes = [2, 32], strides = [1, 1]} : vector<2x128xf32> to vector<2x32xf32>
    %1443 = math.tanh %1442 : vector<2x32xf32>
    %1444 = vector.extract_strided_slice %1441 {offsets = [0, 0], sizes = [2, 32], strides = [1, 1]} : vector<2x96xf32> to vector<2x32xf32>
    %1445 = vector.extract_strided_slice %1441 {offsets = [0, 32], sizes = [2, 32], strides = [1, 1]} : vector<2x96xf32> to vector<2x32xf32>
    %1446 = vector.extract_strided_slice %1441 {offsets = [0, 64], sizes = [2, 32], strides = [1, 1]} : vector<2x96xf32> to vector<2x32xf32>
    %1447 = arith.mulf %1445, %1435 : vector<2x32xf32>
    %1448 = arith.mulf %1444, %1443 : vector<2x32xf32>
    %1449 = arith.addf %1447, %1448 : vector<2x32xf32>
    %1450 = math.tanh %1449 : vector<2x32xf32>
    %1451 = arith.mulf %1446, %1450 : vector<2x32xf32>
    %1452 = vector.extract_strided_slice %1434 {offsets = [0, 32], sizes = [2, 32], strides = [1, 1]} : vector<2x64xf32> to vector<2x32xf32>
    %1453 = vector.extract_strided_slice %1433 {offsets = [0, 0], sizes = [2, 96], strides = [1, 1]} : vector<2x128xf32> to vector<2x96xf32>
    %1454 = arith.negf %1453 : vector<2x96xf32>
    %1455 = math.exp %1454 : vector<2x96xf32>
    %cst_606 = arith.constant 1.000000e+00 : f32
    %1456 = vector.broadcast %cst_606 : f32 to vector<2x96xf32>
    %1457 = arith.addf %1456, %1455 : vector<2x96xf32>
    %1458 = arith.divf %1456, %1457 : vector<2x96xf32>
    %1459 = vector.extract_strided_slice %1433 {offsets = [0, 96], sizes = [2, 32], strides = [1, 1]} : vector<2x128xf32> to vector<2x32xf32>
    %1460 = math.tanh %1459 : vector<2x32xf32>
    %1461 = vector.extract_strided_slice %1458 {offsets = [0, 0], sizes = [2, 32], strides = [1, 1]} : vector<2x96xf32> to vector<2x32xf32>
    %1462 = vector.extract_strided_slice %1458 {offsets = [0, 32], sizes = [2, 32], strides = [1, 1]} : vector<2x96xf32> to vector<2x32xf32>
    %1463 = vector.extract_strided_slice %1458 {offsets = [0, 64], sizes = [2, 32], strides = [1, 1]} : vector<2x96xf32> to vector<2x32xf32>
    %1464 = arith.mulf %1462, %1452 : vector<2x32xf32>
    %1465 = arith.mulf %1461, %1460 : vector<2x32xf32>
    %1466 = arith.addf %1464, %1465 : vector<2x32xf32>
    %1467 = math.tanh %1466 : vector<2x32xf32>
    %1468 = arith.mulf %1463, %1467 : vector<2x32xf32>
    %c0_607 = arith.constant 0 : index
    %c0_608 = arith.constant 0 : index
    %1469 = vector.load %arg11[%c0_607, %c0_608] : memref<2x64xf32, #tpu.memory_space<vmem>>, vector<2x32xf32>
    tpu.vector_store %arg11[%c0_607, %c0_608], %1451 {strides = array<i32>} : memref<2x64xf32, #tpu.memory_space<vmem>>, vector<2x32xf32>,
    %c0_609 = arith.constant 0 : index
    %c32_610 = arith.constant 32 : index
    %1470 = vector.load %arg11[%c0_609, %c32_610] : memref<2x64xf32, #tpu.memory_space<vmem>>, vector<2x32xf32>
    tpu.vector_store %arg11[%c0_609, %c32_610], %1468 {strides = array<i32>} : memref<2x64xf32, #tpu.memory_space<vmem>>, vector<2x32xf32>,
    %c0_611 = arith.constant 0 : index
    %c0_612 = arith.constant 0 : index
    %1471 = vector.load %arg12[%c0_611, %c0_612] : memref<2x64xf32, #tpu.memory_space<vmem>>, vector<2x32xf32>
    tpu.vector_store %arg12[%c0_611, %c0_612], %1449 {strides = array<i32>} : memref<2x64xf32, #tpu.memory_space<vmem>>, vector<2x32xf32>,
    %c0_613 = arith.constant 0 : index
    %c32_614 = arith.constant 32 : index
    %1472 = vector.load %arg12[%c0_613, %c32_614] : memref<2x64xf32, #tpu.memory_space<vmem>>, vector<2x32xf32>
    tpu.vector_store %arg12[%c0_613, %c32_614], %1466 {strides = array<i32>} : memref<2x64xf32, #tpu.memory_space<vmem>>, vector<2x32xf32>,
    %1473 = arith.index_cast %c6_i32_594 : i32 to index
    %c0_615 = arith.constant 0 : index
    %c0_616 = arith.constant 0 : index
    %1474 = vector.load %arg9[%1473, %c0_615, %c0_616] : memref<16x2x32xf32, #tpu.memory_space<vmem>>, vector<1x2x32xf32>
    %1475 = vector.shape_cast %1474 : vector<1x2x32xf32> to vector<2x32xf32>
    %1476 = vector.shape_cast %1451 : vector<2x32xf32> to vector<1x2x32xf32>
    tpu.vector_store %arg9[%1473, %c0_615, %c0_616], %1476 {strides = array<i32>} : memref<16x2x32xf32, #tpu.memory_space<vmem>>, vector<1x2x32xf32>,
    %c15_i32_617 = arith.constant 15 : i32
    %1477 = arith.subi %c15_i32_617, %c6_i32_594 : i32
    %1478 = arith.index_cast %1477 : i32 to index
    %c0_618 = arith.constant 0 : index
    %c0_619 = arith.constant 0 : index
    %1479 = vector.load %arg10[%1478, %c0_618, %c0_619] : memref<16x2x32xf32, #tpu.memory_space<vmem>>, vector<1x2x32xf32>
    %1480 = vector.shape_cast %1479 : vector<1x2x32xf32> to vector<2x32xf32>
    %1481 = vector.shape_cast %1468 : vector<2x32xf32> to vector<1x2x32xf32>
    tpu.vector_store %arg10[%1478, %c0_618, %c0_619], %1481 {strides = array<i32>} : memref<16x2x32xf32, #tpu.memory_space<vmem>>, vector<1x2x32xf32>,
    %c7_i32_620 = arith.constant 7 : i32
    %c0_621 = arith.constant 0 : index
    %c0_622 = arith.constant 0 : index
    %1482 = vector.load %arg11[%c0_621, %c0_622] : memref<2x64xf32, #tpu.memory_space<vmem>>, vector<2x64xf32>
    %cst_623 = arith.constant dense<0.000000e+00> : vector<2x256xf32>
    %1483 = tpu.matmul %1482, %1040, %cst_623 {dimension_numbers = #tpu.dot_dimension_numbers<[1], [0], [0], [1], [0, 0, 1, 1], [], []>} : vector<2x64xf32>, vector<64x256xf32>, vector<2x256xf32> -> vector<2x256xf32>
    %1484 = arith.index_cast %c7_i32_620 : i32 to index
    %c0_624 = arith.constant 0 : index
    %c0_625 = arith.constant 0 : index
    %1485 = vector.load %arg8[%1484, %c0_624, %c0_625] : memref<16x2x256xf32, #tpu.memory_space<vmem>>, vector<1x2x256xf32>
    %1486 = vector.shape_cast %1485 : vector<1x2x256xf32> to vector<2x256xf32>
    %c15_i32_626 = arith.constant 15 : i32
    %1487 = arith.subi %c15_i32_626, %c7_i32_620 : i32
    %1488 = arith.index_cast %1487 : i32 to index
    %c0_627 = arith.constant 0 : index
    %c0_628 = arith.constant 0 : index
    %1489 = vector.load %arg8[%1488, %c0_627, %c0_628] : memref<16x2x256xf32, #tpu.memory_space<vmem>>, vector<1x2x256xf32>
    %1490 = vector.shape_cast %1489 : vector<1x2x256xf32> to vector<2x256xf32>
    %1491 = vector.extract_strided_slice %1483 {offsets = [0, 0], sizes = [2, 128], strides = [1, 1]} : vector<2x256xf32> to vector<2x128xf32>
    %1492 = vector.extract_strided_slice %1486 {offsets = [0, 0], sizes = [2, 128], strides = [1, 1]} : vector<2x256xf32> to vector<2x128xf32>
    %1493 = arith.addf %1491, %1492 : vector<2x128xf32>
    %1494 = vector.extract_strided_slice %1483 {offsets = [0, 128], sizes = [2, 128], strides = [1, 1]} : vector<2x256xf32> to vector<2x128xf32>
    %1495 = vector.extract_strided_slice %1490 {offsets = [0, 128], sizes = [2, 128], strides = [1, 1]} : vector<2x256xf32> to vector<2x128xf32>
    %1496 = arith.addf %1494, %1495 : vector<2x128xf32>
    %c0_629 = arith.constant 0 : index
    %c0_630 = arith.constant 0 : index
    %1497 = vector.load %arg12[%c0_629, %c0_630] : memref<2x64xf32, #tpu.memory_space<vmem>>, vector<2x64xf32>
    %1498 = vector.extract_strided_slice %1497 {offsets = [0, 0], sizes = [2, 32], strides = [1, 1]} : vector<2x64xf32> to vector<2x32xf32>
    %1499 = vector.extract_strided_slice %1493 {offsets = [0, 0], sizes = [2, 96], strides = [1, 1]} : vector<2x128xf32> to vector<2x96xf32>
    %1500 = arith.negf %1499 : vector<2x96xf32>
    %1501 = math.exp %1500 : vector<2x96xf32>
    %cst_631 = arith.constant 1.000000e+00 : f32
    %1502 = vector.broadcast %cst_631 : f32 to vector<2x96xf32>
    %1503 = arith.addf %1502, %1501 : vector<2x96xf32>
    %1504 = arith.divf %1502, %1503 : vector<2x96xf32>
    %1505 = vector.extract_strided_slice %1493 {offsets = [0, 96], sizes = [2, 32], strides = [1, 1]} : vector<2x128xf32> to vector<2x32xf32>
    %1506 = math.tanh %1505 : vector<2x32xf32>
    %1507 = vector.extract_strided_slice %1504 {offsets = [0, 0], sizes = [2, 32], strides = [1, 1]} : vector<2x96xf32> to vector<2x32xf32>
    %1508 = vector.extract_strided_slice %1504 {offsets = [0, 32], sizes = [2, 32], strides = [1, 1]} : vector<2x96xf32> to vector<2x32xf32>
    %1509 = vector.extract_strided_slice %1504 {offsets = [0, 64], sizes = [2, 32], strides = [1, 1]} : vector<2x96xf32> to vector<2x32xf32>
    %1510 = arith.mulf %1508, %1498 : vector<2x32xf32>
    %1511 = arith.mulf %1507, %1506 : vector<2x32xf32>
    %1512 = arith.addf %1510, %1511 : vector<2x32xf32>
    %1513 = math.tanh %1512 : vector<2x32xf32>
    %1514 = arith.mulf %1509, %1513 : vector<2x32xf32>
    %1515 = vector.extract_strided_slice %1497 {offsets = [0, 32], sizes = [2, 32], strides = [1, 1]} : vector<2x64xf32> to vector<2x32xf32>
    %1516 = vector.extract_strided_slice %1496 {offsets = [0, 0], sizes = [2, 96], strides = [1, 1]} : vector<2x128xf32> to vector<2x96xf32>
    %1517 = arith.negf %1516 : vector<2x96xf32>
    %1518 = math.exp %1517 : vector<2x96xf32>
    %cst_632 = arith.constant 1.000000e+00 : f32
    %1519 = vector.broadcast %cst_632 : f32 to vector<2x96xf32>
    %1520 = arith.addf %1519, %1518 : vector<2x96xf32>
    %1521 = arith.divf %1519, %1520 : vector<2x96xf32>
    %1522 = vector.extract_strided_slice %1496 {offsets = [0, 96], sizes = [2, 32], strides = [1, 1]} : vector<2x128xf32> to vector<2x32xf32>
    %1523 = math.tanh %1522 : vector<2x32xf32>
    %1524 = vector.extract_strided_slice %1521 {offsets = [0, 0], sizes = [2, 32], strides = [1, 1]} : vector<2x96xf32> to vector<2x32xf32>
    %1525 = vector.extract_strided_slice %1521 {offsets = [0, 32], sizes = [2, 32], strides = [1, 1]} : vector<2x96xf32> to vector<2x32xf32>
    %1526 = vector.extract_strided_slice %1521 {offsets = [0, 64], sizes = [2, 32], strides = [1, 1]} : vector<2x96xf32> to vector<2x32xf32>
    %1527 = arith.mulf %1525, %1515 : vector<2x32xf32>
    %1528 = arith.mulf %1524, %1523 : vector<2x32xf32>
    %1529 = arith.addf %1527, %1528 : vector<2x32xf32>
    %1530 = math.tanh %1529 : vector<2x32xf32>
    %1531 = arith.mulf %1526, %1530 : vector<2x32xf32>
    %c0_633 = arith.constant 0 : index
    %c0_634 = arith.constant 0 : index
    %1532 = vector.load %arg11[%c0_633, %c0_634] : memref<2x64xf32, #tpu.memory_space<vmem>>, vector<2x32xf32>
    tpu.vector_store %arg11[%c0_633, %c0_634], %1514 {strides = array<i32>} : memref<2x64xf32, #tpu.memory_space<vmem>>, vector<2x32xf32>,
    %c0_635 = arith.constant 0 : index
    %c32_636 = arith.constant 32 : index
    %1533 = vector.load %arg11[%c0_635, %c32_636] : memref<2x64xf32, #tpu.memory_space<vmem>>, vector<2x32xf32>
    tpu.vector_store %arg11[%c0_635, %c32_636], %1531 {strides = array<i32>} : memref<2x64xf32, #tpu.memory_space<vmem>>, vector<2x32xf32>,
    %c0_637 = arith.constant 0 : index
    %c0_638 = arith.constant 0 : index
    %1534 = vector.load %arg12[%c0_637, %c0_638] : memref<2x64xf32, #tpu.memory_space<vmem>>, vector<2x32xf32>
    tpu.vector_store %arg12[%c0_637, %c0_638], %1512 {strides = array<i32>} : memref<2x64xf32, #tpu.memory_space<vmem>>, vector<2x32xf32>,
    %c0_639 = arith.constant 0 : index
    %c32_640 = arith.constant 32 : index
    %1535 = vector.load %arg12[%c0_639, %c32_640] : memref<2x64xf32, #tpu.memory_space<vmem>>, vector<2x32xf32>
    tpu.vector_store %arg12[%c0_639, %c32_640], %1529 {strides = array<i32>} : memref<2x64xf32, #tpu.memory_space<vmem>>, vector<2x32xf32>,
    %1536 = arith.index_cast %c7_i32_620 : i32 to index
    %c0_641 = arith.constant 0 : index
    %c0_642 = arith.constant 0 : index
    %1537 = vector.load %arg9[%1536, %c0_641, %c0_642] : memref<16x2x32xf32, #tpu.memory_space<vmem>>, vector<1x2x32xf32>
    %1538 = vector.shape_cast %1537 : vector<1x2x32xf32> to vector<2x32xf32>
    %1539 = vector.shape_cast %1514 : vector<2x32xf32> to vector<1x2x32xf32>
    tpu.vector_store %arg9[%1536, %c0_641, %c0_642], %1539 {strides = array<i32>} : memref<16x2x32xf32, #tpu.memory_space<vmem>>, vector<1x2x32xf32>,
    %c15_i32_643 = arith.constant 15 : i32
    %1540 = arith.subi %c15_i32_643, %c7_i32_620 : i32
    %1541 = arith.index_cast %1540 : i32 to index
    %c0_644 = arith.constant 0 : index
    %c0_645 = arith.constant 0 : index
    %1542 = vector.load %arg10[%1541, %c0_644, %c0_645] : memref<16x2x32xf32, #tpu.memory_space<vmem>>, vector<1x2x32xf32>
    %1543 = vector.shape_cast %1542 : vector<1x2x32xf32> to vector<2x32xf32>
    %1544 = vector.shape_cast %1531 : vector<2x32xf32> to vector<1x2x32xf32>
    tpu.vector_store %arg10[%1541, %c0_644, %c0_645], %1544 {strides = array<i32>} : memref<16x2x32xf32, #tpu.memory_space<vmem>>, vector<1x2x32xf32>,
    %c8_i32_646 = arith.constant 8 : i32
    %c0_647 = arith.constant 0 : index
    %c0_648 = arith.constant 0 : index
    %1545 = vector.load %arg11[%c0_647, %c0_648] : memref<2x64xf32, #tpu.memory_space<vmem>>, vector<2x64xf32>
    %cst_649 = arith.constant dense<0.000000e+00> : vector<2x256xf32>
    %1546 = tpu.matmul %1545, %1040, %cst_649 {dimension_numbers = #tpu.dot_dimension_numbers<[1], [0], [0], [1], [0, 0, 1, 1], [], []>} : vector<2x64xf32>, vector<64x256xf32>, vector<2x256xf32> -> vector<2x256xf32>
    %1547 = arith.index_cast %c8_i32_646 : i32 to index
    %c0_650 = arith.constant 0 : index
    %c0_651 = arith.constant 0 : index
    %1548 = vector.load %arg8[%1547, %c0_650, %c0_651] : memref<16x2x256xf32, #tpu.memory_space<vmem>>, vector<1x2x256xf32>
    %1549 = vector.shape_cast %1548 : vector<1x2x256xf32> to vector<2x256xf32>
    %c15_i32_652 = arith.constant 15 : i32
    %1550 = arith.subi %c15_i32_652, %c8_i32_646 : i32
    %1551 = arith.index_cast %1550 : i32 to index
    %c0_653 = arith.constant 0 : index
    %c0_654 = arith.constant 0 : index
    %1552 = vector.load %arg8[%1551, %c0_653, %c0_654] : memref<16x2x256xf32, #tpu.memory_space<vmem>>, vector<1x2x256xf32>
    %1553 = vector.shape_cast %1552 : vector<1x2x256xf32> to vector<2x256xf32>
    %1554 = vector.extract_strided_slice %1546 {offsets = [0, 0], sizes = [2, 128], strides = [1, 1]} : vector<2x256xf32> to vector<2x128xf32>
    %1555 = vector.extract_strided_slice %1549 {offsets = [0, 0], sizes = [2, 128], strides = [1, 1]} : vector<2x256xf32> to vector<2x128xf32>
    %1556 = arith.addf %1554, %1555 : vector<2x128xf32>
    %1557 = vector.extract_strided_slice %1546 {offsets = [0, 128], sizes = [2, 128], strides = [1, 1]} : vector<2x256xf32> to vector<2x128xf32>
    %1558 = vector.extract_strided_slice %1553 {offsets = [0, 128], sizes = [2, 128], strides = [1, 1]} : vector<2x256xf32> to vector<2x128xf32>
    %1559 = arith.addf %1557, %1558 : vector<2x128xf32>
    %c0_655 = arith.constant 0 : index
    %c0_656 = arith.constant 0 : index
    %1560 = vector.load %arg12[%c0_655, %c0_656] : memref<2x64xf32, #tpu.memory_space<vmem>>, vector<2x64xf32>
    %1561 = vector.extract_strided_slice %1560 {offsets = [0, 0], sizes = [2, 32], strides = [1, 1]} : vector<2x64xf32> to vector<2x32xf32>
    %1562 = vector.extract_strided_slice %1556 {offsets = [0, 0], sizes = [2, 96], strides = [1, 1]} : vector<2x128xf32> to vector<2x96xf32>
    %1563 = arith.negf %1562 : vector<2x96xf32>
    %1564 = math.exp %1563 : vector<2x96xf32>
    %cst_657 = arith.constant 1.000000e+00 : f32
    %1565 = vector.broadcast %cst_657 : f32 to vector<2x96xf32>
    %1566 = arith.addf %1565, %1564 : vector<2x96xf32>
    %1567 = arith.divf %1565, %1566 : vector<2x96xf32>
    %1568 = vector.extract_strided_slice %1556 {offsets = [0, 96], sizes = [2, 32], strides = [1, 1]} : vector<2x128xf32> to vector<2x32xf32>
    %1569 = math.tanh %1568 : vector<2x32xf32>
    %1570 = vector.extract_strided_slice %1567 {offsets = [0, 0], sizes = [2, 32], strides = [1, 1]} : vector<2x96xf32> to vector<2x32xf32>
    %1571 = vector.extract_strided_slice %1567 {offsets = [0, 32], sizes = [2, 32], strides = [1, 1]} : vector<2x96xf32> to vector<2x32xf32>
    %1572 = vector.extract_strided_slice %1567 {offsets = [0, 64], sizes = [2, 32], strides = [1, 1]} : vector<2x96xf32> to vector<2x32xf32>
    %1573 = arith.mulf %1571, %1561 : vector<2x32xf32>
    %1574 = arith.mulf %1570, %1569 : vector<2x32xf32>
    %1575 = arith.addf %1573, %1574 : vector<2x32xf32>
    %1576 = math.tanh %1575 : vector<2x32xf32>
    %1577 = arith.mulf %1572, %1576 : vector<2x32xf32>
    %1578 = vector.extract_strided_slice %1560 {offsets = [0, 32], sizes = [2, 32], strides = [1, 1]} : vector<2x64xf32> to vector<2x32xf32>
    %1579 = vector.extract_strided_slice %1559 {offsets = [0, 0], sizes = [2, 96], strides = [1, 1]} : vector<2x128xf32> to vector<2x96xf32>
    %1580 = arith.negf %1579 : vector<2x96xf32>
    %1581 = math.exp %1580 : vector<2x96xf32>
    %cst_658 = arith.constant 1.000000e+00 : f32
    %1582 = vector.broadcast %cst_658 : f32 to vector<2x96xf32>
    %1583 = arith.addf %1582, %1581 : vector<2x96xf32>
    %1584 = arith.divf %1582, %1583 : vector<2x96xf32>
    %1585 = vector.extract_strided_slice %1559 {offsets = [0, 96], sizes = [2, 32], strides = [1, 1]} : vector<2x128xf32> to vector<2x32xf32>
    %1586 = math.tanh %1585 : vector<2x32xf32>
    %1587 = vector.extract_strided_slice %1584 {offsets = [0, 0], sizes = [2, 32], strides = [1, 1]} : vector<2x96xf32> to vector<2x32xf32>
    %1588 = vector.extract_strided_slice %1584 {offsets = [0, 32], sizes = [2, 32], strides = [1, 1]} : vector<2x96xf32> to vector<2x32xf32>
    %1589 = vector.extract_strided_slice %1584 {offsets = [0, 64], sizes = [2, 32], strides = [1, 1]} : vector<2x96xf32> to vector<2x32xf32>
    %1590 = arith.mulf %1588, %1578 : vector<2x32xf32>
    %1591 = arith.mulf %1587, %1586 : vector<2x32xf32>
    %1592 = arith.addf %1590, %1591 : vector<2x32xf32>
    %1593 = math.tanh %1592 : vector<2x32xf32>
    %1594 = arith.mulf %1589, %1593 : vector<2x32xf32>
    %c0_659 = arith.constant 0 : index
    %c0_660 = arith.constant 0 : index
    %1595 = vector.load %arg11[%c0_659, %c0_660] : memref<2x64xf32, #tpu.memory_space<vmem>>, vector<2x32xf32>
    tpu.vector_store %arg11[%c0_659, %c0_660], %1577 {strides = array<i32>} : memref<2x64xf32, #tpu.memory_space<vmem>>, vector<2x32xf32>,
    %c0_661 = arith.constant 0 : index
    %c32_662 = arith.constant 32 : index
    %1596 = vector.load %arg11[%c0_661, %c32_662] : memref<2x64xf32, #tpu.memory_space<vmem>>, vector<2x32xf32>
    tpu.vector_store %arg11[%c0_661, %c32_662], %1594 {strides = array<i32>} : memref<2x64xf32, #tpu.memory_space<vmem>>, vector<2x32xf32>,
    %c0_663 = arith.constant 0 : index
    %c0_664 = arith.constant 0 : index
    %1597 = vector.load %arg12[%c0_663, %c0_664] : memref<2x64xf32, #tpu.memory_space<vmem>>, vector<2x32xf32>
    tpu.vector_store %arg12[%c0_663, %c0_664], %1575 {strides = array<i32>} : memref<2x64xf32, #tpu.memory_space<vmem>>, vector<2x32xf32>,
    %c0_665 = arith.constant 0 : index
    %c32_666 = arith.constant 32 : index
    %1598 = vector.load %arg12[%c0_665, %c32_666] : memref<2x64xf32, #tpu.memory_space<vmem>>, vector<2x32xf32>
    tpu.vector_store %arg12[%c0_665, %c32_666], %1592 {strides = array<i32>} : memref<2x64xf32, #tpu.memory_space<vmem>>, vector<2x32xf32>,
    %1599 = arith.index_cast %c8_i32_646 : i32 to index
    %c0_667 = arith.constant 0 : index
    %c0_668 = arith.constant 0 : index
    %1600 = vector.load %arg9[%1599, %c0_667, %c0_668] : memref<16x2x32xf32, #tpu.memory_space<vmem>>, vector<1x2x32xf32>
    %1601 = vector.shape_cast %1600 : vector<1x2x32xf32> to vector<2x32xf32>
    %1602 = vector.shape_cast %1577 : vector<2x32xf32> to vector<1x2x32xf32>
    tpu.vector_store %arg9[%1599, %c0_667, %c0_668], %1602 {strides = array<i32>} : memref<16x2x32xf32, #tpu.memory_space<vmem>>, vector<1x2x32xf32>,
    %c15_i32_669 = arith.constant 15 : i32
    %1603 = arith.subi %c15_i32_669, %c8_i32_646 : i32
    %1604 = arith.index_cast %1603 : i32 to index
    %c0_670 = arith.constant 0 : index
    %c0_671 = arith.constant 0 : index
    %1605 = vector.load %arg10[%1604, %c0_670, %c0_671] : memref<16x2x32xf32, #tpu.memory_space<vmem>>, vector<1x2x32xf32>
    %1606 = vector.shape_cast %1605 : vector<1x2x32xf32> to vector<2x32xf32>
    %1607 = vector.shape_cast %1594 : vector<2x32xf32> to vector<1x2x32xf32>
    tpu.vector_store %arg10[%1604, %c0_670, %c0_671], %1607 {strides = array<i32>} : memref<16x2x32xf32, #tpu.memory_space<vmem>>, vector<1x2x32xf32>,
    %c9_i32_672 = arith.constant 9 : i32
    %c0_673 = arith.constant 0 : index
    %c0_674 = arith.constant 0 : index
    %1608 = vector.load %arg11[%c0_673, %c0_674] : memref<2x64xf32, #tpu.memory_space<vmem>>, vector<2x64xf32>
    %cst_675 = arith.constant dense<0.000000e+00> : vector<2x256xf32>
    %1609 = tpu.matmul %1608, %1040, %cst_675 {dimension_numbers = #tpu.dot_dimension_numbers<[1], [0], [0], [1], [0, 0, 1, 1], [], []>} : vector<2x64xf32>, vector<64x256xf32>, vector<2x256xf32> -> vector<2x256xf32>
    %1610 = arith.index_cast %c9_i32_672 : i32 to index
    %c0_676 = arith.constant 0 : index
    %c0_677 = arith.constant 0 : index
    %1611 = vector.load %arg8[%1610, %c0_676, %c0_677] : memref<16x2x256xf32, #tpu.memory_space<vmem>>, vector<1x2x256xf32>
    %1612 = vector.shape_cast %1611 : vector<1x2x256xf32> to vector<2x256xf32>
    %c15_i32_678 = arith.constant 15 : i32
    %1613 = arith.subi %c15_i32_678, %c9_i32_672 : i32
    %1614 = arith.index_cast %1613 : i32 to index
    %c0_679 = arith.constant 0 : index
    %c0_680 = arith.constant 0 : index
    %1615 = vector.load %arg8[%1614, %c0_679, %c0_680] : memref<16x2x256xf32, #tpu.memory_space<vmem>>, vector<1x2x256xf32>
    %1616 = vector.shape_cast %1615 : vector<1x2x256xf32> to vector<2x256xf32>
    %1617 = vector.extract_strided_slice %1609 {offsets = [0, 0], sizes = [2, 128], strides = [1, 1]} : vector<2x256xf32> to vector<2x128xf32>
    %1618 = vector.extract_strided_slice %1612 {offsets = [0, 0], sizes = [2, 128], strides = [1, 1]} : vector<2x256xf32> to vector<2x128xf32>
    %1619 = arith.addf %1617, %1618 : vector<2x128xf32>
    %1620 = vector.extract_strided_slice %1609 {offsets = [0, 128], sizes = [2, 128], strides = [1, 1]} : vector<2x256xf32> to vector<2x128xf32>
    %1621 = vector.extract_strided_slice %1616 {offsets = [0, 128], sizes = [2, 128], strides = [1, 1]} : vector<2x256xf32> to vector<2x128xf32>
    %1622 = arith.addf %1620, %1621 : vector<2x128xf32>
    %c0_681 = arith.constant 0 : index
    %c0_682 = arith.constant 0 : index
    %1623 = vector.load %arg12[%c0_681, %c0_682] : memref<2x64xf32, #tpu.memory_space<vmem>>, vector<2x64xf32>
    %1624 = vector.extract_strided_slice %1623 {offsets = [0, 0], sizes = [2, 32], strides = [1, 1]} : vector<2x64xf32> to vector<2x32xf32>
    %1625 = vector.extract_strided_slice %1619 {offsets = [0, 0], sizes = [2, 96], strides = [1, 1]} : vector<2x128xf32> to vector<2x96xf32>
    %1626 = arith.negf %1625 : vector<2x96xf32>
    %1627 = math.exp %1626 : vector<2x96xf32>
    %cst_683 = arith.constant 1.000000e+00 : f32
    %1628 = vector.broadcast %cst_683 : f32 to vector<2x96xf32>
    %1629 = arith.addf %1628, %1627 : vector<2x96xf32>
    %1630 = arith.divf %1628, %1629 : vector<2x96xf32>
    %1631 = vector.extract_strided_slice %1619 {offsets = [0, 96], sizes = [2, 32], strides = [1, 1]} : vector<2x128xf32> to vector<2x32xf32>
    %1632 = math.tanh %1631 : vector<2x32xf32>
    %1633 = vector.extract_strided_slice %1630 {offsets = [0, 0], sizes = [2, 32], strides = [1, 1]} : vector<2x96xf32> to vector<2x32xf32>
    %1634 = vector.extract_strided_slice %1630 {offsets = [0, 32], sizes = [2, 32], strides = [1, 1]} : vector<2x96xf32> to vector<2x32xf32>
    %1635 = vector.extract_strided_slice %1630 {offsets = [0, 64], sizes = [2, 32], strides = [1, 1]} : vector<2x96xf32> to vector<2x32xf32>
    %1636 = arith.mulf %1634, %1624 : vector<2x32xf32>
    %1637 = arith.mulf %1633, %1632 : vector<2x32xf32>
    %1638 = arith.addf %1636, %1637 : vector<2x32xf32>
    %1639 = math.tanh %1638 : vector<2x32xf32>
    %1640 = arith.mulf %1635, %1639 : vector<2x32xf32>
    %1641 = vector.extract_strided_slice %1623 {offsets = [0, 32], sizes = [2, 32], strides = [1, 1]} : vector<2x64xf32> to vector<2x32xf32>
    %1642 = vector.extract_strided_slice %1622 {offsets = [0, 0], sizes = [2, 96], strides = [1, 1]} : vector<2x128xf32> to vector<2x96xf32>
    %1643 = arith.negf %1642 : vector<2x96xf32>
    %1644 = math.exp %1643 : vector<2x96xf32>
    %cst_684 = arith.constant 1.000000e+00 : f32
    %1645 = vector.broadcast %cst_684 : f32 to vector<2x96xf32>
    %1646 = arith.addf %1645, %1644 : vector<2x96xf32>
    %1647 = arith.divf %1645, %1646 : vector<2x96xf32>
    %1648 = vector.extract_strided_slice %1622 {offsets = [0, 96], sizes = [2, 32], strides = [1, 1]} : vector<2x128xf32> to vector<2x32xf32>
    %1649 = math.tanh %1648 : vector<2x32xf32>
    %1650 = vector.extract_strided_slice %1647 {offsets = [0, 0], sizes = [2, 32], strides = [1, 1]} : vector<2x96xf32> to vector<2x32xf32>
    %1651 = vector.extract_strided_slice %1647 {offsets = [0, 32], sizes = [2, 32], strides = [1, 1]} : vector<2x96xf32> to vector<2x32xf32>
    %1652 = vector.extract_strided_slice %1647 {offsets = [0, 64], sizes = [2, 32], strides = [1, 1]} : vector<2x96xf32> to vector<2x32xf32>
    %1653 = arith.mulf %1651, %1641 : vector<2x32xf32>
    %1654 = arith.mulf %1650, %1649 : vector<2x32xf32>
    %1655 = arith.addf %1653, %1654 : vector<2x32xf32>
    %1656 = math.tanh %1655 : vector<2x32xf32>
    %1657 = arith.mulf %1652, %1656 : vector<2x32xf32>
    %c0_685 = arith.constant 0 : index
    %c0_686 = arith.constant 0 : index
    %1658 = vector.load %arg11[%c0_685, %c0_686] : memref<2x64xf32, #tpu.memory_space<vmem>>, vector<2x32xf32>
    tpu.vector_store %arg11[%c0_685, %c0_686], %1640 {strides = array<i32>} : memref<2x64xf32, #tpu.memory_space<vmem>>, vector<2x32xf32>,
    %c0_687 = arith.constant 0 : index
    %c32_688 = arith.constant 32 : index
    %1659 = vector.load %arg11[%c0_687, %c32_688] : memref<2x64xf32, #tpu.memory_space<vmem>>, vector<2x32xf32>
    tpu.vector_store %arg11[%c0_687, %c32_688], %1657 {strides = array<i32>} : memref<2x64xf32, #tpu.memory_space<vmem>>, vector<2x32xf32>,
    %c0_689 = arith.constant 0 : index
    %c0_690 = arith.constant 0 : index
    %1660 = vector.load %arg12[%c0_689, %c0_690] : memref<2x64xf32, #tpu.memory_space<vmem>>, vector<2x32xf32>
    tpu.vector_store %arg12[%c0_689, %c0_690], %1638 {strides = array<i32>} : memref<2x64xf32, #tpu.memory_space<vmem>>, vector<2x32xf32>,
    %c0_691 = arith.constant 0 : index
    %c32_692 = arith.constant 32 : index
    %1661 = vector.load %arg12[%c0_691, %c32_692] : memref<2x64xf32, #tpu.memory_space<vmem>>, vector<2x32xf32>
    tpu.vector_store %arg12[%c0_691, %c32_692], %1655 {strides = array<i32>} : memref<2x64xf32, #tpu.memory_space<vmem>>, vector<2x32xf32>,
    %1662 = arith.index_cast %c9_i32_672 : i32 to index
    %c0_693 = arith.constant 0 : index
    %c0_694 = arith.constant 0 : index
    %1663 = vector.load %arg9[%1662, %c0_693, %c0_694] : memref<16x2x32xf32, #tpu.memory_space<vmem>>, vector<1x2x32xf32>
    %1664 = vector.shape_cast %1663 : vector<1x2x32xf32> to vector<2x32xf32>
    %1665 = vector.shape_cast %1640 : vector<2x32xf32> to vector<1x2x32xf32>
    tpu.vector_store %arg9[%1662, %c0_693, %c0_694], %1665 {strides = array<i32>} : memref<16x2x32xf32, #tpu.memory_space<vmem>>, vector<1x2x32xf32>,
    %c15_i32_695 = arith.constant 15 : i32
    %1666 = arith.subi %c15_i32_695, %c9_i32_672 : i32
    %1667 = arith.index_cast %1666 : i32 to index
    %c0_696 = arith.constant 0 : index
    %c0_697 = arith.constant 0 : index
    %1668 = vector.load %arg10[%1667, %c0_696, %c0_697] : memref<16x2x32xf32, #tpu.memory_space<vmem>>, vector<1x2x32xf32>
    %1669 = vector.shape_cast %1668 : vector<1x2x32xf32> to vector<2x32xf32>
    %1670 = vector.shape_cast %1657 : vector<2x32xf32> to vector<1x2x32xf32>
    tpu.vector_store %arg10[%1667, %c0_696, %c0_697], %1670 {strides = array<i32>} : memref<16x2x32xf32, #tpu.memory_space<vmem>>, vector<1x2x32xf32>,
    %c10_i32_698 = arith.constant 10 : i32
    %c0_699 = arith.constant 0 : index
    %c0_700 = arith.constant 0 : index
    %1671 = vector.load %arg11[%c0_699, %c0_700] : memref<2x64xf32, #tpu.memory_space<vmem>>, vector<2x64xf32>
    %cst_701 = arith.constant dense<0.000000e+00> : vector<2x256xf32>
    %1672 = tpu.matmul %1671, %1040, %cst_701 {dimension_numbers = #tpu.dot_dimension_numbers<[1], [0], [0], [1], [0, 0, 1, 1], [], []>} : vector<2x64xf32>, vector<64x256xf32>, vector<2x256xf32> -> vector<2x256xf32>
    %1673 = arith.index_cast %c10_i32_698 : i32 to index
    %c0_702 = arith.constant 0 : index
    %c0_703 = arith.constant 0 : index
    %1674 = vector.load %arg8[%1673, %c0_702, %c0_703] : memref<16x2x256xf32, #tpu.memory_space<vmem>>, vector<1x2x256xf32>
    %1675 = vector.shape_cast %1674 : vector<1x2x256xf32> to vector<2x256xf32>
    %c15_i32_704 = arith.constant 15 : i32
    %1676 = arith.subi %c15_i32_704, %c10_i32_698 : i32
    %1677 = arith.index_cast %1676 : i32 to index
    %c0_705 = arith.constant 0 : index
    %c0_706 = arith.constant 0 : index
    %1678 = vector.load %arg8[%1677, %c0_705, %c0_706] : memref<16x2x256xf32, #tpu.memory_space<vmem>>, vector<1x2x256xf32>
    %1679 = vector.shape_cast %1678 : vector<1x2x256xf32> to vector<2x256xf32>
    %1680 = vector.extract_strided_slice %1672 {offsets = [0, 0], sizes = [2, 128], strides = [1, 1]} : vector<2x256xf32> to vector<2x128xf32>
    %1681 = vector.extract_strided_slice %1675 {offsets = [0, 0], sizes = [2, 128], strides = [1, 1]} : vector<2x256xf32> to vector<2x128xf32>
    %1682 = arith.addf %1680, %1681 : vector<2x128xf32>
    %1683 = vector.extract_strided_slice %1672 {offsets = [0, 128], sizes = [2, 128], strides = [1, 1]} : vector<2x256xf32> to vector<2x128xf32>
    %1684 = vector.extract_strided_slice %1679 {offsets = [0, 128], sizes = [2, 128], strides = [1, 1]} : vector<2x256xf32> to vector<2x128xf32>
    %1685 = arith.addf %1683, %1684 : vector<2x128xf32>
    %c0_707 = arith.constant 0 : index
    %c0_708 = arith.constant 0 : index
    %1686 = vector.load %arg12[%c0_707, %c0_708] : memref<2x64xf32, #tpu.memory_space<vmem>>, vector<2x64xf32>
    %1687 = vector.extract_strided_slice %1686 {offsets = [0, 0], sizes = [2, 32], strides = [1, 1]} : vector<2x64xf32> to vector<2x32xf32>
    %1688 = vector.extract_strided_slice %1682 {offsets = [0, 0], sizes = [2, 96], strides = [1, 1]} : vector<2x128xf32> to vector<2x96xf32>
    %1689 = arith.negf %1688 : vector<2x96xf32>
    %1690 = math.exp %1689 : vector<2x96xf32>
    %cst_709 = arith.constant 1.000000e+00 : f32
    %1691 = vector.broadcast %cst_709 : f32 to vector<2x96xf32>
    %1692 = arith.addf %1691, %1690 : vector<2x96xf32>
    %1693 = arith.divf %1691, %1692 : vector<2x96xf32>
    %1694 = vector.extract_strided_slice %1682 {offsets = [0, 96], sizes = [2, 32], strides = [1, 1]} : vector<2x128xf32> to vector<2x32xf32>
    %1695 = math.tanh %1694 : vector<2x32xf32>
    %1696 = vector.extract_strided_slice %1693 {offsets = [0, 0], sizes = [2, 32], strides = [1, 1]} : vector<2x96xf32> to vector<2x32xf32>
    %1697 = vector.extract_strided_slice %1693 {offsets = [0, 32], sizes = [2, 32], strides = [1, 1]} : vector<2x96xf32> to vector<2x32xf32>
    %1698 = vector.extract_strided_slice %1693 {offsets = [0, 64], sizes = [2, 32], strides = [1, 1]} : vector<2x96xf32> to vector<2x32xf32>
    %1699 = arith.mulf %1697, %1687 : vector<2x32xf32>
    %1700 = arith.mulf %1696, %1695 : vector<2x32xf32>
    %1701 = arith.addf %1699, %1700 : vector<2x32xf32>
    %1702 = math.tanh %1701 : vector<2x32xf32>
    %1703 = arith.mulf %1698, %1702 : vector<2x32xf32>
    %1704 = vector.extract_strided_slice %1686 {offsets = [0, 32], sizes = [2, 32], strides = [1, 1]} : vector<2x64xf32> to vector<2x32xf32>
    %1705 = vector.extract_strided_slice %1685 {offsets = [0, 0], sizes = [2, 96], strides = [1, 1]} : vector<2x128xf32> to vector<2x96xf32>
    %1706 = arith.negf %1705 : vector<2x96xf32>
    %1707 = math.exp %1706 : vector<2x96xf32>
    %cst_710 = arith.constant 1.000000e+00 : f32
    %1708 = vector.broadcast %cst_710 : f32 to vector<2x96xf32>
    %1709 = arith.addf %1708, %1707 : vector<2x96xf32>
    %1710 = arith.divf %1708, %1709 : vector<2x96xf32>
    %1711 = vector.extract_strided_slice %1685 {offsets = [0, 96], sizes = [2, 32], strides = [1, 1]} : vector<2x128xf32> to vector<2x32xf32>
    %1712 = math.tanh %1711 : vector<2x32xf32>
    %1713 = vector.extract_strided_slice %1710 {offsets = [0, 0], sizes = [2, 32], strides = [1, 1]} : vector<2x96xf32> to vector<2x32xf32>
    %1714 = vector.extract_strided_slice %1710 {offsets = [0, 32], sizes = [2, 32], strides = [1, 1]} : vector<2x96xf32> to vector<2x32xf32>
    %1715 = vector.extract_strided_slice %1710 {offsets = [0, 64], sizes = [2, 32], strides = [1, 1]} : vector<2x96xf32> to vector<2x32xf32>
    %1716 = arith.mulf %1714, %1704 : vector<2x32xf32>
    %1717 = arith.mulf %1713, %1712 : vector<2x32xf32>
    %1718 = arith.addf %1716, %1717 : vector<2x32xf32>
    %1719 = math.tanh %1718 : vector<2x32xf32>
    %1720 = arith.mulf %1715, %1719 : vector<2x32xf32>
    %c0_711 = arith.constant 0 : index
    %c0_712 = arith.constant 0 : index
    %1721 = vector.load %arg11[%c0_711, %c0_712] : memref<2x64xf32, #tpu.memory_space<vmem>>, vector<2x32xf32>
    tpu.vector_store %arg11[%c0_711, %c0_712], %1703 {strides = array<i32>} : memref<2x64xf32, #tpu.memory_space<vmem>>, vector<2x32xf32>,
    %c0_713 = arith.constant 0 : index
    %c32_714 = arith.constant 32 : index
    %1722 = vector.load %arg11[%c0_713, %c32_714] : memref<2x64xf32, #tpu.memory_space<vmem>>, vector<2x32xf32>
    tpu.vector_store %arg11[%c0_713, %c32_714], %1720 {strides = array<i32>} : memref<2x64xf32, #tpu.memory_space<vmem>>, vector<2x32xf32>,
    %c0_715 = arith.constant 0 : index
    %c0_716 = arith.constant 0 : index
    %1723 = vector.load %arg12[%c0_715, %c0_716] : memref<2x64xf32, #tpu.memory_space<vmem>>, vector<2x32xf32>
    tpu.vector_store %arg12[%c0_715, %c0_716], %1701 {strides = array<i32>} : memref<2x64xf32, #tpu.memory_space<vmem>>, vector<2x32xf32>,
    %c0_717 = arith.constant 0 : index
    %c32_718 = arith.constant 32 : index
    %1724 = vector.load %arg12[%c0_717, %c32_718] : memref<2x64xf32, #tpu.memory_space<vmem>>, vector<2x32xf32>
    tpu.vector_store %arg12[%c0_717, %c32_718], %1718 {strides = array<i32>} : memref<2x64xf32, #tpu.memory_space<vmem>>, vector<2x32xf32>,
    %1725 = arith.index_cast %c10_i32_698 : i32 to index
    %c0_719 = arith.constant 0 : index
    %c0_720 = arith.constant 0 : index
    %1726 = vector.load %arg9[%1725, %c0_719, %c0_720] : memref<16x2x32xf32, #tpu.memory_space<vmem>>, vector<1x2x32xf32>
    %1727 = vector.shape_cast %1726 : vector<1x2x32xf32> to vector<2x32xf32>
    %1728 = vector.shape_cast %1703 : vector<2x32xf32> to vector<1x2x32xf32>
    tpu.vector_store %arg9[%1725, %c0_719, %c0_720], %1728 {strides = array<i32>} : memref<16x2x32xf32, #tpu.memory_space<vmem>>, vector<1x2x32xf32>,
    %c15_i32_721 = arith.constant 15 : i32
    %1729 = arith.subi %c15_i32_721, %c10_i32_698 : i32
    %1730 = arith.index_cast %1729 : i32 to index
    %c0_722 = arith.constant 0 : index
    %c0_723 = arith.constant 0 : index
    %1731 = vector.load %arg10[%1730, %c0_722, %c0_723] : memref<16x2x32xf32, #tpu.memory_space<vmem>>, vector<1x2x32xf32>
    %1732 = vector.shape_cast %1731 : vector<1x2x32xf32> to vector<2x32xf32>
    %1733 = vector.shape_cast %1720 : vector<2x32xf32> to vector<1x2x32xf32>
    tpu.vector_store %arg10[%1730, %c0_722, %c0_723], %1733 {strides = array<i32>} : memref<16x2x32xf32, #tpu.memory_space<vmem>>, vector<1x2x32xf32>,
    %c11_i32_724 = arith.constant 11 : i32
    %c0_725 = arith.constant 0 : index
    %c0_726 = arith.constant 0 : index
    %1734 = vector.load %arg11[%c0_725, %c0_726] : memref<2x64xf32, #tpu.memory_space<vmem>>, vector<2x64xf32>
    %cst_727 = arith.constant dense<0.000000e+00> : vector<2x256xf32>
    %1735 = tpu.matmul %1734, %1040, %cst_727 {dimension_numbers = #tpu.dot_dimension_numbers<[1], [0], [0], [1], [0, 0, 1, 1], [], []>} : vector<2x64xf32>, vector<64x256xf32>, vector<2x256xf32> -> vector<2x256xf32>
    %1736 = arith.index_cast %c11_i32_724 : i32 to index
    %c0_728 = arith.constant 0 : index
    %c0_729 = arith.constant 0 : index
    %1737 = vector.load %arg8[%1736, %c0_728, %c0_729] : memref<16x2x256xf32, #tpu.memory_space<vmem>>, vector<1x2x256xf32>
    %1738 = vector.shape_cast %1737 : vector<1x2x256xf32> to vector<2x256xf32>
    %c15_i32_730 = arith.constant 15 : i32
    %1739 = arith.subi %c15_i32_730, %c11_i32_724 : i32
    %1740 = arith.index_cast %1739 : i32 to index
    %c0_731 = arith.constant 0 : index
    %c0_732 = arith.constant 0 : index
    %1741 = vector.load %arg8[%1740, %c0_731, %c0_732] : memref<16x2x256xf32, #tpu.memory_space<vmem>>, vector<1x2x256xf32>
    %1742 = vector.shape_cast %1741 : vector<1x2x256xf32> to vector<2x256xf32>
    %1743 = vector.extract_strided_slice %1735 {offsets = [0, 0], sizes = [2, 128], strides = [1, 1]} : vector<2x256xf32> to vector<2x128xf32>
    %1744 = vector.extract_strided_slice %1738 {offsets = [0, 0], sizes = [2, 128], strides = [1, 1]} : vector<2x256xf32> to vector<2x128xf32>
    %1745 = arith.addf %1743, %1744 : vector<2x128xf32>
    %1746 = vector.extract_strided_slice %1735 {offsets = [0, 128], sizes = [2, 128], strides = [1, 1]} : vector<2x256xf32> to vector<2x128xf32>
    %1747 = vector.extract_strided_slice %1742 {offsets = [0, 128], sizes = [2, 128], strides = [1, 1]} : vector<2x256xf32> to vector<2x128xf32>
    %1748 = arith.addf %1746, %1747 : vector<2x128xf32>
    %c0_733 = arith.constant 0 : index
    %c0_734 = arith.constant 0 : index
    %1749 = vector.load %arg12[%c0_733, %c0_734] : memref<2x64xf32, #tpu.memory_space<vmem>>, vector<2x64xf32>
    %1750 = vector.extract_strided_slice %1749 {offsets = [0, 0], sizes = [2, 32], strides = [1, 1]} : vector<2x64xf32> to vector<2x32xf32>
    %1751 = vector.extract_strided_slice %1745 {offsets = [0, 0], sizes = [2, 96], strides = [1, 1]} : vector<2x128xf32> to vector<2x96xf32>
    %1752 = arith.negf %1751 : vector<2x96xf32>
    %1753 = math.exp %1752 : vector<2x96xf32>
    %cst_735 = arith.constant 1.000000e+00 : f32
    %1754 = vector.broadcast %cst_735 : f32 to vector<2x96xf32>
    %1755 = arith.addf %1754, %1753 : vector<2x96xf32>
    %1756 = arith.divf %1754, %1755 : vector<2x96xf32>
    %1757 = vector.extract_strided_slice %1745 {offsets = [0, 96], sizes = [2, 32], strides = [1, 1]} : vector<2x128xf32> to vector<2x32xf32>
    %1758 = math.tanh %1757 : vector<2x32xf32>
    %1759 = vector.extract_strided_slice %1756 {offsets = [0, 0], sizes = [2, 32], strides = [1, 1]} : vector<2x96xf32> to vector<2x32xf32>
    %1760 = vector.extract_strided_slice %1756 {offsets = [0, 32], sizes = [2, 32], strides = [1, 1]} : vector<2x96xf32> to vector<2x32xf32>
    %1761 = vector.extract_strided_slice %1756 {offsets = [0, 64], sizes = [2, 32], strides = [1, 1]} : vector<2x96xf32> to vector<2x32xf32>
    %1762 = arith.mulf %1760, %1750 : vector<2x32xf32>
    %1763 = arith.mulf %1759, %1758 : vector<2x32xf32>
    %1764 = arith.addf %1762, %1763 : vector<2x32xf32>
    %1765 = math.tanh %1764 : vector<2x32xf32>
    %1766 = arith.mulf %1761, %1765 : vector<2x32xf32>
    %1767 = vector.extract_strided_slice %1749 {offsets = [0, 32], sizes = [2, 32], strides = [1, 1]} : vector<2x64xf32> to vector<2x32xf32>
    %1768 = vector.extract_strided_slice %1748 {offsets = [0, 0], sizes = [2, 96], strides = [1, 1]} : vector<2x128xf32> to vector<2x96xf32>
    %1769 = arith.negf %1768 : vector<2x96xf32>
    %1770 = math.exp %1769 : vector<2x96xf32>
    %cst_736 = arith.constant 1.000000e+00 : f32
    %1771 = vector.broadcast %cst_736 : f32 to vector<2x96xf32>
    %1772 = arith.addf %1771, %1770 : vector<2x96xf32>
    %1773 = arith.divf %1771, %1772 : vector<2x96xf32>
    %1774 = vector.extract_strided_slice %1748 {offsets = [0, 96], sizes = [2, 32], strides = [1, 1]} : vector<2x128xf32> to vector<2x32xf32>
    %1775 = math.tanh %1774 : vector<2x32xf32>
    %1776 = vector.extract_strided_slice %1773 {offsets = [0, 0], sizes = [2, 32], strides = [1, 1]} : vector<2x96xf32> to vector<2x32xf32>
    %1777 = vector.extract_strided_slice %1773 {offsets = [0, 32], sizes = [2, 32], strides = [1, 1]} : vector<2x96xf32> to vector<2x32xf32>
    %1778 = vector.extract_strided_slice %1773 {offsets = [0, 64], sizes = [2, 32], strides = [1, 1]} : vector<2x96xf32> to vector<2x32xf32>
    %1779 = arith.mulf %1777, %1767 : vector<2x32xf32>
    %1780 = arith.mulf %1776, %1775 : vector<2x32xf32>
    %1781 = arith.addf %1779, %1780 : vector<2x32xf32>
    %1782 = math.tanh %1781 : vector<2x32xf32>
    %1783 = arith.mulf %1778, %1782 : vector<2x32xf32>
    %c0_737 = arith.constant 0 : index
    %c0_738 = arith.constant 0 : index
    %1784 = vector.load %arg11[%c0_737, %c0_738] : memref<2x64xf32, #tpu.memory_space<vmem>>, vector<2x32xf32>
    tpu.vector_store %arg11[%c0_737, %c0_738], %1766 {strides = array<i32>} : memref<2x64xf32, #tpu.memory_space<vmem>>, vector<2x32xf32>,
    %c0_739 = arith.constant 0 : index
    %c32_740 = arith.constant 32 : index
    %1785 = vector.load %arg11[%c0_739, %c32_740] : memref<2x64xf32, #tpu.memory_space<vmem>>, vector<2x32xf32>
    tpu.vector_store %arg11[%c0_739, %c32_740], %1783 {strides = array<i32>} : memref<2x64xf32, #tpu.memory_space<vmem>>, vector<2x32xf32>,
    %c0_741 = arith.constant 0 : index
    %c0_742 = arith.constant 0 : index
    %1786 = vector.load %arg12[%c0_741, %c0_742] : memref<2x64xf32, #tpu.memory_space<vmem>>, vector<2x32xf32>
    tpu.vector_store %arg12[%c0_741, %c0_742], %1764 {strides = array<i32>} : memref<2x64xf32, #tpu.memory_space<vmem>>, vector<2x32xf32>,
    %c0_743 = arith.constant 0 : index
    %c32_744 = arith.constant 32 : index
    %1787 = vector.load %arg12[%c0_743, %c32_744] : memref<2x64xf32, #tpu.memory_space<vmem>>, vector<2x32xf32>
    tpu.vector_store %arg12[%c0_743, %c32_744], %1781 {strides = array<i32>} : memref<2x64xf32, #tpu.memory_space<vmem>>, vector<2x32xf32>,
    %1788 = arith.index_cast %c11_i32_724 : i32 to index
    %c0_745 = arith.constant 0 : index
    %c0_746 = arith.constant 0 : index
    %1789 = vector.load %arg9[%1788, %c0_745, %c0_746] : memref<16x2x32xf32, #tpu.memory_space<vmem>>, vector<1x2x32xf32>
    %1790 = vector.shape_cast %1789 : vector<1x2x32xf32> to vector<2x32xf32>
    %1791 = vector.shape_cast %1766 : vector<2x32xf32> to vector<1x2x32xf32>
    tpu.vector_store %arg9[%1788, %c0_745, %c0_746], %1791 {strides = array<i32>} : memref<16x2x32xf32, #tpu.memory_space<vmem>>, vector<1x2x32xf32>,
    %c15_i32_747 = arith.constant 15 : i32
    %1792 = arith.subi %c15_i32_747, %c11_i32_724 : i32
    %1793 = arith.index_cast %1792 : i32 to index
    %c0_748 = arith.constant 0 : index
    %c0_749 = arith.constant 0 : index
    %1794 = vector.load %arg10[%1793, %c0_748, %c0_749] : memref<16x2x32xf32, #tpu.memory_space<vmem>>, vector<1x2x32xf32>
    %1795 = vector.shape_cast %1794 : vector<1x2x32xf32> to vector<2x32xf32>
    %1796 = vector.shape_cast %1783 : vector<2x32xf32> to vector<1x2x32xf32>
    tpu.vector_store %arg10[%1793, %c0_748, %c0_749], %1796 {strides = array<i32>} : memref<16x2x32xf32, #tpu.memory_space<vmem>>, vector<1x2x32xf32>,
    %c12_i32_750 = arith.constant 12 : i32
    %c0_751 = arith.constant 0 : index
    %c0_752 = arith.constant 0 : index
    %1797 = vector.load %arg11[%c0_751, %c0_752] : memref<2x64xf32, #tpu.memory_space<vmem>>, vector<2x64xf32>
    %cst_753 = arith.constant dense<0.000000e+00> : vector<2x256xf32>
    %1798 = tpu.matmul %1797, %1040, %cst_753 {dimension_numbers = #tpu.dot_dimension_numbers<[1], [0], [0], [1], [0, 0, 1, 1], [], []>} : vector<2x64xf32>, vector<64x256xf32>, vector<2x256xf32> -> vector<2x256xf32>
    %1799 = arith.index_cast %c12_i32_750 : i32 to index
    %c0_754 = arith.constant 0 : index
    %c0_755 = arith.constant 0 : index
    %1800 = vector.load %arg8[%1799, %c0_754, %c0_755] : memref<16x2x256xf32, #tpu.memory_space<vmem>>, vector<1x2x256xf32>
    %1801 = vector.shape_cast %1800 : vector<1x2x256xf32> to vector<2x256xf32>
    %c15_i32_756 = arith.constant 15 : i32
    %1802 = arith.subi %c15_i32_756, %c12_i32_750 : i32
    %1803 = arith.index_cast %1802 : i32 to index
    %c0_757 = arith.constant 0 : index
    %c0_758 = arith.constant 0 : index
    %1804 = vector.load %arg8[%1803, %c0_757, %c0_758] : memref<16x2x256xf32, #tpu.memory_space<vmem>>, vector<1x2x256xf32>
    %1805 = vector.shape_cast %1804 : vector<1x2x256xf32> to vector<2x256xf32>
    %1806 = vector.extract_strided_slice %1798 {offsets = [0, 0], sizes = [2, 128], strides = [1, 1]} : vector<2x256xf32> to vector<2x128xf32>
    %1807 = vector.extract_strided_slice %1801 {offsets = [0, 0], sizes = [2, 128], strides = [1, 1]} : vector<2x256xf32> to vector<2x128xf32>
    %1808 = arith.addf %1806, %1807 : vector<2x128xf32>
    %1809 = vector.extract_strided_slice %1798 {offsets = [0, 128], sizes = [2, 128], strides = [1, 1]} : vector<2x256xf32> to vector<2x128xf32>
    %1810 = vector.extract_strided_slice %1805 {offsets = [0, 128], sizes = [2, 128], strides = [1, 1]} : vector<2x256xf32> to vector<2x128xf32>
    %1811 = arith.addf %1809, %1810 : vector<2x128xf32>
    %c0_759 = arith.constant 0 : index
    %c0_760 = arith.constant 0 : index
    %1812 = vector.load %arg12[%c0_759, %c0_760] : memref<2x64xf32, #tpu.memory_space<vmem>>, vector<2x64xf32>
    %1813 = vector.extract_strided_slice %1812 {offsets = [0, 0], sizes = [2, 32], strides = [1, 1]} : vector<2x64xf32> to vector<2x32xf32>
    %1814 = vector.extract_strided_slice %1808 {offsets = [0, 0], sizes = [2, 96], strides = [1, 1]} : vector<2x128xf32> to vector<2x96xf32>
    %1815 = arith.negf %1814 : vector<2x96xf32>
    %1816 = math.exp %1815 : vector<2x96xf32>
    %cst_761 = arith.constant 1.000000e+00 : f32
    %1817 = vector.broadcast %cst_761 : f32 to vector<2x96xf32>
    %1818 = arith.addf %1817, %1816 : vector<2x96xf32>
    %1819 = arith.divf %1817, %1818 : vector<2x96xf32>
    %1820 = vector.extract_strided_slice %1808 {offsets = [0, 96], sizes = [2, 32], strides = [1, 1]} : vector<2x128xf32> to vector<2x32xf32>
    %1821 = math.tanh %1820 : vector<2x32xf32>
    %1822 = vector.extract_strided_slice %1819 {offsets = [0, 0], sizes = [2, 32], strides = [1, 1]} : vector<2x96xf32> to vector<2x32xf32>
    %1823 = vector.extract_strided_slice %1819 {offsets = [0, 32], sizes = [2, 32], strides = [1, 1]} : vector<2x96xf32> to vector<2x32xf32>
    %1824 = vector.extract_strided_slice %1819 {offsets = [0, 64], sizes = [2, 32], strides = [1, 1]} : vector<2x96xf32> to vector<2x32xf32>
    %1825 = arith.mulf %1823, %1813 : vector<2x32xf32>
    %1826 = arith.mulf %1822, %1821 : vector<2x32xf32>
    %1827 = arith.addf %1825, %1826 : vector<2x32xf32>
    %1828 = math.tanh %1827 : vector<2x32xf32>
    %1829 = arith.mulf %1824, %1828 : vector<2x32xf32>
    %1830 = vector.extract_strided_slice %1812 {offsets = [0, 32], sizes = [2, 32], strides = [1, 1]} : vector<2x64xf32> to vector<2x32xf32>
    %1831 = vector.extract_strided_slice %1811 {offsets = [0, 0], sizes = [2, 96], strides = [1, 1]} : vector<2x128xf32> to vector<2x96xf32>
    %1832 = arith.negf %1831 : vector<2x96xf32>
    %1833 = math.exp %1832 : vector<2x96xf32>
    %cst_762 = arith.constant 1.000000e+00 : f32
    %1834 = vector.broadcast %cst_762 : f32 to vector<2x96xf32>
    %1835 = arith.addf %1834, %1833 : vector<2x96xf32>
    %1836 = arith.divf %1834, %1835 : vector<2x96xf32>
    %1837 = vector.extract_strided_slice %1811 {offsets = [0, 96], sizes = [2, 32], strides = [1, 1]} : vector<2x128xf32> to vector<2x32xf32>
    %1838 = math.tanh %1837 : vector<2x32xf32>
    %1839 = vector.extract_strided_slice %1836 {offsets = [0, 0], sizes = [2, 32], strides = [1, 1]} : vector<2x96xf32> to vector<2x32xf32>
    %1840 = vector.extract_strided_slice %1836 {offsets = [0, 32], sizes = [2, 32], strides = [1, 1]} : vector<2x96xf32> to vector<2x32xf32>
    %1841 = vector.extract_strided_slice %1836 {offsets = [0, 64], sizes = [2, 32], strides = [1, 1]} : vector<2x96xf32> to vector<2x32xf32>
    %1842 = arith.mulf %1840, %1830 : vector<2x32xf32>
    %1843 = arith.mulf %1839, %1838 : vector<2x32xf32>
    %1844 = arith.addf %1842, %1843 : vector<2x32xf32>
    %1845 = math.tanh %1844 : vector<2x32xf32>
    %1846 = arith.mulf %1841, %1845 : vector<2x32xf32>
    %c0_763 = arith.constant 0 : index
    %c0_764 = arith.constant 0 : index
    %1847 = vector.load %arg11[%c0_763, %c0_764] : memref<2x64xf32, #tpu.memory_space<vmem>>, vector<2x32xf32>
    tpu.vector_store %arg11[%c0_763, %c0_764], %1829 {strides = array<i32>} : memref<2x64xf32, #tpu.memory_space<vmem>>, vector<2x32xf32>,
    %c0_765 = arith.constant 0 : index
    %c32_766 = arith.constant 32 : index
    %1848 = vector.load %arg11[%c0_765, %c32_766] : memref<2x64xf32, #tpu.memory_space<vmem>>, vector<2x32xf32>
    tpu.vector_store %arg11[%c0_765, %c32_766], %1846 {strides = array<i32>} : memref<2x64xf32, #tpu.memory_space<vmem>>, vector<2x32xf32>,
    %c0_767 = arith.constant 0 : index
    %c0_768 = arith.constant 0 : index
    %1849 = vector.load %arg12[%c0_767, %c0_768] : memref<2x64xf32, #tpu.memory_space<vmem>>, vector<2x32xf32>
    tpu.vector_store %arg12[%c0_767, %c0_768], %1827 {strides = array<i32>} : memref<2x64xf32, #tpu.memory_space<vmem>>, vector<2x32xf32>,
    %c0_769 = arith.constant 0 : index
    %c32_770 = arith.constant 32 : index
    %1850 = vector.load %arg12[%c0_769, %c32_770] : memref<2x64xf32, #tpu.memory_space<vmem>>, vector<2x32xf32>
    tpu.vector_store %arg12[%c0_769, %c32_770], %1844 {strides = array<i32>} : memref<2x64xf32, #tpu.memory_space<vmem>>, vector<2x32xf32>,
    %1851 = arith.index_cast %c12_i32_750 : i32 to index
    %c0_771 = arith.constant 0 : index
    %c0_772 = arith.constant 0 : index
    %1852 = vector.load %arg9[%1851, %c0_771, %c0_772] : memref<16x2x32xf32, #tpu.memory_space<vmem>>, vector<1x2x32xf32>
    %1853 = vector.shape_cast %1852 : vector<1x2x32xf32> to vector<2x32xf32>
    %1854 = vector.shape_cast %1829 : vector<2x32xf32> to vector<1x2x32xf32>
    tpu.vector_store %arg9[%1851, %c0_771, %c0_772], %1854 {strides = array<i32>} : memref<16x2x32xf32, #tpu.memory_space<vmem>>, vector<1x2x32xf32>,
    %c15_i32_773 = arith.constant 15 : i32
    %1855 = arith.subi %c15_i32_773, %c12_i32_750 : i32
    %1856 = arith.index_cast %1855 : i32 to index
    %c0_774 = arith.constant 0 : index
    %c0_775 = arith.constant 0 : index
    %1857 = vector.load %arg10[%1856, %c0_774, %c0_775] : memref<16x2x32xf32, #tpu.memory_space<vmem>>, vector<1x2x32xf32>
    %1858 = vector.shape_cast %1857 : vector<1x2x32xf32> to vector<2x32xf32>
    %1859 = vector.shape_cast %1846 : vector<2x32xf32> to vector<1x2x32xf32>
    tpu.vector_store %arg10[%1856, %c0_774, %c0_775], %1859 {strides = array<i32>} : memref<16x2x32xf32, #tpu.memory_space<vmem>>, vector<1x2x32xf32>,
    %c13_i32_776 = arith.constant 13 : i32
    %c0_777 = arith.constant 0 : index
    %c0_778 = arith.constant 0 : index
    %1860 = vector.load %arg11[%c0_777, %c0_778] : memref<2x64xf32, #tpu.memory_space<vmem>>, vector<2x64xf32>
    %cst_779 = arith.constant dense<0.000000e+00> : vector<2x256xf32>
    %1861 = tpu.matmul %1860, %1040, %cst_779 {dimension_numbers = #tpu.dot_dimension_numbers<[1], [0], [0], [1], [0, 0, 1, 1], [], []>} : vector<2x64xf32>, vector<64x256xf32>, vector<2x256xf32> -> vector<2x256xf32>
    %1862 = arith.index_cast %c13_i32_776 : i32 to index
    %c0_780 = arith.constant 0 : index
    %c0_781 = arith.constant 0 : index
    %1863 = vector.load %arg8[%1862, %c0_780, %c0_781] : memref<16x2x256xf32, #tpu.memory_space<vmem>>, vector<1x2x256xf32>
    %1864 = vector.shape_cast %1863 : vector<1x2x256xf32> to vector<2x256xf32>
    %c15_i32_782 = arith.constant 15 : i32
    %1865 = arith.subi %c15_i32_782, %c13_i32_776 : i32
    %1866 = arith.index_cast %1865 : i32 to index
    %c0_783 = arith.constant 0 : index
    %c0_784 = arith.constant 0 : index
    %1867 = vector.load %arg8[%1866, %c0_783, %c0_784] : memref<16x2x256xf32, #tpu.memory_space<vmem>>, vector<1x2x256xf32>
    %1868 = vector.shape_cast %1867 : vector<1x2x256xf32> to vector<2x256xf32>
    %1869 = vector.extract_strided_slice %1861 {offsets = [0, 0], sizes = [2, 128], strides = [1, 1]} : vector<2x256xf32> to vector<2x128xf32>
    %1870 = vector.extract_strided_slice %1864 {offsets = [0, 0], sizes = [2, 128], strides = [1, 1]} : vector<2x256xf32> to vector<2x128xf32>
    %1871 = arith.addf %1869, %1870 : vector<2x128xf32>
    %1872 = vector.extract_strided_slice %1861 {offsets = [0, 128], sizes = [2, 128], strides = [1, 1]} : vector<2x256xf32> to vector<2x128xf32>
    %1873 = vector.extract_strided_slice %1868 {offsets = [0, 128], sizes = [2, 128], strides = [1, 1]} : vector<2x256xf32> to vector<2x128xf32>
    %1874 = arith.addf %1872, %1873 : vector<2x128xf32>
    %c0_785 = arith.constant 0 : index
    %c0_786 = arith.constant 0 : index
    %1875 = vector.load %arg12[%c0_785, %c0_786] : memref<2x64xf32, #tpu.memory_space<vmem>>, vector<2x64xf32>
    %1876 = vector.extract_strided_slice %1875 {offsets = [0, 0], sizes = [2, 32], strides = [1, 1]} : vector<2x64xf32> to vector<2x32xf32>
    %1877 = vector.extract_strided_slice %1871 {offsets = [0, 0], sizes = [2, 96], strides = [1, 1]} : vector<2x128xf32> to vector<2x96xf32>
    %1878 = arith.negf %1877 : vector<2x96xf32>
    %1879 = math.exp %1878 : vector<2x96xf32>
    %cst_787 = arith.constant 1.000000e+00 : f32
    %1880 = vector.broadcast %cst_787 : f32 to vector<2x96xf32>
    %1881 = arith.addf %1880, %1879 : vector<2x96xf32>
    %1882 = arith.divf %1880, %1881 : vector<2x96xf32>
    %1883 = vector.extract_strided_slice %1871 {offsets = [0, 96], sizes = [2, 32], strides = [1, 1]} : vector<2x128xf32> to vector<2x32xf32>
    %1884 = math.tanh %1883 : vector<2x32xf32>
    %1885 = vector.extract_strided_slice %1882 {offsets = [0, 0], sizes = [2, 32], strides = [1, 1]} : vector<2x96xf32> to vector<2x32xf32>
    %1886 = vector.extract_strided_slice %1882 {offsets = [0, 32], sizes = [2, 32], strides = [1, 1]} : vector<2x96xf32> to vector<2x32xf32>
    %1887 = vector.extract_strided_slice %1882 {offsets = [0, 64], sizes = [2, 32], strides = [1, 1]} : vector<2x96xf32> to vector<2x32xf32>
    %1888 = arith.mulf %1886, %1876 : vector<2x32xf32>
    %1889 = arith.mulf %1885, %1884 : vector<2x32xf32>
    %1890 = arith.addf %1888, %1889 : vector<2x32xf32>
    %1891 = math.tanh %1890 : vector<2x32xf32>
    %1892 = arith.mulf %1887, %1891 : vector<2x32xf32>
    %1893 = vector.extract_strided_slice %1875 {offsets = [0, 32], sizes = [2, 32], strides = [1, 1]} : vector<2x64xf32> to vector<2x32xf32>
    %1894 = vector.extract_strided_slice %1874 {offsets = [0, 0], sizes = [2, 96], strides = [1, 1]} : vector<2x128xf32> to vector<2x96xf32>
    %1895 = arith.negf %1894 : vector<2x96xf32>
    %1896 = math.exp %1895 : vector<2x96xf32>
    %cst_788 = arith.constant 1.000000e+00 : f32
    %1897 = vector.broadcast %cst_788 : f32 to vector<2x96xf32>
    %1898 = arith.addf %1897, %1896 : vector<2x96xf32>
    %1899 = arith.divf %1897, %1898 : vector<2x96xf32>
    %1900 = vector.extract_strided_slice %1874 {offsets = [0, 96], sizes = [2, 32], strides = [1, 1]} : vector<2x128xf32> to vector<2x32xf32>
    %1901 = math.tanh %1900 : vector<2x32xf32>
    %1902 = vector.extract_strided_slice %1899 {offsets = [0, 0], sizes = [2, 32], strides = [1, 1]} : vector<2x96xf32> to vector<2x32xf32>
    %1903 = vector.extract_strided_slice %1899 {offsets = [0, 32], sizes = [2, 32], strides = [1, 1]} : vector<2x96xf32> to vector<2x32xf32>
    %1904 = vector.extract_strided_slice %1899 {offsets = [0, 64], sizes = [2, 32], strides = [1, 1]} : vector<2x96xf32> to vector<2x32xf32>
    %1905 = arith.mulf %1903, %1893 : vector<2x32xf32>
    %1906 = arith.mulf %1902, %1901 : vector<2x32xf32>
    %1907 = arith.addf %1905, %1906 : vector<2x32xf32>
    %1908 = math.tanh %1907 : vector<2x32xf32>
    %1909 = arith.mulf %1904, %1908 : vector<2x32xf32>
    %c0_789 = arith.constant 0 : index
    %c0_790 = arith.constant 0 : index
    %1910 = vector.load %arg11[%c0_789, %c0_790] : memref<2x64xf32, #tpu.memory_space<vmem>>, vector<2x32xf32>
    tpu.vector_store %arg11[%c0_789, %c0_790], %1892 {strides = array<i32>} : memref<2x64xf32, #tpu.memory_space<vmem>>, vector<2x32xf32>,
    %c0_791 = arith.constant 0 : index
    %c32_792 = arith.constant 32 : index
    %1911 = vector.load %arg11[%c0_791, %c32_792] : memref<2x64xf32, #tpu.memory_space<vmem>>, vector<2x32xf32>
    tpu.vector_store %arg11[%c0_791, %c32_792], %1909 {strides = array<i32>} : memref<2x64xf32, #tpu.memory_space<vmem>>, vector<2x32xf32>,
    %c0_793 = arith.constant 0 : index
    %c0_794 = arith.constant 0 : index
    %1912 = vector.load %arg12[%c0_793, %c0_794] : memref<2x64xf32, #tpu.memory_space<vmem>>, vector<2x32xf32>
    tpu.vector_store %arg12[%c0_793, %c0_794], %1890 {strides = array<i32>} : memref<2x64xf32, #tpu.memory_space<vmem>>, vector<2x32xf32>,
    %c0_795 = arith.constant 0 : index
    %c32_796 = arith.constant 32 : index
    %1913 = vector.load %arg12[%c0_795, %c32_796] : memref<2x64xf32, #tpu.memory_space<vmem>>, vector<2x32xf32>
    tpu.vector_store %arg12[%c0_795, %c32_796], %1907 {strides = array<i32>} : memref<2x64xf32, #tpu.memory_space<vmem>>, vector<2x32xf32>,
    %1914 = arith.index_cast %c13_i32_776 : i32 to index
    %c0_797 = arith.constant 0 : index
    %c0_798 = arith.constant 0 : index
    %1915 = vector.load %arg9[%1914, %c0_797, %c0_798] : memref<16x2x32xf32, #tpu.memory_space<vmem>>, vector<1x2x32xf32>
    %1916 = vector.shape_cast %1915 : vector<1x2x32xf32> to vector<2x32xf32>
    %1917 = vector.shape_cast %1892 : vector<2x32xf32> to vector<1x2x32xf32>
    tpu.vector_store %arg9[%1914, %c0_797, %c0_798], %1917 {strides = array<i32>} : memref<16x2x32xf32, #tpu.memory_space<vmem>>, vector<1x2x32xf32>,
    %c15_i32_799 = arith.constant 15 : i32
    %1918 = arith.subi %c15_i32_799, %c13_i32_776 : i32
    %1919 = arith.index_cast %1918 : i32 to index
    %c0_800 = arith.constant 0 : index
    %c0_801 = arith.constant 0 : index
    %1920 = vector.load %arg10[%1919, %c0_800, %c0_801] : memref<16x2x32xf32, #tpu.memory_space<vmem>>, vector<1x2x32xf32>
    %1921 = vector.shape_cast %1920 : vector<1x2x32xf32> to vector<2x32xf32>
    %1922 = vector.shape_cast %1909 : vector<2x32xf32> to vector<1x2x32xf32>
    tpu.vector_store %arg10[%1919, %c0_800, %c0_801], %1922 {strides = array<i32>} : memref<16x2x32xf32, #tpu.memory_space<vmem>>, vector<1x2x32xf32>,
    %c14_i32_802 = arith.constant 14 : i32
    %c0_803 = arith.constant 0 : index
    %c0_804 = arith.constant 0 : index
    %1923 = vector.load %arg11[%c0_803, %c0_804] : memref<2x64xf32, #tpu.memory_space<vmem>>, vector<2x64xf32>
    %cst_805 = arith.constant dense<0.000000e+00> : vector<2x256xf32>
    %1924 = tpu.matmul %1923, %1040, %cst_805 {dimension_numbers = #tpu.dot_dimension_numbers<[1], [0], [0], [1], [0, 0, 1, 1], [], []>} : vector<2x64xf32>, vector<64x256xf32>, vector<2x256xf32> -> vector<2x256xf32>
    %1925 = arith.index_cast %c14_i32_802 : i32 to index
    %c0_806 = arith.constant 0 : index
    %c0_807 = arith.constant 0 : index
    %1926 = vector.load %arg8[%1925, %c0_806, %c0_807] : memref<16x2x256xf32, #tpu.memory_space<vmem>>, vector<1x2x256xf32>
    %1927 = vector.shape_cast %1926 : vector<1x2x256xf32> to vector<2x256xf32>
    %c15_i32_808 = arith.constant 15 : i32
    %1928 = arith.subi %c15_i32_808, %c14_i32_802 : i32
    %1929 = arith.index_cast %1928 : i32 to index
    %c0_809 = arith.constant 0 : index
    %c0_810 = arith.constant 0 : index
    %1930 = vector.load %arg8[%1929, %c0_809, %c0_810] : memref<16x2x256xf32, #tpu.memory_space<vmem>>, vector<1x2x256xf32>
    %1931 = vector.shape_cast %1930 : vector<1x2x256xf32> to vector<2x256xf32>
    %1932 = vector.extract_strided_slice %1924 {offsets = [0, 0], sizes = [2, 128], strides = [1, 1]} : vector<2x256xf32> to vector<2x128xf32>
    %1933 = vector.extract_strided_slice %1927 {offsets = [0, 0], sizes = [2, 128], strides = [1, 1]} : vector<2x256xf32> to vector<2x128xf32>
    %1934 = arith.addf %1932, %1933 : vector<2x128xf32>
    %1935 = vector.extract_strided_slice %1924 {offsets = [0, 128], sizes = [2, 128], strides = [1, 1]} : vector<2x256xf32> to vector<2x128xf32>
    %1936 = vector.extract_strided_slice %1931 {offsets = [0, 128], sizes = [2, 128], strides = [1, 1]} : vector<2x256xf32> to vector<2x128xf32>
    %1937 = arith.addf %1935, %1936 : vector<2x128xf32>
    %c0_811 = arith.constant 0 : index
    %c0_812 = arith.constant 0 : index
    %1938 = vector.load %arg12[%c0_811, %c0_812] : memref<2x64xf32, #tpu.memory_space<vmem>>, vector<2x64xf32>
    %1939 = vector.extract_strided_slice %1938 {offsets = [0, 0], sizes = [2, 32], strides = [1, 1]} : vector<2x64xf32> to vector<2x32xf32>
    %1940 = vector.extract_strided_slice %1934 {offsets = [0, 0], sizes = [2, 96], strides = [1, 1]} : vector<2x128xf32> to vector<2x96xf32>
    %1941 = arith.negf %1940 : vector<2x96xf32>
    %1942 = math.exp %1941 : vector<2x96xf32>
    %cst_813 = arith.constant 1.000000e+00 : f32
    %1943 = vector.broadcast %cst_813 : f32 to vector<2x96xf32>
    %1944 = arith.addf %1943, %1942 : vector<2x96xf32>
    %1945 = arith.divf %1943, %1944 : vector<2x96xf32>
    %1946 = vector.extract_strided_slice %1934 {offsets = [0, 96], sizes = [2, 32], strides = [1, 1]} : vector<2x128xf32> to vector<2x32xf32>
    %1947 = math.tanh %1946 : vector<2x32xf32>
    %1948 = vector.extract_strided_slice %1945 {offsets = [0, 0], sizes = [2, 32], strides = [1, 1]} : vector<2x96xf32> to vector<2x32xf32>
    %1949 = vector.extract_strided_slice %1945 {offsets = [0, 32], sizes = [2, 32], strides = [1, 1]} : vector<2x96xf32> to vector<2x32xf32>
    %1950 = vector.extract_strided_slice %1945 {offsets = [0, 64], sizes = [2, 32], strides = [1, 1]} : vector<2x96xf32> to vector<2x32xf32>
    %1951 = arith.mulf %1949, %1939 : vector<2x32xf32>
    %1952 = arith.mulf %1948, %1947 : vector<2x32xf32>
    %1953 = arith.addf %1951, %1952 : vector<2x32xf32>
    %1954 = math.tanh %1953 : vector<2x32xf32>
    %1955 = arith.mulf %1950, %1954 : vector<2x32xf32>
    %1956 = vector.extract_strided_slice %1938 {offsets = [0, 32], sizes = [2, 32], strides = [1, 1]} : vector<2x64xf32> to vector<2x32xf32>
    %1957 = vector.extract_strided_slice %1937 {offsets = [0, 0], sizes = [2, 96], strides = [1, 1]} : vector<2x128xf32> to vector<2x96xf32>
    %1958 = arith.negf %1957 : vector<2x96xf32>
    %1959 = math.exp %1958 : vector<2x96xf32>
    %cst_814 = arith.constant 1.000000e+00 : f32
    %1960 = vector.broadcast %cst_814 : f32 to vector<2x96xf32>
    %1961 = arith.addf %1960, %1959 : vector<2x96xf32>
    %1962 = arith.divf %1960, %1961 : vector<2x96xf32>
    %1963 = vector.extract_strided_slice %1937 {offsets = [0, 96], sizes = [2, 32], strides = [1, 1]} : vector<2x128xf32> to vector<2x32xf32>
    %1964 = math.tanh %1963 : vector<2x32xf32>
    %1965 = vector.extract_strided_slice %1962 {offsets = [0, 0], sizes = [2, 32], strides = [1, 1]} : vector<2x96xf32> to vector<2x32xf32>
    %1966 = vector.extract_strided_slice %1962 {offsets = [0, 32], sizes = [2, 32], strides = [1, 1]} : vector<2x96xf32> to vector<2x32xf32>
    %1967 = vector.extract_strided_slice %1962 {offsets = [0, 64], sizes = [2, 32], strides = [1, 1]} : vector<2x96xf32> to vector<2x32xf32>
    %1968 = arith.mulf %1966, %1956 : vector<2x32xf32>
    %1969 = arith.mulf %1965, %1964 : vector<2x32xf32>
    %1970 = arith.addf %1968, %1969 : vector<2x32xf32>
    %1971 = math.tanh %1970 : vector<2x32xf32>
    %1972 = arith.mulf %1967, %1971 : vector<2x32xf32>
    %c0_815 = arith.constant 0 : index
    %c0_816 = arith.constant 0 : index
    %1973 = vector.load %arg11[%c0_815, %c0_816] : memref<2x64xf32, #tpu.memory_space<vmem>>, vector<2x32xf32>
    tpu.vector_store %arg11[%c0_815, %c0_816], %1955 {strides = array<i32>} : memref<2x64xf32, #tpu.memory_space<vmem>>, vector<2x32xf32>,
    %c0_817 = arith.constant 0 : index
    %c32_818 = arith.constant 32 : index
    %1974 = vector.load %arg11[%c0_817, %c32_818] : memref<2x64xf32, #tpu.memory_space<vmem>>, vector<2x32xf32>
    tpu.vector_store %arg11[%c0_817, %c32_818], %1972 {strides = array<i32>} : memref<2x64xf32, #tpu.memory_space<vmem>>, vector<2x32xf32>,
    %c0_819 = arith.constant 0 : index
    %c0_820 = arith.constant 0 : index
    %1975 = vector.load %arg12[%c0_819, %c0_820] : memref<2x64xf32, #tpu.memory_space<vmem>>, vector<2x32xf32>
    tpu.vector_store %arg12[%c0_819, %c0_820], %1953 {strides = array<i32>} : memref<2x64xf32, #tpu.memory_space<vmem>>, vector<2x32xf32>,
    %c0_821 = arith.constant 0 : index
    %c32_822 = arith.constant 32 : index
    %1976 = vector.load %arg12[%c0_821, %c32_822] : memref<2x64xf32, #tpu.memory_space<vmem>>, vector<2x32xf32>
    tpu.vector_store %arg12[%c0_821, %c32_822], %1970 {strides = array<i32>} : memref<2x64xf32, #tpu.memory_space<vmem>>, vector<2x32xf32>,
    %1977 = arith.index_cast %c14_i32_802 : i32 to index
    %c0_823 = arith.constant 0 : index
    %c0_824 = arith.constant 0 : index
    %1978 = vector.load %arg9[%1977, %c0_823, %c0_824] : memref<16x2x32xf32, #tpu.memory_space<vmem>>, vector<1x2x32xf32>
    %1979 = vector.shape_cast %1978 : vector<1x2x32xf32> to vector<2x32xf32>
    %1980 = vector.shape_cast %1955 : vector<2x32xf32> to vector<1x2x32xf32>
    tpu.vector_store %arg9[%1977, %c0_823, %c0_824], %1980 {strides = array<i32>} : memref<16x2x32xf32, #tpu.memory_space<vmem>>, vector<1x2x32xf32>,
    %c15_i32_825 = arith.constant 15 : i32
    %1981 = arith.subi %c15_i32_825, %c14_i32_802 : i32
    %1982 = arith.index_cast %1981 : i32 to index
    %c0_826 = arith.constant 0 : index
    %c0_827 = arith.constant 0 : index
    %1983 = vector.load %arg10[%1982, %c0_826, %c0_827] : memref<16x2x32xf32, #tpu.memory_space<vmem>>, vector<1x2x32xf32>
    %1984 = vector.shape_cast %1983 : vector<1x2x32xf32> to vector<2x32xf32>
    %1985 = vector.shape_cast %1972 : vector<2x32xf32> to vector<1x2x32xf32>
    tpu.vector_store %arg10[%1982, %c0_826, %c0_827], %1985 {strides = array<i32>} : memref<16x2x32xf32, #tpu.memory_space<vmem>>, vector<1x2x32xf32>,
    %c15_i32_828 = arith.constant 15 : i32
    %c0_829 = arith.constant 0 : index
    %c0_830 = arith.constant 0 : index
    %1986 = vector.load %arg11[%c0_829, %c0_830] : memref<2x64xf32, #tpu.memory_space<vmem>>, vector<2x64xf32>
    %cst_831 = arith.constant dense<0.000000e+00> : vector<2x256xf32>
    %1987 = tpu.matmul %1986, %1040, %cst_831 {dimension_numbers = #tpu.dot_dimension_numbers<[1], [0], [0], [1], [0, 0, 1, 1], [], []>} : vector<2x64xf32>, vector<64x256xf32>, vector<2x256xf32> -> vector<2x256xf32>
    %1988 = arith.index_cast %c15_i32_828 : i32 to index
    %c0_832 = arith.constant 0 : index
    %c0_833 = arith.constant 0 : index
    %1989 = vector.load %arg8[%1988, %c0_832, %c0_833] : memref<16x2x256xf32, #tpu.memory_space<vmem>>, vector<1x2x256xf32>
    %1990 = vector.shape_cast %1989 : vector<1x2x256xf32> to vector<2x256xf32>
    %c15_i32_834 = arith.constant 15 : i32
    %1991 = arith.subi %c15_i32_834, %c15_i32_828 : i32
    %1992 = arith.index_cast %1991 : i32 to index
    %c0_835 = arith.constant 0 : index
    %c0_836 = arith.constant 0 : index
    %1993 = vector.load %arg8[%1992, %c0_835, %c0_836] : memref<16x2x256xf32, #tpu.memory_space<vmem>>, vector<1x2x256xf32>
    %1994 = vector.shape_cast %1993 : vector<1x2x256xf32> to vector<2x256xf32>
    %1995 = vector.extract_strided_slice %1987 {offsets = [0, 0], sizes = [2, 128], strides = [1, 1]} : vector<2x256xf32> to vector<2x128xf32>
    %1996 = vector.extract_strided_slice %1990 {offsets = [0, 0], sizes = [2, 128], strides = [1, 1]} : vector<2x256xf32> to vector<2x128xf32>
    %1997 = arith.addf %1995, %1996 : vector<2x128xf32>
    %1998 = vector.extract_strided_slice %1987 {offsets = [0, 128], sizes = [2, 128], strides = [1, 1]} : vector<2x256xf32> to vector<2x128xf32>
    %1999 = vector.extract_strided_slice %1994 {offsets = [0, 128], sizes = [2, 128], strides = [1, 1]} : vector<2x256xf32> to vector<2x128xf32>
    %2000 = arith.addf %1998, %1999 : vector<2x128xf32>
    %c0_837 = arith.constant 0 : index
    %c0_838 = arith.constant 0 : index
    %2001 = vector.load %arg12[%c0_837, %c0_838] : memref<2x64xf32, #tpu.memory_space<vmem>>, vector<2x64xf32>
    %2002 = vector.extract_strided_slice %2001 {offsets = [0, 0], sizes = [2, 32], strides = [1, 1]} : vector<2x64xf32> to vector<2x32xf32>
    %2003 = vector.extract_strided_slice %1997 {offsets = [0, 0], sizes = [2, 96], strides = [1, 1]} : vector<2x128xf32> to vector<2x96xf32>
    %2004 = arith.negf %2003 : vector<2x96xf32>
    %2005 = math.exp %2004 : vector<2x96xf32>
    %cst_839 = arith.constant 1.000000e+00 : f32
    %2006 = vector.broadcast %cst_839 : f32 to vector<2x96xf32>
    %2007 = arith.addf %2006, %2005 : vector<2x96xf32>
    %2008 = arith.divf %2006, %2007 : vector<2x96xf32>
    %2009 = vector.extract_strided_slice %1997 {offsets = [0, 96], sizes = [2, 32], strides = [1, 1]} : vector<2x128xf32> to vector<2x32xf32>
    %2010 = math.tanh %2009 : vector<2x32xf32>
    %2011 = vector.extract_strided_slice %2008 {offsets = [0, 0], sizes = [2, 32], strides = [1, 1]} : vector<2x96xf32> to vector<2x32xf32>
    %2012 = vector.extract_strided_slice %2008 {offsets = [0, 32], sizes = [2, 32], strides = [1, 1]} : vector<2x96xf32> to vector<2x32xf32>
    %2013 = vector.extract_strided_slice %2008 {offsets = [0, 64], sizes = [2, 32], strides = [1, 1]} : vector<2x96xf32> to vector<2x32xf32>
    %2014 = arith.mulf %2012, %2002 : vector<2x32xf32>
    %2015 = arith.mulf %2011, %2010 : vector<2x32xf32>
    %2016 = arith.addf %2014, %2015 : vector<2x32xf32>
    %2017 = math.tanh %2016 : vector<2x32xf32>
    %2018 = arith.mulf %2013, %2017 : vector<2x32xf32>
    %2019 = vector.extract_strided_slice %2001 {offsets = [0, 32], sizes = [2, 32], strides = [1, 1]} : vector<2x64xf32> to vector<2x32xf32>
    %2020 = vector.extract_strided_slice %2000 {offsets = [0, 0], sizes = [2, 96], strides = [1, 1]} : vector<2x128xf32> to vector<2x96xf32>
    %2021 = arith.negf %2020 : vector<2x96xf32>
    %2022 = math.exp %2021 : vector<2x96xf32>
    %cst_840 = arith.constant 1.000000e+00 : f32
    %2023 = vector.broadcast %cst_840 : f32 to vector<2x96xf32>
    %2024 = arith.addf %2023, %2022 : vector<2x96xf32>
    %2025 = arith.divf %2023, %2024 : vector<2x96xf32>
    %2026 = vector.extract_strided_slice %2000 {offsets = [0, 96], sizes = [2, 32], strides = [1, 1]} : vector<2x128xf32> to vector<2x32xf32>
    %2027 = math.tanh %2026 : vector<2x32xf32>
    %2028 = vector.extract_strided_slice %2025 {offsets = [0, 0], sizes = [2, 32], strides = [1, 1]} : vector<2x96xf32> to vector<2x32xf32>
    %2029 = vector.extract_strided_slice %2025 {offsets = [0, 32], sizes = [2, 32], strides = [1, 1]} : vector<2x96xf32> to vector<2x32xf32>
    %2030 = vector.extract_strided_slice %2025 {offsets = [0, 64], sizes = [2, 32], strides = [1, 1]} : vector<2x96xf32> to vector<2x32xf32>
    %2031 = arith.mulf %2029, %2019 : vector<2x32xf32>
    %2032 = arith.mulf %2028, %2027 : vector<2x32xf32>
    %2033 = arith.addf %2031, %2032 : vector<2x32xf32>
    %2034 = math.tanh %2033 : vector<2x32xf32>
    %2035 = arith.mulf %2030, %2034 : vector<2x32xf32>
    %c0_841 = arith.constant 0 : index
    %c0_842 = arith.constant 0 : index
    %2036 = vector.load %arg11[%c0_841, %c0_842] : memref<2x64xf32, #tpu.memory_space<vmem>>, vector<2x32xf32>
    tpu.vector_store %arg11[%c0_841, %c0_842], %2018 {strides = array<i32>} : memref<2x64xf32, #tpu.memory_space<vmem>>, vector<2x32xf32>,
    %c0_843 = arith.constant 0 : index
    %c32_844 = arith.constant 32 : index
    %2037 = vector.load %arg11[%c0_843, %c32_844] : memref<2x64xf32, #tpu.memory_space<vmem>>, vector<2x32xf32>
    tpu.vector_store %arg11[%c0_843, %c32_844], %2035 {strides = array<i32>} : memref<2x64xf32, #tpu.memory_space<vmem>>, vector<2x32xf32>,
    %c0_845 = arith.constant 0 : index
    %c0_846 = arith.constant 0 : index
    %2038 = vector.load %arg12[%c0_845, %c0_846] : memref<2x64xf32, #tpu.memory_space<vmem>>, vector<2x32xf32>
    tpu.vector_store %arg12[%c0_845, %c0_846], %2016 {strides = array<i32>} : memref<2x64xf32, #tpu.memory_space<vmem>>, vector<2x32xf32>,
    %c0_847 = arith.constant 0 : index
    %c32_848 = arith.constant 32 : index
    %2039 = vector.load %arg12[%c0_847, %c32_848] : memref<2x64xf32, #tpu.memory_space<vmem>>, vector<2x32xf32>
    tpu.vector_store %arg12[%c0_847, %c32_848], %2033 {strides = array<i32>} : memref<2x64xf32, #tpu.memory_space<vmem>>, vector<2x32xf32>,
    %2040 = arith.index_cast %c15_i32_828 : i32 to index
    %c0_849 = arith.constant 0 : index
    %c0_850 = arith.constant 0 : index
    %2041 = vector.load %arg9[%2040, %c0_849, %c0_850] : memref<16x2x32xf32, #tpu.memory_space<vmem>>, vector<1x2x32xf32>
    %2042 = vector.shape_cast %2041 : vector<1x2x32xf32> to vector<2x32xf32>
    %2043 = vector.shape_cast %2018 : vector<2x32xf32> to vector<1x2x32xf32>
    tpu.vector_store %arg9[%2040, %c0_849, %c0_850], %2043 {strides = array<i32>} : memref<16x2x32xf32, #tpu.memory_space<vmem>>, vector<1x2x32xf32>,
    %c15_i32_851 = arith.constant 15 : i32
    %2044 = arith.subi %c15_i32_851, %c15_i32_828 : i32
    %2045 = arith.index_cast %2044 : i32 to index
    %c0_852 = arith.constant 0 : index
    %c0_853 = arith.constant 0 : index
    %2046 = vector.load %arg10[%2045, %c0_852, %c0_853] : memref<16x2x32xf32, #tpu.memory_space<vmem>>, vector<1x2x32xf32>
    %2047 = vector.shape_cast %2046 : vector<1x2x32xf32> to vector<2x32xf32>
    %2048 = vector.shape_cast %2035 : vector<2x32xf32> to vector<1x2x32xf32>
    tpu.vector_store %arg10[%2045, %c0_852, %c0_853], %2048 {strides = array<i32>} : memref<16x2x32xf32, #tpu.memory_space<vmem>>, vector<1x2x32xf32>,
    %c16_i32_854 = arith.constant 16 : i32
    %c0_855 = arith.constant 0 : index
    %c0_856 = arith.constant 0 : index
    %c0_857 = arith.constant 0 : index
    %2049 = vector.load %arg9[%c0_855, %c0_856, %c0_857] : memref<16x2x32xf32, #tpu.memory_space<vmem>>, vector<16x2x32xf32>
    %c0_858 = arith.constant 0 : index
    %c0_859 = arith.constant 0 : index
    %c0_860 = arith.constant 0 : index
    %2050 = vector.load %arg7[%c0_858, %c0_859, %c0_860] : memref<16x2x64xf32, #tpu.memory_space<vmem>>, vector<16x2x32xf32>
    tpu.vector_store %arg7[%c0_858, %c0_859, %c0_860], %2049 {strides = array<i32>} : memref<16x2x64xf32, #tpu.memory_space<vmem>>, vector<16x2x32xf32>,
    %c0_861 = arith.constant 0 : index
    %c0_862 = arith.constant 0 : index
    %c0_863 = arith.constant 0 : index
    %2051 = vector.load %arg10[%c0_861, %c0_862, %c0_863] : memref<16x2x32xf32, #tpu.memory_space<vmem>>, vector<16x2x32xf32>
    %c0_864 = arith.constant 0 : index
    %c0_865 = arith.constant 0 : index
    %c32_866 = arith.constant 32 : index
    %2052 = vector.load %arg7[%c0_864, %c0_865, %c32_866] : memref<16x2x64xf32, #tpu.memory_space<vmem>>, vector<16x2x32xf32>
    tpu.vector_store %arg7[%c0_864, %c0_865, %c32_866], %2051 {strides = array<i32>} : memref<16x2x64xf32, #tpu.memory_space<vmem>>, vector<16x2x32xf32>,
    return
  }
}

</mosaic_0001>

<bundles_post_ra>
// kernel: sequence_encoder_rnn.1
= control target key start
LH: loop header
LB: loop body
LE: loop exit
PB: predicated region body
PF: predicated region fallthrough
CT: control target
= control target key end

     0   :  { %vm272_vm0 = vcmask 517120   ;;  %v7472_v3 = vmov 0.0   ;;  %s7473_s18 = smov 32   ;;  %vm58_vm1 = vcmask 523264   ;;  %v48_v55 = vlaneseq  ;;  %s7476_s27 = smov 96   ;;  %s8977_s1 = inlined_call_operand.vmem [shape: f32[64,256], index: 1, kind: input, shape index: {}]   ;;  %s8978_s2 = inlined_call_operand.vmem [shape: f32[64,256], index: 2, kind: input, shape index: {}]   ;;  %s8979_s0 = inlined_call_operand.vmem [shape: f32[32,64], index: 0, kind: input, shape index: {}]   ;;  %s8980_s3 = inlined_call_operand.vmem [shape: f32[1,256], index: 3, kind: input, shape index: {}]   ;;  %s8981_s4 = inlined_call_operand.vmem [shape: f32[64,256], index: 4, kind: input, shape index: {}]   ;;  %s8982_s5 = inlined_call_operand.vmem [shape: f32[64,256], index: 5, kind: input, shape index: {}]   ;;  %s8983_s6 = inlined_call_operand.vmem [shape: f32[1,256], index: 6, kind: input, shape index: {}]   ;;  %s8984_s7 = inlined_call_operand.vmem [shape: f32[16,2,64], index: 7, kind: output, shape index: {}]  }
   0x1   :  { %v31_v0 = vld [vmem:[%s8977_s1 + $0x8] sm:$0xff]  ;;  %v33_v1 = vld [vmem:[%s8977_s1 + $0x18] sm:$0xff]  ;;  %v30_v2 = vld [vmem:[%s8977_s1] sm:$0xff]  ;;  %135 = vmatprep.mubr.f32.mxu0 %v7472_v3  ;;  %359 = vmatprep.mubr.f32.mxu1 %v7472_v3  ;;  %273 = vst.msk [vmem:[#allocation5] sm:$0x3] %vm272_vm0, %v7472_v3  ;;  %vm438_vm2 = vcmask 254976  }
   0x2   :  { %274 = vst.msk [vmem:[#allocation6] sm:$0x3] %vm272_vm0, %v7472_v3  ;;  %v6403_v4 = vpack.c.bf16 %v33_v1, %v31_v0  ;;  %v32_v5 = vld [vmem:[%s8977_s1 + $0x10] sm:$0xff]  ;;  %v35_v6 = vld [vmem:[%s8977_s1 + $0x28] sm:$0xff]  ;;  %v37_v7 = vld [vmem:[%s8977_s1 + $0x38] sm:$0xff]  ;;  %v7687_v56 = vshrl.u32 %v48_v55, 7 }
   0x3   :  { %v6405_v8 = vpack.c.bf16 %v32_v5, %v30_v2  ;;  %v6407_v9 = vpack.c.bf16 %v37_v7, %v35_v6  ;;  %v34_v10 = vld [vmem:[%s8977_s1 + $0x20] sm:$0xff]  ;;  %v36_v11 = vld [vmem:[%s8977_s1 + $0x30] sm:$0xff]  ;;  %v39_v12 = vld [vmem:[%s8977_s1 + $0x48] sm:$0xff]  ;;  %v7474_v59 = vmov 1983009808   ;;  %vm444_vm3 = vcmask 517376  }
   0x4   :  { %6404 = vmatprep.subr.bf16.mxu0 %v6403_v4  ;;  %v41_v13 = vld [vmem:[%s8977_s1 + $0x58] sm:$0xff]  ;;  %v6409_v14 = vpack.c.bf16 %v36_v11, %v34_v10  ;;  %v38_v15 = vld [vmem:[%s8977_s1 + $0x40] sm:$0xff]  ;;  %v40_v16 = vld [vmem:[%s8977_s1 + $0x50] sm:$0xff]  ;;  %v50_v57 = vsub.s32 0, %v7687_v56  ;;  %v171_v60 = vunpack.c.l.s4 %v7474_v59  ;;  %v54_v61 = vsub.s32 1, %v7687_v56 }
   0x5   :  { %6406 = vmatpush1.bf16.msra.mxu0 %v6405_v8  ;;  %v6411_v17 = vpack.c.bf16 %v41_v13, %v39_v12  ;;  %v43_v18 = vld [vmem:[%s8977_s1 + $0x68] sm:$0xff]  ;;  %v278_v20 = vld [vmem:[%s8978_s2 + $0x18] sm:$0xff]  ;;  %v275_v23 = vld [vmem:[%s8978_s2] sm:$0xff]  ;;  %v6413_v29 = vpack.c.bf16 %v40_v16, %v38_v15  ;;  %vm3078_vm4 = vcmask 261120  }
   0x6   :  { %6408 = vmatprep.subr.bf16.mxu0 %v6407_v9  ;;  %v276_v19 = vld [vmem:[%s8978_s2 + $0x8] sm:$0xff]  ;;  %v45_v21 = vld [vmem:[%s8977_s1 + $0x78] sm:$0xff]  ;;  %v277_v24 = vld [vmem:[%s8978_s2 + $0x10] sm:$0xff]  ;;  %v172_v63 = vunpack.c.0.s8 %v171_v60 }
   0x7   :  { %v7571_v22 = vpack.c.bf16 %v278_v20, %v276_v19  ;;  %v7579_v25 = vpack.c.bf16 %v277_v24, %v275_v23  ;;  %v280_v26 = vld [vmem:[%s8978_s2 + $0x28] sm:$0xff]  ;;  %v282_v27 = vld [vmem:[%s8978_s2 + $0x38] sm:$0xff]  ;;  %v279_v28 = vld [vmem:[%s8978_s2 + $0x20] sm:$0xff]  ;;  %v6415_v33 = vpack.c.bf16 %v45_v21, %v43_v18 }
   0x8   :  { %v7591_v30 = vpack.c.bf16 %v282_v27, %v280_v26  ;;  %v281_v31 = vld [vmem:[%s8978_s2 + $0x30] sm:$0xff]  ;;  %v284_v32 = vld [vmem:[%s8978_s2 + $0x48] sm:$0xff]  ;;  %v42_v34 = vld [vmem:[%s8977_s1 + $0x60] sm:$0xff]  ;;  %v7699_v5 = vsub.s32 %v172_v63, %v7687_v56 }
   0x9   :  { %6410 = vmatpush1.bf16.msra.mxu0 %v6409_v14  ;;  %6420 = vmatprep.subr.bf16.mxu1 %v7571_v22  ;;  %v44_v35 = vld [vmem:[%s8977_s1 + $0x70] sm:$0xff]  ;;  %v7606_v36 = vpack.c.bf16 %v281_v31, %v279_v28  ;;  %v286_v37 = vld [vmem:[%s8978_s2 + $0x58] sm:$0xff]  ;;  %v283_v39 = vld [vmem:[%s8978_s2 + $0x40] sm:$0xff] }
   0xa   :  { %6412 = vmatprep.subr.bf16.mxu0 %v6411_v17  ;;  %6422 = vmatpush1.bf16.msra.mxu1 %v7579_v25  ;;  %v7612_v38 = vpack.c.bf16 %v286_v37, %v284_v32  ;;  %v285_v40 = vld [vmem:[%s8978_s2 + $0x50] sm:$0xff]  ;;  %v288_v41 = vld [vmem:[%s8978_s2 + $0x68] sm:$0xff]  ;;  %v290_v42 = vld [vmem:[%s8978_s2 + $0x78] sm:$0xff]  ;;  %v6417_v43 = vpack.c.bf16 %v44_v35, %v42_v34 }
   0xb   :  { %6424 = vmatprep.subr.bf16.mxu1 %v7591_v30  ;;  %v7626_v44 = vld [vmem:[#allocation6] sm:$0x3]  ;;  %v7629_v45 = vpack.c.bf16 %v285_v40, %v283_v39  ;;  %v7632_v46 = vpack.c.bf16 %v290_v42, %v288_v41  ;;  %v289_v48 = vld [vmem:[%s8978_s2 + $0x70] sm:$0xff]  ;;  %v27_v51 = vld [vmem:[%s8979_s0 + $0x8] sm:$0xff] }
   0xc   :  { %v287_v47 = vld [vmem:[%s8978_s2 + $0x60] sm:$0xff]  ;;  %390 = vrot.lane.b32.xlu1 %v7626_v44, %s7473_s18  ;;  %v28_v53 = vld [vmem:[%s8979_s0 + $0x10] sm:$0xff]  ;;  %v29_v54 = vld [vmem:[%s8979_s0 + $0x18] sm:$0xff] }
   0xd   :  { %6414 = vmatpush1.bf16.msra.mxu0 %v6413_v29  ;;  %v26_v49 = vld [vmem:[%s8979_s0] sm:$0xff]  ;;  %v7646_v50 = vpack.c.bf16 %v289_v48, %v287_v47 }
   0xe   :  { %6416 = vmatprep.subr.bf16.mxu0 %v6415_v33  ;;  %6426 = vmatpush1.bf16.msra.mxu1 %v7606_v36  ;;  %v291_v52 = vld [vmem:[#allocation5] sm:$0x3] }
   0xf   :  { %6428 = vmatprep.subr.bf16.mxu1 %v7612_v38  ;;  %v46_v58 = vld [vmem:[%s8980_s3] sm:$0x3]  ;;  %s7475_s3 = smov 64  }
  0x10   :  { %v51_v62 = vrot.slane %v46_v58, %v50_v57  ;;  %v55_v0 = vrot.slane %v46_v58, %v54_v61 }
  0x11   :  { %6418 = vmatpush1.bf16.msra.mxu0 %v6417_v43 }
  0x12   :  { %6430 = vmatpush1.bf16.msra.mxu1 %v7629_v45  ;;  %6436 = vmatprep.subr.bf16.mxu0 %v7571_v22 }
  0x13   :  { %6432 = vmatprep.subr.bf16.mxu1 %v7632_v46 }
  0x14   :  { %6247 = vmatmul.mubr.msk.f32.vlgmr.msra.gmra.mrb[0].mxu0 %vm58_vm1, %v26_v49 }
  0x15   :  { %141 = vmatprep.mubr.f32.mxu0 %v7472_v3  ;;  %6438 = vmatpush1.bf16.msra.mxu0 %v7579_v25 }
  0x16   :  { %6434 = vmatpush1.bf16.msra.mxu1 %v7646_v50  ;;  %6440 = vmatprep.subr.bf16.mxu0 %v7591_v30 }
  0x17   :  { %6452 = vmatprep.subr.bf16.mxu1 %v7571_v22 }
  0x18   :  { %6248 = vmatmul.mubr.msk.f32.gmra.mrb[2].mxu0 %vm58_vm1, %v27_v51 }
  0x19   :  { %147 = vmatprep.mubr.f32.mxu0 %v7472_v3  ;;  %6259 = vmatmul.mubr.msk.f32.vlgmr.msra.gmra.mrb[0].mxu1 %vm58_vm1, %v291_v52 }
  0x1a   :  { %6442 = vmatpush1.bf16.msra.mxu0 %v7606_v36  ;;  %6454 = vmatpush1.bf16.msra.mxu1 %v7579_v25 }
  0x1b   :  { %6444 = vmatprep.subr.bf16.mxu0 %v7612_v38  ;;  %6456 = vmatprep.subr.bf16.mxu1 %v7591_v30 }
  0x1c   :  { %6249 = vmatmul.mubr.msk.f32.gmra.mrb[4].mxu0 %vm58_vm1, %v28_v53  ;;  %693 = vmatprep.mubr.f32.mxu1 %v7472_v3 }
  0x1d   :  { %153 = vmatprep.mubr.f32.mxu0 %v7472_v3 }
  0x1e   :  { %6446 = vmatpush1.bf16.msra.mxu0 %v7629_v45  ;;  %6458 = vmatpush1.bf16.msra.mxu1 %v7606_v36 }
  0x1f   :  { %6448 = vmatprep.subr.bf16.mxu0 %v7632_v46  ;;  %6460 = vmatprep.subr.bf16.mxu1 %v7612_v38 }
  0x20   :  { %6250 = vmatmul.mubr.msk.f32.gmra.mrb[6].mxu0 %vm58_vm1, %v29_v54 }
  0x21   :  { %526 = vmatprep.mubr.f32.mxu0 %v7472_v3 }
  0x22   :  { %6450 = vmatpush1.bf16.msra.mxu0 %v7646_v50  ;;  %6462 = vmatpush1.bf16.msra.mxu1 %v7629_v45 }
  0x23   :  { %6464 = vmatprep.subr.bf16.mxu1 %v7632_v46  ;;  %6468 = vmatprep.subr.bf16.mxu0 %v7571_v22 }
  0x26   :  { %6466 = vmatpush1.bf16.msra.mxu1 %v7646_v50 }
  0x27   :  { %6484 = vmatprep.subr.bf16.mxu1 %v7571_v22 }
  0xe7   :  { %v137_v1 = vpop.f32.mrb[0].mxu0 }
  0xe8   :  { %v138_v2 = vadd.f32 %v137_v1, %v51_v62  ;;  %v139_v4 = vpop.f32.mrb[1].mxu0 }
  0xe9   :  { %v140_v6 = vadd.f32 %v139_v4, %v55_v0 }
  0xeb   :  { %v168_v7 = vcombine.low %v138_v2, %v140_v6  ;;  %v169_v8 = vcombine.high %v138_v2, %v140_v6  ;;  %v143_v9 = vpop.f32.mrb[2].mxu0 }
  0xec   :  { %v144_v10 = vadd.f32 %v143_v9, %v51_v62  ;;  %v145_v11 = vpop.f32.mrb[3].mxu0  ;;  %v361_v12 = vpop.f32.mrb[0].mxu1 }
  0xed   :  { %v176_v13 = vrot.slane %v168_v7, %v7699_v5  ;;  %v183_v14 = vrot.slane %v169_v8, %v7699_v5  ;;  %6251 = vst.sshfl [vmem:[#allocation2] sm:$0x33 pattern:$0x76325410] %v168_v7  ;;  %v146_v15 = vadd.f32 %v145_v11, %v55_v0  ;;  %v363_v16 = vpop.f32.mrb[1].mxu1 }
  0xee   :  { %6252 = vst.sshfl [vmem:[#allocation2 + $0x8] sm:$0x33 pattern:$0x76325410] %v169_v8 }
  0xef   :  { %v184_v17 = vcombine.high %v176_v13, %v176_v13  ;;  %v185_v18 = vcombine.high %v183_v14, %v183_v14  ;;  %v186_v19 = vcombine.low %v144_v10, %v146_v15  ;;  %v187_v20 = vcombine.high %v144_v10, %v146_v15  ;;  %v149_v21 = vpop.f32.mrb[4].mxu0  ;;  %v391_v14 = vpop.permute.xlu1 %390 }
  0xf0   :  { %v150_v23 = vadd.f32 %v149_v21, %v51_v62  ;;  %v151_v24 = vpop.f32.mrb[5].mxu0 }
  0xf1   :  { %257 = vst [vmem:[#allocation2 + $0x4] sm:$0xf] %v184_v17  ;;  %259 = vst [vmem:[#allocation2 + $0xc] sm:$0xf] %v185_v18  ;;  %v194_v26 = vrot.slane %v186_v19, %v7699_v5  ;;  %v201_v27 = vrot.slane %v187_v20, %v7699_v5  ;;  %v152_v28 = vadd.f32 %v151_v24, %v55_v0 }
  0xf2   :  { %6253 = vst.sshfl [vmem:[#allocation2 + $0x10] sm:$0x33 pattern:$0x76325410] %v186_v19 }
  0xf3   :  { %6254 = vst.sshfl [vmem:[#allocation2 + $0x18] sm:$0x33 pattern:$0x76325410] %v187_v20  ;;  %v202_v29 = vcombine.high %v194_v26, %v194_v26  ;;  %v203_v31 = vcombine.high %v201_v27, %v201_v27  ;;  %v204_v32 = vcombine.low %v150_v23, %v152_v28  ;;  %v205_v33 = vcombine.high %v150_v23, %v152_v28  ;;  %v155_v34 = vpop.f32.mrb[6].mxu0 }
  0xf4   :  { %v156_v35 = vadd.f32 %v155_v34, %v51_v62  ;;  %v157_v37 = vpop.f32.mrb[7].mxu0  ;;  %v366_v39 = vld [vmem:[#allocation2] sm:$0xf] }
  0xf5   :  { %261 = vst [vmem:[#allocation2 + $0x14] sm:$0xf] %v202_v29  ;;  %263 = vst [vmem:[#allocation2 + $0x1c] sm:$0xf] %v203_v31  ;;  %v212_v40 = vrot.slane %v204_v32, %v7699_v5  ;;  %v219_v41 = vrot.slane %v205_v33, %v7699_v5  ;;  %v158_v42 = vadd.f32 %v157_v37, %v55_v0 }
  0xf6   :  { %6255 = vst.sshfl [vmem:[#allocation2 + $0x20] sm:$0x33 pattern:$0x76325410] %v204_v32  ;;  %v369_v43 = vadd.f32 %v366_v39, %v361_v12 }
  0xf7   :  { %6256 = vst.sshfl [vmem:[#allocation2 + $0x28] sm:$0x33 pattern:$0x76325410] %v205_v33  ;;  %v220_v47 = vcombine.high %v212_v40, %v212_v40  ;;  %v221_v48 = vcombine.high %v219_v41, %v219_v41  ;;  %v222_v49 = vcombine.low %v156_v35, %v158_v42  ;;  %v223_v51 = vcombine.high %v156_v35, %v158_v42 }
  0xf8   :  { %6960 = vtanh.f32 %v369_v43  ;;  %v6261_v0 = vmul.f32 -1.442695, %v369_v43  ;;  %v534_v35 = vld [vmem:[#allocation2 + $0x4] sm:$0xf] }
  0xf9   :  { %265 = vst [vmem:[#allocation2 + $0x24] sm:$0xf] %v220_v47  ;;  %267 = vst [vmem:[#allocation2 + $0x2c] sm:$0xf] %v221_v48  ;;  %v230_v52 = vrot.slane %v222_v49, %v7699_v5  ;;  %v237_v53 = vrot.slane %v223_v51, %v7699_v5 }
  0xfa   :  { %6257 = vst.sshfl [vmem:[#allocation2 + $0x30] sm:$0x33 pattern:$0x76325410] %v222_v49 }
  0xfb   :  { %6258 = vst.sshfl [vmem:[#allocation2 + $0x38] sm:$0x33 pattern:$0x76325410] %v223_v51  ;;  %v238_v54 = vcombine.high %v230_v52, %v230_v52  ;;  %v239_v55 = vcombine.high %v237_v53, %v237_v53 }
  0xfd   :  { %269 = vst [vmem:[#allocation2 + $0x34] sm:$0xf] %v238_v54  ;;  %271 = vst [vmem:[#allocation2 + $0x3c] sm:$0xf] %v239_v55 }
 0x102   :  { %v6961_v58 = vpop.eup %6960  ;;  %v6264_v33 = vld.sshfl [vmem:[#allocation2 + $0x38] sm:$0x33 pattern:$0x76325410] }
 0x103   :  { %395 = vrot.lane.b32.xlu0 %v6961_v58, %s7473_s18  ;;  %v546_v37 = vcombine.high %v6264_v33, %v6264_v33 }
 0x104   :  { %v6260_v59 = vld.sshfl [vmem:[#allocation2 + $0x3c] sm:$0x33 pattern:$0x76325410] }
 0x105   :  { %v378_v60 = vcombine.high %v6260_v59, %v6260_v59 }
 0x107   :  { %v380_v62 = vadd.f32 %v378_v60, %v363_v16 }
 0x109   :  { %6962 = vtanh.f32 %v380_v62  ;;  %v6262_v4 = vmul.f32 -1.442695, %v380_v62 }
 0x10a   :  { %6964 = vpow2.f32 %v6261_v0 }
 0x113   :  { %v6963_v63 = vpop.eup %6962 }
 0x114   :  { %419 = vrot.lane.b32.xlu0 %v6963_v63, %s7473_s18  ;;  %v6965_v1 = vpop.eup %6964 }
 0x115   :  { %v385_v2 = vadd.f32 1.0, %v6965_v1 }
 0x117   :  { %6966 = vrcp.f32 %v385_v2 }
 0x118   :  { %6968 = vpow2.f32 %v6262_v4 }
 0x121   :  { %v6967_v6 = vpop.eup %6966 }
 0x122   :  { %v6969_v7 = vpop.eup %6968  ;;  %v393_v15 = vmul.f32 %v6967_v6, %v391_v14 }
 0x123   :  { %v413_v10 = vadd.f32 1.0, %v6969_v7 }
 0x125   :  { %6970 = vrcp.f32 %v413_v10 }
 0x12f   :  { %v6971_v11 = vpop.eup %6970 }
 0x130   :  { %v417_v19 = vmul.f32 %v6971_v11, %v7626_v44 }
 0x175   :  { %v396_v8 = vpop.permute.xlu0 %395 }
 0x176   :  { %v398_v9 = vmul.f32 %v6967_v6, %v396_v8 }
 0x178   :  { %400 = vrot.lane.b32.xlu1 %v398_v9, %s7473_s18 }
 0x186   :  { %v420_v12 = vpop.permute.xlu0 %419 }
 0x187   :  { %v422_v13 = vmul.f32 %v6971_v11, %v420_v12 }
 0x189   :  { %424 = vrot.lane.b32.xlu0 %v422_v13, %s7473_s18 }
 0x1ea   :  { %v401_v16 = vpop.permute.xlu1 %400 }
 0x1eb   :  { %v403_v17 = vadd.f32 %v401_v16, %v393_v15 }
 0x1ed   :  { %6972 = vtanh.f32 %v403_v17 }
 0x1f7   :  { %v6973_v18 = vpop.eup %6972 }
 0x1f8   :  { %406 = vrot.lane.b32.xlu1 %v6973_v18, %s7473_s18 }
 0x1fb   :  { %v425_v20 = vpop.permute.xlu0 %424 }
 0x1fc   :  { %v427_v21 = vadd.f32 %v425_v20, %v417_v19  ;;  %v6268_v19 = vld.sshfl [vmem:[#allocation2 + $0x34] sm:$0x33 pattern:$0x76325410] }
 0x1fe   :  { %6974 = vtanh.f32 %v427_v21 }
 0x208   :  { %v6975_v23 = vpop.eup %6974 }
 0x209   :  { %430 = vrot.lane.b32.xlu0 %v6975_v23, %s7473_s18  ;;  %v713_v23 = vcombine.high %v6268_v19, %v6268_v19 }
 0x26a   :  { %v407_v24 = vpop.permute.xlu1 %406 }
 0x26b   :  { %v409_v26 = vmul.f32 %v6967_v6, %v407_v24 }
 0x26d   :  { %435 = vrot.lane.b32.xlu1 %v409_v26, %s7475_s3 }
 0x271   :  { %447 = vrot.lane.b32.xlu1 %v403_v17, %s7476_s27 }
 0x27b   :  { %v431_v27 = vpop.permute.xlu0 %430 }
 0x27c   :  { %v7718_v28 = vmul.f32 %v6971_v11, %v431_v27 }
 0x27e   :  { %441 = vrot.lane.b32.xlu0 %v7718_v28, %s7476_s27 }
 0x2df   :  { %v436_v44 = vpop.permute.xlu1 %435 }
 0x2e0   :  { %439 = vst.msk [vmem:[#allocation5] sm:$0x3] %vm438_vm2, %v436_v44  ;;  %452 = vst.msk [vmem:[#allocation3] sm:$0x3] %vm438_vm2, %v436_v44 }
 0x2e3   :  { %v448_v29 = vpop.permute.xlu1 %447 }
 0x2e4   :  { %450 = vst.msk [vmem:[#allocation6] sm:$0x3] %vm438_vm2, %v448_v29 }
 0x2e5   :  { %451 = vst.msk [vmem:[#allocation6] sm:$0x3] %vm444_vm3, %v427_v21  ;;  %v701_v21 = vld [vmem:[#allocation2 + $0x8] sm:$0xf] }
 0x2ec   :  { %v549_v47 = vld [vmem:[#allocation6] sm:$0x3] }
 0x2f0   :  { %v442_v31 = vpop.permute.xlu0 %441 }
 0x2f1   :  { %445 = vst.msk [vmem:[#allocation5] sm:$0x3] %vm444_vm3, %v442_v31 }
 0x2f8   :  { %v458_v32 = vld [vmem:[#allocation5] sm:$0x3] }
 0x2f9   :  { %6263 = vmatmul.mubr.msk.f32.vlgmr.msra.gmra.mrb[8].mxu0 %vm58_vm1, %v458_v32 }
 0x2fa   :  { %6470 = vmatpush1.bf16.msra.mxu0 %v7579_v25  ;;  %860 = vmatprep.mubr.f32.mxu0 %v7472_v3 }
 0x2fb   :  { %6472 = vmatprep.subr.bf16.mxu0 %v7591_v30 }
 0x2fe   :  { %6474 = vmatpush1.bf16.msra.mxu0 %v7606_v36 }
 0x2ff   :  { %6476 = vmatprep.subr.bf16.mxu0 %v7612_v38 }
 0x302   :  { %6478 = vmatpush1.bf16.msra.mxu0 %v7629_v45 }
 0x303   :  { %6480 = vmatprep.subr.bf16.mxu0 %v7632_v46 }
 0x306   :  { %6482 = vmatpush1.bf16.msra.mxu0 %v7646_v50 }
 0x307   :  { %6500 = vmatprep.subr.bf16.mxu0 %v7571_v22 }
 0x3cc   :  { %v528_v34 = vpop.f32.mrb[8].mxu0 }
 0x3cd   :  { %v537_v39 = vadd.f32 %v534_v35, %v528_v34  ;;  %v530_v40 = vpop.f32.mrb[9].mxu0 }
 0x3ce   :  { %v548_v41 = vadd.f32 %v546_v37, %v530_v40 }
 0x3cf   :  { %6976 = vtanh.f32 %v537_v39  ;;  %v6265_v48 = vmul.f32 -1.442695, %v537_v39 }
 0x3d0   :  { %6978 = vtanh.f32 %v548_v41  ;;  %v6266_v49 = vmul.f32 -1.442695, %v548_v41 }
 0x3d1   :  { %6980 = vpow2.f32 %v6265_v48 }
 0x3d2   :  { %6982 = vpow2.f32 %v6266_v49 }
 0x3d9   :  { %v6977_v42 = vpop.eup %6976 }
 0x3da   :  { %v6979_v43 = vpop.eup %6978  ;;  %563 = vrot.lane.b32.xlu0 %v6977_v42, %s7473_s18 }
 0x3db   :  { %587 = vrot.lane.b32.xlu1 %v6979_v43, %s7473_s18  ;;  %v6981_v51 = vpop.eup %6980 }
 0x3dc   :  { %v6983_v52 = vpop.eup %6982  ;;  %v553_v53 = vadd.f32 1.0, %v6981_v51 }
 0x3dd   :  { %v581_v54 = vadd.f32 1.0, %v6983_v52 }
 0x3de   :  { %558 = vrot.lane.b32.xlu0 %v549_v47, %s7473_s18  ;;  %6984 = vrcp.f32 %v553_v53 }
 0x3df   :  { %6986 = vrcp.f32 %v581_v54 }
 0x3e8   :  { %v6985_v55 = vpop.eup %6984 }
 0x3e9   :  { %v6987_v59 = vpop.eup %6986 }
 0x3ea   :  { %v585_v4 = vmul.f32 %v6987_v59, %v549_v47 }
 0x44c   :  { %v564_v58 = vpop.permute.xlu0 %563 }
 0x44d   :  { %v566_v60 = vmul.f32 %v6985_v55, %v564_v58  ;;  %v588_v62 = vpop.permute.xlu1 %587 }
 0x44e   :  { %v590_v63 = vmul.f32 %v6987_v59, %v588_v62 }
 0x44f   :  { %568 = vrot.lane.b32.xlu1 %v566_v60, %s7473_s18 }
 0x450   :  { %592 = vrot.lane.b32.xlu0 %v590_v63, %s7473_s18  ;;  %v559_v0 = vpop.permute.xlu0 %558 }
 0x451   :  { %v561_v1 = vmul.f32 %v6985_v55, %v559_v0 }
 0x4c1   :  { %v569_v2 = vpop.permute.xlu1 %568 }
 0x4c2   :  { %v571_v6 = vadd.f32 %v569_v2, %v561_v1  ;;  %v593_v7 = vpop.permute.xlu0 %592 }
 0x4c3   :  { %v595_v8 = vadd.f32 %v593_v7, %v585_v4 }
 0x4c4   :  { %6988 = vtanh.f32 %v571_v6 }
 0x4c5   :  { %6990 = vtanh.f32 %v595_v8 }
 0x4ce   :  { %v6989_v9 = vpop.eup %6988 }
 0x4cf   :  { %v6991_v10 = vpop.eup %6990  ;;  %574 = vrot.lane.b32.xlu1 %v6989_v9, %s7473_s18 }
 0x4d0   :  { %598 = vrot.lane.b32.xlu0 %v6991_v10, %s7473_s18  ;;  %v868_v10 = vld [vmem:[#allocation2 + $0xc] sm:$0xf] }
 0x541   :  { %v575_v11 = vpop.permute.xlu1 %574 }
 0x542   :  { %v577_v12 = vmul.f32 %v6985_v55, %v575_v11  ;;  %v599_v13 = vpop.permute.xlu0 %598 }
 0x543   :  { %v7744_v14 = vmul.f32 %v6987_v59, %v599_v13 }
 0x544   :  { %603 = vrot.lane.b32.xlu1 %v577_v12, %s7475_s3 }
 0x545   :  { %608 = vrot.lane.b32.xlu0 %v7744_v14, %s7476_s27 }
 0x548   :  { %613 = vrot.lane.b32.xlu1 %v571_v6, %s7476_s27 }
 0x5b6   :  { %v604_v15 = vpop.permute.xlu1 %603 }
 0x5b7   :  { %606 = vst.msk [vmem:[#allocation5] sm:$0x3] %vm438_vm2, %v604_v15  ;;  %619 = vst.msk [vmem:[#allocation3 + $0x2] sm:$0x3] %vm438_vm2, %v604_v15  ;;  %v609_v16 = vpop.permute.xlu0 %608 }
 0x5b8   :  { %611 = vst.msk [vmem:[#allocation5] sm:$0x3] %vm444_vm3, %v609_v16 }
 0x5ba   :  { %v614_v17 = vpop.permute.xlu1 %613 }
 0x5bb   :  { %616 = vst.msk [vmem:[#allocation6] sm:$0x3] %vm438_vm2, %v614_v17 }
 0x5bc   :  { %617 = vst.msk [vmem:[#allocation6] sm:$0x3] %vm444_vm3, %v595_v8  ;;  %v6272_v8 = vld.sshfl [vmem:[#allocation2 + $0x30] sm:$0x33 pattern:$0x76325410] }
 0x5bd   :  { %v880_v11 = vcombine.high %v6272_v8, %v6272_v8 }
 0x5bf   :  { %v625_v18 = vld [vmem:[#allocation5] sm:$0x3] }
 0x5c0   :  { %6267 = vmatmul.mubr.msk.f32.vlgmr.msra.gmra.mrb[2].mxu1 %vm58_vm1, %v625_v18 }
 0x5c1   :  { %6486 = vmatpush1.bf16.msra.mxu1 %v7579_v25  ;;  %1027 = vmatprep.mubr.f32.mxu1 %v7472_v3 }
 0x5c2   :  { %6488 = vmatprep.subr.bf16.mxu1 %v7591_v30 }
 0x5c3   :  { %v716_v31 = vld [vmem:[#allocation6] sm:$0x3] }
 0x5c5   :  { %6490 = vmatpush1.bf16.msra.mxu1 %v7606_v36 }
 0x5c6   :  { %6492 = vmatprep.subr.bf16.mxu1 %v7612_v38 }
 0x5c9   :  { %6494 = vmatpush1.bf16.msra.mxu1 %v7629_v45 }
 0x5ca   :  { %6496 = vmatprep.subr.bf16.mxu1 %v7632_v46 }
 0x5cd   :  { %6498 = vmatpush1.bf16.msra.mxu1 %v7646_v50 }
 0x5ce   :  { %6516 = vmatprep.subr.bf16.mxu1 %v7571_v22 }
 0x693   :  { %v695_v20 = vpop.f32.mrb[2].mxu1 }
 0x694   :  { %v704_v24 = vadd.f32 %v701_v21, %v695_v20  ;;  %v697_v26 = vpop.f32.mrb[3].mxu1 }
 0x695   :  { %v715_v27 = vadd.f32 %v713_v23, %v697_v26 }
 0x696   :  { %6992 = vtanh.f32 %v704_v24  ;;  %v6269_v32 = vmul.f32 -1.442695, %v704_v24 }
 0x697   :  { %6994 = vtanh.f32 %v715_v27  ;;  %v6270_v33 = vmul.f32 -1.442695, %v715_v27 }
 0x698   :  { %6996 = vpow2.f32 %v6269_v32 }
 0x699   :  { %6998 = vpow2.f32 %v6270_v33 }
 0x6a0   :  { %v6993_v44 = vpop.eup %6992 }
 0x6a1   :  { %v6995_v29 = vpop.eup %6994  ;;  %730 = vrot.lane.b32.xlu0 %v6993_v44, %s7473_s18 }
 0x6a2   :  { %754 = vrot.lane.b32.xlu1 %v6995_v29, %s7473_s18  ;;  %v6997_v34 = vpop.eup %6996 }
 0x6a3   :  { %v6999_v35 = vpop.eup %6998  ;;  %v720_v37 = vadd.f32 1.0, %v6997_v34 }
 0x6a4   :  { %v748_v39 = vadd.f32 1.0, %v6999_v35 }
 0x6a5   :  { %725 = vrot.lane.b32.xlu0 %v716_v31, %s7473_s18  ;;  %7000 = vrcp.f32 %v720_v37 }
 0x6a6   :  { %7002 = vrcp.f32 %v748_v39 }
 0x6af   :  { %v7001_v40 = vpop.eup %7000 }
 0x6b0   :  { %v7003_v42 = vpop.eup %7002 }
 0x6b1   :  { %v752_v53 = vmul.f32 %v7003_v42, %v716_v31 }
 0x713   :  { %v731_v41 = vpop.permute.xlu0 %730 }
 0x714   :  { %v733_v43 = vmul.f32 %v7001_v40, %v731_v41  ;;  %v755_v47 = vpop.permute.xlu1 %754 }
 0x715   :  { %v757_v48 = vmul.f32 %v7003_v42, %v755_v47 }
 0x716   :  { %735 = vrot.lane.b32.xlu1 %v733_v43, %s7473_s18 }
 0x717   :  { %759 = vrot.lane.b32.xlu0 %v757_v48, %s7473_s18  ;;  %v726_v49 = vpop.permute.xlu0 %725 }
 0x718   :  { %v728_v51 = vmul.f32 %v7001_v40, %v726_v49 }
 0x788   :  { %v736_v52 = vpop.permute.xlu1 %735 }
 0x789   :  { %v738_v54 = vadd.f32 %v736_v52, %v728_v51  ;;  %v760_v55 = vpop.permute.xlu0 %759 }
 0x78a   :  { %v762_v58 = vadd.f32 %v760_v55, %v752_v53 }
 0x78b   :  { %7004 = vtanh.f32 %v738_v54 }
 0x78c   :  { %7006 = vtanh.f32 %v762_v58 }
 0x795   :  { %v7005_v59 = vpop.eup %7004 }
 0x796   :  { %v7007_v60 = vpop.eup %7006  ;;  %741 = vrot.lane.b32.xlu1 %v7005_v59, %s7473_s18  ;;  %v6276_v59 = vld.sshfl [vmem:[#allocation2 + $0x2c] sm:$0x33 pattern:$0x76325410] }
 0x797   :  { %765 = vrot.lane.b32.xlu0 %v7007_v60, %s7473_s18 }
 0x808   :  { %v742_v62 = vpop.permute.xlu1 %741 }
 0x809   :  { %v744_v63 = vmul.f32 %v7001_v40, %v742_v62  ;;  %v766_v0 = vpop.permute.xlu0 %765  ;;  %v1035_v62 = vld [vmem:[#allocation2 + $0x10] sm:$0xf] }
 0x80a   :  { %v7772_v1 = vmul.f32 %v7003_v42, %v766_v0 }
 0x80b   :  { %770 = vrot.lane.b32.xlu1 %v744_v63, %s7475_s3  ;;  %v1047_v63 = vcombine.high %v6276_v59, %v6276_v59 }
 0x80c   :  { %775 = vrot.lane.b32.xlu0 %v7772_v1, %s7476_s27 }
 0x80f   :  { %780 = vrot.lane.b32.xlu1 %v738_v54, %s7476_s27 }
 0x87d   :  { %v771_v2 = vpop.permute.xlu1 %770 }
 0x87e   :  { %773 = vst.msk [vmem:[#allocation5] sm:$0x3] %vm438_vm2, %v771_v2  ;;  %786 = vst.msk [vmem:[#allocation3 + $0x4] sm:$0x3] %vm438_vm2, %v771_v2  ;;  %v776_v4 = vpop.permute.xlu0 %775 }
 0x87f   :  { %778 = vst.msk [vmem:[#allocation5] sm:$0x3] %vm444_vm3, %v776_v4 }
 0x881   :  { %v781_v6 = vpop.permute.xlu1 %780 }
 0x882   :  { %783 = vst.msk [vmem:[#allocation6] sm:$0x3] %vm438_vm2, %v781_v6 }
 0x883   :  { %784 = vst.msk [vmem:[#allocation6] sm:$0x3] %vm444_vm3, %v762_v58 }
 0x886   :  { %v792_v7 = vld [vmem:[#allocation5] sm:$0x3] }
 0x887   :  { %6271 = vmatmul.mubr.msk.f32.vlgmr.msra.gmra.mrb[10].mxu0 %vm58_vm1, %v792_v7 }
 0x888   :  { %6502 = vmatpush1.bf16.msra.mxu0 %v7579_v25  ;;  %1194 = vmatprep.mubr.f32.mxu0 %v7472_v3 }
 0x889   :  { %6504 = vmatprep.subr.bf16.mxu0 %v7591_v30 }
 0x88a   :  { %v883_v18 = vld [vmem:[#allocation6] sm:$0x3] }
 0x88c   :  { %6506 = vmatpush1.bf16.msra.mxu0 %v7606_v36 }
 0x88d   :  { %6508 = vmatprep.subr.bf16.mxu0 %v7612_v38 }
 0x890   :  { %6510 = vmatpush1.bf16.msra.mxu0 %v7629_v45 }
 0x891   :  { %6512 = vmatprep.subr.bf16.mxu0 %v7632_v46 }
 0x894   :  { %6514 = vmatpush1.bf16.msra.mxu0 %v7646_v50 }
 0x895   :  { %6532 = vmatprep.subr.bf16.mxu0 %v7571_v22 }
 0x95a   :  { %v862_v9 = vpop.f32.mrb[10].mxu0 }
 0x95b   :  { %v871_v12 = vadd.f32 %v868_v10, %v862_v9  ;;  %v864_v13 = vpop.f32.mrb[11].mxu0 }
 0x95c   :  { %v882_v15 = vadd.f32 %v880_v11, %v864_v13 }
 0x95d   :  { %7008 = vtanh.f32 %v871_v12  ;;  %v6273_v19 = vmul.f32 -1.442695, %v871_v12 }
 0x95e   :  { %7010 = vtanh.f32 %v882_v15  ;;  %v6274_v20 = vmul.f32 -1.442695, %v882_v15 }
 0x95f   :  { %7012 = vpow2.f32 %v6273_v19 }
 0x960   :  { %7014 = vpow2.f32 %v6274_v20 }
 0x967   :  { %v7009_v16 = vpop.eup %7008 }
 0x968   :  { %v7011_v17 = vpop.eup %7010  ;;  %897 = vrot.lane.b32.xlu0 %v7009_v16, %s7473_s18 }
 0x969   :  { %921 = vrot.lane.b32.xlu1 %v7011_v17, %s7473_s18  ;;  %v7013_v21 = vpop.eup %7012 }
 0x96a   :  { %v7015_v23 = vpop.eup %7014  ;;  %v887_v24 = vadd.f32 1.0, %v7013_v21 }
 0x96b   :  { %v915_v26 = vadd.f32 1.0, %v7015_v23 }
 0x96c   :  { %892 = vrot.lane.b32.xlu0 %v883_v18, %s7473_s18  ;;  %7016 = vrcp.f32 %v887_v24 }
 0x96d   :  { %7018 = vrcp.f32 %v915_v26 }
 0x976   :  { %v7017_v27 = vpop.eup %7016 }
 0x977   :  { %v7019_v29 = vpop.eup %7018 }
 0x978   :  { %v919_v39 = vmul.f32 %v7019_v29, %v883_v18 }
 0x9da   :  { %v898_v44 = vpop.permute.xlu0 %897 }
 0x9db   :  { %v900_v31 = vmul.f32 %v7017_v27, %v898_v44  ;;  %v922_v32 = vpop.permute.xlu1 %921 }
 0x9dc   :  { %v924_v33 = vmul.f32 %v7019_v29, %v922_v32 }
 0x9dd   :  { %902 = vrot.lane.b32.xlu1 %v900_v31, %s7473_s18 }
 0x9de   :  { %926 = vrot.lane.b32.xlu0 %v924_v33, %s7473_s18  ;;  %v893_v34 = vpop.permute.xlu0 %892 }
 0x9df   :  { %v895_v35 = vmul.f32 %v7017_v27, %v893_v34 }
 0xa4f   :  { %v903_v37 = vpop.permute.xlu1 %902 }
 0xa50   :  { %v905_v40 = vadd.f32 %v903_v37, %v895_v35  ;;  %v927_v41 = vpop.permute.xlu0 %926 }
 0xa51   :  { %v929_v42 = vadd.f32 %v927_v41, %v919_v39 }
 0xa52   :  { %7020 = vtanh.f32 %v905_v40 }
 0xa53   :  { %7022 = vtanh.f32 %v929_v42 }
 0xa5c   :  { %v7021_v43 = vpop.eup %7020 }
 0xa5d   :  { %v7023_v47 = vpop.eup %7022  ;;  %908 = vrot.lane.b32.xlu1 %v7021_v43, %s7473_s18 }
 0xa5e   :  { %932 = vrot.lane.b32.xlu0 %v7023_v47, %s7473_s18  ;;  %v6280_v47 = vld.sshfl [vmem:[#allocation2 + $0x28] sm:$0x33 pattern:$0x76325410] }
 0xacf   :  { %v909_v48 = vpop.permute.xlu1 %908 }
 0xad0   :  { %v911_v49 = vmul.f32 %v7017_v27, %v909_v48  ;;  %v933_v51 = vpop.permute.xlu0 %932 }
 0xad1   :  { %v7800_v52 = vmul.f32 %v7019_v29, %v933_v51  ;;  %v1214_v51 = vcombine.high %v6280_v47, %v6280_v47 }
 0xad2   :  { %937 = vrot.lane.b32.xlu1 %v911_v49, %s7475_s3  ;;  %v1202_v49 = vld [vmem:[#allocation2 + $0x14] sm:$0xf] }
 0xad3   :  { %942 = vrot.lane.b32.xlu0 %v7800_v52, %s7476_s27 }
 0xad6   :  { %947 = vrot.lane.b32.xlu1 %v905_v40, %s7476_s27 }
 0xb44   :  { %v938_v53 = vpop.permute.xlu1 %937 }
 0xb45   :  { %940 = vst.msk [vmem:[#allocation5] sm:$0x3] %vm438_vm2, %v938_v53  ;;  %953 = vst.msk [vmem:[#allocation3 + $0x6] sm:$0x3] %vm438_vm2, %v938_v53  ;;  %v943_v54 = vpop.permute.xlu0 %942 }
 0xb46   :  { %945 = vst.msk [vmem:[#allocation5] sm:$0x3] %vm444_vm3, %v943_v54 }
 0xb48   :  { %v948_v55 = vpop.permute.xlu1 %947 }
 0xb49   :  { %950 = vst.msk [vmem:[#allocation6] sm:$0x3] %vm438_vm2, %v948_v55 }
 0xb4a   :  { %951 = vst.msk [vmem:[#allocation6] sm:$0x3] %vm444_vm3, %v929_v42 }
 0xb4d   :  { %v959_v58 = vld [vmem:[#allocation5] sm:$0x3] }
 0xb4e   :  { %6275 = vmatmul.mubr.msk.f32.vlgmr.msra.gmra.mrb[4].mxu1 %vm58_vm1, %v959_v58 }
 0xb4f   :  { %6518 = vmatpush1.bf16.msra.mxu1 %v7579_v25  ;;  %1361 = vmatprep.mubr.f32.mxu1 %v7472_v3 }
 0xb50   :  { %6520 = vmatprep.subr.bf16.mxu1 %v7591_v30 }
 0xb51   :  { %v1050_v8 = vld [vmem:[#allocation6] sm:$0x3] }
 0xb53   :  { %6522 = vmatpush1.bf16.msra.mxu1 %v7606_v36 }
 0xb54   :  { %6524 = vmatprep.subr.bf16.mxu1 %v7612_v38 }
 0xb57   :  { %6526 = vmatpush1.bf16.msra.mxu1 %v7629_v45 }
 0xb58   :  { %6528 = vmatprep.subr.bf16.mxu1 %v7632_v46 }
 0xb5b   :  { %6530 = vmatpush1.bf16.msra.mxu1 %v7646_v50 }
 0xb5c   :  { %6548 = vmatprep.subr.bf16.mxu1 %v7571_v22 }
 0xc21   :  { %v1029_v60 = vpop.f32.mrb[4].mxu1 }
 0xc22   :  { %v1038_v0 = vadd.f32 %v1035_v62, %v1029_v60  ;;  %v1031_v2 = vpop.f32.mrb[5].mxu1 }
 0xc23   :  { %v1049_v4 = vadd.f32 %v1047_v63, %v1031_v2 }
 0xc24   :  { %7024 = vtanh.f32 %v1038_v0  ;;  %v6277_v9 = vmul.f32 -1.442695, %v1038_v0 }
 0xc25   :  { %7026 = vtanh.f32 %v1049_v4  ;;  %v6278_v10 = vmul.f32 -1.442695, %v1049_v4 }
 0xc26   :  { %7028 = vpow2.f32 %v6277_v9 }
 0xc27   :  { %7030 = vpow2.f32 %v6278_v10 }
 0xc2e   :  { %v7025_v6 = vpop.eup %7024 }
 0xc2f   :  { %v7027_v7 = vpop.eup %7026  ;;  %1064 = vrot.lane.b32.xlu0 %v7025_v6, %s7473_s18 }
 0xc30   :  { %1088 = vrot.lane.b32.xlu1 %v7027_v7, %s7473_s18  ;;  %v7029_v11 = vpop.eup %7028 }
 0xc31   :  { %v7031_v12 = vpop.eup %7030  ;;  %v1054_v13 = vadd.f32 1.0, %v7029_v11 }
 0xc32   :  { %v1082_v15 = vadd.f32 1.0, %v7031_v12 }
 0xc33   :  { %1059 = vrot.lane.b32.xlu0 %v1050_v8, %s7473_s18  ;;  %7032 = vrcp.f32 %v1054_v13 }
 0xc34   :  { %7034 = vrcp.f32 %v1082_v15 }
 0xc3d   :  { %v7033_v16 = vpop.eup %7032 }
 0xc3e   :  { %v7035_v18 = vpop.eup %7034 }
 0xc3f   :  { %v1086_v27 = vmul.f32 %v7035_v18, %v1050_v8 }
 0xca1   :  { %v1065_v17 = vpop.permute.xlu0 %1064 }
 0xca2   :  { %v1067_v19 = vmul.f32 %v7033_v16, %v1065_v17  ;;  %v1089_v20 = vpop.permute.xlu1 %1088 }
 0xca3   :  { %v1091_v21 = vmul.f32 %v7035_v18, %v1089_v20 }
 0xca4   :  { %1069 = vrot.lane.b32.xlu1 %v1067_v19, %s7473_s18 }
 0xca5   :  { %1093 = vrot.lane.b32.xlu0 %v1091_v21, %s7473_s18  ;;  %v1060_v23 = vpop.permute.xlu0 %1059 }
 0xca6   :  { %v1062_v24 = vmul.f32 %v7033_v16, %v1060_v23 }
 0xd16   :  { %v1070_v26 = vpop.permute.xlu1 %1069 }
 0xd17   :  { %v1072_v44 = vadd.f32 %v1070_v26, %v1062_v24  ;;  %v1094_v29 = vpop.permute.xlu0 %1093 }
 0xd18   :  { %v1096_v31 = vadd.f32 %v1094_v29, %v1086_v27 }
 0xd19   :  { %7036 = vtanh.f32 %v1072_v44 }
 0xd1a   :  { %7038 = vtanh.f32 %v1096_v31 }
 0xd23   :  { %v7037_v32 = vpop.eup %7036 }
 0xd24   :  { %v7039_v33 = vpop.eup %7038  ;;  %1075 = vrot.lane.b32.xlu1 %v7037_v32, %s7473_s18 }
 0xd25   :  { %1099 = vrot.lane.b32.xlu0 %v7039_v33, %s7473_s18 }
 0xd96   :  { %v1076_v34 = vpop.permute.xlu1 %1075 }
 0xd97   :  { %v1078_v35 = vmul.f32 %v7033_v16, %v1076_v34  ;;  %v1100_v37 = vpop.permute.xlu0 %1099  ;;  %v6284_v34 = vld.sshfl [vmem:[#allocation2 + $0x24] sm:$0x33 pattern:$0x76325410] }
 0xd98   :  { %v7828_v39 = vmul.f32 %v7035_v18, %v1100_v37  ;;  %v1369_v37 = vld [vmem:[#allocation2 + $0x18] sm:$0xf] }
 0xd99   :  { %1104 = vrot.lane.b32.xlu1 %v1078_v35, %s7475_s3 }
 0xd9a   :  { %1109 = vrot.lane.b32.xlu0 %v7828_v39, %s7476_s27 }
 0xd9d   :  { %1114 = vrot.lane.b32.xlu1 %v1072_v44, %s7476_s27 }
 0xe0b   :  { %v1105_v40 = vpop.permute.xlu1 %1104 }
 0xe0c   :  { %1107 = vst.msk [vmem:[#allocation5] sm:$0x3] %vm438_vm2, %v1105_v40  ;;  %1120 = vst.msk [vmem:[#allocation3 + $0x8] sm:$0x3] %vm438_vm2, %v1105_v40  ;;  %v1110_v41 = vpop.permute.xlu0 %1109  ;;  %v1381_v40 = vcombine.high %v6284_v34, %v6284_v34 }
 0xe0d   :  { %1112 = vst.msk [vmem:[#allocation5] sm:$0x3] %vm444_vm3, %v1110_v41 }
 0xe0f   :  { %v1115_v42 = vpop.permute.xlu1 %1114 }
 0xe10   :  { %1117 = vst.msk [vmem:[#allocation6] sm:$0x3] %vm438_vm2, %v1115_v42 }
 0xe11   :  { %1118 = vst.msk [vmem:[#allocation6] sm:$0x3] %vm444_vm3, %v1096_v31 }
 0xe14   :  { %v1126_v43 = vld [vmem:[#allocation5] sm:$0x3] }
 0xe15   :  { %6279 = vmatmul.mubr.msk.f32.vlgmr.msra.gmra.mrb[12].mxu0 %vm58_vm1, %v1126_v43 }
 0xe16   :  { %6534 = vmatpush1.bf16.msra.mxu0 %v7579_v25  ;;  %1528 = vmatprep.mubr.f32.mxu0 %v7472_v3 }
 0xe17   :  { %6536 = vmatprep.subr.bf16.mxu0 %v7591_v30 }
 0xe18   :  { %v1217_v60 = vld [vmem:[#allocation6] sm:$0x3] }
 0xe1a   :  { %6538 = vmatpush1.bf16.msra.mxu0 %v7606_v36 }
 0xe1b   :  { %6540 = vmatprep.subr.bf16.mxu0 %v7612_v38 }
 0xe1e   :  { %6542 = vmatpush1.bf16.msra.mxu0 %v7629_v45 }
 0xe1f   :  { %6544 = vmatprep.subr.bf16.mxu0 %v7632_v46 }
 0xe22   :  { %6546 = vmatpush1.bf16.msra.mxu0 %v7646_v50 }
 0xe23   :  { %6564 = vmatprep.subr.bf16.mxu0 %v7571_v22 }
 0xee8   :  { %v1196_v48 = vpop.f32.mrb[12].mxu0 }
 0xee9   :  { %v1205_v53 = vadd.f32 %v1202_v49, %v1196_v48  ;;  %v1198_v54 = vpop.f32.mrb[13].mxu0 }
 0xeea   :  { %v1216_v55 = vadd.f32 %v1214_v51, %v1198_v54 }
 0xeeb   :  { %7040 = vtanh.f32 %v1205_v53  ;;  %v6281_v62 = vmul.f32 -1.442695, %v1205_v53 }
 0xeec   :  { %7042 = vtanh.f32 %v1216_v55  ;;  %v6282_v63 = vmul.f32 -1.442695, %v1216_v55 }
 0xeed   :  { %7044 = vpow2.f32 %v6281_v62 }
 0xeee   :  { %7046 = vpow2.f32 %v6282_v63 }
 0xef5   :  { %v7041_v58 = vpop.eup %7040 }
 0xef6   :  { %v7043_v59 = vpop.eup %7042  ;;  %1231 = vrot.lane.b32.xlu0 %v7041_v58, %s7473_s18 }
 0xef7   :  { %1255 = vrot.lane.b32.xlu1 %v7043_v59, %s7473_s18  ;;  %v7045_v0 = vpop.eup %7044 }
 0xef8   :  { %v7047_v2 = vpop.eup %7046  ;;  %v1221_v4 = vadd.f32 1.0, %v7045_v0 }
 0xef9   :  { %v1249_v6 = vadd.f32 1.0, %v7047_v2 }
 0xefa   :  { %1226 = vrot.lane.b32.xlu0 %v1217_v60, %s7473_s18  ;;  %7048 = vrcp.f32 %v1221_v4 }
 0xefb   :  { %7050 = vrcp.f32 %v1249_v6 }
 0xf04   :  { %v7049_v7 = vpop.eup %7048 }
 0xf05   :  { %v7051_v9 = vpop.eup %7050 }
 0xf06   :  { %v1253_v17 = vmul.f32 %v7051_v9, %v1217_v60 }
 0xf68   :  { %v1232_v8 = vpop.permute.xlu0 %1231 }
 0xf69   :  { %v1234_v10 = vmul.f32 %v7049_v7, %v1232_v8  ;;  %v1256_v11 = vpop.permute.xlu1 %1255 }
 0xf6a   :  { %v1258_v12 = vmul.f32 %v7051_v9, %v1256_v11 }
 0xf6b   :  { %1236 = vrot.lane.b32.xlu1 %v1234_v10, %s7473_s18 }
 0xf6c   :  { %1260 = vrot.lane.b32.xlu0 %v1258_v12, %s7473_s18  ;;  %v1227_v13 = vpop.permute.xlu0 %1226 }
 0xf6d   :  { %v1229_v15 = vmul.f32 %v7049_v7, %v1227_v13 }
 0xfdd   :  { %v1237_v16 = vpop.permute.xlu1 %1236 }
 0xfde   :  { %v1239_v18 = vadd.f32 %v1237_v16, %v1229_v15  ;;  %v1261_v19 = vpop.permute.xlu0 %1260 }
 0xfdf   :  { %v1263_v20 = vadd.f32 %v1261_v19, %v1253_v17 }
 0xfe0   :  { %7052 = vtanh.f32 %v1239_v18 }
 0xfe1   :  { %7054 = vtanh.f32 %v1263_v20 }
 0xfea   :  { %v7053_v21 = vpop.eup %7052 }
 0xfeb   :  { %v7055_v23 = vpop.eup %7054  ;;  %1242 = vrot.lane.b32.xlu1 %v7053_v21, %s7473_s18 }
 0xfec   :  { %1266 = vrot.lane.b32.xlu0 %v7055_v23, %s7473_s18 }
0x105d   :  { %v1243_v24 = vpop.permute.xlu1 %1242 }
0x105e   :  { %v1245_v26 = vmul.f32 %v7049_v7, %v1243_v24  ;;  %v1267_v27 = vpop.permute.xlu0 %1266 }
0x105f   :  { %v7856_v44 = vmul.f32 %v7051_v9, %v1267_v27 }
0x1060   :  { %1271 = vrot.lane.b32.xlu1 %v1245_v26, %s7475_s3  ;;  %v6288_v26 = vld.sshfl [vmem:[#allocation2 + $0x20] sm:$0x33 pattern:$0x76325410] }
0x1061   :  { %1276 = vrot.lane.b32.xlu0 %v7856_v44, %s7476_s27 }
0x1064   :  { %1281 = vrot.lane.b32.xlu1 %v1239_v18, %s7476_s27 }
0x10d2   :  { %v1272_v29 = vpop.permute.xlu1 %1271 }
0x10d3   :  { %1274 = vst.msk [vmem:[#allocation5] sm:$0x3] %vm438_vm2, %v1272_v29  ;;  %1287 = vst.msk [vmem:[#allocation3 + $0xa] sm:$0x3] %vm438_vm2, %v1272_v29  ;;  %v1277_v31 = vpop.permute.xlu0 %1276  ;;  %v1536_v29 = vld [vmem:[#allocation2 + $0x1c] sm:$0xf] }
0x10d4   :  { %1279 = vst.msk [vmem:[#allocation5] sm:$0x3] %vm444_vm3, %v1277_v31  ;;  %v1548_v31 = vcombine.high %v6288_v26, %v6288_v26 }
0x10d6   :  { %v1282_v32 = vpop.permute.xlu1 %1281 }
0x10d7   :  { %1284 = vst.msk [vmem:[#allocation6] sm:$0x3] %vm438_vm2, %v1282_v32 }
0x10d8   :  { %1285 = vst.msk [vmem:[#allocation6] sm:$0x3] %vm444_vm3, %v1263_v20 }
0x10db   :  { %v1293_v33 = vld [vmem:[#allocation5] sm:$0x3] }
0x10dc   :  { %6283 = vmatmul.mubr.msk.f32.vlgmr.msra.gmra.mrb[6].mxu1 %vm58_vm1, %v1293_v33 }
0x10dd   :  { %6550 = vmatpush1.bf16.msra.mxu1 %v7579_v25  ;;  %1695 = vmatprep.mubr.f32.mxu1 %v7472_v3 }
0x10de   :  { %6552 = vmatprep.subr.bf16.mxu1 %v7591_v30 }
0x10df   :  { %v1384_v49 = vld [vmem:[#allocation6] sm:$0x3] }
0x10e1   :  { %6554 = vmatpush1.bf16.msra.mxu1 %v7606_v36 }
0x10e2   :  { %6556 = vmatprep.subr.bf16.mxu1 %v7612_v38 }
0x10e5   :  { %6558 = vmatpush1.bf16.msra.mxu1 %v7629_v45 }
0x10e6   :  { %6560 = vmatprep.subr.bf16.mxu1 %v7632_v46 }
0x10e9   :  { %6562 = vmatpush1.bf16.msra.mxu1 %v7646_v50 }
0x10ea   :  { %6580 = vmatprep.subr.bf16.mxu1 %v7571_v22 }
0x11af   :  { %v1363_v35 = vpop.f32.mrb[6].mxu1 }
0x11b0   :  { %v1372_v41 = vadd.f32 %v1369_v37, %v1363_v35  ;;  %v1365_v42 = vpop.f32.mrb[7].mxu1 }
0x11b1   :  { %v1383_v43 = vadd.f32 %v1381_v40, %v1365_v42 }
0x11b2   :  { %7056 = vtanh.f32 %v1372_v41  ;;  %v6285_v51 = vmul.f32 -1.442695, %v1372_v41 }
0x11b3   :  { %7058 = vtanh.f32 %v1383_v43  ;;  %v6286_v53 = vmul.f32 -1.442695, %v1383_v43 }
0x11b4   :  { %7060 = vpow2.f32 %v6285_v51 }
0x11b5   :  { %7062 = vpow2.f32 %v6286_v53 }
0x11bc   :  { %v7057_v47 = vpop.eup %7056 }
0x11bd   :  { %v7059_v48 = vpop.eup %7058  ;;  %1398 = vrot.lane.b32.xlu0 %v7057_v47, %s7473_s18 }
0x11be   :  { %1422 = vrot.lane.b32.xlu1 %v7059_v48, %s7473_s18  ;;  %v7061_v54 = vpop.eup %7060 }
0x11bf   :  { %v7063_v55 = vpop.eup %7062  ;;  %v1388_v58 = vadd.f32 1.0, %v7061_v54 }
0x11c0   :  { %v1416_v59 = vadd.f32 1.0, %v7063_v55 }
0x11c1   :  { %1393 = vrot.lane.b32.xlu0 %v1384_v49, %s7473_s18  ;;  %7064 = vrcp.f32 %v1388_v58 }
0x11c2   :  { %7066 = vrcp.f32 %v1416_v59 }
0x11cb   :  { %v7065_v60 = vpop.eup %7064 }
0x11cc   :  { %v7067_v63 = vpop.eup %7066 }
0x11cd   :  { %v1420_v9 = vmul.f32 %v7067_v63, %v1384_v49 }
0x122f   :  { %v1399_v62 = vpop.permute.xlu0 %1398 }
0x1230   :  { %v1401_v0 = vmul.f32 %v7065_v60, %v1399_v62  ;;  %v1423_v2 = vpop.permute.xlu1 %1422 }
0x1231   :  { %v1425_v4 = vmul.f32 %v7067_v63, %v1423_v2 }
0x1232   :  { %1403 = vrot.lane.b32.xlu1 %v1401_v0, %s7473_s18 }
0x1233   :  { %1427 = vrot.lane.b32.xlu0 %v1425_v4, %s7473_s18  ;;  %v1394_v6 = vpop.permute.xlu0 %1393 }
0x1234   :  { %v1396_v7 = vmul.f32 %v7065_v60, %v1394_v6 }
0x12a4   :  { %v1404_v8 = vpop.permute.xlu1 %1403 }
0x12a5   :  { %v1406_v10 = vadd.f32 %v1404_v8, %v1396_v7  ;;  %v1428_v11 = vpop.permute.xlu0 %1427 }
0x12a6   :  { %v1430_v12 = vadd.f32 %v1428_v11, %v1420_v9 }
0x12a7   :  { %7068 = vtanh.f32 %v1406_v10 }
0x12a8   :  { %7070 = vtanh.f32 %v1430_v12 }
0x12b1   :  { %v7069_v13 = vpop.eup %7068 }
0x12b2   :  { %v7071_v15 = vpop.eup %7070  ;;  %1409 = vrot.lane.b32.xlu1 %v7069_v13, %s7473_s18 }
0x12b3   :  { %1433 = vrot.lane.b32.xlu0 %v7071_v15, %s7473_s18 }
0x1324   :  { %v1410_v16 = vpop.permute.xlu1 %1409 }
0x1325   :  { %v1412_v17 = vmul.f32 %v7065_v60, %v1410_v16  ;;  %v1434_v18 = vpop.permute.xlu0 %1433 }
0x1326   :  { %v7884_v19 = vmul.f32 %v7067_v63, %v1434_v18  ;;  %v6292_v18 = vld.sshfl [vmem:[#allocation2 + $0x1c] sm:$0x33 pattern:$0x76325410] }
0x1327   :  { %1438 = vrot.lane.b32.xlu1 %v1412_v17, %s7475_s3 }
0x1328   :  { %1443 = vrot.lane.b32.xlu0 %v7884_v19, %s7476_s27 }
0x132b   :  { %1448 = vrot.lane.b32.xlu1 %v1406_v10, %s7476_s27 }
0x1399   :  { %v1439_v20 = vpop.permute.xlu1 %1438 }
0x139a   :  { %1441 = vst.msk [vmem:[#allocation5] sm:$0x3] %vm438_vm2, %v1439_v20  ;;  %1454 = vst.msk [vmem:[#allocation3 + $0xc] sm:$0x3] %vm438_vm2, %v1439_v20  ;;  %v1444_v21 = vpop.permute.xlu0 %1443 }
0x139b   :  { %1446 = vst.msk [vmem:[#allocation5] sm:$0x3] %vm444_vm3, %v1444_v21  ;;  %v1702_v21 = vld [vmem:[#allocation2 + $0x20] sm:$0xf] }
0x139d   :  { %v1449_v23 = vpop.permute.xlu1 %1448 }
0x139e   :  { %1451 = vst.msk [vmem:[#allocation6] sm:$0x3] %vm438_vm2, %v1449_v23  ;;  %v1713_v23 = vcombine.high %v6292_v18, %v6292_v18 }
0x139f   :  { %1452 = vst.msk [vmem:[#allocation6] sm:$0x3] %vm444_vm3, %v1430_v12 }
0x13a2   :  { %v1460_v24 = vld [vmem:[#allocation5] sm:$0x3] }
0x13a3   :  { %6287 = vmatmul.mubr.msk.f32.vlgmr.msra.gmra.mrb[14].mxu0 %vm58_vm1, %v1460_v24 }
0x13a4   :  { %6566 = vmatpush1.bf16.msra.mxu0 %v7579_v25  ;;  %1860 = vmatprep.mubr.f32.mxu0 %v7472_v3 }
0x13a5   :  { %6568 = vmatprep.subr.bf16.mxu0 %v7591_v30 }
0x13a6   :  { %v1551_v40 = vld [vmem:[#allocation6] sm:$0x3] }
0x13a8   :  { %6570 = vmatpush1.bf16.msra.mxu0 %v7606_v36 }
0x13a9   :  { %6572 = vmatprep.subr.bf16.mxu0 %v7612_v38 }
0x13ac   :  { %6574 = vmatpush1.bf16.msra.mxu0 %v7629_v45 }
0x13ad   :  { %6576 = vmatprep.subr.bf16.mxu0 %v7632_v46 }
0x13b0   :  { %6578 = vmatpush1.bf16.msra.mxu0 %v7646_v50 }
0x13b1   :  { %6596 = vmatprep.subr.bf16.mxu0 %v7571_v22 }
0x1476   :  { %v1530_v27 = vpop.f32.mrb[14].mxu0 }
0x1477   :  { %v1539_v32 = vadd.f32 %v1536_v29, %v1530_v27  ;;  %v1532_v33 = vpop.f32.mrb[15].mxu0 }
0x1478   :  { %v1550_v34 = vadd.f32 %v1548_v31, %v1532_v33 }
0x1479   :  { %7072 = vtanh.f32 %v1539_v32  ;;  %v6289_v41 = vmul.f32 -1.442695, %v1539_v32 }
0x147a   :  { %7074 = vtanh.f32 %v1550_v34  ;;  %v6290_v42 = vmul.f32 -1.442695, %v1550_v34 }
0x147b   :  { %7076 = vpow2.f32 %v6289_v41 }
0x147c   :  { %7078 = vpow2.f32 %v6290_v42 }
0x1483   :  { %v7073_v35 = vpop.eup %7072 }
0x1484   :  { %v7075_v37 = vpop.eup %7074  ;;  %1565 = vrot.lane.b32.xlu0 %v7073_v35, %s7473_s18 }
0x1485   :  { %1589 = vrot.lane.b32.xlu1 %v7075_v37, %s7473_s18  ;;  %v7077_v43 = vpop.eup %7076 }
0x1486   :  { %v7079_v47 = vpop.eup %7078  ;;  %v1555_v48 = vadd.f32 1.0, %v7077_v43 }
0x1487   :  { %v1583_v49 = vadd.f32 1.0, %v7079_v47 }
0x1488   :  { %1560 = vrot.lane.b32.xlu0 %v1551_v40, %s7473_s18  ;;  %7080 = vrcp.f32 %v1555_v48 }
0x1489   :  { %7082 = vrcp.f32 %v1583_v49 }
0x1492   :  { %v7081_v51 = vpop.eup %7080 }
0x1493   :  { %v7083_v54 = vpop.eup %7082 }
0x1494   :  { %v1587_v0 = vmul.f32 %v7083_v54, %v1551_v40 }
0x14f6   :  { %v1566_v53 = vpop.permute.xlu0 %1565 }
0x14f7   :  { %v1568_v55 = vmul.f32 %v7081_v51, %v1566_v53  ;;  %v1590_v58 = vpop.permute.xlu1 %1589 }
0x14f8   :  { %v1592_v59 = vmul.f32 %v7083_v54, %v1590_v58 }
0x14f9   :  { %1570 = vrot.lane.b32.xlu1 %v1568_v55, %s7473_s18 }
0x14fa   :  { %1594 = vrot.lane.b32.xlu0 %v1592_v59, %s7473_s18  ;;  %v1561_v60 = vpop.permute.xlu0 %1560 }
0x14fb   :  { %v1563_v62 = vmul.f32 %v7081_v51, %v1561_v60 }
0x156b   :  { %v1571_v63 = vpop.permute.xlu1 %1570 }
0x156c   :  { %v1573_v2 = vadd.f32 %v1571_v63, %v1563_v62  ;;  %v1595_v4 = vpop.permute.xlu0 %1594 }
0x156d   :  { %v1597_v6 = vadd.f32 %v1595_v4, %v1587_v0 }
0x156e   :  { %7084 = vtanh.f32 %v1573_v2 }
0x156f   :  { %7086 = vtanh.f32 %v1597_v6 }
0x1578   :  { %v7085_v7 = vpop.eup %7084 }
0x1579   :  { %v7087_v8 = vpop.eup %7086  ;;  %1576 = vrot.lane.b32.xlu1 %v7085_v7, %s7473_s18 }
0x157a   :  { %1600 = vrot.lane.b32.xlu0 %v7087_v8, %s7473_s18 }
0x15eb   :  { %v1577_v9 = vpop.permute.xlu1 %1576 }
0x15ec   :  { %v1579_v10 = vmul.f32 %v7081_v51, %v1577_v9  ;;  %v1601_v11 = vpop.permute.xlu0 %1600 }
0x15ed   :  { %v7912_v12 = vmul.f32 %v7083_v54, %v1601_v11 }
0x15ee   :  { %1605 = vrot.lane.b32.xlu1 %v1579_v10, %s7475_s3 }
0x15ef   :  { %1610 = vrot.lane.b32.xlu0 %v7912_v12, %s7476_s27 }
0x15f2   :  { %1615 = vrot.lane.b32.xlu1 %v1573_v2, %s7476_s27 }
0x1660   :  { %v1606_v13 = vpop.permute.xlu1 %1605 }
0x1661   :  { %1608 = vst.msk [vmem:[#allocation5] sm:$0x3] %vm438_vm2, %v1606_v13  ;;  %1621 = vst.msk [vmem:[#allocation3 + $0xe] sm:$0x3] %vm438_vm2, %v1606_v13  ;;  %v1611_v15 = vpop.permute.xlu0 %1610 }
0x1662   :  { %1613 = vst.msk [vmem:[#allocation5] sm:$0x3] %vm444_vm3, %v1611_v15  ;;  %v6296_v13 = vld.sshfl [vmem:[#allocation2 + $0x18] sm:$0x33 pattern:$0x76325410] }
0x1664   :  { %v1616_v16 = vpop.permute.xlu1 %1615 }
0x1665   :  { %1618 = vst.msk [vmem:[#allocation6] sm:$0x3] %vm438_vm2, %v1616_v16  ;;  %v1867_v16 = vld [vmem:[#allocation2 + $0x24] sm:$0xf] }
0x1666   :  { %1619 = vst.msk [vmem:[#allocation6] sm:$0x3] %vm444_vm3, %v1597_v6 }
0x1669   :  { %v1627_v17 = vld [vmem:[#allocation5] sm:$0x3] }
0x166a   :  { %6291 = vmatmul.mubr.msk.f32.vlgmr.msra.gmra.mrb[8].mxu1 %vm58_vm1, %v1627_v17  ;;  %v1878_v17 = vcombine.high %v6296_v13, %v6296_v13 }
0x166b   :  { %6582 = vmatpush1.bf16.msra.mxu1 %v7579_v25  ;;  %2025 = vmatprep.mubr.f32.mxu1 %v7472_v3 }
0x166c   :  { %6584 = vmatprep.subr.bf16.mxu1 %v7591_v30 }
0x166d   :  { %v1716_v32 = vld [vmem:[#allocation6] sm:$0x3] }
0x166f   :  { %6586 = vmatpush1.bf16.msra.mxu1 %v7606_v36 }
0x1670   :  { %6588 = vmatprep.subr.bf16.mxu1 %v7612_v38 }
0x1673   :  { %6590 = vmatpush1.bf16.msra.mxu1 %v7629_v45 }
0x1674   :  { %6592 = vmatprep.subr.bf16.mxu1 %v7632_v46 }
0x1677   :  { %6594 = vmatpush1.bf16.msra.mxu1 %v7646_v50 }
0x1678   :  { %6612 = vmatprep.subr.bf16.mxu1 %v7571_v22 }
0x173d   :  { %v1697_v20 = vpop.f32.mrb[8].mxu1 }
0x173e   :  { %v1704_v24 = vadd.f32 %v1702_v21, %v1697_v20  ;;  %v1699_v26 = vpop.f32.mrb[9].mxu1 }
0x173f   :  { %v1715_v27 = vadd.f32 %v1713_v23, %v1699_v26 }
0x1740   :  { %7088 = vtanh.f32 %v1704_v24  ;;  %v6293_v33 = vmul.f32 -1.442695, %v1704_v24 }
0x1741   :  { %7090 = vtanh.f32 %v1715_v27  ;;  %v6294_v34 = vmul.f32 -1.442695, %v1715_v27 }
0x1742   :  { %7092 = vpow2.f32 %v6293_v33 }
0x1743   :  { %7094 = vpow2.f32 %v6294_v34 }
0x174a   :  { %v7089_v29 = vpop.eup %7088 }
0x174b   :  { %v7091_v31 = vpop.eup %7090  ;;  %1730 = vrot.lane.b32.xlu0 %v7089_v29, %s7473_s18 }
0x174c   :  { %1754 = vrot.lane.b32.xlu1 %v7091_v31, %s7473_s18  ;;  %v7093_v35 = vpop.eup %7092 }
0x174d   :  { %v7095_v37 = vpop.eup %7094  ;;  %v1720_v40 = vadd.f32 1.0, %v7093_v35 }
0x174e   :  { %v1748_v41 = vadd.f32 1.0, %v7095_v37 }
0x174f   :  { %1725 = vrot.lane.b32.xlu0 %v1716_v32, %s7473_s18  ;;  %7096 = vrcp.f32 %v1720_v40 }
0x1750   :  { %7098 = vrcp.f32 %v1748_v41 }
0x1759   :  { %v7097_v42 = vpop.eup %7096 }
0x175a   :  { %v7099_v47 = vpop.eup %7098 }
0x175b   :  { %v1752_v58 = vmul.f32 %v7099_v47, %v1716_v32 }
0x17bd   :  { %v1731_v43 = vpop.permute.xlu0 %1730 }
0x17be   :  { %v1733_v48 = vmul.f32 %v7097_v42, %v1731_v43  ;;  %v1755_v49 = vpop.permute.xlu1 %1754 }
0x17bf   :  { %v1757_v51 = vmul.f32 %v7099_v47, %v1755_v49 }
0x17c0   :  { %1735 = vrot.lane.b32.xlu1 %v1733_v48, %s7473_s18 }
0x17c1   :  { %1759 = vrot.lane.b32.xlu0 %v1757_v51, %s7473_s18  ;;  %v1726_v53 = vpop.permute.xlu0 %1725 }
0x17c2   :  { %v1728_v54 = vmul.f32 %v7097_v42, %v1726_v53 }
0x1832   :  { %v1736_v55 = vpop.permute.xlu1 %1735 }
0x1833   :  { %v1738_v59 = vadd.f32 %v1736_v55, %v1728_v54  ;;  %v1760_v60 = vpop.permute.xlu0 %1759 }
0x1834   :  { %v1762_v62 = vadd.f32 %v1760_v60, %v1752_v58 }
0x1835   :  { %7100 = vtanh.f32 %v1738_v59 }
0x1836   :  { %7102 = vtanh.f32 %v1762_v62 }
0x183f   :  { %v7101_v63 = vpop.eup %7100 }
0x1840   :  { %v7103_v0 = vpop.eup %7102  ;;  %1741 = vrot.lane.b32.xlu1 %v7101_v63, %s7473_s18 }
0x1841   :  { %1765 = vrot.lane.b32.xlu0 %v7103_v0, %s7473_s18 }
0x18b2   :  { %v1742_v2 = vpop.permute.xlu1 %1741 }
0x18b3   :  { %v1744_v4 = vmul.f32 %v7097_v42, %v1742_v2  ;;  %v1766_v6 = vpop.permute.xlu0 %1765 }
0x18b4   :  { %v7940_v7 = vmul.f32 %v7099_v47, %v1766_v6 }
0x18b5   :  { %1770 = vrot.lane.b32.xlu1 %v1744_v4, %s7475_s3 }
0x18b6   :  { %1775 = vrot.lane.b32.xlu0 %v7940_v7, %s7476_s27 }
0x18b9   :  { %1780 = vrot.lane.b32.xlu1 %v1738_v59, %s7476_s27 }
0x1927   :  { %v1771_v8 = vpop.permute.xlu1 %1770 }
0x1928   :  { %1773 = vst.msk [vmem:[#allocation5] sm:$0x3] %vm438_vm2, %v1771_v8  ;;  %1786 = vst.msk [vmem:[#allocation3 + $0x10] sm:$0x3] %vm438_vm2, %v1771_v8  ;;  %v1776_v9 = vpop.permute.xlu0 %1775 }
0x1929   :  { %1778 = vst.msk [vmem:[#allocation5] sm:$0x3] %vm444_vm3, %v1776_v9  ;;  %v6300_v9 = vld.sshfl [vmem:[#allocation2 + $0x14] sm:$0x33 pattern:$0x76325410] }
0x192a   :  { %v2043_v13 = vcombine.high %v6300_v9, %v6300_v9  ;;  %v2197_v9 = vld [vmem:[#allocation2 + $0x2c] sm:$0xf] }
0x192b   :  { %v1781_v10 = vpop.permute.xlu1 %1780 }
0x192c   :  { %1783 = vst.msk [vmem:[#allocation6] sm:$0x3] %vm438_vm2, %v1781_v10 }
0x192d   :  { %1784 = vst.msk [vmem:[#allocation6] sm:$0x3] %vm444_vm3, %v1762_v62 }
0x1930   :  { %v1792_v11 = vld [vmem:[#allocation5] sm:$0x3] }
0x1931   :  { %6295 = vmatmul.mubr.msk.f32.vlgmr.msra.gmra.mrb[16].mxu0 %vm58_vm1, %v1792_v11  ;;  %v2032_v11 = vld [vmem:[#allocation2 + $0x28] sm:$0xf] }
0x1932   :  { %6598 = vmatpush1.bf16.msra.mxu0 %v7579_v25  ;;  %2190 = vmatprep.mubr.f32.mxu0 %v7472_v3 }
0x1933   :  { %6600 = vmatprep.subr.bf16.mxu0 %v7591_v30 }
0x1934   :  { %v1881_v26 = vld [vmem:[#allocation6] sm:$0x3] }
0x1936   :  { %6602 = vmatpush1.bf16.msra.mxu0 %v7606_v36 }
0x1937   :  { %6604 = vmatprep.subr.bf16.mxu0 %v7612_v38 }
0x193a   :  { %6606 = vmatpush1.bf16.msra.mxu0 %v7629_v45 }
0x193b   :  { %6608 = vmatprep.subr.bf16.mxu0 %v7632_v46 }
0x193e   :  { %6610 = vmatpush1.bf16.msra.mxu0 %v7646_v50 }
0x193f   :  { %6628 = vmatprep.subr.bf16.mxu0 %v7571_v22 }
0x1a04   :  { %v1862_v15 = vpop.f32.mrb[16].mxu0 }
0x1a05   :  { %v1869_v18 = vadd.f32 %v1867_v16, %v1862_v15  ;;  %v1864_v20 = vpop.f32.mrb[17].mxu0 }
0x1a06   :  { %v1880_v21 = vadd.f32 %v1878_v17, %v1864_v20 }
0x1a07   :  { %7104 = vtanh.f32 %v1869_v18  ;;  %v6297_v27 = vmul.f32 -1.442695, %v1869_v18 }
0x1a08   :  { %7106 = vtanh.f32 %v1880_v21  ;;  %v6298_v29 = vmul.f32 -1.442695, %v1880_v21 }
0x1a09   :  { %7108 = vpow2.f32 %v6297_v27 }
0x1a0a   :  { %7110 = vpow2.f32 %v6298_v29 }
0x1a11   :  { %v7105_v23 = vpop.eup %7104 }
0x1a12   :  { %v7107_v24 = vpop.eup %7106  ;;  %1895 = vrot.lane.b32.xlu0 %v7105_v23, %s7473_s18 }
0x1a13   :  { %1919 = vrot.lane.b32.xlu1 %v7107_v24, %s7473_s18  ;;  %v7109_v31 = vpop.eup %7108 }
0x1a14   :  { %v7111_v32 = vpop.eup %7110  ;;  %v1885_v33 = vadd.f32 1.0, %v7109_v31 }
0x1a15   :  { %v1913_v34 = vadd.f32 1.0, %v7111_v32 }
0x1a16   :  { %1890 = vrot.lane.b32.xlu0 %v1881_v26, %s7473_s18  ;;  %7112 = vrcp.f32 %v1885_v33 }
0x1a17   :  { %7114 = vrcp.f32 %v1913_v34 }
0x1a20   :  { %v7113_v35 = vpop.eup %7112 }
0x1a21   :  { %v7115_v40 = vpop.eup %7114 }
0x1a22   :  { %v1917_v51 = vmul.f32 %v7115_v40, %v1881_v26 }
0x1a84   :  { %v1896_v37 = vpop.permute.xlu0 %1895 }
0x1a85   :  { %v1898_v41 = vmul.f32 %v7113_v35, %v1896_v37  ;;  %v1920_v42 = vpop.permute.xlu1 %1919 }
0x1a86   :  { %v1922_v43 = vmul.f32 %v7115_v40, %v1920_v42 }
0x1a87   :  { %1900 = vrot.lane.b32.xlu1 %v1898_v41, %s7473_s18 }
0x1a88   :  { %1924 = vrot.lane.b32.xlu0 %v1922_v43, %s7473_s18  ;;  %v1891_v47 = vpop.permute.xlu0 %1890 }
0x1a89   :  { %v1893_v48 = vmul.f32 %v7113_v35, %v1891_v47 }
0x1af9   :  { %v1901_v49 = vpop.permute.xlu1 %1900 }
0x1afa   :  { %v1903_v53 = vadd.f32 %v1901_v49, %v1893_v48  ;;  %v1925_v54 = vpop.permute.xlu0 %1924 }
0x1afb   :  { %v1927_v55 = vadd.f32 %v1925_v54, %v1917_v51 }
0x1afc   :  { %7116 = vtanh.f32 %v1903_v53 }
0x1afd   :  { %7118 = vtanh.f32 %v1927_v55 }
0x1b06   :  { %v7117_v58 = vpop.eup %7116 }
0x1b07   :  { %v7119_v59 = vpop.eup %7118  ;;  %1906 = vrot.lane.b32.xlu1 %v7117_v58, %s7473_s18 }
0x1b08   :  { %1930 = vrot.lane.b32.xlu0 %v7119_v59, %s7473_s18 }
0x1b79   :  { %v1907_v60 = vpop.permute.xlu1 %1906 }
0x1b7a   :  { %v1909_v62 = vmul.f32 %v7113_v35, %v1907_v60  ;;  %v1931_v63 = vpop.permute.xlu0 %1930 }
0x1b7b   :  { %v7968_v0 = vmul.f32 %v7115_v40, %v1931_v63 }
0x1b7c   :  { %1935 = vrot.lane.b32.xlu1 %v1909_v62, %s7475_s3 }
0x1b7d   :  { %1940 = vrot.lane.b32.xlu0 %v7968_v0, %s7476_s27 }
0x1b80   :  { %1945 = vrot.lane.b32.xlu1 %v1903_v53, %s7476_s27 }
0x1bee   :  { %v1936_v2 = vpop.permute.xlu1 %1935 }
0x1bef   :  { %1938 = vst.msk [vmem:[#allocation5] sm:$0x3] %vm438_vm2, %v1936_v2  ;;  %1951 = vst.msk [vmem:[#allocation3 + $0x12] sm:$0x3] %vm438_vm2, %v1936_v2  ;;  %v1941_v4 = vpop.permute.xlu0 %1940 }
0x1bf0   :  { %1943 = vst.msk [vmem:[#allocation5] sm:$0x3] %vm444_vm3, %v1941_v4 }
0x1bf2   :  { %v1946_v6 = vpop.permute.xlu1 %1945 }
0x1bf3   :  { %1948 = vst.msk [vmem:[#allocation6] sm:$0x3] %vm438_vm2, %v1946_v6  ;;  %v6304_v6 = vld.sshfl [vmem:[#allocation2 + $0x10] sm:$0x33 pattern:$0x76325410] }
0x1bf4   :  { %1949 = vst.msk [vmem:[#allocation6] sm:$0x3] %vm444_vm3, %v1927_v55 }
0x1bf7   :  { %v1957_v8 = vld [vmem:[#allocation5] sm:$0x3] }
0x1bf8   :  { %6299 = vmatmul.mubr.msk.f32.vlgmr.msra.gmra.mrb[10].mxu1 %vm58_vm1, %v1957_v8 }
0x1bf9   :  { %6614 = vmatpush1.bf16.msra.mxu1 %v7579_v25  ;;  %2355 = vmatprep.mubr.f32.mxu1 %v7472_v3 }
0x1bfa   :  { %6616 = vmatprep.subr.bf16.mxu1 %v7591_v30 }
0x1bfb   :  { %v2046_v21 = vld [vmem:[#allocation6] sm:$0x3] }
0x1bfd   :  { %6618 = vmatpush1.bf16.msra.mxu1 %v7606_v36 }
0x1bfe   :  { %6620 = vmatprep.subr.bf16.mxu1 %v7612_v38 }
0x1c01   :  { %6622 = vmatpush1.bf16.msra.mxu1 %v7629_v45 }
0x1c02   :  { %6624 = vmatprep.subr.bf16.mxu1 %v7632_v46 }
0x1c05   :  { %6626 = vmatpush1.bf16.msra.mxu1 %v7646_v50 }
0x1c06   :  { %6644 = vmatprep.subr.bf16.mxu1 %v7571_v22 }
0x1ccb   :  { %v2027_v10 = vpop.f32.mrb[10].mxu1 }
0x1ccc   :  { %v2034_v15 = vadd.f32 %v2032_v11, %v2027_v10  ;;  %v2029_v16 = vpop.f32.mrb[11].mxu1  ;;  %v2208_v10 = vcombine.high %v6304_v6, %v6304_v6  ;;  %v2362_v6 = vld [vmem:[#allocation2 + $0x30] sm:$0xf] }
0x1ccd   :  { %v2045_v17 = vadd.f32 %v2043_v13, %v2029_v16 }
0x1cce   :  { %7120 = vtanh.f32 %v2034_v15  ;;  %v6301_v23 = vmul.f32 -1.442695, %v2034_v15 }
0x1ccf   :  { %7122 = vtanh.f32 %v2045_v17  ;;  %v6302_v24 = vmul.f32 -1.442695, %v2045_v17 }
0x1cd0   :  { %7124 = vpow2.f32 %v6301_v23 }
0x1cd1   :  { %7126 = vpow2.f32 %v6302_v24 }
0x1cd8   :  { %v7121_v18 = vpop.eup %7120 }
0x1cd9   :  { %v7123_v20 = vpop.eup %7122  ;;  %2060 = vrot.lane.b32.xlu0 %v7121_v18, %s7473_s18 }
0x1cda   :  { %2084 = vrot.lane.b32.xlu1 %v7123_v20, %s7473_s18  ;;  %v7125_v26 = vpop.eup %7124 }
0x1cdb   :  { %v7127_v27 = vpop.eup %7126  ;;  %v2050_v29 = vadd.f32 1.0, %v7125_v26 }
0x1cdc   :  { %v2078_v31 = vadd.f32 1.0, %v7127_v27 }
0x1cdd   :  { %2055 = vrot.lane.b32.xlu0 %v2046_v21, %s7473_s18  ;;  %7128 = vrcp.f32 %v2050_v29 }
0x1cde   :  { %7130 = vrcp.f32 %v2078_v31 }
0x1ce7   :  { %v7129_v32 = vpop.eup %7128 }
0x1ce8   :  { %v7131_v34 = vpop.eup %7130 }
0x1ce9   :  { %v2082_v47 = vmul.f32 %v7131_v34, %v2046_v21 }
0x1d4b   :  { %v2061_v33 = vpop.permute.xlu0 %2060 }
0x1d4c   :  { %v2063_v35 = vmul.f32 %v7129_v32, %v2061_v33  ;;  %v2085_v37 = vpop.permute.xlu1 %2084 }
0x1d4d   :  { %v2087_v40 = vmul.f32 %v7131_v34, %v2085_v37 }
0x1d4e   :  { %2065 = vrot.lane.b32.xlu1 %v2063_v35, %s7473_s18 }
0x1d4f   :  { %2089 = vrot.lane.b32.xlu0 %v2087_v40, %s7473_s18  ;;  %v2056_v41 = vpop.permute.xlu0 %2055 }
0x1d50   :  { %v2058_v42 = vmul.f32 %v7129_v32, %v2056_v41 }
0x1dc0   :  { %v2066_v43 = vpop.permute.xlu1 %2065 }
0x1dc1   :  { %v2068_v48 = vadd.f32 %v2066_v43, %v2058_v42  ;;  %v2090_v49 = vpop.permute.xlu0 %2089 }
0x1dc2   :  { %v2092_v51 = vadd.f32 %v2090_v49, %v2082_v47 }
0x1dc3   :  { %7132 = vtanh.f32 %v2068_v48 }
0x1dc4   :  { %7134 = vtanh.f32 %v2092_v51 }
0x1dcd   :  { %v7133_v53 = vpop.eup %7132 }
0x1dce   :  { %v7135_v54 = vpop.eup %7134  ;;  %2071 = vrot.lane.b32.xlu1 %v7133_v53, %s7473_s18 }
0x1dcf   :  { %2095 = vrot.lane.b32.xlu0 %v7135_v54, %s7473_s18 }
0x1e40   :  { %v2072_v55 = vpop.permute.xlu1 %2071 }
0x1e41   :  { %v2074_v58 = vmul.f32 %v7129_v32, %v2072_v55  ;;  %v2096_v59 = vpop.permute.xlu0 %2095 }
0x1e42   :  { %v7996_v60 = vmul.f32 %v7131_v34, %v2096_v59 }
0x1e43   :  { %2100 = vrot.lane.b32.xlu1 %v2074_v58, %s7475_s3 }
0x1e44   :  { %2105 = vrot.lane.b32.xlu0 %v7996_v60, %s7476_s27 }
0x1e47   :  { %2110 = vrot.lane.b32.xlu1 %v2068_v48, %s7476_s27 }
0x1eb5   :  { %v2101_v62 = vpop.permute.xlu1 %2100 }
0x1eb6   :  { %2103 = vst.msk [vmem:[#allocation5] sm:$0x3] %vm438_vm2, %v2101_v62  ;;  %2116 = vst.msk [vmem:[#allocation3 + $0x14] sm:$0x3] %vm438_vm2, %v2101_v62  ;;  %v2106_v63 = vpop.permute.xlu0 %2105 }
0x1eb7   :  { %2108 = vst.msk [vmem:[#allocation5] sm:$0x3] %vm444_vm3, %v2106_v63 }
0x1eb9   :  { %v2111_v2 = vpop.permute.xlu1 %2110 }
0x1eba   :  { %2113 = vst.msk [vmem:[#allocation6] sm:$0x3] %vm438_vm2, %v2111_v2  ;;  %v6308_v2 = vld.sshfl [vmem:[#allocation2 + $0xc] sm:$0x33 pattern:$0x76325410] }
0x1ebb   :  { %2114 = vst.msk [vmem:[#allocation6] sm:$0x3] %vm444_vm3, %v2092_v51 }
0x1ebe   :  { %v2122_v4 = vld [vmem:[#allocation5] sm:$0x3] }
0x1ebf   :  { %6303 = vmatmul.mubr.msk.f32.vlgmr.msra.gmra.mrb[18].mxu0 %vm58_vm1, %v2122_v4 }
0x1ec0   :  { %6630 = vmatpush1.bf16.msra.mxu0 %v7579_v25  ;;  %2520 = vmatprep.mubr.f32.mxu0 %v7472_v3 }
0x1ec1   :  { %6632 = vmatprep.subr.bf16.mxu0 %v7591_v30 }
0x1ec2   :  { %v2211_v18 = vld [vmem:[#allocation6] sm:$0x3] }
0x1ec4   :  { %6634 = vmatpush1.bf16.msra.mxu0 %v7606_v36 }
0x1ec5   :  { %6636 = vmatprep.subr.bf16.mxu0 %v7612_v38 }
0x1ec8   :  { %6638 = vmatpush1.bf16.msra.mxu0 %v7629_v45 }
0x1ec9   :  { %6640 = vmatprep.subr.bf16.mxu0 %v7632_v46 }
0x1ecc   :  { %6642 = vmatpush1.bf16.msra.mxu0 %v7646_v50 }
0x1ecd   :  { %6660 = vmatprep.subr.bf16.mxu0 %v7571_v22 }
0x1f92   :  { %v2192_v8 = vpop.f32.mrb[18].mxu0 }
0x1f93   :  { %v2199_v11 = vadd.f32 %v2197_v9, %v2192_v8  ;;  %v2194_v13 = vpop.f32.mrb[19].mxu0  ;;  %v2373_v8 = vcombine.high %v6308_v2, %v6308_v2 }
0x1f94   :  { %v2210_v15 = vadd.f32 %v2208_v10, %v2194_v13 }
0x1f95   :  { %7136 = vtanh.f32 %v2199_v11  ;;  %v6305_v20 = vmul.f32 -1.442695, %v2199_v11 }
0x1f96   :  { %7138 = vtanh.f32 %v2210_v15  ;;  %v6306_v22 = vmul.f32 -1.442695, %v2210_v15 }
0x1f97   :  { %7140 = vpow2.f32 %v6305_v20 }
0x1f98   :  { %7142 = vpow2.f32 %v6306_v22 }
0x1f9f   :  { %v7137_v16 = vpop.eup %7136 }
0x1fa0   :  { %v7139_v17 = vpop.eup %7138  ;;  %2225 = vrot.lane.b32.xlu0 %v7137_v16, %s7473_s18 }
0x1fa1   :  { %2249 = vrot.lane.b32.xlu1 %v7139_v17, %s7473_s18  ;;  %v7141_v21 = vpop.eup %7140 }
0x1fa2   :  { %v7143_v23 = vpop.eup %7142  ;;  %v2215_v24 = vadd.f32 1.0, %v7141_v21 }
0x1fa3   :  { %v2243_v26 = vadd.f32 1.0, %v7143_v23 }
0x1fa4   :  { %2220 = vrot.lane.b32.xlu0 %v2211_v18, %s7473_s18  ;;  %7144 = vrcp.f32 %v2215_v24 }
0x1fa5   :  { %7146 = vrcp.f32 %v2243_v26 }
0x1fae   :  { %v7145_v27 = vpop.eup %7144 }
0x1faf   :  { %v7147_v31 = vpop.eup %7146 }
0x1fb0   :  { %v2247_v41 = vmul.f32 %v7147_v31, %v2211_v18 }
0x2012   :  { %v2226_v29 = vpop.permute.xlu0 %2225 }
0x2013   :  { %v2228_v32 = vmul.f32 %v7145_v27, %v2226_v29  ;;  %v2250_v33 = vpop.permute.xlu1 %2249 }
0x2014   :  { %v2252_v34 = vmul.f32 %v7147_v31, %v2250_v33 }
0x2015   :  { %2230 = vrot.lane.b32.xlu1 %v2228_v32, %s7473_s18 }
0x2016   :  { %2254 = vrot.lane.b32.xlu0 %v2252_v34, %s7473_s18  ;;  %v2221_v35 = vpop.permute.xlu0 %2220 }
0x2017   :  { %v2223_v37 = vmul.f32 %v7145_v27, %v2221_v35 }
0x2087   :  { %v2231_v40 = vpop.permute.xlu1 %2230 }
0x2088   :  { %v2233_v42 = vadd.f32 %v2231_v40, %v2223_v37  ;;  %v2255_v43 = vpop.permute.xlu0 %2254 }
0x2089   :  { %v2257_v47 = vadd.f32 %v2255_v43, %v2247_v41 }
0x208a   :  { %7148 = vtanh.f32 %v2233_v42 }
0x208b   :  { %7150 = vtanh.f32 %v2257_v47 }
0x2094   :  { %v7149_v48 = vpop.eup %7148 }
0x2095   :  { %v7151_v49 = vpop.eup %7150  ;;  %2236 = vrot.lane.b32.xlu1 %v7149_v48, %s7473_s18 }
0x2096   :  { %2260 = vrot.lane.b32.xlu0 %v7151_v49, %s7473_s18 }
0x2107   :  { %v2237_v51 = vpop.permute.xlu1 %2236 }
0x2108   :  { %v2239_v53 = vmul.f32 %v7145_v27, %v2237_v51  ;;  %v2261_v54 = vpop.permute.xlu0 %2260 }
0x2109   :  { %v8024_v55 = vmul.f32 %v7147_v31, %v2261_v54 }
0x210a   :  { %2265 = vrot.lane.b32.xlu1 %v2239_v53, %s7475_s3 }
0x210b   :  { %2270 = vrot.lane.b32.xlu0 %v8024_v55, %s7476_s27 }
0x210e   :  { %2275 = vrot.lane.b32.xlu1 %v2233_v42, %s7476_s27 }
0x217c   :  { %v2266_v58 = vpop.permute.xlu1 %2265 }
0x217d   :  { %2268 = vst.msk [vmem:[#allocation5] sm:$0x3] %vm438_vm2, %v2266_v58  ;;  %2281 = vst.msk [vmem:[#allocation3 + $0x16] sm:$0x3] %vm438_vm2, %v2266_v58  ;;  %v2271_v59 = vpop.permute.xlu0 %2270 }
0x217e   :  { %2273 = vst.msk [vmem:[#allocation5] sm:$0x3] %vm444_vm3, %v2271_v59 }
0x2180   :  { %v2276_v62 = vpop.permute.xlu1 %2275 }
0x2181   :  { %2278 = vst.msk [vmem:[#allocation6] sm:$0x3] %vm438_vm2, %v2276_v62 }
0x2182   :  { %2279 = vst.msk [vmem:[#allocation6] sm:$0x3] %vm444_vm3, %v2257_v47 }
0x2185   :  { %v2287_v63 = vld [vmem:[#allocation5] sm:$0x3] }
0x2186   :  { %6307 = vmatmul.mubr.msk.f32.vlgmr.msra.gmra.mrb[12].mxu1 %vm58_vm1, %v2287_v63  ;;  %v6312_v63 = vld.sshfl [vmem:[#allocation2 + $0x8] sm:$0x33 pattern:$0x76325410] }
0x2187   :  { %6646 = vmatpush1.bf16.msra.mxu1 %v7579_v25  ;;  %2685 = vmatprep.mubr.f32.mxu1 %v7472_v3 }
0x2188   :  { %6648 = vmatprep.subr.bf16.mxu1 %v7591_v30 }
0x2189   :  { %v2376_v16 = vld [vmem:[#allocation6] sm:$0x3] }
0x218b   :  { %6650 = vmatpush1.bf16.msra.mxu1 %v7606_v36 }
0x218c   :  { %6652 = vmatprep.subr.bf16.mxu1 %v7612_v38 }
0x218f   :  { %6654 = vmatpush1.bf16.msra.mxu1 %v7629_v45 }
0x2190   :  { %6656 = vmatprep.subr.bf16.mxu1 %v7632_v46 }
0x2193   :  { %6658 = vmatpush1.bf16.msra.mxu1 %v7646_v50 }
0x2259   :  { %v2357_v4 = vpop.f32.mrb[12].mxu1 }
0x225a   :  { %v2364_v9 = vadd.f32 %v2362_v6, %v2357_v4  ;;  %v2359_v10 = vpop.f32.mrb[13].mxu1  ;;  %v2527_v4 = vld [vmem:[#allocation2 + $0x34] sm:$0xf]  ;;  %v2538_v6 = vcombine.high %v6312_v63, %v6312_v63 }
0x225b   :  { %v2375_v11 = vadd.f32 %v2373_v8, %v2359_v10 }
0x225c   :  { %7152 = vtanh.f32 %v2364_v9  ;;  %v6309_v17 = vmul.f32 -1.442695, %v2364_v9 }
0x225d   :  { %7154 = vtanh.f32 %v2375_v11  ;;  %v6310_v18 = vmul.f32 -1.442695, %v2375_v11 }
0x225e   :  { %7156 = vpow2.f32 %v6309_v17 }
0x225f   :  { %7158 = vpow2.f32 %v6310_v18 }
0x2266   :  { %v7153_v13 = vpop.eup %7152 }
0x2267   :  { %v7155_v15 = vpop.eup %7154  ;;  %2390 = vrot.lane.b32.xlu0 %v7153_v13, %s7473_s18 }
0x2268   :  { %2414 = vrot.lane.b32.xlu1 %v7155_v15, %s7473_s18  ;;  %v7157_v20 = vpop.eup %7156 }
0x2269   :  { %v7159_v22 = vpop.eup %7158  ;;  %v2380_v21 = vadd.f32 1.0, %v7157_v20 }
0x226a   :  { %v2408_v23 = vadd.f32 1.0, %v7159_v22 }
0x226b   :  { %2385 = vrot.lane.b32.xlu0 %v2376_v16, %s7473_s18  ;;  %7160 = vrcp.f32 %v2380_v21 }
0x226c   :  { %7162 = vrcp.f32 %v2408_v23 }
0x2275   :  { %v7161_v24 = vpop.eup %7160 }
0x2276   :  { %v7163_v27 = vpop.eup %7162 }
0x2277   :  { %v2412_v37 = vmul.f32 %v7163_v27, %v2376_v16 }
0x22d9   :  { %v2391_v26 = vpop.permute.xlu0 %2390 }
0x22da   :  { %v2393_v29 = vmul.f32 %v7161_v24, %v2391_v26  ;;  %v2415_v31 = vpop.permute.xlu1 %2414 }
0x22db   :  { %v2417_v32 = vmul.f32 %v7163_v27, %v2415_v31 }
0x22dc   :  { %2395 = vrot.lane.b32.xlu1 %v2393_v29, %s7473_s18 }
0x22dd   :  { %2419 = vrot.lane.b32.xlu0 %v2417_v32, %s7473_s18  ;;  %v2386_v33 = vpop.permute.xlu0 %2385 }
0x22de   :  { %v2388_v34 = vmul.f32 %v7161_v24, %v2386_v33 }
0x234e   :  { %v2396_v35 = vpop.permute.xlu1 %2395 }
0x234f   :  { %v2398_v40 = vadd.f32 %v2396_v35, %v2388_v34  ;;  %v2420_v41 = vpop.permute.xlu0 %2419 }
0x2350   :  { %v2422_v42 = vadd.f32 %v2420_v41, %v2412_v37 }
0x2351   :  { %7164 = vtanh.f32 %v2398_v40 }
0x2352   :  { %7166 = vtanh.f32 %v2422_v42 }
0x235b   :  { %v7165_v43 = vpop.eup %7164 }
0x235c   :  { %v7167_v47 = vpop.eup %7166  ;;  %2401 = vrot.lane.b32.xlu1 %v7165_v43, %s7473_s18 }
0x235d   :  { %2425 = vrot.lane.b32.xlu0 %v7167_v47, %s7473_s18 }
0x23ce   :  { %v2402_v48 = vpop.permute.xlu1 %2401 }
0x23cf   :  { %v2404_v49 = vmul.f32 %v7161_v24, %v2402_v48  ;;  %v2426_v51 = vpop.permute.xlu0 %2425  ;;  %v6316_v48 = vld.sshfl [vmem:[#allocation2 + $0x4] sm:$0x33 pattern:$0x76325410] }
0x23d0   :  { %v8051_v53 = vmul.f32 %v7163_v27, %v2426_v51  ;;  %v2692_v51 = vld [vmem:[#allocation2 + $0x38] sm:$0xf] }
0x23d1   :  { %2430 = vrot.lane.b32.xlu1 %v2404_v49, %s7475_s3 }
0x23d2   :  { %2435 = vrot.lane.b32.xlu0 %v8051_v53, %s7476_s27 }
0x23d5   :  { %2440 = vrot.lane.b32.xlu1 %v2398_v40, %s7476_s27 }
0x2443   :  { %v2431_v54 = vpop.permute.xlu1 %2430 }
0x2444   :  { %2433 = vst.msk [vmem:[#allocation5] sm:$0x3] %vm438_vm2, %v2431_v54  ;;  %2446 = vst.msk [vmem:[#allocation3 + $0x18] sm:$0x3] %vm438_vm2, %v2431_v54  ;;  %v2436_v58 = vpop.permute.xlu0 %2435  ;;  %v2703_v54 = vcombine.high %v6316_v48, %v6316_v48 }
0x2445   :  { %2438 = vst.msk [vmem:[#allocation5] sm:$0x3] %vm444_vm3, %v2436_v58 }
0x2447   :  { %v2441_v59 = vpop.permute.xlu1 %2440 }
0x2448   :  { %2443 = vst.msk [vmem:[#allocation6] sm:$0x3] %vm438_vm2, %v2441_v59 }
0x2449   :  { %2444 = vst.msk [vmem:[#allocation6] sm:$0x3] %vm444_vm3, %v2422_v42 }
0x244c   :  { %v2452_v62 = vld [vmem:[#allocation5] sm:$0x3] }
0x244d   :  { %6311 = vmatmul.mubr.msk.f32.vlgmr.msra.gmra.mrb[20].mxu0 %vm58_vm1, %v2452_v62 }
0x244e   :  { %6662 = vmatpush1.bf16.msra.mxu0 %v7579_v25  ;;  %2850 = vmatprep.mubr.f32.mxu0 %v7472_v3 }
0x244f   :  { %6664 = vmatprep.subr.bf16.mxu0 %v7591_v30 }
0x2452   :  { %6666 = vmatpush1.bf16.msra.mxu0 %v7606_v36  ;;  %v2541_v36 = vld [vmem:[#allocation6] sm:$0x3] }
0x2453   :  { %6668 = vmatprep.subr.bf16.mxu0 %v7612_v38 }
0x2456   :  { %6670 = vmatpush1.bf16.msra.mxu0 %v7629_v45 }
0x2457   :  { %6672 = vmatprep.subr.bf16.mxu0 %v7632_v46 }
0x245a   :  { %6674 = vmatpush1.bf16.msra.mxu0 %v7646_v50 }
0x2520   :  { %v2522_v2 = vpop.f32.mrb[20].mxu0 }
0x2521   :  { %v2529_v8 = vadd.f32 %v2527_v4, %v2522_v2  ;;  %v2524_v25 = vpop.f32.mrb[21].mxu0 }
0x2522   :  { %v2540_v9 = vadd.f32 %v2538_v6, %v2524_v25 }
0x2523   :  { %7168 = vtanh.f32 %v2529_v8  ;;  %v6313_v38 = vmul.f32 -1.442695, %v2529_v8 }
0x2524   :  { %7170 = vtanh.f32 %v2540_v9  ;;  %v6314_v45 = vmul.f32 -1.442695, %v2540_v9 }
0x2525   :  { %7172 = vpow2.f32 %v6313_v38 }
0x2526   :  { %7174 = vpow2.f32 %v6314_v45 }
0x252d   :  { %v7169_v30 = vpop.eup %7168 }
0x252e   :  { %v7171_v10 = vpop.eup %7170  ;;  %2555 = vrot.lane.b32.xlu0 %v7169_v30, %s7473_s18 }
0x252f   :  { %2579 = vrot.lane.b32.xlu1 %v7171_v10, %s7473_s18  ;;  %v7173_v46 = vpop.eup %7172 }
0x2530   :  { %v7175_v50 = vpop.eup %7174  ;;  %v2545_v11 = vadd.f32 1.0, %v7173_v46 }
0x2531   :  { %v2573_v13 = vadd.f32 1.0, %v7175_v50 }
0x2532   :  { %2550 = vrot.lane.b32.xlu0 %v2541_v36, %s7473_s18  ;;  %7176 = vrcp.f32 %v2545_v11 }
0x2533   :  { %7178 = vrcp.f32 %v2573_v13 }
0x253c   :  { %v7177_v15 = vpop.eup %7176 }
0x253d   :  { %v7179_v17 = vpop.eup %7178 }
0x253e   :  { %v2577_v26 = vmul.f32 %v7179_v17, %v2541_v36 }
0x25a0   :  { %v2556_v16 = vpop.permute.xlu0 %2555 }
0x25a1   :  { %v2558_v18 = vmul.f32 %v7177_v15, %v2556_v16  ;;  %v2580_v20 = vpop.permute.xlu1 %2579 }
0x25a2   :  { %v2582_v22 = vmul.f32 %v7179_v17, %v2580_v20 }
0x25a3   :  { %2560 = vrot.lane.b32.xlu1 %v2558_v18, %s7473_s18 }
0x25a4   :  { %2584 = vrot.lane.b32.xlu0 %v2582_v22, %s7473_s18  ;;  %v2551_v21 = vpop.permute.xlu0 %2550 }
0x25a5   :  { %v2553_v23 = vmul.f32 %v7177_v15, %v2551_v21 }
0x2615   :  { %v2561_v24 = vpop.permute.xlu1 %2560 }
0x2616   :  { %v2563_v27 = vadd.f32 %v2561_v24, %v2553_v23  ;;  %v2585_v29 = vpop.permute.xlu0 %2584 }
0x2617   :  { %v2587_v31 = vadd.f32 %v2585_v29, %v2577_v26 }
0x2618   :  { %7180 = vtanh.f32 %v2563_v27 }
0x2619   :  { %7182 = vtanh.f32 %v2587_v31 }
0x2622   :  { %v7181_v32 = vpop.eup %7180 }
0x2623   :  { %v7183_v33 = vpop.eup %7182  ;;  %2566 = vrot.lane.b32.xlu1 %v7181_v32, %s7473_s18 }
0x2624   :  { %2590 = vrot.lane.b32.xlu0 %v7183_v33, %s7473_s18 }
0x2695   :  { %v2567_v34 = vpop.permute.xlu1 %2566 }
0x2696   :  { %v2569_v35 = vmul.f32 %v7177_v15, %v2567_v34  ;;  %v2591_v37 = vpop.permute.xlu0 %2590 }
0x2697   :  { %v8078_v40 = vmul.f32 %v7179_v17, %v2591_v37 }
0x2698   :  { %2595 = vrot.lane.b32.xlu1 %v2569_v35, %s7475_s3  ;;  %v6320_v35 = vld.sshfl [vmem:[#allocation2] sm:$0x33 pattern:$0x76325410] }
0x2699   :  { %2600 = vrot.lane.b32.xlu0 %v8078_v40, %s7476_s27 }
0x269c   :  { %2605 = vrot.lane.b32.xlu1 %v2563_v27, %s7476_s27 }
0x270a   :  { %v2596_v41 = vpop.permute.xlu1 %2595 }
0x270b   :  { %2598 = vst.msk [vmem:[#allocation5] sm:$0x3] %vm438_vm2, %v2596_v41  ;;  %2611 = vst.msk [vmem:[#allocation3 + $0x1a] sm:$0x3] %vm438_vm2, %v2596_v41  ;;  %v2601_v42 = vpop.permute.xlu0 %2600  ;;  %v2868_v41 = vcombine.high %v6320_v35, %v6320_v35  ;;  %v3492_v35 = vld [vmem:[%s8982_s5 + $0x8] sm:$0xff] }
0x270c   :  { %2603 = vst.msk [vmem:[#allocation5] sm:$0x3] %vm444_vm3, %v2601_v42 }
0x270e   :  { %v2606_v43 = vpop.permute.xlu1 %2605 }
0x270f   :  { %2608 = vst.msk [vmem:[#allocation6] sm:$0x3] %vm438_vm2, %v2606_v43 }
0x2710   :  { %2609 = vst.msk [vmem:[#allocation6] sm:$0x3] %vm444_vm3, %v2587_v31 }
0x2713   :  { %v2617_v47 = vld [vmem:[#allocation5] sm:$0x3] }
0x2714   :  { %6315 = vmatmul.mubr.msk.f32.vlgmr.msra.gmra.mrb[14].mxu1 %vm58_vm1, %v2617_v47  ;;  %v2857_v47 = vld [vmem:[#allocation2 + $0x3c] sm:$0xf] }
0x2715   :  { %3151 = vmatprep.mubr.f32.mxu1 %v7472_v3 }
0x2717   :  { %v2706_v4 = vld [vmem:[#allocation6] sm:$0x3] }
0x27e7   :  { %v2687_v49 = vpop.f32.mrb[14].mxu1 }
0x27e8   :  { %v2694_v58 = vadd.f32 %v2692_v51, %v2687_v49  ;;  %v2689_v59 = vpop.f32.mrb[15].mxu1 }
0x27e9   :  { %v2705_v62 = vadd.f32 %v2703_v54, %v2689_v59 }
0x27ea   :  { %7184 = vtanh.f32 %v2694_v58  ;;  %v6317_v6 = vmul.f32 -1.442695, %v2694_v58 }
0x27eb   :  { %7186 = vtanh.f32 %v2705_v62  ;;  %v6318_v8 = vmul.f32 -1.442695, %v2705_v62 }
0x27ec   :  { %7188 = vpow2.f32 %v6317_v6 }
0x27ed   :  { %7190 = vpow2.f32 %v6318_v8 }
0x27f4   :  { %v7185_v63 = vpop.eup %7184 }
0x27f5   :  { %v7187_v2 = vpop.eup %7186  ;;  %2720 = vrot.lane.b32.xlu0 %v7185_v63, %s7473_s18 }
0x27f6   :  { %2744 = vrot.lane.b32.xlu1 %v7187_v2, %s7473_s18  ;;  %v7189_v25 = vpop.eup %7188 }
0x27f7   :  { %v7191_v9 = vpop.eup %7190  ;;  %v2710_v30 = vadd.f32 1.0, %v7189_v25 }
0x27f8   :  { %v2738_v10 = vadd.f32 1.0, %v7191_v9 }
0x27f9   :  { %2715 = vrot.lane.b32.xlu0 %v2706_v4, %s7473_s18  ;;  %7192 = vrcp.f32 %v2710_v30 }
0x27fa   :  { %7194 = vrcp.f32 %v2738_v10 }
0x2803   :  { %v7193_v36 = vpop.eup %7192 }
0x2804   :  { %v7195_v45 = vpop.eup %7194 }
0x2805   :  { %v2742_v17 = vmul.f32 %v7195_v45, %v2706_v4 }
0x2867   :  { %v2721_v38 = vpop.permute.xlu0 %2720 }
0x2868   :  { %v2723_v46 = vmul.f32 %v7193_v36, %v2721_v38  ;;  %v2745_v50 = vpop.permute.xlu1 %2744 }
0x2869   :  { %v2747_v11 = vmul.f32 %v7195_v45, %v2745_v50 }
0x286a   :  { %2725 = vrot.lane.b32.xlu1 %v2723_v46, %s7473_s18 }
0x286b   :  { %2749 = vrot.lane.b32.xlu0 %v2747_v11, %s7473_s18  ;;  %v2716_v13 = vpop.permute.xlu0 %2715 }
0x286c   :  { %v2718_v15 = vmul.f32 %v7193_v36, %v2716_v13 }
0x28dc   :  { %v2726_v16 = vpop.permute.xlu1 %2725 }
0x28dd   :  { %v2728_v18 = vadd.f32 %v2726_v16, %v2718_v15  ;;  %v2750_v20 = vpop.permute.xlu0 %2749 }
0x28de   :  { %v2752_v22 = vadd.f32 %v2750_v20, %v2742_v17 }
0x28df   :  { %7196 = vtanh.f32 %v2728_v18 }
0x28e0   :  { %7198 = vtanh.f32 %v2752_v22 }
0x28e9   :  { %v7197_v21 = vpop.eup %7196 }
0x28ea   :  { %v7199_v23 = vpop.eup %7198  ;;  %2731 = vrot.lane.b32.xlu1 %v7197_v21, %s7473_s18  ;;  %v2981_v21 = vld [vmem:[%s8981_s4 + $0x18] sm:$0xff] }
0x28eb   :  { %2755 = vrot.lane.b32.xlu0 %v7199_v23, %s7473_s18 }
0x295c   :  { %v2732_v24 = vpop.permute.xlu1 %2731 }
0x295d   :  { %v2734_v26 = vmul.f32 %v7193_v36, %v2732_v24  ;;  %v2756_v27 = vpop.permute.xlu0 %2755 }
0x295e   :  { %v2758_v29 = vmul.f32 %v7195_v45, %v2756_v27 }
0x295f   :  { %2760 = vrot.lane.b32.xlu1 %v2734_v26, %s7475_s3 }
0x2960   :  { %2765 = vrot.lane.b32.xlu0 %v2758_v29, %s7476_s27 }
0x2964   :  { %2770 = vrot.lane.b32.xlu0 %v2728_v18, %s7476_s27  ;;  %v2992_v18 = vld [vmem:[%s8981_s4 + $0x70] sm:$0xff] }
0x29d1   :  { %v2761_v31 = vpop.permute.xlu1 %2760 }
0x29d2   :  { %2763 = vst.msk [vmem:[#allocation5] sm:$0x3] %vm438_vm2, %v2761_v31  ;;  %2776 = vst.msk [vmem:[#allocation3 + $0x1c] sm:$0x3] %vm438_vm2, %v2761_v31  ;;  %v2766_v32 = vpop.permute.xlu0 %2765 }
0x29d3   :  { %2768 = vst.msk [vmem:[#allocation5] sm:$0x3] %vm444_vm3, %v2766_v32 }
0x29d6   :  { %v2771_v33 = vpop.permute.xlu0 %2770 }
0x29d7   :  { %2773 = vst.msk [vmem:[#allocation6] sm:$0x3] %vm438_vm2, %v2771_v33 }
0x29d8   :  { %2774 = vst.msk [vmem:[#allocation6] sm:$0x3] %vm444_vm3, %v2752_v22  ;;  %v2979_v22 = vld [vmem:[%s8981_s4 + $0x8] sm:$0xff] }
0x29d9   :  { %v6683_v23 = vpack.c.bf16 %v2981_v21, %v2979_v22  ;;  %v2983_v21 = vld [vmem:[%s8981_s4 + $0x28] sm:$0xff] }
0x29da   :  { %v2782_v34 = vld [vmem:[#allocation5] sm:$0x3] }
0x29db   :  { %6319 = vmatmul.mubr.msk.f32.vlgmr.msra.gmra.mrb[22].mxu0 %vm58_vm1, %v2782_v34 }
0x29dc   :  { %3575 = vmatprep.mubr.f32.mxu0 %v7472_v3 }
0x29df   :  { %v2871_v54 = vld [vmem:[#allocation6] sm:$0x3] }
0x2aae   :  { %v2852_v37 = vpop.f32.mrb[22].mxu0 }
0x2aaf   :  { %v2854_v42 = vpop.f32.mrb[23].mxu0  ;;  %v2859_v48 = vadd.f32 %v2857_v47, %v2852_v37  ;;  %v3491_v37 = vld [vmem:[%s8982_s5] sm:$0xff] }
0x2ab0   :  { %v2870_v43 = vadd.f32 %v2868_v41, %v2854_v42 }
0x2ab1   :  { %v6321_v59 = vmul.f32 -1.442695, %v2859_v48 }
0x2ab2   :  { %7200 = vtanh.f32 %v2870_v43  ;;  %v6322_v58 = vmul.f32 -1.442695, %v2870_v43 }
0x2ab3   :  { %7202 = vtanh.f32 %v2859_v48  ;;  %v3496_v48 = vld [vmem:[%s8982_s5 + $0x28] sm:$0xff] }
0x2ab4   :  { %7204 = vpow2.f32 %v6322_v58 }
0x2ab5   :  { %7206 = vpow2.f32 %v6321_v59 }
0x2abc   :  { %v7201_v49 = vpop.eup %7200 }
0x2abd   :  { %2909 = vrot.lane.b32.xlu1 %v7201_v49, %s7473_s18  ;;  %v7203_v51 = vpop.eup %7202  ;;  %v3498_v49 = vld [vmem:[%s8982_s5 + $0x38] sm:$0xff] }
0x2abe   :  { %v7205_v62 = vpop.eup %7204  ;;  %v8220_v58 = vpack.c.bf16 %v3498_v49, %v3496_v48 }
0x2abf   :  { %v2903_v63 = vadd.f32 1.0, %v7205_v62  ;;  %v7207_v2 = vpop.eup %7206 }
0x2ac0   :  { %v2875_v4 = vadd.f32 1.0, %v7207_v2  ;;  %v3502_v2 = vld [vmem:[%s8982_s5 + $0x58] sm:$0xff] }
0x2ac1   :  { %2885 = vrot.lane.b32.xlu1 %v7203_v51, %s7473_s18  ;;  %7208 = vrcp.f32 %v2903_v63  ;;  %v3495_v51 = vld [vmem:[%s8982_s5 + $0x20] sm:$0xff]  ;;  %v3500_v63 = vld [vmem:[%s8982_s5 + $0x48] sm:$0xff] }
0x2ac2   :  { %7210 = vrcp.f32 %v2875_v4  ;;  %v3499_v4 = vld [vmem:[%s8982_s5 + $0x40] sm:$0xff] }
0x2ac5   :  { %2880 = vrot.lane.b32.xlu1 %v2871_v54, %s7473_s18 }
0x2acb   :  { %v7209_v6 = vpop.eup %7208 }
0x2acc   :  { %v7211_v9 = vpop.eup %7210  ;;  %v2907_v36 = vmul.f32 %v7209_v6, %v2871_v54  ;;  %v3497_v54 = vld [vmem:[%s8982_s5 + $0x30] sm:$0xff] }
0x2acd   :  { %v8222_v59 = vpack.c.bf16 %v3497_v54, %v3495_v51 }
0x2b2f   :  { %v2910_v8 = vpop.permute.xlu1 %2909 }
0x2b30   :  { %v2912_v25 = vmul.f32 %v7209_v6, %v2910_v8  ;;  %v8239_v8 = vpack.c.bf16 %v3502_v2, %v3500_v63 }
0x2b32   :  { %2914 = vrot.lane.b32.xlu0 %v2912_v25, %s7473_s18 }
0x2b33   :  { %v2886_v30 = vpop.permute.xlu1 %2885 }
0x2b34   :  { %v2888_v10 = vmul.f32 %v7211_v9, %v2886_v30  ;;  %v3504_v30 = vld [vmem:[%s8982_s5 + $0x68] sm:$0xff] }
0x2b36   :  { %2890 = vrot.lane.b32.xlu0 %v2888_v10, %s7473_s18  ;;  %v3506_v10 = vld [vmem:[%s8982_s5 + $0x78] sm:$0xff] }
0x2b37   :  { %v2881_v38 = vpop.permute.xlu1 %2880 }
0x2b38   :  { %v2883_v50 = vmul.f32 %v7211_v9, %v2881_v38  ;;  %v3505_v38 = vld [vmem:[%s8982_s5 + $0x70] sm:$0xff] }
0x2ba4   :  { %v2915_v45 = vpop.permute.xlu0 %2914 }
0x2ba5   :  { %v8113_v46 = vadd.f32 %v2915_v45, %v2907_v36  ;;  %v3503_v36 = vld [vmem:[%s8982_s5 + $0x60] sm:$0xff]  ;;  %v8258_v45 = vpack.c.bf16 %v3506_v10, %v3504_v30 }
0x2ba6   :  { %v2947_v30 = vld [vmem:[#allocation3 + $0x2] sm:$0x3] }
0x2ba7   :  { %7212 = vtanh.f32 %v8113_v46 }
0x2ba8   :  { %v2891_v11 = vpop.permute.xlu0 %2890 }
0x2ba9   :  { %v2893_v13 = vadd.f32 %v2891_v11, %v2883_v50  ;;  %v8260_v50 = vpack.c.bf16 %v3505_v38, %v3503_v36  ;;  %v2948_v38 = vld [vmem:[#allocation3 + $0x4] sm:$0x3] }
0x2bab   :  { %7214 = vtanh.f32 %v2893_v13 }
0x2bb1   :  { %v7213_v15 = vpop.eup %7212 }
0x2bb2   :  { %2920 = vrot.lane.b32.xlu1 %v7213_v15, %s7473_s18 }
0x2bb5   :  { %v7215_v16 = vpop.eup %7214 }
0x2bb6   :  { %2896 = vrot.lane.b32.xlu0 %v7215_v16, %s7473_s18  ;;  %2447 = vrot.lane.b32.xlu1 %v8051_v53, %s7475_s3  ;;  %v2990_v53 = vld [vmem:[%s8981_s4 + $0x60] sm:$0xff] }
0x2bb7   :  { %v6681_v20 = vpack.c.bf16 %v2992_v18, %v2990_v53  ;;  %v2978_v18 = vld [vmem:[%s8981_s4] sm:$0xff] }
0x2bba   :  { %2612 = vrot.lane.b32.xlu0 %v8078_v40, %s7475_s3  ;;  %2777 = vrot.lane.b32.xlu1 %v2758_v29, %s7475_s3 }
0x2bbe   :  { %1952 = vrot.lane.b32.xlu0 %v7968_v0, %s7475_s3  ;;  %1787 = vrot.lane.b32.xlu1 %v7940_v7, %s7475_s3  ;;  %v2987_v7 = vld [vmem:[%s8981_s4 + $0x48] sm:$0xff] }
0x2bc2   :  { %2282 = vrot.lane.b32.xlu0 %v8024_v55, %s7475_s3  ;;  %2117 = vrot.lane.b32.xlu1 %v7996_v60, %s7475_s3  ;;  %v2991_v60 = vld [vmem:[%s8981_s4 + $0x68] sm:$0xff]  ;;  %v2993_v55 = vld [vmem:[%s8981_s4 + $0x78] sm:$0xff] }
0x2bc3   :  { %v6679_v17 = vpack.c.bf16 %v2993_v55, %v2991_v60 }
0x2bc6   :  { %1288 = vrot.lane.b32.xlu0 %v7856_v44, %s7475_s3  ;;  %1121 = vrot.lane.b32.xlu1 %v7828_v39, %s7475_s3  ;;  %v2989_v44 = vld [vmem:[%s8981_s4 + $0x58] sm:$0xff]  ;;  %v2986_v39 = vld [vmem:[%s8981_s4 + $0x40] sm:$0xff] }
0x2bc7   :  { %v6675_v0 = vpack.c.bf16 %v2989_v44, %v2987_v7 }
0x2bc9   :  { %6676 = vmatprep.subr.bf16.mxu1 %v6675_v0 }
0x2bca   :  { %1455 = vrot.lane.b32.xlu1 %v7884_v19, %s7475_s3 }
0x2bce   :  { %453 = vrot.lane.b32.xlu1 %v7718_v28, %s7475_s3  ;;  %v2988_v28 = vld [vmem:[%s8981_s4 + $0x50] sm:$0xff] }
0x2bcf   :  { %v6677_v19 = vpack.c.bf16 %v2988_v28, %v2986_v39 }
0x2bd1   :  { %6678 = vmatpush1.bf16.msra.mxu1 %v6677_v19 }
0x2bd2   :  { %787 = vrot.lane.b32.xlu1 %v7772_v1, %s7475_s3  ;;  %6680 = vmatprep.subr.bf16.mxu1 %v6679_v17 }
0x2bd5   :  { %6682 = vmatpush1.bf16.msra.mxu1 %v6681_v20  ;;  %v2980_v20 = vld [vmem:[%s8981_s4 + $0x10] sm:$0xff] }
0x2bd6   :  { %6684 = vmatprep.subr.bf16.mxu1 %v6683_v23  ;;  %v2985_v23 = vld [vmem:[%s8981_s4 + $0x38] sm:$0xff] }
0x2c24   :  { %v2921_v1 = vpop.permute.xlu1 %2920 }
0x2c25   :  { %v2923_v40 = vmul.f32 %v7209_v6, %v2921_v1  ;;  %v3501_v6 = vld [vmem:[%s8982_s5 + $0x50] sm:$0xff] }
0x2c26   :  { %v8241_v25 = vpack.c.bf16 %v3501_v6, %v3499_v4  ;;  %v2949_v4 = vld [vmem:[#allocation3 + $0x6] sm:$0x3] }
0x2c27   :  { %2942 = vrot.lane.b32.xlu0 %v2923_v40, %s7475_s3 }
0x2c28   :  { %v2897_v24 = vpop.permute.xlu0 %2896  ;;  %v2448_v26 = vpop.permute.xlu1 %2447 }
0x2c29   :  { %v2899_v27 = vmul.f32 %v7211_v9, %v2897_v24  ;;  %2451 = vst.msk [vmem:[#allocation4 + $0x6] sm:$0x3] %vm438_vm2, %v2448_v26 }
0x2c2b   :  { %2925 = vrot.lane.b32.xlu1 %v2899_v27, %s7475_s3  ;;  %1622 = vrot.lane.b32.xlu0 %v7912_v12, %s7475_s3 }
0x2c2c   :  { %v2613_v29 = vpop.permute.xlu0 %2612  ;;  %v2778_v31 = vpop.permute.xlu1 %2777 }
0x2c2d   :  { %2616 = vst.msk [vmem:[#allocation4 + $0x4] sm:$0x3] %vm438_vm2, %v2613_v29  ;;  %2781 = vst.msk [vmem:[#allocation4 + $0x2] sm:$0x3] %vm438_vm2, %v2778_v31 }
0x2c2f   :  { %2935 = vrot.lane.b32.xlu1 %v2893_v13, %s7476_s27  ;;  %620 = vrot.lane.b32.xlu0 %v7744_v14, %s7475_s3  ;;  %v3494_v14 = vld [vmem:[%s8982_s5 + $0x18] sm:$0xff] }
0x2c30   :  { %v1953_v32 = vpop.permute.xlu0 %1952  ;;  %v1788_v33 = vpop.permute.xlu1 %1787  ;;  %v8196_v41 = vpack.c.bf16 %v3494_v14, %v3492_v35  ;;  %v2965_v44 = vld [vmem:[#allocation4 + $0x6] sm:$0x3]  ;;  %v6687_v14 = vpack.c.bf16 %v2985_v23, %v2983_v21  ;;  %v2956_v21 = vld [vmem:[#allocation3 + $0x14] sm:$0x3] }
0x2c31   :  { %1956 = vst.msk [vmem:[#allocation4 + $0xc] sm:$0x3] %vm438_vm2, %v1953_v32  ;;  %1791 = vst.msk [vmem:[#allocation4 + $0xe] sm:$0x3] %vm438_vm2, %v1788_v33 }
0x2c32   :  { %6692 = vmatprep.subr.bf16.mxu0 %v8196_v41 }
0x2c33   :  { %954 = vrot.lane.b32.xlu0 %v7800_v52, %s7475_s3  ;;  %v3493_v52 = vld [vmem:[%s8982_s5 + $0x10] sm:$0xff] }
0x2c34   :  { %v2283_v12 = vpop.permute.xlu0 %2282  ;;  %v2118_v34 = vpop.permute.xlu1 %2117  ;;  %v8202_v42 = vpack.c.bf16 %v3493_v52, %v3491_v37  ;;  %v2964_v7 = vld [vmem:[#allocation4 + $0x4] sm:$0x3]  ;;  %v2963_v28 = vld [vmem:[#allocation4 + $0x2] sm:$0x3] }
0x2c35   :  { %2286 = vst.msk [vmem:[#allocation4 + $0x8] sm:$0x3] %vm438_vm2, %v2283_v12  ;;  %2121 = vst.msk [vmem:[#allocation4 + $0xa] sm:$0x3] %vm438_vm2, %v2118_v34  ;;  %v3011_v19 = vcombine.low %v2964_v7, %v2965_v44  ;;  %v2982_v52 = vld [vmem:[%s8981_s4 + $0x20] sm:$0xff] }
0x2c36   :  { %6694 = vmatpush1.bf16.msra.mxu0 %v8202_v42  ;;  %v2953_v7 = vld [vmem:[#allocation3 + $0xe] sm:$0x3] }
0x2c37   :  { %2930 = vrot.lane.b32.xlu0 %v2923_v40, %s7476_s27  ;;  %6696 = vmatprep.subr.bf16.mxu0 %v8220_v58  ;;  %v3025_v26 = vrot.slane %v3011_v19, %v7699_v5  ;;  %v2952_v19 = vld [vmem:[#allocation3 + $0xc] sm:$0x3] }
0x2c38   :  { %v1289_v43 = vpop.permute.xlu0 %1288  ;;  %v1122_v47 = vpop.permute.xlu1 %1121  ;;  %v2968_v53 = vld [vmem:[#allocation4 + $0xc] sm:$0x3]  ;;  %v2969_v40 = vld [vmem:[#allocation4 + $0xe] sm:$0x3] }
0x2c39   :  { %1292 = vst.msk [vmem:[#allocation4 + $0x14] sm:$0x3] %vm438_vm2, %v1289_v43  ;;  %1125 = vst.msk [vmem:[#allocation4 + $0x16] sm:$0x3] %vm438_vm2, %v1122_v47  ;;  %v3028_v27 = vcombine.low %v2968_v53, %v2969_v40  ;;  %v2984_v43 = vld [vmem:[%s8981_s4 + $0x30] sm:$0xff]  ;;  %v3210_v53 = vcombine.low %v2952_v19, %v2953_v7 }
0x2c3a   :  { %6698 = vmatpush1.bf16.msra.mxu0 %v8222_v59  ;;  %v6689_v51 = vpack.c.bf16 %v2984_v43, %v2982_v52  ;;  %v2950_v40 = vld [vmem:[#allocation3 + $0x8] sm:$0x3] }
0x2c3b   :  { %6700 = vmatprep.subr.bf16.mxu0 %v8239_v8  ;;  %v3042_v47 = vrot.slane %v3028_v27, %v7699_v5  ;;  %v2954_v27 = vld [vmem:[#allocation3 + $0x10] sm:$0x3] }
0x2c3c   :  { %v1456_v62 = vpop.permute.xlu1 %1455  ;;  %v2966_v39 = vld [vmem:[#allocation4 + $0x8] sm:$0x3]  ;;  %v2967_v0 = vld [vmem:[#allocation4 + $0xa] sm:$0x3] }
0x2c3d   :  { %1459 = vst.msk [vmem:[#allocation4 + $0x12] sm:$0x3] %vm438_vm2, %v1456_v62  ;;  %v3027_v22 = vcombine.low %v2966_v39, %v2967_v0 }
0x2c3e   :  { %6702 = vmatpush1.bf16.msra.mxu0 %v8241_v25 }
0x2c3f   :  { %6704 = vmatprep.subr.bf16.mxu0 %v8258_v45  ;;  %v3035_v35 = vrot.slane %v3027_v22, %v7699_v5  ;;  %v2955_v22 = vld [vmem:[#allocation3 + $0x12] sm:$0x3] }
0x2c40   :  { %v454_v9 = vpop.permute.xlu1 %453  ;;  %v2972_v29 = vld [vmem:[#allocation4 + $0x14] sm:$0x3]  ;;  %v2973_v12 = vld [vmem:[#allocation4 + $0x16] sm:$0x3] }
0x2c41   :  { %457 = vst.msk [vmem:[#allocation4 + $0x1e] sm:$0x3] %vm438_vm2, %v454_v9  ;;  %v3045_v48 = vcombine.low %v2972_v29, %v2973_v12  ;;  %v3043_v62 = vcombine.low %v3035_v35, %v3042_v47 }
0x2c42   :  { %6706 = vmatpush1.bf16.msra.mxu0 %v8260_v50 }
0x2c43   :  { %6724 = vmatprep.subr.bf16.mxu0 %v8196_v41  ;;  %v3059_v6 = vrot.slane %v3045_v48, %v7699_v5 }
0x2c44   :  { %v788_v11 = vpop.permute.xlu1 %787  ;;  %v2971_v33 = vld [vmem:[#allocation4 + $0x12] sm:$0x3] }
0x2c45   :  { %791 = vst.msk [vmem:[#allocation4 + $0x1a] sm:$0x3] %vm438_vm2, %v788_v11 }
0x2c48   :  { %v2977_v2 = vld [vmem:[#allocation4 + $0x1e] sm:$0x3] }
0x2c4c   :  { %v2975_v36 = vld [vmem:[#allocation4 + $0x1a] sm:$0x3] }
0x2c99   :  { %v2943_v13 = vpop.permute.xlu0 %2942 }
0x2c9a   :  { %2945 = vst.msk [vmem:[#allocation4] sm:$0x3] %vm438_vm2, %v2943_v13 }
0x2c9d   :  { %v1623_v15 = vpop.permute.xlu0 %1622  ;;  %v2926_v16 = vpop.permute.xlu1 %2925 }
0x2c9e   :  { %1626 = vst.msk [vmem:[#allocation4 + $0x10] sm:$0x3] %vm438_vm2, %v1623_v15  ;;  %2928 = vst.msk [vmem:[#allocation5] sm:$0x3] %vm438_vm2, %v2926_v16  ;;  %v3193_v15 = vcombine.low %v2948_v38, %v2949_v4 }
0x2c9f   :  { %2941 = vst.msk [vmem:[#allocation3 + $0x1e] sm:$0x3] %vm438_vm2, %v2926_v16  ;;  %v2946_v16 = vld [vmem:[#allocation3] sm:$0x3] }
0x2ca0   :  { %v3192_v0 = vcombine.low %v2946_v16, %v2947_v30 }
0x2ca1   :  { %v621_v1 = vpop.permute.xlu0 %620  ;;  %v2936_v60 = vpop.permute.xlu1 %2935  ;;  %v2962_v55 = vld [vmem:[#allocation4] sm:$0x3] }
0x2ca2   :  { %624 = vst.msk [vmem:[#allocation4 + $0x1c] sm:$0x3] %vm438_vm2, %v621_v1  ;;  %2938 = vst.msk [vmem:[#allocation6] sm:$0x3] %vm438_vm2, %v2936_v60  ;;  %v3010_v17 = vcombine.low %v2962_v55, %v2963_v28  ;;  %v2951_v28 = vld [vmem:[#allocation3 + $0xa] sm:$0x3]  ;;  %v3207_v55 = vrot.slane %v3193_v15, %v7699_v5 }
0x2ca3   :  { %2939 = vst.msk [vmem:[#allocation6] sm:$0x3] %vm444_vm3, %v8113_v46  ;;  %v6685_v46 = vpack.c.bf16 %v2980_v20, %v2978_v18  ;;  %v3200_v18 = vrot.slane %v3192_v0, %v7699_v5  ;;  %v3209_v20 = vcombine.low %v2950_v40, %v2951_v28 }
0x2ca4   :  { %3490 = vst.msk [vmem:[#allocation6] sm:$0x3] %vm272_vm0, %v7472_v3  ;;  %v3018_v24 = vrot.slane %v3010_v17, %v7699_v5  ;;  %v2957_v17 = vld [vmem:[#allocation3 + $0x16] sm:$0x3] }
0x2ca5   :  { %v955_v31 = vpop.permute.xlu0 %954  ;;  %v2970_v32 = vld [vmem:[#allocation4 + $0x10] sm:$0x3]  ;;  %v3208_v23 = vcombine.low %v3200_v18, %v3207_v55 }
0x2ca6   :  { %958 = vst.msk [vmem:[#allocation4 + $0x18] sm:$0x3] %vm438_vm2, %v955_v31  ;;  %v3026_v34 = vcombine.low %v3018_v24, %v3025_v26  ;;  %v3044_v37 = vcombine.low %v2970_v32, %v2971_v33  ;;  %v3224_v24 = vrot.slane %v3210_v53, %v7699_v5  ;;  %v3227_v26 = vcombine.low %v2956_v21, %v2957_v17  ;;  %v2961_v29 = vld [vmem:[#allocation3 + $0x1e] sm:$0x3]  ;;  %v2959_v32 = vld [vmem:[#allocation3 + $0x1a] sm:$0x3] }
0x2ca7   :  { %v3217_v31 = vrot.slane %v3209_v20, %v7699_v5  ;;  %v2960_v33 = vld [vmem:[#allocation3 + $0x1c] sm:$0x3] }
0x2ca8   :  { %6323 = vmatmul.mubr.msk.f32.vlgmr.msra.gmra.mrb[16].mxu1 %vm3078_vm4, %v3026_v34  ;;  %v3052_v63 = vrot.slane %v3044_v37, %v7699_v5  ;;  %v3241_v34 = vrot.slane %v3227_v26, %v7699_v5  ;;  %v3244_v35 = vcombine.low %v2960_v33, %v2961_v29 }
0x2ca9   :  { %6686 = vmatpush1.bf16.msra.mxu1 %v6685_v46  ;;  %v2931_v49 = vpop.permute.xlu0 %2930  ;;  %3157 = vmatprep.mubr.f32.mxu1 %v7472_v3  ;;  %v2976_v54 = vld [vmem:[#allocation4 + $0x1c] sm:$0x3]  ;;  %v3226_v46 = vcombine.low %v2954_v27, %v2955_v22  ;;  %v3225_v12 = vcombine.low %v3217_v31, %v3224_v24 }
0x2caa   :  { %2933 = vst.msk [vmem:[#allocation5] sm:$0x3] %vm444_vm3, %v2931_v49  ;;  %6688 = vmatprep.subr.bf16.mxu1 %v6687_v14  ;;  %v3062_v9 = vcombine.low %v2976_v54, %v2977_v2  ;;  %v3060_v11 = vcombine.low %v3052_v63, %v3059_v6  ;;  %v2958_v14 = vld [vmem:[#allocation3 + $0x18] sm:$0x3]  ;;  %v3258_v47 = vrot.slane %v3244_v35, %v7699_v5 }
0x2cab   :  { %3489 = vst.msk [vmem:[#allocation5] sm:$0x3] %vm272_vm0, %v7472_v3  ;;  %v3234_v37 = vrot.slane %v3226_v46, %v7699_v5  ;;  %v3243_v52 = vcombine.low %v2958_v14, %v2959_v32 }
0x2cac   :  { %6324 = vmatmul.mubr.msk.f32.gmra.mrb[18].mxu1 %vm3078_vm4, %v3043_v62  ;;  %v3076_v39 = vrot.slane %v3062_v9, %v7699_v5 }
0x2cad   :  { %3163 = vmatprep.mubr.f32.mxu1 %v7472_v3  ;;  %6690 = vmatpush1.bf16.msra.mxu1 %v6689_v51  ;;  %v2974_v10 = vld [vmem:[#allocation4 + $0x18] sm:$0x3]  ;;  %v3242_v43 = vcombine.low %v3234_v37, %v3241_v34  ;;  %v3251_v48 = vrot.slane %v3243_v52, %v7699_v5  ;;  %v3357_v51 = vld [vmem:[%s8983_s6] sm:$0x3]  ;;  %v3596_v52 = vld [vmem:[#allocation6] sm:$0x3] }
0x2cae   :  { %v3061_v13 = vcombine.low %v2974_v10, %v2975_v36  ;;  %6708 = vmatprep.subr.bf16.mxu1 %v8196_v41  ;;  %v3362_v63 = vrot.slane %v3357_v51, %v50_v57  ;;  %v3366_v2 = vrot.slane %v3357_v51, %v54_v61 }
0x2caf   :  { %v3259_v49 = vcombine.low %v3251_v48, %v3258_v47 }
0x2cb0   :  { %6325 = vmatmul.mubr.msk.f32.gmra.mrb[20].mxu1 %vm3078_vm4, %v3060_v11  ;;  %v3069_v44 = vrot.slane %v3061_v13, %v7699_v5 }
0x2cb1   :  { %3169 = vmatprep.mubr.f32.mxu1 %v7472_v3 }
0x2cb2   :  { %v3507_v1 = vld [vmem:[#allocation5] sm:$0x3]  ;;  %v3077_v60 = vcombine.low %v3069_v44, %v3076_v39 }
0x2cb3   :  { %6339 = vmatmul.mubr.msk.f32.vlgmr.msra.gmra.mrb[24].mxu0 %vm58_vm1, %v3507_v1 }
0x2cb4   :  { %6326 = vmatmul.mubr.msk.f32.gmra.mrb[22].mxu1 %vm3078_vm4, %v3077_v60  ;;  %6726 = vmatpush1.bf16.msra.mxu0 %v8202_v42 }
0x2cb5   :  { %3332 = vmatprep.mubr.f32.mxu1 %v7472_v3  ;;  %6728 = vmatprep.subr.bf16.mxu0 %v8220_v58 }
0x2cb6   :  { %3901 = vmatprep.mubr.f32.mxu0 %v7472_v3 }
0x2cb8   :  { %6327 = vmatmul.mubr.msk.f32.vlgmr.msra.gmra.mrb[16].mxu1 %vm3078_vm4, %v3208_v23  ;;  %6730 = vmatpush1.bf16.msra.mxu0 %v8222_v59 }
0x2cb9   :  { %3338 = vmatprep.mubr.f32.mxu1 %v7472_v3  ;;  %6710 = vmatpush1.bf16.msra.mxu1 %v8202_v42 }
0x2cba   :  { %6712 = vmatprep.subr.bf16.mxu1 %v8220_v58  ;;  %6732 = vmatprep.subr.bf16.mxu0 %v8239_v8 }
0x2cbc   :  { %6328 = vmatmul.mubr.msk.f32.gmra.mrb[18].mxu1 %vm3078_vm4, %v3225_v12  ;;  %6734 = vmatpush1.bf16.msra.mxu0 %v8241_v25 }
0x2cbd   :  { %3344 = vmatprep.mubr.f32.mxu1 %v7472_v3  ;;  %6714 = vmatpush1.bf16.msra.mxu1 %v8222_v59 }
0x2cbe   :  { %6716 = vmatprep.subr.bf16.mxu1 %v8239_v8  ;;  %6736 = vmatprep.subr.bf16.mxu0 %v8258_v45 }
0x2cc0   :  { %6329 = vmatmul.mubr.msk.f32.gmra.mrb[20].mxu1 %vm3078_vm4, %v3242_v43  ;;  %6738 = vmatpush1.bf16.msra.mxu0 %v8260_v50 }
0x2cc1   :  { %3350 = vmatprep.mubr.f32.mxu1 %v7472_v3  ;;  %6718 = vmatpush1.bf16.msra.mxu1 %v8241_v25 }
0x2cc2   :  { %6720 = vmatprep.subr.bf16.mxu1 %v8258_v45  ;;  %6756 = vmatprep.subr.bf16.mxu0 %v8196_v41 }
0x2cc4   :  { %6330 = vmatmul.mubr.msk.f32.gmra.mrb[22].mxu1 %vm3078_vm4, %v3259_v49 }
0x2cc5   :  { %6722 = vmatpush1.bf16.msra.mxu1 %v8260_v50  ;;  %3738 = vmatprep.mubr.f32.mxu1 %v7472_v3 }
0x2cc6   :  { %6740 = vmatprep.subr.bf16.mxu1 %v8196_v41 }
0x2d86   :  { %v3577_v54 = vpop.f32.mrb[24].mxu0 }
0x2d87   :  { %v8352_v62 = vpop.f32.mrb[25].mxu0 }
0x2d8b   :  { %v3334_v4 = vpop.f32.mrb[16].mxu1 }
0x2d8c   :  { %v3369_v6 = vadd.f32 %v3362_v63, %v3334_v4  ;;  %v3336_v9 = vpop.f32.mrb[17].mxu1 }
0x2d8d   :  { %v3370_v30 = vadd.f32 %v3366_v2, %v3336_v9 }
0x2d8f   :  { %v3385_v10 = vcombine.low %v3369_v6, %v3370_v30  ;;  %v3386_v36 = vcombine.high %v3369_v6, %v3370_v30  ;;  %v3340_v38 = vpop.f32.mrb[18].mxu1 }
0x2d90   :  { %v3371_v11 = vadd.f32 %v3362_v63, %v3340_v38  ;;  %v3342_v13 = vpop.f32.mrb[19].mxu1 }
0x2d91   :  { %v3393_v15 = vrot.slane %v3385_v10, %v7699_v5  ;;  %v3400_v16 = vrot.slane %v3386_v36, %v7699_v5  ;;  %6331 = vst.sshfl [vmem:[#allocation2] sm:$0x33 pattern:$0x76325410] %v3385_v10  ;;  %v3372_v7 = vadd.f32 %v3366_v2, %v3342_v13 }
0x2d92   :  { %6332 = vst.sshfl [vmem:[#allocation2 + $0x8] sm:$0x33 pattern:$0x76325410] %v3386_v36 }
0x2d93   :  { %v3401_v57 = vcombine.high %v3393_v15, %v3393_v15  ;;  %v3402_v44 = vcombine.high %v3400_v16, %v3400_v16  ;;  %v3403_v56 = vcombine.low %v3371_v11, %v3372_v7  ;;  %v3404_v61 = vcombine.high %v3371_v11, %v3372_v7  ;;  %v3346_v39 = vpop.f32.mrb[20].mxu1 }
0x2d94   :  { %v3373_v0 = vadd.f32 %v3362_v63, %v3346_v39  ;;  %v3348_v28 = vpop.f32.mrb[21].mxu1 }
0x2d95   :  { %3474 = vst [vmem:[#allocation2 + $0x4] sm:$0xf] %v3401_v57  ;;  %3476 = vst [vmem:[#allocation2 + $0xc] sm:$0xf] %v3402_v44  ;;  %v3411_v19 = vrot.slane %v3403_v56, %v7699_v5  ;;  %v3418_v1 = vrot.slane %v3404_v61, %v7699_v5  ;;  %v3374_v60 = vadd.f32 %v3366_v2, %v3348_v28 }
0x2d96   :  { %6333 = vst.sshfl [vmem:[#allocation2 + $0x10] sm:$0x33 pattern:$0x76325410] %v3403_v56 }
0x2d97   :  { %6334 = vst.sshfl [vmem:[#allocation2 + $0x18] sm:$0x33 pattern:$0x76325410] %v3404_v61  ;;  %v3419_v55 = vcombine.high %v3411_v19, %v3411_v19  ;;  %v3420_v53 = vcombine.high %v3418_v1, %v3418_v1  ;;  %v3421_v40 = vcombine.low %v3373_v0, %v3374_v60  ;;  %v3422_v17 = vcombine.high %v3373_v0, %v3374_v60  ;;  %v3352_v18 = vpop.f32.mrb[22].mxu1 }
0x2d98   :  { %v3375_v20 = vadd.f32 %v3362_v63, %v3352_v18  ;;  %v3354_v22 = vpop.f32.mrb[23].mxu1  ;;  %v3582_v21 = vld [vmem:[#allocation2] sm:$0xf] }
0x2d99   :  { %3478 = vst [vmem:[#allocation2 + $0x14] sm:$0xf] %v3419_v55  ;;  %3480 = vst [vmem:[#allocation2 + $0x1c] sm:$0xf] %v3420_v53  ;;  %v3429_v23 = vrot.slane %v3421_v40, %v7699_v5  ;;  %v3436_v24 = vrot.slane %v3422_v17, %v7699_v5  ;;  %v3376_v26 = vadd.f32 %v3366_v2, %v3354_v22 }
0x2d9a   :  { %6335 = vst.sshfl [vmem:[#allocation2 + $0x20] sm:$0x33 pattern:$0x76325410] %v3421_v40  ;;  %v3584_v27 = vadd.f32 %v3582_v21, %v3577_v54 }
0x2d9b   :  { %6336 = vst.sshfl [vmem:[#allocation2 + $0x28] sm:$0x33 pattern:$0x76325410] %v3422_v17  ;;  %v3437_v29 = vcombine.high %v3429_v23, %v3429_v23  ;;  %v3438_v31 = vcombine.high %v3436_v24, %v3436_v24  ;;  %v3439_v46 = vcombine.low %v3375_v20, %v3376_v26  ;;  %v3440_v32 = vcombine.high %v3375_v20, %v3376_v26 }
0x2d9c   :  { %7216 = vtanh.f32 %v3584_v27  ;;  %v3745_v17 = vld [vmem:[#allocation2 + $0x4] sm:$0xf] }
0x2d9d   :  { %3482 = vst [vmem:[#allocation2 + $0x24] sm:$0xf] %v3437_v29  ;;  %3484 = vst [vmem:[#allocation2 + $0x2c] sm:$0xf] %v3438_v31  ;;  %v3447_v33 = vrot.slane %v3439_v46, %v7699_v5  ;;  %v3454_v12 = vrot.slane %v3440_v32, %v7699_v5  ;;  %v6341_v5 = vmul.f32 -1.442695, %v3584_v27 }
0x2d9e   :  { %6337 = vst.sshfl [vmem:[#allocation2 + $0x30] sm:$0x33 pattern:$0x76325410] %v3439_v46 }
0x2d9f   :  { %6338 = vst.sshfl [vmem:[#allocation2 + $0x38] sm:$0x33 pattern:$0x76325410] %v3440_v32  ;;  %v3455_v34 = vcombine.high %v3447_v33, %v3447_v33  ;;  %v3456_v35 = vcombine.high %v3454_v12, %v3454_v12 }
0x2da1   :  { %3486 = vst [vmem:[#allocation2 + $0x34] sm:$0xf] %v3455_v34  ;;  %3488 = vst [vmem:[#allocation2 + $0x3c] sm:$0xf] %v3456_v35 }
0x2da6   :  { %v7217_v14 = vpop.eup %7216  ;;  %v6344_v53 = vld.sshfl [vmem:[#allocation2 + $0x38] sm:$0x33 pattern:$0x76325410] }
0x2da7   :  { %3610 = vrot.lane.b32.xlu0 %v7217_v14, %s7473_s18  ;;  %v3756_v18 = vcombine.high %v6344_v53, %v6344_v53 }
0x2da8   :  { %v6340_v37 = vld.sshfl [vmem:[#allocation2 + $0x3c] sm:$0x33 pattern:$0x76325410] }
0x2da9   :  { %v3593_v43 = vcombine.high %v6340_v37, %v6340_v37 }
0x2dab   :  { %v3595_v47 = vadd.f32 %v3593_v43, %v8352_v62  ;;  %3605 = vrot.lane.b32.xlu0 %v3596_v52, %s7473_s18 }
0x2dad   :  { %7218 = vtanh.f32 %v3595_v47  ;;  %v6342_v54 = vmul.f32 -1.442695, %v3595_v47 }
0x2dae   :  { %7220 = vpow2.f32 %v6341_v5 }
0x2db7   :  { %v7219_v48 = vpop.eup %7218 }
0x2db8   :  { %3634 = vrot.lane.b32.xlu1 %v7219_v48, %s7473_s18  ;;  %v7221_v49 = vpop.eup %7220 }
0x2db9   :  { %v3600_v51 = vadd.f32 1.0, %v7221_v49 }
0x2dbb   :  { %7222 = vrcp.f32 %v3600_v51 }
0x2dbc   :  { %7224 = vpow2.f32 %v6342_v54 }
0x2dc5   :  { %v7223_v63 = vpop.eup %7222 }
0x2dc6   :  { %v7225_v2 = vpop.eup %7224 }
0x2dc7   :  { %v3628_v9 = vadd.f32 1.0, %v7225_v2 }
0x2dc9   :  { %7226 = vrcp.f32 %v3628_v9 }
0x2dd3   :  { %v7227_v62 = vpop.eup %7226 }
0x2dd4   :  { %v3632_v16 = vmul.f32 %v7227_v62, %v3596_v52 }
0x2e19   :  { %v3611_v4 = vpop.permute.xlu0 %3610 }
0x2e1a   :  { %v3613_v6 = vmul.f32 %v7223_v63, %v3611_v4 }
0x2e1c   :  { %3615 = vrot.lane.b32.xlu1 %v3613_v6, %s7473_s18 }
0x2e1d   :  { %v3606_v36 = vpop.permute.xlu0 %3605 }
0x2e1e   :  { %v3608_v38 = vmul.f32 %v7223_v63, %v3606_v36 }
0x2e2a   :  { %v3635_v30 = vpop.permute.xlu1 %3634 }
0x2e2b   :  { %v3637_v10 = vmul.f32 %v7227_v62, %v3635_v30 }
0x2e2d   :  { %3639 = vrot.lane.b32.xlu0 %v3637_v10, %s7473_s18 }
0x2e8e   :  { %v3616_v11 = vpop.permute.xlu1 %3615 }
0x2e8f   :  { %v3618_v13 = vadd.f32 %v3616_v11, %v3608_v38 }
0x2e91   :  { %7228 = vtanh.f32 %v3618_v13 }
0x2e9b   :  { %v7229_v15 = vpop.eup %7228 }
0x2e9c   :  { %3621 = vrot.lane.b32.xlu1 %v7229_v15, %s7473_s18 }
0x2e9f   :  { %v3640_v7 = vpop.permute.xlu0 %3639 }
0x2ea0   :  { %v3642_v57 = vadd.f32 %v3640_v7, %v3632_v16  ;;  %v3908_v16 = vld [vmem:[#allocation2 + $0x8] sm:$0xf] }
0x2ea2   :  { %7230 = vtanh.f32 %v3642_v57 }
0x2eac   :  { %v7231_v44 = vpop.eup %7230 }
0x2ead   :  { %3645 = vrot.lane.b32.xlu0 %v7231_v44, %s7473_s18 }
0x2f0e   :  { %v3622_v56 = vpop.permute.xlu1 %3621 }
0x2f0f   :  { %v3624_v61 = vmul.f32 %v7223_v63, %v3622_v56 }
0x2f11   :  { %3650 = vrot.lane.b32.xlu1 %v3624_v61, %s7475_s3 }
0x2f15   :  { %3660 = vrot.lane.b32.xlu1 %v3618_v13, %s7476_s27  ;;  %v6348_v13 = vld.sshfl [vmem:[#allocation2 + $0x34] sm:$0x33 pattern:$0x76325410] }
0x2f16   :  { %v3919_v7 = vcombine.high %v6348_v13, %v6348_v13 }
0x2f1f   :  { %v3646_v39 = vpop.permute.xlu0 %3645 }
0x2f20   :  { %v8376_v0 = vmul.f32 %v7227_v62, %v3646_v39 }
0x2f22   :  { %3655 = vrot.lane.b32.xlu0 %v8376_v0, %s7476_s27 }
0x2f83   :  { %v3651_v28 = vpop.permute.xlu1 %3650 }
0x2f84   :  { %3653 = vst.msk [vmem:[#allocation5] sm:$0x3] %vm438_vm2, %v3651_v28  ;;  %3665 = vst.msk [vmem:[#allocation3] sm:$0x3] %vm438_vm2, %v3651_v28 }
0x2f87   :  { %v3661_v19 = vpop.permute.xlu1 %3660 }
0x2f88   :  { %3663 = vst.msk [vmem:[#allocation6] sm:$0x3] %vm438_vm2, %v3661_v19 }
0x2f89   :  { %3664 = vst.msk [vmem:[#allocation6] sm:$0x3] %vm444_vm3, %v3642_v57 }
0x2f8b   :  { %v6115_v1 = vld [vmem:[#allocation3] sm:$0x3] }
0x2f8c   :  { %6131 = vst.msk [vmem:[%s8984_s7] sm:$0x3] %vm438_vm2, %v6115_v1 }
0x2f90   :  { %v3759_v26 = vld [vmem:[#allocation6] sm:$0x3] }
0x2f94   :  { %v3656_v60 = vpop.permute.xlu0 %3655 }
0x2f95   :  { %3658 = vst.msk [vmem:[#allocation5] sm:$0x3] %vm444_vm3, %v3656_v60 }
0x2f9c   :  { %v3670_v55 = vld [vmem:[#allocation5] sm:$0x3] }
0x2f9d   :  { %6343 = vmatmul.mubr.msk.f32.vlgmr.msra.gmra.mrb[24].mxu1 %vm58_vm1, %v3670_v55 }
0x2f9e   :  { %6742 = vmatpush1.bf16.msra.mxu1 %v8202_v42  ;;  %4064 = vmatprep.mubr.f32.mxu1 %v7472_v3 }
0x2f9f   :  { %6744 = vmatprep.subr.bf16.mxu1 %v8220_v58 }
0x2fa2   :  { %6746 = vmatpush1.bf16.msra.mxu1 %v8222_v59 }
0x2fa3   :  { %6748 = vmatprep.subr.bf16.mxu1 %v8239_v8 }
0x2fa6   :  { %6750 = vmatpush1.bf16.msra.mxu1 %v8241_v25 }
0x2fa7   :  { %6752 = vmatprep.subr.bf16.mxu1 %v8258_v45 }
0x2faa   :  { %6754 = vmatpush1.bf16.msra.mxu1 %v8260_v50 }
0x2fab   :  { %6772 = vmatprep.subr.bf16.mxu1 %v8196_v41 }
0x3070   :  { %v3740_v40 = vpop.f32.mrb[24].mxu1 }
0x3071   :  { %v3747_v20 = vadd.f32 %v3745_v17, %v3740_v40  ;;  %v3742_v22 = vpop.f32.mrb[25].mxu1 }
0x3072   :  { %v3758_v21 = vadd.f32 %v3756_v18, %v3742_v22 }
0x3073   :  { %7232 = vtanh.f32 %v3747_v20  ;;  %v6345_v27 = vmul.f32 -1.442695, %v3747_v20 }
0x3074   :  { %7234 = vtanh.f32 %v3758_v21  ;;  %v6346_v29 = vmul.f32 -1.442695, %v3758_v21 }
0x3075   :  { %7236 = vpow2.f32 %v6345_v27 }
0x3076   :  { %7238 = vpow2.f32 %v6346_v29 }
0x307d   :  { %v7233_v23 = vpop.eup %7232 }
0x307e   :  { %v7235_v24 = vpop.eup %7234  ;;  %3773 = vrot.lane.b32.xlu0 %v7233_v23, %s7473_s18 }
0x307f   :  { %3797 = vrot.lane.b32.xlu1 %v7235_v24, %s7473_s18  ;;  %v7237_v31 = vpop.eup %7236 }
0x3080   :  { %v7239_v46 = vpop.eup %7238  ;;  %v3763_v32 = vadd.f32 1.0, %v7237_v31 }
0x3081   :  { %v3791_v33 = vadd.f32 1.0, %v7239_v46 }
0x3082   :  { %3768 = vrot.lane.b32.xlu0 %v3759_v26, %s7473_s18  ;;  %7240 = vrcp.f32 %v3763_v32 }
0x3083   :  { %7242 = vrcp.f32 %v3791_v33 }
0x308c   :  { %v7241_v12 = vpop.eup %7240 }
0x308d   :  { %v7243_v35 = vpop.eup %7242 }
0x308e   :  { %v3795_v5 = vmul.f32 %v7243_v35, %v3759_v26 }
0x30f0   :  { %v3774_v34 = vpop.permute.xlu0 %3773 }
0x30f1   :  { %v3776_v14 = vmul.f32 %v7241_v12, %v3774_v34  ;;  %v3798_v37 = vpop.permute.xlu1 %3797 }
0x30f2   :  { %v3800_v52 = vmul.f32 %v7243_v35, %v3798_v37 }
0x30f3   :  { %3778 = vrot.lane.b32.xlu1 %v3776_v14, %s7473_s18 }
0x30f4   :  { %3802 = vrot.lane.b32.xlu0 %v3800_v52, %s7473_s18  ;;  %v3769_v43 = vpop.permute.xlu0 %3768 }
0x30f5   :  { %v3771_v47 = vmul.f32 %v7241_v12, %v3769_v43 }
0x3165   :  { %v3779_v48 = vpop.permute.xlu1 %3778 }
0x3166   :  { %v3781_v49 = vadd.f32 %v3779_v48, %v3771_v47  ;;  %v3803_v51 = vpop.permute.xlu0 %3802 }
0x3167   :  { %v3805_v54 = vadd.f32 %v3803_v51, %v3795_v5 }
0x3168   :  { %7244 = vtanh.f32 %v3781_v49 }
0x3169   :  { %7246 = vtanh.f32 %v3805_v54 }
0x3172   :  { %v7245_v63 = vpop.eup %7244 }
0x3173   :  { %v7247_v2 = vpop.eup %7246  ;;  %3784 = vrot.lane.b32.xlu1 %v7245_v63, %s7473_s18 }
0x3174   :  { %3808 = vrot.lane.b32.xlu0 %v7247_v2, %s7473_s18 }
0x31e5   :  { %v3785_v4 = vpop.permute.xlu1 %3784 }
0x31e6   :  { %v3787_v6 = vmul.f32 %v7241_v12, %v3785_v4  ;;  %v3809_v9 = vpop.permute.xlu0 %3808 }
0x31e7   :  { %v8406_v62 = vmul.f32 %v7243_v35, %v3809_v9 }
0x31e8   :  { %3813 = vrot.lane.b32.xlu1 %v3787_v6, %s7475_s3 }
0x31e9   :  { %3818 = vrot.lane.b32.xlu0 %v8406_v62, %s7476_s27 }
0x31ec   :  { %3823 = vrot.lane.b32.xlu1 %v3781_v49, %s7476_s27  ;;  %v6352_v49 = vld.sshfl [vmem:[#allocation2 + $0x30] sm:$0x33 pattern:$0x76325410] }
0x31ed   :  { %v4082_v63 = vcombine.high %v6352_v49, %v6352_v49 }
0x325a   :  { %v3814_v30 = vpop.permute.xlu1 %3813 }
0x325b   :  { %3816 = vst.msk [vmem:[#allocation5] sm:$0x3] %vm438_vm2, %v3814_v30  ;;  %3828 = vst.msk [vmem:[#allocation3 + $0x2] sm:$0x3] %vm438_vm2, %v3814_v30  ;;  %v3819_v10 = vpop.permute.xlu0 %3818 }
0x325c   :  { %3821 = vst.msk [vmem:[#allocation5] sm:$0x3] %vm444_vm3, %v3819_v10 }
0x325e   :  { %v3824_v36 = vpop.permute.xlu1 %3823 }
0x325f   :  { %3826 = vst.msk [vmem:[#allocation6] sm:$0x3] %vm438_vm2, %v3824_v36 }
0x3260   :  { %3827 = vst.msk [vmem:[#allocation6] sm:$0x3] %vm444_vm3, %v3805_v54  ;;  %v4071_v54 = vld [vmem:[#allocation2 + $0xc] sm:$0xf] }
0x3262   :  { %v6116_v38 = vld [vmem:[#allocation3 + $0x2] sm:$0x3] }
0x3263   :  { %v3833_v11 = vld [vmem:[#allocation5] sm:$0x3]  ;;  %6132 = vst.msk [vmem:[%s8984_s7 + $0x2] sm:$0x3] %vm438_vm2, %v6116_v38 }
0x3264   :  { %6347 = vmatmul.mubr.msk.f32.vlgmr.msra.gmra.mrb[26].mxu0 %vm58_vm1, %v3833_v11 }
0x3265   :  { %6758 = vmatpush1.bf16.msra.mxu0 %v8202_v42  ;;  %4227 = vmatprep.mubr.f32.mxu0 %v7472_v3 }
0x3266   :  { %6760 = vmatprep.subr.bf16.mxu0 %v8220_v58 }
0x3267   :  { %v3922_v28 = vld [vmem:[#allocation6] sm:$0x3] }
0x3269   :  { %6762 = vmatpush1.bf16.msra.mxu0 %v8222_v59 }
0x326a   :  { %6764 = vmatprep.subr.bf16.mxu0 %v8239_v8 }
0x326d   :  { %6766 = vmatpush1.bf16.msra.mxu0 %v8241_v25 }
0x326e   :  { %6768 = vmatprep.subr.bf16.mxu0 %v8258_v45 }
0x3271   :  { %6770 = vmatpush1.bf16.msra.mxu0 %v8260_v50 }
0x3272   :  { %6788 = vmatprep.subr.bf16.mxu0 %v8196_v41 }
0x3337   :  { %v3903_v15 = vpop.f32.mrb[26].mxu0 }
0x3338   :  { %v3910_v57 = vadd.f32 %v3908_v16, %v3903_v15  ;;  %v3905_v44 = vpop.f32.mrb[27].mxu0 }
0x3339   :  { %v3921_v56 = vadd.f32 %v3919_v7, %v3905_v44 }
0x333a   :  { %7248 = vtanh.f32 %v3910_v57  ;;  %v6349_v19 = vmul.f32 -1.442695, %v3910_v57 }
0x333b   :  { %7250 = vtanh.f32 %v3921_v56  ;;  %v6350_v1 = vmul.f32 -1.442695, %v3921_v56 }
0x333c   :  { %7252 = vpow2.f32 %v6349_v19 }
0x333d   :  { %7254 = vpow2.f32 %v6350_v1 }
0x3344   :  { %v7249_v61 = vpop.eup %7248 }
0x3345   :  { %v7251_v39 = vpop.eup %7250  ;;  %3936 = vrot.lane.b32.xlu0 %v7249_v61, %s7473_s18 }
0x3346   :  { %3960 = vrot.lane.b32.xlu1 %v7251_v39, %s7473_s18  ;;  %v7253_v60 = vpop.eup %7252 }
0x3347   :  { %v7255_v55 = vpop.eup %7254  ;;  %v3926_v53 = vadd.f32 1.0, %v7253_v60 }
0x3348   :  { %v3954_v40 = vadd.f32 1.0, %v7255_v55 }
0x3349   :  { %3931 = vrot.lane.b32.xlu0 %v3922_v28, %s7473_s18  ;;  %7256 = vrcp.f32 %v3926_v53 }
0x334a   :  { %7258 = vrcp.f32 %v3954_v40 }
0x3353   :  { %v7257_v17 = vpop.eup %7256 }
0x3354   :  { %v7259_v20 = vpop.eup %7258 }
0x3355   :  { %v3958_v29 = vmul.f32 %v7259_v20, %v3922_v28 }
0x33b7   :  { %v3937_v18 = vpop.permute.xlu0 %3936 }
0x33b8   :  { %v3939_v22 = vmul.f32 %v7257_v17, %v3937_v18  ;;  %v3961_v21 = vpop.permute.xlu1 %3960 }
0x33b9   :  { %v3963_v23 = vmul.f32 %v7259_v20, %v3961_v21 }
0x33ba   :  { %3941 = vrot.lane.b32.xlu1 %v3939_v22, %s7473_s18 }
0x33bb   :  { %3965 = vrot.lane.b32.xlu0 %v3963_v23, %s7473_s18  ;;  %v3932_v24 = vpop.permute.xlu0 %3931 }
0x33bc   :  { %v3934_v26 = vmul.f32 %v7257_v17, %v3932_v24 }
0x342c   :  { %v3942_v27 = vpop.permute.xlu1 %3941 }
0x342d   :  { %v3944_v31 = vadd.f32 %v3942_v27, %v3934_v26  ;;  %v3966_v46 = vpop.permute.xlu0 %3965 }
0x342e   :  { %v3968_v32 = vadd.f32 %v3966_v46, %v3958_v29  ;;  %v6356_v46 = vld.sshfl [vmem:[#allocation2 + $0x2c] sm:$0x33 pattern:$0x76325410] }
0x342f   :  { %7260 = vtanh.f32 %v3944_v31 }
0x3430   :  { %7262 = vtanh.f32 %v3968_v32 }
0x3439   :  { %v7261_v33 = vpop.eup %7260 }
0x343a   :  { %v7263_v12 = vpop.eup %7262  ;;  %3947 = vrot.lane.b32.xlu1 %v7261_v33, %s7473_s18  ;;  %v4234_v33 = vld [vmem:[#allocation2 + $0x10] sm:$0xf] }
0x343b   :  { %3971 = vrot.lane.b32.xlu0 %v7263_v12, %s7473_s18  ;;  %v4245_v12 = vcombine.high %v6356_v46, %v6356_v46 }
0x34ac   :  { %v3948_v34 = vpop.permute.xlu1 %3947 }
0x34ad   :  { %v3950_v35 = vmul.f32 %v7257_v17, %v3948_v34  ;;  %v3972_v14 = vpop.permute.xlu0 %3971 }
0x34ae   :  { %v8438_v37 = vmul.f32 %v7259_v20, %v3972_v14 }
0x34af   :  { %3976 = vrot.lane.b32.xlu1 %v3950_v35, %s7475_s3 }
0x34b0   :  { %3981 = vrot.lane.b32.xlu0 %v8438_v37, %s7476_s27 }
0x34b3   :  { %3986 = vrot.lane.b32.xlu1 %v3944_v31, %s7476_s27 }
0x3521   :  { %v3977_v52 = vpop.permute.xlu1 %3976 }
0x3522   :  { %3979 = vst.msk [vmem:[#allocation5] sm:$0x3] %vm438_vm2, %v3977_v52  ;;  %3991 = vst.msk [vmem:[#allocation3 + $0x4] sm:$0x3] %vm438_vm2, %v3977_v52  ;;  %v3982_v43 = vpop.permute.xlu0 %3981 }
0x3523   :  { %3984 = vst.msk [vmem:[#allocation5] sm:$0x3] %vm444_vm3, %v3982_v43 }
0x3525   :  { %v3987_v47 = vpop.permute.xlu1 %3986 }
0x3526   :  { %3989 = vst.msk [vmem:[#allocation6] sm:$0x3] %vm438_vm2, %v3987_v47 }
0x3527   :  { %3990 = vst.msk [vmem:[#allocation6] sm:$0x3] %vm444_vm3, %v3968_v32 }
0x3529   :  { %v6117_v48 = vld [vmem:[#allocation3 + $0x4] sm:$0x3] }
0x352a   :  { %v3996_v5 = vld [vmem:[#allocation5] sm:$0x3]  ;;  %6133 = vst.msk [vmem:[%s8984_s7 + $0x4] sm:$0x3] %vm438_vm2, %v6117_v48 }
0x352b   :  { %6351 = vmatmul.mubr.msk.f32.vlgmr.msra.gmra.mrb[26].mxu1 %vm58_vm1, %v3996_v5 }
0x352c   :  { %6774 = vmatpush1.bf16.msra.mxu1 %v8202_v42  ;;  %4390 = vmatprep.mubr.f32.mxu1 %v7472_v3 }
0x352d   :  { %6776 = vmatprep.subr.bf16.mxu1 %v8220_v58 }
0x352e   :  { %v4085_v10 = vld [vmem:[#allocation6] sm:$0x3] }
0x3530   :  { %6778 = vmatpush1.bf16.msra.mxu1 %v8222_v59 }
0x3531   :  { %6780 = vmatprep.subr.bf16.mxu1 %v8239_v8 }
0x3534   :  { %6782 = vmatpush1.bf16.msra.mxu1 %v8241_v25 }
0x3535   :  { %6784 = vmatprep.subr.bf16.mxu1 %v8258_v45 }
0x3538   :  { %6786 = vmatpush1.bf16.msra.mxu1 %v8260_v50 }
0x3539   :  { %6804 = vmatprep.subr.bf16.mxu1 %v8196_v41 }
0x35fe   :  { %v4066_v51 = vpop.f32.mrb[26].mxu1 }
0x35ff   :  { %v4073_v2 = vadd.f32 %v4071_v54, %v4066_v51  ;;  %v4068_v4 = vpop.f32.mrb[27].mxu1 }
0x3600   :  { %v4084_v6 = vadd.f32 %v4082_v63, %v4068_v4 }
0x3601   :  { %7264 = vtanh.f32 %v4073_v2  ;;  %v6353_v36 = vmul.f32 -1.442695, %v4073_v2 }
0x3602   :  { %7266 = vtanh.f32 %v4084_v6  ;;  %v6354_v38 = vmul.f32 -1.442695, %v4084_v6 }
0x3603   :  { %7268 = vpow2.f32 %v6353_v36 }
0x3604   :  { %7270 = vpow2.f32 %v6354_v38 }
0x360b   :  { %v7265_v9 = vpop.eup %7264 }
0x360c   :  { %v7267_v30 = vpop.eup %7266  ;;  %4099 = vrot.lane.b32.xlu0 %v7265_v9, %s7473_s18 }
0x360d   :  { %4123 = vrot.lane.b32.xlu1 %v7267_v30, %s7473_s18  ;;  %v7269_v11 = vpop.eup %7268 }
0x360e   :  { %v7271_v13 = vpop.eup %7270  ;;  %v4089_v15 = vadd.f32 1.0, %v7269_v11 }
0x360f   :  { %v4117_v16 = vadd.f32 1.0, %v7271_v13 }
0x3610   :  { %4094 = vrot.lane.b32.xlu0 %v4085_v10, %s7473_s18  ;;  %7272 = vrcp.f32 %v4089_v15 }
0x3611   :  { %7274 = vrcp.f32 %v4117_v16 }
0x361a   :  { %v7273_v7 = vpop.eup %7272 }
0x361b   :  { %v7275_v44 = vpop.eup %7274 }
0x361c   :  { %v4121_v60 = vmul.f32 %v7275_v44, %v4085_v10 }
0x367e   :  { %v4100_v57 = vpop.permute.xlu0 %4099 }
0x367f   :  { %v4102_v56 = vmul.f32 %v7273_v7, %v4100_v57  ;;  %v4124_v61 = vpop.permute.xlu1 %4123 }
0x3680   :  { %v4126_v39 = vmul.f32 %v7275_v44, %v4124_v61 }
0x3681   :  { %4104 = vrot.lane.b32.xlu1 %v4102_v56, %s7473_s18 }
0x3682   :  { %4128 = vrot.lane.b32.xlu0 %v4126_v39, %s7473_s18  ;;  %v4095_v28 = vpop.permute.xlu0 %4094 }
0x3683   :  { %v4097_v19 = vmul.f32 %v7273_v7, %v4095_v28 }
0x36f3   :  { %v4105_v1 = vpop.permute.xlu1 %4104 }
0x36f4   :  { %v4107_v55 = vadd.f32 %v4105_v1, %v4097_v19  ;;  %v4129_v53 = vpop.permute.xlu0 %4128 }
0x36f5   :  { %v4131_v40 = vadd.f32 %v4129_v53, %v4121_v60 }
0x36f6   :  { %7276 = vtanh.f32 %v4107_v55 }
0x36f7   :  { %7278 = vtanh.f32 %v4131_v40 }
0x3700   :  { %v7277_v17 = vpop.eup %7276 }
0x3701   :  { %v7279_v18 = vpop.eup %7278  ;;  %4110 = vrot.lane.b32.xlu1 %v7277_v17, %s7473_s18 }
0x3702   :  { %4134 = vrot.lane.b32.xlu0 %v7279_v18, %s7473_s18  ;;  %v4397_v18 = vld [vmem:[#allocation2 + $0x14] sm:$0xf] }
0x3773   :  { %v4111_v20 = vpop.permute.xlu1 %4110 }
0x3774   :  { %v4113_v22 = vmul.f32 %v7273_v7, %v4111_v20  ;;  %v4135_v21 = vpop.permute.xlu0 %4134 }
0x3775   :  { %v8470_v23 = vmul.f32 %v7275_v44, %v4135_v21 }
0x3776   :  { %4139 = vrot.lane.b32.xlu1 %v4113_v22, %s7475_s3 }
0x3777   :  { %4144 = vrot.lane.b32.xlu0 %v8470_v23, %s7476_s27 }
0x377a   :  { %4149 = vrot.lane.b32.xlu1 %v4107_v55, %s7476_s27 }
0x37e8   :  { %v4140_v24 = vpop.permute.xlu1 %4139 }
0x37e9   :  { %4142 = vst.msk [vmem:[#allocation5] sm:$0x3] %vm438_vm2, %v4140_v24  ;;  %4154 = vst.msk [vmem:[#allocation3 + $0x6] sm:$0x3] %vm438_vm2, %v4140_v24  ;;  %v4145_v26 = vpop.permute.xlu0 %4144 }
0x37ea   :  { %4147 = vst.msk [vmem:[#allocation5] sm:$0x3] %vm444_vm3, %v4145_v26 }
0x37ec   :  { %v4150_v27 = vpop.permute.xlu1 %4149 }
0x37ed   :  { %4152 = vst.msk [vmem:[#allocation6] sm:$0x3] %vm438_vm2, %v4150_v27 }
0x37ee   :  { %4153 = vst.msk [vmem:[#allocation6] sm:$0x3] %vm444_vm3, %v4131_v40  ;;  %v6360_v40 = vld.sshfl [vmem:[#allocation2 + $0x28] sm:$0x33 pattern:$0x76325410] }
0x37ef   :  { %v4408_v20 = vcombine.high %v6360_v40, %v6360_v40 }
0x37f0   :  { %v6118_v29 = vld [vmem:[#allocation3 + $0x6] sm:$0x3] }
0x37f1   :  { %v4159_v31 = vld [vmem:[#allocation5] sm:$0x3]  ;;  %6134 = vst.msk [vmem:[%s8984_s7 + $0x6] sm:$0x3] %vm438_vm2, %v6118_v29 }
0x37f2   :  { %6355 = vmatmul.mubr.msk.f32.vlgmr.msra.gmra.mrb[28].mxu0 %vm58_vm1, %v4159_v31 }
0x37f3   :  { %6790 = vmatpush1.bf16.msra.mxu0 %v8202_v42  ;;  %4553 = vmatprep.mubr.f32.mxu0 %v7472_v3 }
0x37f4   :  { %6792 = vmatprep.subr.bf16.mxu0 %v8220_v58 }
0x37f5   :  { %v4248_v47 = vld [vmem:[#allocation6] sm:$0x3] }
0x37f7   :  { %6794 = vmatpush1.bf16.msra.mxu0 %v8222_v59 }
0x37f8   :  { %6796 = vmatprep.subr.bf16.mxu0 %v8239_v8 }
0x37fb   :  { %6798 = vmatpush1.bf16.msra.mxu0 %v8241_v25 }
0x37fc   :  { %6800 = vmatprep.subr.bf16.mxu0 %v8258_v45 }
0x37ff   :  { %6802 = vmatpush1.bf16.msra.mxu0 %v8260_v50 }
0x3800   :  { %6820 = vmatprep.subr.bf16.mxu0 %v8196_v41 }
0x38c5   :  { %v4229_v32 = vpop.f32.mrb[28].mxu0 }
0x38c6   :  { %v4236_v34 = vadd.f32 %v4234_v33, %v4229_v32  ;;  %v4231_v35 = vpop.f32.mrb[29].mxu0 }
0x38c7   :  { %v4247_v14 = vadd.f32 %v4245_v12, %v4231_v35 }
0x38c8   :  { %7280 = vtanh.f32 %v4236_v34  ;;  %v6357_v48 = vmul.f32 -1.442695, %v4236_v34 }
0x38c9   :  { %7282 = vtanh.f32 %v4247_v14  ;;  %v6358_v5 = vmul.f32 -1.442695, %v4247_v14 }
0x38ca   :  { %7284 = vpow2.f32 %v6357_v48 }
0x38cb   :  { %7286 = vpow2.f32 %v6358_v5 }
0x38d2   :  { %v7281_v52 = vpop.eup %7280 }
0x38d3   :  { %v7283_v43 = vpop.eup %7282  ;;  %4262 = vrot.lane.b32.xlu0 %v7281_v52, %s7473_s18 }
0x38d4   :  { %4286 = vrot.lane.b32.xlu1 %v7283_v43, %s7473_s18  ;;  %v7285_v49 = vpop.eup %7284 }
0x38d5   :  { %v7287_v51 = vpop.eup %7286  ;;  %v4252_v54 = vadd.f32 1.0, %v7285_v49 }
0x38d6   :  { %v4280_v63 = vadd.f32 1.0, %v7287_v51 }
0x38d7   :  { %4257 = vrot.lane.b32.xlu0 %v4248_v47, %s7473_s18  ;;  %7288 = vrcp.f32 %v4252_v54 }
0x38d8   :  { %7290 = vrcp.f32 %v4280_v63 }
0x38e1   :  { %v7289_v2 = vpop.eup %7288 }
0x38e2   :  { %v7291_v6 = vpop.eup %7290 }
0x38e3   :  { %v4284_v13 = vmul.f32 %v7291_v6, %v4248_v47 }
0x3945   :  { %v4263_v4 = vpop.permute.xlu0 %4262 }
0x3946   :  { %v4265_v9 = vmul.f32 %v7289_v2, %v4263_v4  ;;  %v4287_v30 = vpop.permute.xlu1 %4286 }
0x3947   :  { %v4289_v10 = vmul.f32 %v7291_v6, %v4287_v30 }
0x3948   :  { %4267 = vrot.lane.b32.xlu1 %v4265_v9, %s7473_s18 }
0x3949   :  { %4291 = vrot.lane.b32.xlu0 %v4289_v10, %s7473_s18  ;;  %v4258_v36 = vpop.permute.xlu0 %4257 }
0x394a   :  { %v4260_v38 = vmul.f32 %v7289_v2, %v4258_v36 }
0x39ba   :  { %v4268_v11 = vpop.permute.xlu1 %4267 }
0x39bb   :  { %v4270_v15 = vadd.f32 %v4268_v11, %v4260_v38  ;;  %v4292_v16 = vpop.permute.xlu0 %4291 }
0x39bc   :  { %v4294_v7 = vadd.f32 %v4292_v16, %v4284_v13 }
0x39bd   :  { %7292 = vtanh.f32 %v4270_v15 }
0x39be   :  { %7294 = vtanh.f32 %v4294_v7 }
0x39c7   :  { %v7293_v57 = vpop.eup %7292 }
0x39c8   :  { %v7295_v44 = vpop.eup %7294  ;;  %4273 = vrot.lane.b32.xlu1 %v7293_v57, %s7473_s18  ;;  %v6364_v57 = vld.sshfl [vmem:[#allocation2 + $0x24] sm:$0x33 pattern:$0x76325410] }
0x39c9   :  { %4297 = vrot.lane.b32.xlu0 %v7295_v44, %s7473_s18 }
0x3a3a   :  { %v4274_v56 = vpop.permute.xlu1 %4273 }
0x3a3b   :  { %v4276_v61 = vmul.f32 %v7289_v2, %v4274_v56  ;;  %v4298_v39 = vpop.permute.xlu0 %4297  ;;  %v4560_v56 = vld [vmem:[#allocation2 + $0x18] sm:$0xf] }
0x3a3c   :  { %v8502_v28 = vmul.f32 %v7291_v6, %v4298_v39 }
0x3a3d   :  { %4302 = vrot.lane.b32.xlu1 %v4276_v61, %s7475_s3  ;;  %v4571_v61 = vcombine.high %v6364_v57, %v6364_v57 }
0x3a3e   :  { %4307 = vrot.lane.b32.xlu0 %v8502_v28, %s7476_s27 }
0x3a41   :  { %4312 = vrot.lane.b32.xlu1 %v4270_v15, %s7476_s27 }
0x3aaf   :  { %v4303_v19 = vpop.permute.xlu1 %4302 }
0x3ab0   :  { %4305 = vst.msk [vmem:[#allocation5] sm:$0x3] %vm438_vm2, %v4303_v19  ;;  %4317 = vst.msk [vmem:[#allocation3 + $0x8] sm:$0x3] %vm438_vm2, %v4303_v19  ;;  %v4308_v1 = vpop.permute.xlu0 %4307 }
0x3ab1   :  { %4310 = vst.msk [vmem:[#allocation5] sm:$0x3] %vm444_vm3, %v4308_v1 }
0x3ab3   :  { %v4313_v60 = vpop.permute.xlu1 %4312 }
0x3ab4   :  { %4315 = vst.msk [vmem:[#allocation6] sm:$0x3] %vm438_vm2, %v4313_v60 }
0x3ab5   :  { %4316 = vst.msk [vmem:[#allocation6] sm:$0x3] %vm444_vm3, %v4294_v7 }
0x3ab7   :  { %v6119_v55 = vld [vmem:[#allocation3 + $0x8] sm:$0x3] }
0x3ab8   :  { %v4322_v53 = vld [vmem:[#allocation5] sm:$0x3]  ;;  %6135 = vst.msk [vmem:[%s8984_s7 + $0x8] sm:$0x3] %vm438_vm2, %v6119_v55 }
0x3ab9   :  { %6359 = vmatmul.mubr.msk.f32.vlgmr.msra.gmra.mrb[28].mxu1 %vm58_vm1, %v4322_v53 }
0x3aba   :  { %6806 = vmatpush1.bf16.msra.mxu1 %v8202_v42  ;;  %4716 = vmatprep.mubr.f32.mxu1 %v7472_v3 }
0x3abb   :  { %6808 = vmatprep.subr.bf16.mxu1 %v8220_v58 }
0x3abc   :  { %v4411_v29 = vld [vmem:[#allocation6] sm:$0x3] }
0x3abe   :  { %6810 = vmatpush1.bf16.msra.mxu1 %v8222_v59 }
0x3abf   :  { %6812 = vmatprep.subr.bf16.mxu1 %v8239_v8 }
0x3ac2   :  { %6814 = vmatpush1.bf16.msra.mxu1 %v8241_v25 }
0x3ac3   :  { %6816 = vmatprep.subr.bf16.mxu1 %v8258_v45 }
0x3ac6   :  { %6818 = vmatpush1.bf16.msra.mxu1 %v8260_v50 }
0x3ac7   :  { %6836 = vmatprep.subr.bf16.mxu1 %v8196_v41 }
0x3b8c   :  { %v4392_v17 = vpop.f32.mrb[28].mxu1 }
0x3b8d   :  { %v4399_v22 = vadd.f32 %v4397_v18, %v4392_v17  ;;  %v4394_v21 = vpop.f32.mrb[29].mxu1 }
0x3b8e   :  { %v4410_v24 = vadd.f32 %v4408_v20, %v4394_v21 }
0x3b8f   :  { %7296 = vtanh.f32 %v4399_v22  ;;  %v6361_v31 = vmul.f32 -1.442695, %v4399_v22 }
0x3b90   :  { %7298 = vtanh.f32 %v4410_v24  ;;  %v6362_v46 = vmul.f32 -1.442695, %v4410_v24 }
0x3b91   :  { %7300 = vpow2.f32 %v6361_v31 }
0x3b92   :  { %7302 = vpow2.f32 %v6362_v46 }
0x3b99   :  { %v7297_v26 = vpop.eup %7296 }
0x3b9a   :  { %v7299_v27 = vpop.eup %7298  ;;  %4425 = vrot.lane.b32.xlu0 %v7297_v26, %s7473_s18 }
0x3b9b   :  { %4449 = vrot.lane.b32.xlu1 %v7299_v27, %s7473_s18  ;;  %v7301_v32 = vpop.eup %7300 }
0x3b9c   :  { %v7303_v33 = vpop.eup %7302  ;;  %v4415_v12 = vadd.f32 1.0, %v7301_v32 }
0x3b9d   :  { %v4443_v34 = vadd.f32 1.0, %v7303_v33 }
0x3b9e   :  { %4420 = vrot.lane.b32.xlu0 %v4411_v29, %s7473_s18  ;;  %7304 = vrcp.f32 %v4415_v12 }
0x3b9f   :  { %7306 = vrcp.f32 %v4443_v34 }
0x3ba8   :  { %v7305_v35 = vpop.eup %7304 }
0x3ba9   :  { %v7307_v52 = vpop.eup %7306 }
0x3baa   :  { %v4447_v54 = vmul.f32 %v7307_v52, %v4411_v29 }
0x3c0c   :  { %v4426_v14 = vpop.permute.xlu0 %4425 }
0x3c0d   :  { %v4428_v43 = vmul.f32 %v7305_v35, %v4426_v14  ;;  %v4450_v47 = vpop.permute.xlu1 %4449 }
0x3c0e   :  { %v4452_v48 = vmul.f32 %v7307_v52, %v4450_v47 }
0x3c0f   :  { %4430 = vrot.lane.b32.xlu1 %v4428_v43, %s7473_s18 }
0x3c10   :  { %4454 = vrot.lane.b32.xlu0 %v4452_v48, %s7473_s18  ;;  %v4421_v5 = vpop.permute.xlu0 %4420 }
0x3c11   :  { %v4423_v49 = vmul.f32 %v7305_v35, %v4421_v5 }
0x3c81   :  { %v4431_v51 = vpop.permute.xlu1 %4430 }
0x3c82   :  { %v4433_v63 = vadd.f32 %v4431_v51, %v4423_v49  ;;  %v4455_v2 = vpop.permute.xlu0 %4454 }
0x3c83   :  { %v4457_v4 = vadd.f32 %v4455_v2, %v4447_v54 }
0x3c84   :  { %7308 = vtanh.f32 %v4433_v63 }
0x3c85   :  { %7310 = vtanh.f32 %v4457_v4 }
0x3c8e   :  { %v7309_v6 = vpop.eup %7308 }
0x3c8f   :  { %v7311_v9 = vpop.eup %7310  ;;  %4436 = vrot.lane.b32.xlu1 %v7309_v6, %s7473_s18 }
0x3c90   :  { %4460 = vrot.lane.b32.xlu0 %v7311_v9, %s7473_s18  ;;  %v6368_v9 = vld.sshfl [vmem:[#allocation2 + $0x20] sm:$0x33 pattern:$0x76325410] }
0x3d01   :  { %v4437_v30 = vpop.permute.xlu1 %4436 }
0x3d02   :  { %v4439_v10 = vmul.f32 %v7305_v35, %v4437_v30  ;;  %v4461_v36 = vpop.permute.xlu0 %4460 }
0x3d03   :  { %v8534_v38 = vmul.f32 %v7307_v52, %v4461_v36  ;;  %v4734_v36 = vcombine.high %v6368_v9, %v6368_v9 }
0x3d04   :  { %4465 = vrot.lane.b32.xlu1 %v4439_v10, %s7475_s3  ;;  %v4723_v10 = vld [vmem:[#allocation2 + $0x1c] sm:$0xf] }
0x3d05   :  { %4470 = vrot.lane.b32.xlu0 %v8534_v38, %s7476_s27 }
0x3d08   :  { %4475 = vrot.lane.b32.xlu1 %v4433_v63, %s7476_s27 }
0x3d76   :  { %v4466_v11 = vpop.permute.xlu1 %4465 }
0x3d77   :  { %4468 = vst.msk [vmem:[#allocation5] sm:$0x3] %vm438_vm2, %v4466_v11  ;;  %4480 = vst.msk [vmem:[#allocation3 + $0xa] sm:$0x3] %vm438_vm2, %v4466_v11  ;;  %v4471_v13 = vpop.permute.xlu0 %4470 }
0x3d78   :  { %4473 = vst.msk [vmem:[#allocation5] sm:$0x3] %vm444_vm3, %v4471_v13 }
0x3d7a   :  { %v4476_v15 = vpop.permute.xlu1 %4475 }
0x3d7b   :  { %4478 = vst.msk [vmem:[#allocation6] sm:$0x3] %vm438_vm2, %v4476_v15 }
0x3d7c   :  { %4479 = vst.msk [vmem:[#allocation6] sm:$0x3] %vm444_vm3, %v4457_v4 }
0x3d7e   :  { %v6120_v16 = vld [vmem:[#allocation3 + $0xa] sm:$0x3] }
0x3d7f   :  { %v4485_v7 = vld [vmem:[#allocation5] sm:$0x3]  ;;  %6136 = vst.msk [vmem:[%s8984_s7 + $0xa] sm:$0x3] %vm438_vm2, %v6120_v16 }
0x3d80   :  { %6363 = vmatmul.mubr.msk.f32.vlgmr.msra.gmra.mrb[30].mxu0 %vm58_vm1, %v4485_v7 }
0x3d81   :  { %6822 = vmatpush1.bf16.msra.mxu0 %v8202_v42  ;;  %4879 = vmatprep.mubr.f32.mxu0 %v7472_v3 }
0x3d82   :  { %6824 = vmatprep.subr.bf16.mxu0 %v8220_v58 }
0x3d83   :  { %v4574_v53 = vld [vmem:[#allocation6] sm:$0x3] }
0x3d85   :  { %6826 = vmatpush1.bf16.msra.mxu0 %v8222_v59 }
0x3d86   :  { %6828 = vmatprep.subr.bf16.mxu0 %v8239_v8 }
0x3d89   :  { %6830 = vmatpush1.bf16.msra.mxu0 %v8241_v25 }
0x3d8a   :  { %6832 = vmatprep.subr.bf16.mxu0 %v8258_v45 }
0x3d8d   :  { %6834 = vmatpush1.bf16.msra.mxu0 %v8260_v50 }
0x3d8e   :  { %6852 = vmatprep.subr.bf16.mxu0 %v8196_v41 }
0x3e53   :  { %v4555_v44 = vpop.f32.mrb[30].mxu0 }
0x3e54   :  { %v4562_v39 = vadd.f32 %v4560_v56, %v4555_v44  ;;  %v4557_v19 = vpop.f32.mrb[31].mxu0 }
0x3e55   :  { %v4573_v1 = vadd.f32 %v4571_v61, %v4557_v19 }
0x3e56   :  { %7312 = vtanh.f32 %v4562_v39  ;;  %v6365_v40 = vmul.f32 -1.442695, %v4562_v39 }
0x3e57   :  { %7314 = vtanh.f32 %v4573_v1  ;;  %v6366_v17 = vmul.f32 -1.442695, %v4573_v1 }
0x3e58   :  { %7316 = vpow2.f32 %v6365_v40 }
0x3e59   :  { %7318 = vpow2.f32 %v6366_v17 }
0x3e60   :  { %v7313_v60 = vpop.eup %7312 }
0x3e61   :  { %v7315_v55 = vpop.eup %7314  ;;  %4588 = vrot.lane.b32.xlu0 %v7313_v60, %s7473_s18 }
0x3e62   :  { %4612 = vrot.lane.b32.xlu1 %v7315_v55, %s7473_s18  ;;  %v7317_v18 = vpop.eup %7316 }
0x3e63   :  { %v7319_v20 = vpop.eup %7318  ;;  %v4578_v22 = vadd.f32 1.0, %v7317_v18 }
0x3e64   :  { %v4606_v21 = vadd.f32 1.0, %v7319_v20 }
0x3e65   :  { %4583 = vrot.lane.b32.xlu0 %v4574_v53, %s7473_s18  ;;  %7320 = vrcp.f32 %v4578_v22 }
0x3e66   :  { %7322 = vrcp.f32 %v4606_v21 }
0x3e6f   :  { %v7321_v24 = vpop.eup %7320 }
0x3e70   :  { %v7323_v27 = vpop.eup %7322 }
0x3e71   :  { %v4610_v34 = vmul.f32 %v7323_v27, %v4574_v53 }
0x3ed3   :  { %v4589_v26 = vpop.permute.xlu0 %4588 }
0x3ed4   :  { %v4591_v29 = vmul.f32 %v7321_v24, %v4589_v26  ;;  %v4613_v31 = vpop.permute.xlu1 %4612 }
0x3ed5   :  { %v4615_v46 = vmul.f32 %v7323_v27, %v4613_v31 }
0x3ed6   :  { %4593 = vrot.lane.b32.xlu1 %v4591_v29, %s7473_s18 }
0x3ed7   :  { %4617 = vrot.lane.b32.xlu0 %v4615_v46, %s7473_s18  ;;  %v4584_v32 = vpop.permute.xlu0 %4583 }
0x3ed8   :  { %v4586_v33 = vmul.f32 %v7321_v24, %v4584_v32 }
0x3f48   :  { %v4594_v12 = vpop.permute.xlu1 %4593 }
0x3f49   :  { %v4596_v35 = vadd.f32 %v4594_v12, %v4586_v33  ;;  %v4618_v14 = vpop.permute.xlu0 %4617 }
0x3f4a   :  { %v4620_v52 = vadd.f32 %v4618_v14, %v4610_v34 }
0x3f4b   :  { %7324 = vtanh.f32 %v4596_v35 }
0x3f4c   :  { %7326 = vtanh.f32 %v4620_v52 }
0x3f55   :  { %v7325_v43 = vpop.eup %7324 }
0x3f56   :  { %v7327_v47 = vpop.eup %7326  ;;  %4599 = vrot.lane.b32.xlu1 %v7325_v43, %s7473_s18 }
0x3f57   :  { %4623 = vrot.lane.b32.xlu0 %v7327_v47, %s7473_s18 }
0x3fc8   :  { %v4600_v48 = vpop.permute.xlu1 %4599 }
0x3fc9   :  { %v4602_v5 = vmul.f32 %v7321_v24, %v4600_v48  ;;  %v4624_v49 = vpop.permute.xlu0 %4623  ;;  %v6372_v48 = vld.sshfl [vmem:[#allocation2 + $0x1c] sm:$0x33 pattern:$0x76325410] }
0x3fca   :  { %v8566_v51 = vmul.f32 %v7323_v27, %v4624_v49  ;;  %v4886_v49 = vld [vmem:[#allocation2 + $0x20] sm:$0xf] }
0x3fcb   :  { %4628 = vrot.lane.b32.xlu1 %v4602_v5, %s7475_s3 }
0x3fcc   :  { %4633 = vrot.lane.b32.xlu0 %v8566_v51, %s7476_s27 }
0x3fcf   :  { %4638 = vrot.lane.b32.xlu1 %v4596_v35, %s7476_s27 }
0x403d   :  { %v4629_v54 = vpop.permute.xlu1 %4628 }
0x403e   :  { %4631 = vst.msk [vmem:[#allocation5] sm:$0x3] %vm438_vm2, %v4629_v54  ;;  %4643 = vst.msk [vmem:[#allocation3 + $0xc] sm:$0x3] %vm438_vm2, %v4629_v54  ;;  %v4634_v63 = vpop.permute.xlu0 %4633  ;;  %v4897_v54 = vcombine.high %v6372_v48, %v6372_v48 }
0x403f   :  { %4636 = vst.msk [vmem:[#allocation5] sm:$0x3] %vm444_vm3, %v4634_v63 }
0x4041   :  { %v4639_v2 = vpop.permute.xlu1 %4638 }
0x4042   :  { %4641 = vst.msk [vmem:[#allocation6] sm:$0x3] %vm438_vm2, %v4639_v2 }
0x4043   :  { %4642 = vst.msk [vmem:[#allocation6] sm:$0x3] %vm444_vm3, %v4620_v52 }
0x4045   :  { %v6121_v4 = vld [vmem:[#allocation3 + $0xc] sm:$0x3] }
0x4046   :  { %v4648_v6 = vld [vmem:[#allocation5] sm:$0x3]  ;;  %6137 = vst.msk [vmem:[%s8984_s7 + $0xc] sm:$0x3] %vm438_vm2, %v6121_v4 }
0x4047   :  { %6367 = vmatmul.mubr.msk.f32.vlgmr.msra.gmra.mrb[30].mxu1 %vm58_vm1, %v4648_v6 }
0x4048   :  { %6838 = vmatpush1.bf16.msra.mxu1 %v8202_v42  ;;  %5042 = vmatprep.mubr.f32.mxu1 %v7472_v3 }
0x4049   :  { %6840 = vmatprep.subr.bf16.mxu1 %v8220_v58 }
0x404a   :  { %v4737_v57 = vld [vmem:[#allocation6] sm:$0x3] }
0x404c   :  { %6842 = vmatpush1.bf16.msra.mxu1 %v8222_v59 }
0x404d   :  { %6844 = vmatprep.subr.bf16.mxu1 %v8239_v8 }
0x4050   :  { %6846 = vmatpush1.bf16.msra.mxu1 %v8241_v25 }
0x4051   :  { %6848 = vmatprep.subr.bf16.mxu1 %v8258_v45 }
0x4054   :  { %6850 = vmatpush1.bf16.msra.mxu1 %v8260_v50 }
0x4055   :  { %6868 = vmatprep.subr.bf16.mxu1 %v8196_v41 }
0x411a   :  { %v4718_v30 = vpop.f32.mrb[30].mxu1 }
0x411b   :  { %v4725_v11 = vadd.f32 %v4723_v10, %v4718_v30  ;;  %v4720_v13 = vpop.f32.mrb[31].mxu1 }
0x411c   :  { %v4736_v15 = vadd.f32 %v4734_v36, %v4720_v13 }
0x411d   :  { %7328 = vtanh.f32 %v4725_v11  ;;  %v6369_v44 = vmul.f32 -1.442695, %v4725_v11 }
0x411e   :  { %7330 = vtanh.f32 %v4736_v15  ;;  %v6370_v56 = vmul.f32 -1.442695, %v4736_v15 }
0x411f   :  { %7332 = vpow2.f32 %v6369_v44 }
0x4120   :  { %7334 = vpow2.f32 %v6370_v56 }
0x4127   :  { %v7329_v16 = vpop.eup %7328 }
0x4128   :  { %v7331_v7 = vpop.eup %7330  ;;  %4751 = vrot.lane.b32.xlu0 %v7329_v16, %s7473_s18 }
0x4129   :  { %4775 = vrot.lane.b32.xlu1 %v7331_v7, %s7473_s18  ;;  %v7333_v61 = vpop.eup %7332 }
0x412a   :  { %v7335_v39 = vpop.eup %7334  ;;  %v4741_v19 = vadd.f32 1.0, %v7333_v61 }
0x412b   :  { %v4769_v1 = vadd.f32 1.0, %v7335_v39 }
0x412c   :  { %4746 = vrot.lane.b32.xlu0 %v4737_v57, %s7473_s18  ;;  %7336 = vrcp.f32 %v4741_v19 }
0x412d   :  { %7338 = vrcp.f32 %v4769_v1 }
0x4136   :  { %v7337_v60 = vpop.eup %7336 }
0x4137   :  { %v7339_v53 = vpop.eup %7338 }
0x4138   :  { %v4773_v24 = vmul.f32 %v7339_v53, %v4737_v57 }
0x419a   :  { %v4752_v55 = vpop.permute.xlu0 %4751 }
0x419b   :  { %v4754_v40 = vmul.f32 %v7337_v60, %v4752_v55  ;;  %v4776_v17 = vpop.permute.xlu1 %4775 }
0x419c   :  { %v4778_v18 = vmul.f32 %v7339_v53, %v4776_v17 }
0x419d   :  { %4756 = vrot.lane.b32.xlu1 %v4754_v40, %s7473_s18 }
0x419e   :  { %4780 = vrot.lane.b32.xlu0 %v4778_v18, %s7473_s18  ;;  %v4747_v20 = vpop.permute.xlu0 %4746 }
0x419f   :  { %v4749_v22 = vmul.f32 %v7337_v60, %v4747_v20 }
0x420f   :  { %v4757_v21 = vpop.permute.xlu1 %4756 }
0x4210   :  { %v4759_v26 = vadd.f32 %v4757_v21, %v4749_v22  ;;  %v4781_v27 = vpop.permute.xlu0 %4780 }
0x4211   :  { %v4783_v29 = vadd.f32 %v4781_v27, %v4773_v24 }
0x4212   :  { %7340 = vtanh.f32 %v4759_v26 }
0x4213   :  { %7342 = vtanh.f32 %v4783_v29 }
0x421c   :  { %v7341_v31 = vpop.eup %7340 }
0x421d   :  { %v7343_v46 = vpop.eup %7342  ;;  %4762 = vrot.lane.b32.xlu1 %v7341_v31, %s7473_s18 }
0x421e   :  { %4786 = vrot.lane.b32.xlu0 %v7343_v46, %s7473_s18 }
0x428f   :  { %v4763_v32 = vpop.permute.xlu1 %4762 }
0x4290   :  { %v4765_v33 = vmul.f32 %v7337_v60, %v4763_v32  ;;  %v4787_v12 = vpop.permute.xlu0 %4786 }
0x4291   :  { %v8598_v34 = vmul.f32 %v7339_v53, %v4787_v12 }
0x4292   :  { %4791 = vrot.lane.b32.xlu1 %v4765_v33, %s7475_s3  ;;  %v6376_v33 = vld.sshfl [vmem:[#allocation2 + $0x18] sm:$0x33 pattern:$0x76325410] }
0x4293   :  { %4796 = vrot.lane.b32.xlu0 %v8598_v34, %s7476_s27 }
0x4296   :  { %4801 = vrot.lane.b32.xlu1 %v4759_v26, %s7476_s27 }
0x4304   :  { %v4792_v35 = vpop.permute.xlu1 %4791 }
0x4305   :  { %4794 = vst.msk [vmem:[#allocation5] sm:$0x3] %vm438_vm2, %v4792_v35  ;;  %4806 = vst.msk [vmem:[#allocation3 + $0xe] sm:$0x3] %vm438_vm2, %v4792_v35  ;;  %v4797_v14 = vpop.permute.xlu0 %4796  ;;  %v5049_v35 = vld [vmem:[#allocation2 + $0x24] sm:$0xf] }
0x4306   :  { %4799 = vst.msk [vmem:[#allocation5] sm:$0x3] %vm444_vm3, %v4797_v14  ;;  %v5060_v14 = vcombine.high %v6376_v33, %v6376_v33 }
0x4308   :  { %v4802_v52 = vpop.permute.xlu1 %4801 }
0x4309   :  { %4804 = vst.msk [vmem:[#allocation6] sm:$0x3] %vm438_vm2, %v4802_v52 }
0x430a   :  { %4805 = vst.msk [vmem:[#allocation6] sm:$0x3] %vm444_vm3, %v4783_v29 }
0x430c   :  { %v6122_v43 = vld [vmem:[#allocation3 + $0xe] sm:$0x3] }
0x430d   :  { %v4811_v47 = vld [vmem:[#allocation5] sm:$0x3]  ;;  %6138 = vst.msk [vmem:[%s8984_s7 + $0xe] sm:$0x3] %vm438_vm2, %v6122_v43 }
0x430e   :  { %6371 = vmatmul.mubr.msk.f32.vlgmr.msra.gmra.mrb[32].mxu0 %vm58_vm1, %v4811_v47 }
0x430f   :  { %6854 = vmatpush1.bf16.msra.mxu0 %v8202_v42  ;;  %5205 = vmatprep.mubr.f32.mxu0 %v7472_v3 }
0x4310   :  { %6856 = vmatprep.subr.bf16.mxu0 %v8220_v58 }
0x4311   :  { %v4900_v30 = vld [vmem:[#allocation6] sm:$0x3] }
0x4313   :  { %6858 = vmatpush1.bf16.msra.mxu0 %v8222_v59 }
0x4314   :  { %6860 = vmatprep.subr.bf16.mxu0 %v8239_v8 }
0x4317   :  { %6862 = vmatpush1.bf16.msra.mxu0 %v8241_v25 }
0x4318   :  { %6864 = vmatprep.subr.bf16.mxu0 %v8258_v45 }
0x431b   :  { %6866 = vmatpush1.bf16.msra.mxu0 %v8260_v50 }
0x431c   :  { %6884 = vmatprep.subr.bf16.mxu0 %v8196_v41 }
0x43e1   :  { %v4881_v5 = vpop.f32.mrb[32].mxu0 }
0x43e2   :  { %v4888_v63 = vadd.f32 %v4886_v49, %v4881_v5  ;;  %v4883_v2 = vpop.f32.mrb[33].mxu0 }
0x43e3   :  { %v4899_v4 = vadd.f32 %v4897_v54, %v4883_v2 }
0x43e4   :  { %7344 = vtanh.f32 %v4888_v63  ;;  %v6373_v10 = vmul.f32 -1.442695, %v4888_v63 }
0x43e5   :  { %7346 = vtanh.f32 %v4899_v4  ;;  %v6374_v36 = vmul.f32 -1.442695, %v4899_v4 }
0x43e6   :  { %7348 = vpow2.f32 %v6373_v10 }
0x43e7   :  { %7350 = vpow2.f32 %v6374_v36 }
0x43ee   :  { %v7345_v6 = vpop.eup %7344 }
0x43ef   :  { %v7347_v9 = vpop.eup %7346  ;;  %4914 = vrot.lane.b32.xlu0 %v7345_v6, %s7473_s18 }
0x43f0   :  { %4938 = vrot.lane.b32.xlu1 %v7347_v9, %s7473_s18  ;;  %v7349_v11 = vpop.eup %7348 }
0x43f1   :  { %v7351_v13 = vpop.eup %7350  ;;  %v4904_v15 = vadd.f32 1.0, %v7349_v11 }
0x43f2   :  { %v4932_v16 = vadd.f32 1.0, %v7351_v13 }
0x43f3   :  { %4909 = vrot.lane.b32.xlu0 %v4900_v30, %s7473_s18  ;;  %7352 = vrcp.f32 %v4904_v15 }
0x43f4   :  { %7354 = vrcp.f32 %v4932_v16 }
0x43fd   :  { %v7353_v7 = vpop.eup %7352 }
0x43fe   :  { %v7355_v44 = vpop.eup %7354 }
0x43ff   :  { %v4936_v55 = vmul.f32 %v7355_v44, %v4900_v30 }
0x4461   :  { %v4915_v57 = vpop.permute.xlu0 %4914 }
0x4462   :  { %v4917_v56 = vmul.f32 %v7353_v7, %v4915_v57  ;;  %v4939_v61 = vpop.permute.xlu1 %4938 }
0x4463   :  { %v4941_v39 = vmul.f32 %v7355_v44, %v4939_v61 }
0x4464   :  { %4919 = vrot.lane.b32.xlu1 %v4917_v56, %s7473_s18 }
0x4465   :  { %4943 = vrot.lane.b32.xlu0 %v4941_v39, %s7473_s18  ;;  %v4910_v19 = vpop.permute.xlu0 %4909 }
0x4466   :  { %v4912_v1 = vmul.f32 %v7353_v7, %v4910_v19 }
0x44d6   :  { %v4920_v60 = vpop.permute.xlu1 %4919 }
0x44d7   :  { %v4922_v53 = vadd.f32 %v4920_v60, %v4912_v1  ;;  %v4944_v40 = vpop.permute.xlu0 %4943 }
0x44d8   :  { %v4946_v17 = vadd.f32 %v4944_v40, %v4936_v55 }
0x44d9   :  { %7356 = vtanh.f32 %v4922_v53 }
0x44da   :  { %7358 = vtanh.f32 %v4946_v17 }
0x44e3   :  { %v7357_v18 = vpop.eup %7356 }
0x44e4   :  { %v7359_v20 = vpop.eup %7358  ;;  %4925 = vrot.lane.b32.xlu1 %v7357_v18, %s7473_s18 }
0x44e5   :  { %4949 = vrot.lane.b32.xlu0 %v7359_v20, %s7473_s18 }
0x4556   :  { %v4926_v22 = vpop.permute.xlu1 %4925 }
0x4557   :  { %v4928_v21 = vmul.f32 %v7353_v7, %v4926_v22  ;;  %v4950_v24 = vpop.permute.xlu0 %4949 }
0x4558   :  { %v8630_v26 = vmul.f32 %v7355_v44, %v4950_v24  ;;  %v6380_v24 = vld.sshfl [vmem:[#allocation2 + $0x14] sm:$0x33 pattern:$0x76325410] }
0x4559   :  { %4954 = vrot.lane.b32.xlu1 %v4928_v21, %s7475_s3 }
0x455a   :  { %4959 = vrot.lane.b32.xlu0 %v8630_v26, %s7476_s27 }
0x455d   :  { %4964 = vrot.lane.b32.xlu1 %v4922_v53, %s7476_s27 }
0x45cb   :  { %v4955_v27 = vpop.permute.xlu1 %4954 }
0x45cc   :  { %4957 = vst.msk [vmem:[#allocation5] sm:$0x3] %vm438_vm2, %v4955_v27  ;;  %4969 = vst.msk [vmem:[#allocation3 + $0x10] sm:$0x3] %vm438_vm2, %v4955_v27  ;;  %v4960_v29 = vpop.permute.xlu0 %4959 }
0x45cd   :  { %4962 = vst.msk [vmem:[#allocation5] sm:$0x3] %vm444_vm3, %v4960_v29  ;;  %v5212_v29 = vld [vmem:[#allocation2 + $0x28] sm:$0xf] }
0x45cf   :  { %v4965_v31 = vpop.permute.xlu1 %4964 }
0x45d0   :  { %4967 = vst.msk [vmem:[#allocation6] sm:$0x3] %vm438_vm2, %v4965_v31  ;;  %v5223_v31 = vcombine.high %v6380_v24, %v6380_v24 }
0x45d1   :  { %4968 = vst.msk [vmem:[#allocation6] sm:$0x3] %vm444_vm3, %v4946_v17 }
0x45d3   :  { %v6123_v46 = vld [vmem:[#allocation3 + $0x10] sm:$0x3] }
0x45d4   :  { %v4974_v32 = vld [vmem:[#allocation5] sm:$0x3]  ;;  %6139 = vst.msk [vmem:[%s8984_s7 + $0x10] sm:$0x3] %vm438_vm2, %v6123_v46 }
0x45d5   :  { %6375 = vmatmul.mubr.msk.f32.vlgmr.msra.gmra.mrb[32].mxu1 %vm58_vm1, %v4974_v32 }
0x45d6   :  { %6870 = vmatpush1.bf16.msra.mxu1 %v8202_v42  ;;  %5368 = vmatprep.mubr.f32.mxu1 %v7472_v3 }
0x45d7   :  { %6872 = vmatprep.subr.bf16.mxu1 %v8220_v58 }
0x45d8   :  { %v5063_v49 = vld [vmem:[#allocation6] sm:$0x3] }
0x45da   :  { %6874 = vmatpush1.bf16.msra.mxu1 %v8222_v59 }
0x45db   :  { %6876 = vmatprep.subr.bf16.mxu1 %v8239_v8 }
0x45de   :  { %6878 = vmatpush1.bf16.msra.mxu1 %v8241_v25 }
0x45df   :  { %6880 = vmatprep.subr.bf16.mxu1 %v8258_v45 }
0x45e2   :  { %6882 = vmatpush1.bf16.msra.mxu1 %v8260_v50 }
0x45e3   :  { %6900 = vmatprep.subr.bf16.mxu1 %v8196_v41 }
0x46a8   :  { %v5044_v12 = vpop.f32.mrb[32].mxu1 }
0x46a9   :  { %v5051_v52 = vadd.f32 %v5049_v35, %v5044_v12  ;;  %v5046_v43 = vpop.f32.mrb[33].mxu1 }
0x46aa   :  { %v5062_v47 = vadd.f32 %v5060_v14, %v5046_v43 }
0x46ab   :  { %7360 = vtanh.f32 %v5051_v52  ;;  %v6377_v54 = vmul.f32 -1.442695, %v5051_v52 }
0x46ac   :  { %7362 = vtanh.f32 %v5062_v47  ;;  %v6378_v63 = vmul.f32 -1.442695, %v5062_v47 }
0x46ad   :  { %7364 = vpow2.f32 %v6377_v54 }
0x46ae   :  { %7366 = vpow2.f32 %v6378_v63 }
0x46b5   :  { %v7361_v48 = vpop.eup %7360 }
0x46b6   :  { %v7363_v5 = vpop.eup %7362  ;;  %5077 = vrot.lane.b32.xlu0 %v7361_v48, %s7473_s18 }
0x46b7   :  { %5101 = vrot.lane.b32.xlu1 %v7363_v5, %s7473_s18  ;;  %v7365_v2 = vpop.eup %7364 }
0x46b8   :  { %v7367_v4 = vpop.eup %7366  ;;  %v5067_v6 = vadd.f32 1.0, %v7365_v2 }
0x46b9   :  { %v5095_v9 = vadd.f32 1.0, %v7367_v4 }
0x46ba   :  { %5072 = vrot.lane.b32.xlu0 %v5063_v49, %s7473_s18  ;;  %7368 = vrcp.f32 %v5067_v6 }
0x46bb   :  { %7370 = vrcp.f32 %v5095_v9 }
0x46c4   :  { %v7369_v30 = vpop.eup %7368 }
0x46c5   :  { %v7371_v36 = vpop.eup %7370 }
0x46c6   :  { %v5099_v44 = vmul.f32 %v7371_v36, %v5063_v49 }
0x4728   :  { %v5078_v10 = vpop.permute.xlu0 %5077 }
0x4729   :  { %v5080_v11 = vmul.f32 %v7369_v30, %v5078_v10  ;;  %v5102_v13 = vpop.permute.xlu1 %5101 }
0x472a   :  { %v5104_v15 = vmul.f32 %v7371_v36, %v5102_v13 }
0x472b   :  { %5082 = vrot.lane.b32.xlu1 %v5080_v11, %s7473_s18 }
0x472c   :  { %5106 = vrot.lane.b32.xlu0 %v5104_v15, %s7473_s18  ;;  %v5073_v16 = vpop.permute.xlu0 %5072 }
0x472d   :  { %v5075_v7 = vmul.f32 %v7369_v30, %v5073_v16 }
0x479d   :  { %v5083_v57 = vpop.permute.xlu1 %5082 }
0x479e   :  { %v5085_v56 = vadd.f32 %v5083_v57, %v5075_v7  ;;  %v5107_v61 = vpop.permute.xlu0 %5106 }
0x479f   :  { %v5109_v39 = vadd.f32 %v5107_v61, %v5099_v44 }
0x47a0   :  { %7372 = vtanh.f32 %v5085_v56 }
0x47a1   :  { %7374 = vtanh.f32 %v5109_v39 }
0x47aa   :  { %v7373_v19 = vpop.eup %7372 }
0x47ab   :  { %v7375_v1 = vpop.eup %7374  ;;  %5088 = vrot.lane.b32.xlu1 %v7373_v19, %s7473_s18 }
0x47ac   :  { %5112 = vrot.lane.b32.xlu0 %v7375_v1, %s7473_s18 }
0x481d   :  { %v5089_v60 = vpop.permute.xlu1 %5088 }
0x481e   :  { %v5091_v55 = vmul.f32 %v7369_v30, %v5089_v60  ;;  %v5113_v53 = vpop.permute.xlu0 %5112 }
0x481f   :  { %v8662_v40 = vmul.f32 %v7371_v36, %v5113_v53 }
0x4820   :  { %5117 = vrot.lane.b32.xlu1 %v5091_v55, %s7475_s3 }
0x4821   :  { %5122 = vrot.lane.b32.xlu0 %v8662_v40, %s7476_s27 }
0x4824   :  { %5127 = vrot.lane.b32.xlu1 %v5085_v56, %s7476_s27 }
0x4892   :  { %v5118_v17 = vpop.permute.xlu1 %5117 }
0x4893   :  { %5120 = vst.msk [vmem:[#allocation5] sm:$0x3] %vm438_vm2, %v5118_v17  ;;  %5132 = vst.msk [vmem:[#allocation3 + $0x12] sm:$0x3] %vm438_vm2, %v5118_v17  ;;  %v5123_v18 = vpop.permute.xlu0 %5122 }
0x4894   :  { %5125 = vst.msk [vmem:[#allocation5] sm:$0x3] %vm444_vm3, %v5123_v18  ;;  %v6384_v17 = vld.sshfl [vmem:[#allocation2 + $0x10] sm:$0x33 pattern:$0x76325410] }
0x4896   :  { %v5128_v20 = vpop.permute.xlu1 %5127 }
0x4897   :  { %5130 = vst.msk [vmem:[#allocation6] sm:$0x3] %vm438_vm2, %v5128_v20  ;;  %v5375_v20 = vld [vmem:[#allocation2 + $0x2c] sm:$0xf] }
0x4898   :  { %5131 = vst.msk [vmem:[#allocation6] sm:$0x3] %vm444_vm3, %v5109_v39 }
0x489a   :  { %v6124_v22 = vld [vmem:[#allocation3 + $0x12] sm:$0x3] }
0x489b   :  { %v5137_v21 = vld [vmem:[#allocation5] sm:$0x3]  ;;  %6140 = vst.msk [vmem:[%s8984_s7 + $0x12] sm:$0x3] %vm438_vm2, %v6124_v22  ;;  %v5386_v22 = vcombine.high %v6384_v17, %v6384_v17 }
0x489c   :  { %6379 = vmatmul.mubr.msk.f32.vlgmr.msra.gmra.mrb[34].mxu0 %vm58_vm1, %v5137_v21 }
0x489d   :  { %6886 = vmatpush1.bf16.msra.mxu0 %v8202_v42  ;;  %5531 = vmatprep.mubr.f32.mxu0 %v7472_v3 }
0x489e   :  { %6888 = vmatprep.subr.bf16.mxu0 %v8220_v58 }
0x489f   :  { %v5226_v14 = vld [vmem:[#allocation6] sm:$0x3] }
0x48a1   :  { %6890 = vmatpush1.bf16.msra.mxu0 %v8222_v59 }
0x48a2   :  { %6892 = vmatprep.subr.bf16.mxu0 %v8239_v8 }
0x48a5   :  { %6894 = vmatpush1.bf16.msra.mxu0 %v8241_v25 }
0x48a6   :  { %6896 = vmatprep.subr.bf16.mxu0 %v8258_v45 }
0x48a9   :  { %6898 = vmatpush1.bf16.msra.mxu0 %v8260_v50 }
0x48aa   :  { %6916 = vmatprep.subr.bf16.mxu0 %v8196_v41 }
0x496f   :  { %v5207_v27 = vpop.f32.mrb[34].mxu0 }
0x4970   :  { %v5214_v46 = vadd.f32 %v5212_v29, %v5207_v27  ;;  %v5209_v32 = vpop.f32.mrb[35].mxu0 }
0x4971   :  { %v5225_v33 = vadd.f32 %v5223_v31, %v5209_v32 }
0x4972   :  { %7376 = vtanh.f32 %v5214_v46  ;;  %v6381_v52 = vmul.f32 -1.442695, %v5214_v46 }
0x4973   :  { %7378 = vtanh.f32 %v5225_v33  ;;  %v6382_v43 = vmul.f32 -1.442695, %v5225_v33 }
0x4974   :  { %7380 = vpow2.f32 %v6381_v52 }
0x4975   :  { %7382 = vpow2.f32 %v6382_v43 }
0x497c   :  { %v7377_v12 = vpop.eup %7376 }
0x497d   :  { %v7379_v35 = vpop.eup %7378  ;;  %5240 = vrot.lane.b32.xlu0 %v7377_v12, %s7473_s18 }
0x497e   :  { %5264 = vrot.lane.b32.xlu1 %v7379_v35, %s7473_s18  ;;  %v7381_v47 = vpop.eup %7380 }
0x497f   :  { %v7383_v48 = vpop.eup %7382  ;;  %v5230_v5 = vadd.f32 1.0, %v7381_v47 }
0x4980   :  { %v5258_v49 = vadd.f32 1.0, %v7383_v48 }
0x4981   :  { %5235 = vrot.lane.b32.xlu0 %v5226_v14, %s7473_s18  ;;  %7384 = vrcp.f32 %v5230_v5 }
0x4982   :  { %7386 = vrcp.f32 %v5258_v49 }
0x498b   :  { %v7385_v54 = vpop.eup %7384 }
0x498c   :  { %v7387_v2 = vpop.eup %7386 }
0x498d   :  { %v5262_v11 = vmul.f32 %v7387_v2, %v5226_v14 }
0x49ef   :  { %v5241_v63 = vpop.permute.xlu0 %5240 }
0x49f0   :  { %v5243_v4 = vmul.f32 %v7385_v54, %v5241_v63  ;;  %v5265_v6 = vpop.permute.xlu1 %5264 }
0x49f1   :  { %v5267_v9 = vmul.f32 %v7387_v2, %v5265_v6 }
0x49f2   :  { %5245 = vrot.lane.b32.xlu1 %v5243_v4, %s7473_s18 }
0x49f3   :  { %5269 = vrot.lane.b32.xlu0 %v5267_v9, %s7473_s18  ;;  %v5236_v30 = vpop.permute.xlu0 %5235 }
0x49f4   :  { %v5238_v10 = vmul.f32 %v7385_v54, %v5236_v30 }
0x4a64   :  { %v5246_v36 = vpop.permute.xlu1 %5245 }
0x4a65   :  { %v5248_v13 = vadd.f32 %v5246_v36, %v5238_v10  ;;  %v5270_v15 = vpop.permute.xlu0 %5269 }
0x4a66   :  { %v5272_v16 = vadd.f32 %v5270_v15, %v5262_v11 }
0x4a67   :  { %7388 = vtanh.f32 %v5248_v13 }
0x4a68   :  { %7390 = vtanh.f32 %v5272_v16 }
0x4a71   :  { %v7389_v7 = vpop.eup %7388 }
0x4a72   :  { %v7391_v57 = vpop.eup %7390  ;;  %5251 = vrot.lane.b32.xlu1 %v7389_v7, %s7473_s18 }
0x4a73   :  { %5275 = vrot.lane.b32.xlu0 %v7391_v57, %s7473_s18 }
0x4ae4   :  { %v5252_v44 = vpop.permute.xlu1 %5251 }
0x4ae5   :  { %v5254_v56 = vmul.f32 %v7385_v54, %v5252_v44  ;;  %v5276_v61 = vpop.permute.xlu0 %5275 }
0x4ae6   :  { %v8694_v39 = vmul.f32 %v7387_v2, %v5276_v61 }
0x4ae7   :  { %5280 = vrot.lane.b32.xlu1 %v5254_v56, %s7475_s3 }
0x4ae8   :  { %5285 = vrot.lane.b32.xlu0 %v8694_v39, %s7476_s27 }
0x4aeb   :  { %5290 = vrot.lane.b32.xlu1 %v5248_v13, %s7476_s27 }
0x4b59   :  { %v5281_v19 = vpop.permute.xlu1 %5280 }
0x4b5a   :  { %5283 = vst.msk [vmem:[#allocation5] sm:$0x3] %vm438_vm2, %v5281_v19  ;;  %5295 = vst.msk [vmem:[#allocation3 + $0x14] sm:$0x3] %vm438_vm2, %v5281_v19  ;;  %v5286_v1 = vpop.permute.xlu0 %5285 }
0x4b5b   :  { %5288 = vst.msk [vmem:[#allocation5] sm:$0x3] %vm444_vm3, %v5286_v1  ;;  %v6388_v19 = vld.sshfl [vmem:[#allocation2 + $0xc] sm:$0x33 pattern:$0x76325410] }
0x4b5d   :  { %v5291_v60 = vpop.permute.xlu1 %5290 }
0x4b5e   :  { %5293 = vst.msk [vmem:[#allocation6] sm:$0x3] %vm438_vm2, %v5291_v60  ;;  %v5538_v60 = vld [vmem:[#allocation2 + $0x30] sm:$0xf] }
0x4b5f   :  { %5294 = vst.msk [vmem:[#allocation6] sm:$0x3] %vm444_vm3, %v5272_v16 }
0x4b61   :  { %v6125_v55 = vld [vmem:[#allocation3 + $0x14] sm:$0x3] }
0x4b62   :  { %v5300_v53 = vld [vmem:[#allocation5] sm:$0x3]  ;;  %6141 = vst.msk [vmem:[%s8984_s7 + $0x14] sm:$0x3] %vm438_vm2, %v6125_v55  ;;  %v5549_v55 = vcombine.high %v6388_v19, %v6388_v19 }
0x4b63   :  { %6383 = vmatmul.mubr.msk.f32.vlgmr.msra.gmra.mrb[34].mxu1 %vm58_vm1, %v5300_v53 }
0x4b64   :  { %6902 = vmatpush1.bf16.msra.mxu1 %v8202_v42  ;;  %5694 = vmatprep.mubr.f32.mxu1 %v7472_v3 }
0x4b65   :  { %6904 = vmatprep.subr.bf16.mxu1 %v8220_v58 }
0x4b66   :  { %v5389_v46 = vld [vmem:[#allocation6] sm:$0x3] }
0x4b68   :  { %6906 = vmatpush1.bf16.msra.mxu1 %v8222_v59 }
0x4b69   :  { %6908 = vmatprep.subr.bf16.mxu1 %v8239_v8 }
0x4b6c   :  { %6910 = vmatpush1.bf16.msra.mxu1 %v8241_v25 }
0x4b6d   :  { %6912 = vmatprep.subr.bf16.mxu1 %v8258_v45 }
0x4b70   :  { %6914 = vmatpush1.bf16.msra.mxu1 %v8260_v50 }
0x4b71   :  { %6932 = vmatprep.subr.bf16.mxu1 %v8196_v41 }
0x4c36   :  { %v5370_v18 = vpop.f32.mrb[34].mxu1 }
0x4c37   :  { %v5377_v21 = vadd.f32 %v5375_v20, %v5370_v18  ;;  %v5372_v24 = vpop.f32.mrb[35].mxu1 }
0x4c38   :  { %v5388_v27 = vadd.f32 %v5386_v22, %v5372_v24 }
0x4c39   :  { %7392 = vtanh.f32 %v5377_v21  ;;  %v6385_v32 = vmul.f32 -1.442695, %v5377_v21 }
0x4c3a   :  { %7394 = vtanh.f32 %v5388_v27  ;;  %v6386_v41 = vmul.f32 -1.442695, %v5388_v27 }
0x4c3b   :  { %7396 = vpow2.f32 %v6385_v32 }
0x4c3c   :  { %7398 = vpow2.f32 %v6386_v41 }
0x4c43   :  { %v7393_v29 = vpop.eup %7392 }
0x4c44   :  { %v7395_v31 = vpop.eup %7394  ;;  %5403 = vrot.lane.b32.xlu0 %v7393_v29, %s7473_s18 }
0x4c45   :  { %5427 = vrot.lane.b32.xlu1 %v7395_v31, %s7473_s18  ;;  %v7397_v33 = vpop.eup %7396 }
0x4c46   :  { %v7399_v12 = vpop.eup %7398  ;;  %v5393_v35 = vadd.f32 1.0, %v7397_v33 }
0x4c47   :  { %v5421_v14 = vadd.f32 1.0, %v7399_v12 }
0x4c48   :  { %5398 = vrot.lane.b32.xlu0 %v5389_v46, %s7473_s18  ;;  %7400 = vrcp.f32 %v5393_v35 }
0x4c49   :  { %7402 = vrcp.f32 %v5421_v14 }
0x4c52   :  { %v7401_v52 = vpop.eup %7400 }
0x4c53   :  { %v7403_v47 = vpop.eup %7402 }
0x4c54   :  { %v5425_v4 = vmul.f32 %v7403_v47, %v5389_v46 }
0x4cb6   :  { %v5404_v43 = vpop.permute.xlu0 %5403 }
0x4cb7   :  { %v5406_v48 = vmul.f32 %v7401_v52, %v5404_v43  ;;  %v5428_v5 = vpop.permute.xlu1 %5427 }
0x4cb8   :  { %v5430_v49 = vmul.f32 %v7403_v47, %v5428_v5 }
0x4cb9   :  { %5408 = vrot.lane.b32.xlu1 %v5406_v48, %s7473_s18 }
0x4cba   :  { %5432 = vrot.lane.b32.xlu0 %v5430_v49, %s7473_s18  ;;  %v5399_v54 = vpop.permute.xlu0 %5398 }
0x4cbb   :  { %v5401_v63 = vmul.f32 %v7401_v52, %v5399_v54 }
0x4d2b   :  { %v5409_v2 = vpop.permute.xlu1 %5408 }
0x4d2c   :  { %v5411_v6 = vadd.f32 %v5409_v2, %v5401_v63  ;;  %v5433_v9 = vpop.permute.xlu0 %5432 }
0x4d2d   :  { %v5435_v30 = vadd.f32 %v5433_v9, %v5425_v4 }
0x4d2e   :  { %7404 = vtanh.f32 %v5411_v6 }
0x4d2f   :  { %7406 = vtanh.f32 %v5435_v30 }
0x4d38   :  { %v7405_v10 = vpop.eup %7404 }
0x4d39   :  { %v7407_v36 = vpop.eup %7406  ;;  %5414 = vrot.lane.b32.xlu1 %v7405_v10, %s7473_s18 }
0x4d3a   :  { %5438 = vrot.lane.b32.xlu0 %v7407_v36, %s7473_s18 }
0x4dab   :  { %v5415_v11 = vpop.permute.xlu1 %5414 }
0x4dac   :  { %v5417_v13 = vmul.f32 %v7401_v52, %v5415_v11  ;;  %v5439_v15 = vpop.permute.xlu0 %5438 }
0x4dad   :  { %v8726_v16 = vmul.f32 %v7403_v47, %v5439_v15 }
0x4dae   :  { %5443 = vrot.lane.b32.xlu1 %v5417_v13, %s7475_s3 }
0x4daf   :  { %5448 = vrot.lane.b32.xlu0 %v8726_v16, %s7476_s27 }
0x4db2   :  { %5453 = vrot.lane.b32.xlu1 %v5411_v6, %s7476_s27 }
0x4e20   :  { %v5444_v7 = vpop.permute.xlu1 %5443 }
0x4e21   :  { %5446 = vst.msk [vmem:[#allocation5] sm:$0x3] %vm438_vm2, %v5444_v7  ;;  %5458 = vst.msk [vmem:[#allocation3 + $0x16] sm:$0x3] %vm438_vm2, %v5444_v7  ;;  %v5449_v57 = vpop.permute.xlu0 %5448 }
0x4e22   :  { %5451 = vst.msk [vmem:[#allocation5] sm:$0x3] %vm444_vm3, %v5449_v57  ;;  %v6392_v57 = vld.sshfl [vmem:[#allocation2 + $0x8] sm:$0x33 pattern:$0x76325410] }
0x4e24   :  { %v5454_v44 = vpop.permute.xlu1 %5453 }
0x4e25   :  { %5456 = vst.msk [vmem:[#allocation6] sm:$0x3] %vm438_vm2, %v5454_v44 }
0x4e26   :  { %5457 = vst.msk [vmem:[#allocation6] sm:$0x3] %vm444_vm3, %v5435_v30 }
0x4e28   :  { %v6126_v56 = vld [vmem:[#allocation3 + $0x16] sm:$0x3] }
0x4e29   :  { %v5463_v61 = vld [vmem:[#allocation5] sm:$0x3]  ;;  %6142 = vst.msk [vmem:[%s8984_s7 + $0x16] sm:$0x3] %vm438_vm2, %v6126_v56  ;;  %v5701_v56 = vld [vmem:[#allocation2 + $0x34] sm:$0xf] }
0x4e2a   :  { %6387 = vmatmul.mubr.msk.f32.vlgmr.msra.gmra.mrb[36].mxu0 %vm58_vm1, %v5463_v61  ;;  %v5712_v61 = vcombine.high %v6392_v57, %v6392_v57 }
0x4e2b   :  { %6918 = vmatpush1.bf16.msra.mxu0 %v8202_v42  ;;  %5857 = vmatprep.mubr.f32.mxu0 %v7472_v3 }
0x4e2c   :  { %6920 = vmatprep.subr.bf16.mxu0 %v8220_v58 }
0x4e2d   :  { %v5552_v21 = vld [vmem:[#allocation6] sm:$0x3] }
0x4e2f   :  { %6922 = vmatpush1.bf16.msra.mxu0 %v8222_v59 }
0x4e30   :  { %6924 = vmatprep.subr.bf16.mxu0 %v8239_v8 }
0x4e33   :  { %6926 = vmatpush1.bf16.msra.mxu0 %v8241_v25 }
0x4e34   :  { %6928 = vmatprep.subr.bf16.mxu0 %v8258_v45 }
0x4e37   :  { %6930 = vmatpush1.bf16.msra.mxu0 %v8260_v50 }
0x4efd   :  { %v5533_v1 = vpop.f32.mrb[36].mxu0 }
0x4efe   :  { %v5540_v53 = vadd.f32 %v5538_v60, %v5533_v1  ;;  %v5535_v17 = vpop.f32.mrb[37].mxu0 }
0x4eff   :  { %v5551_v18 = vadd.f32 %v5549_v55, %v5535_v17 }
0x4f00   :  { %7408 = vtanh.f32 %v5540_v53  ;;  %v6389_v24 = vmul.f32 -1.442695, %v5540_v53 }
0x4f01   :  { %7410 = vtanh.f32 %v5551_v18  ;;  %v6390_v27 = vmul.f32 -1.442695, %v5551_v18 }
0x4f02   :  { %7412 = vpow2.f32 %v6389_v24 }
0x4f03   :  { %7414 = vpow2.f32 %v6390_v27 }
0x4f0a   :  { %v7409_v20 = vpop.eup %7408 }
0x4f0b   :  { %v7411_v22 = vpop.eup %7410  ;;  %5566 = vrot.lane.b32.xlu0 %v7409_v20, %s7473_s18 }
0x4f0c   :  { %5590 = vrot.lane.b32.xlu1 %v7411_v22, %s7473_s18  ;;  %v7413_v29 = vpop.eup %7412 }
0x4f0d   :  { %v7415_v31 = vpop.eup %7414  ;;  %v5556_v46 = vadd.f32 1.0, %v7413_v29 }
0x4f0e   :  { %v5584_v32 = vadd.f32 1.0, %v7415_v31 }
0x4f0f   :  { %5561 = vrot.lane.b32.xlu0 %v5552_v21, %s7473_s18  ;;  %7416 = vrcp.f32 %v5556_v46 }
0x4f10   :  { %7418 = vrcp.f32 %v5584_v32 }
0x4f19   :  { %v7417_v41 = vpop.eup %7416 }
0x4f1a   :  { %v7419_v12 = vpop.eup %7418 }
0x4f1b   :  { %v5588_v5 = vmul.f32 %v7419_v12, %v5552_v21 }
0x4f7d   :  { %v5567_v33 = vpop.permute.xlu0 %5566 }
0x4f7e   :  { %v5569_v35 = vmul.f32 %v7417_v41, %v5567_v33  ;;  %v5591_v14 = vpop.permute.xlu1 %5590 }
0x4f7f   :  { %v5593_v52 = vmul.f32 %v7419_v12, %v5591_v14 }
0x4f80   :  { %5571 = vrot.lane.b32.xlu1 %v5569_v35, %s7473_s18 }
0x4f81   :  { %5595 = vrot.lane.b32.xlu0 %v5593_v52, %s7473_s18  ;;  %v5562_v43 = vpop.permute.xlu0 %5561 }
0x4f82   :  { %v5564_v47 = vmul.f32 %v7417_v41, %v5562_v43 }
0x4ff2   :  { %v5572_v48 = vpop.permute.xlu1 %5571 }
0x4ff3   :  { %v5574_v49 = vadd.f32 %v5572_v48, %v5564_v47  ;;  %v5596_v54 = vpop.permute.xlu0 %5595 }
0x4ff4   :  { %v5598_v63 = vadd.f32 %v5596_v54, %v5588_v5 }
0x4ff5   :  { %7420 = vtanh.f32 %v5574_v49 }
0x4ff6   :  { %7422 = vtanh.f32 %v5598_v63 }
0x4fff   :  { %v7421_v2 = vpop.eup %7420 }
0x5000   :  { %v7423_v4 = vpop.eup %7422  ;;  %5577 = vrot.lane.b32.xlu1 %v7421_v2, %s7473_s18 }
0x5001   :  { %5601 = vrot.lane.b32.xlu0 %v7423_v4, %s7473_s18  ;;  %v5864_v4 = vld [vmem:[#allocation2 + $0x38] sm:$0xf] }
0x5072   :  { %v5578_v6 = vpop.permute.xlu1 %5577 }
0x5073   :  { %v5580_v9 = vmul.f32 %v7417_v41, %v5578_v6  ;;  %v5602_v30 = vpop.permute.xlu0 %5601 }
0x5074   :  { %v8757_v10 = vmul.f32 %v7419_v12, %v5602_v30 }
0x5075   :  { %5606 = vrot.lane.b32.xlu1 %v5580_v9, %s7475_s3 }
0x5076   :  { %5611 = vrot.lane.b32.xlu0 %v8757_v10, %s7476_s27 }
0x5079   :  { %5616 = vrot.lane.b32.xlu1 %v5574_v49, %s7476_s27 }
0x50e7   :  { %v5607_v36 = vpop.permute.xlu1 %5606 }
0x50e8   :  { %5609 = vst.msk [vmem:[#allocation5] sm:$0x3] %vm438_vm2, %v5607_v36  ;;  %5621 = vst.msk [vmem:[#allocation3 + $0x18] sm:$0x3] %vm438_vm2, %v5607_v36  ;;  %v5612_v11 = vpop.permute.xlu0 %5611 }
0x50e9   :  { %5614 = vst.msk [vmem:[#allocation5] sm:$0x3] %vm444_vm3, %v5612_v11 }
0x50eb   :  { %v5617_v13 = vpop.permute.xlu1 %5616 }
0x50ec   :  { %5619 = vst.msk [vmem:[#allocation6] sm:$0x3] %vm438_vm2, %v5617_v13 }
0x50ed   :  { %5620 = vst.msk [vmem:[#allocation6] sm:$0x3] %vm444_vm3, %v5598_v63  ;;  %v6396_v63 = vld.sshfl [vmem:[#allocation2 + $0x4] sm:$0x33 pattern:$0x76325410] }
0x50ee   :  { %v5875_v6 = vcombine.high %v6396_v63, %v6396_v63 }
0x50ef   :  { %v6127_v15 = vld [vmem:[#allocation3 + $0x18] sm:$0x3] }
0x50f0   :  { %v5626_v7 = vld [vmem:[#allocation5] sm:$0x3]  ;;  %6143 = vst.msk [vmem:[%s8984_s7 + $0x18] sm:$0x3] %vm438_vm2, %v6127_v15 }
0x50f1   :  { %6391 = vmatmul.mubr.msk.f32.vlgmr.msra.gmra.mrb[36].mxu1 %vm58_vm1, %v5626_v7 }
0x50f2   :  { %6934 = vmatpush1.bf16.msra.mxu1 %v8202_v42  ;;  %6020 = vmatprep.mubr.f32.mxu1 %v7472_v3 }
0x50f3   :  { %6936 = vmatprep.subr.bf16.mxu1 %v8220_v58 }
0x50f6   :  { %6938 = vmatpush1.bf16.msra.mxu1 %v8222_v59  ;;  %v5715_v59 = vld [vmem:[#allocation6] sm:$0x3] }
0x50f7   :  { %6940 = vmatprep.subr.bf16.mxu1 %v8239_v8 }
0x50fa   :  { %6942 = vmatpush1.bf16.msra.mxu1 %v8241_v25 }
0x50fb   :  { %6944 = vmatprep.subr.bf16.mxu1 %v8258_v45 }
0x50fe   :  { %6946 = vmatpush1.bf16.msra.mxu1 %v8260_v50 }
0x51c4   :  { %v5696_v44 = vpop.f32.mrb[36].mxu1 }
0x51c5   :  { %v5703_v19 = vadd.f32 %v5701_v56, %v5696_v44  ;;  %v5698_v42 = vpop.f32.mrb[37].mxu1 }
0x51c6   :  { %v5714_v1 = vadd.f32 %v5712_v61, %v5698_v42 }
0x51c7   :  { %7424 = vtanh.f32 %v5703_v19  ;;  %v6393_v8 = vmul.f32 -1.442695, %v5703_v19 }
0x51c8   :  { %7426 = vtanh.f32 %v5714_v1  ;;  %v6394_v25 = vmul.f32 -1.442695, %v5714_v1 }
0x51c9   :  { %7428 = vpow2.f32 %v6393_v8 }
0x51ca   :  { %7430 = vpow2.f32 %v6394_v25 }
0x51d1   :  { %v7425_v3 = vpop.eup %7424 }
0x51d2   :  { %v7427_v58 = vpop.eup %7426  ;;  %5729 = vrot.lane.b32.xlu0 %v7425_v3, %s7473_s18 }
0x51d3   :  { %5753 = vrot.lane.b32.xlu1 %v7427_v58, %s7473_s18  ;;  %v7429_v45 = vpop.eup %7428 }
0x51d4   :  { %v7431_v50 = vpop.eup %7430  ;;  %v5719_v60 = vadd.f32 1.0, %v7429_v45 }
0x51d5   :  { %v5747_v55 = vadd.f32 1.0, %v7431_v50 }
0x51d6   :  { %5724 = vrot.lane.b32.xlu0 %v5715_v59, %s7473_s18  ;;  %7432 = vrcp.f32 %v5719_v60 }
0x51d7   :  { %7434 = vrcp.f32 %v5747_v55 }
0x51e0   :  { %v7433_v53 = vpop.eup %7432 }
0x51e1   :  { %v7435_v18 = vpop.eup %7434 }
0x51e2   :  { %v5751_v31 = vmul.f32 %v7435_v18, %v5715_v59 }
0x5244   :  { %v5730_v17 = vpop.permute.xlu0 %5729 }
0x5245   :  { %v5732_v20 = vmul.f32 %v7433_v53, %v5730_v17  ;;  %v5754_v22 = vpop.permute.xlu1 %5753 }
0x5246   :  { %v5756_v21 = vmul.f32 %v7435_v18, %v5754_v22 }
0x5247   :  { %5734 = vrot.lane.b32.xlu1 %v5732_v20, %s7473_s18 }
0x5248   :  { %5758 = vrot.lane.b32.xlu0 %v5756_v21, %s7473_s18  ;;  %v5725_v24 = vpop.permute.xlu0 %5724 }
0x5249   :  { %v5727_v27 = vmul.f32 %v7433_v53, %v5725_v24 }
0x52b9   :  { %v5735_v29 = vpop.permute.xlu1 %5734 }
0x52ba   :  { %v5737_v46 = vadd.f32 %v5735_v29, %v5727_v27  ;;  %v5759_v32 = vpop.permute.xlu0 %5758 }
0x52bb   :  { %v5761_v41 = vadd.f32 %v5759_v32, %v5751_v31 }
0x52bc   :  { %7436 = vtanh.f32 %v5737_v46 }
0x52bd   :  { %7438 = vtanh.f32 %v5761_v41 }
0x52c6   :  { %v7437_v33 = vpop.eup %7436 }
0x52c7   :  { %v7439_v12 = vpop.eup %7438  ;;  %5740 = vrot.lane.b32.xlu1 %v7437_v33, %s7473_s18  ;;  %v6400_v33 = vld.sshfl [vmem:[#allocation2] sm:$0x33 pattern:$0x76325410] }
0x52c8   :  { %5764 = vrot.lane.b32.xlu0 %v7439_v12, %s7473_s18 }
0x5339   :  { %v5741_v35 = vpop.permute.xlu1 %5740 }
0x533a   :  { %v5743_v14 = vmul.f32 %v7433_v53, %v5741_v35  ;;  %v5765_v52 = vpop.permute.xlu0 %5764  ;;  %v6038_v35 = vcombine.high %v6400_v33, %v6400_v33 }
0x533b   :  { %v8788_v43 = vmul.f32 %v7435_v18, %v5765_v52 }
0x533c   :  { %5769 = vrot.lane.b32.xlu1 %v5743_v14, %s7475_s3 }
0x533d   :  { %5774 = vrot.lane.b32.xlu0 %v8788_v43, %s7476_s27 }
0x5340   :  { %5779 = vrot.lane.b32.xlu1 %v5737_v46, %s7476_s27 }
0x53ae   :  { %v5770_v47 = vpop.permute.xlu1 %5769 }
0x53af   :  { %5772 = vst.msk [vmem:[#allocation5] sm:$0x3] %vm438_vm2, %v5770_v47  ;;  %5784 = vst.msk [vmem:[#allocation3 + $0x1a] sm:$0x3] %vm438_vm2, %v5770_v47  ;;  %v5775_v48 = vpop.permute.xlu0 %5774  ;;  %v6027_v47 = vld [vmem:[#allocation2 + $0x3c] sm:$0xf] }
0x53b0   :  { %5777 = vst.msk [vmem:[#allocation5] sm:$0x3] %vm444_vm3, %v5775_v48 }
0x53b2   :  { %v5780_v5 = vpop.permute.xlu1 %5779 }
0x53b3   :  { %5782 = vst.msk [vmem:[#allocation6] sm:$0x3] %vm438_vm2, %v5780_v5 }
0x53b4   :  { %5783 = vst.msk [vmem:[#allocation6] sm:$0x3] %vm444_vm3, %v5761_v41 }
0x53b6   :  { %v6128_v49 = vld [vmem:[#allocation3 + $0x1a] sm:$0x3] }
0x53b7   :  { %v5789_v54 = vld [vmem:[#allocation5] sm:$0x3]  ;;  %6144 = vst.msk [vmem:[%s8984_s7 + $0x1a] sm:$0x3] %vm438_vm2, %v6128_v49 }
0x53b8   :  { %6395 = vmatmul.mubr.msk.f32.vlgmr.msra.gmra.mrb[38].mxu0 %vm58_vm1, %v5789_v54 }
0x53bb   :  { %v5878_v15 = vld [vmem:[#allocation6] sm:$0x3] }
0x548b   :  { %v5859_v2 = vpop.f32.mrb[38].mxu0 }
0x548c   :  { %v5866_v9 = vadd.f32 %v5864_v4, %v5859_v2  ;;  %v5861_v30 = vpop.f32.mrb[39].mxu0 }
0x548d   :  { %v5877_v36 = vadd.f32 %v5875_v6, %v5861_v30 }
0x548e   :  { %7440 = vtanh.f32 %v5866_v9  ;;  %v6397_v7 = vmul.f32 -1.442695, %v5866_v9 }
0x548f   :  { %7442 = vtanh.f32 %v5877_v36  ;;  %v6398_v57 = vmul.f32 -1.442695, %v5877_v36 }
0x5490   :  { %7444 = vpow2.f32 %v6397_v7 }
0x5491   :  { %7446 = vpow2.f32 %v6398_v57 }
0x5498   :  { %v7441_v11 = vpop.eup %7440 }
0x5499   :  { %v7443_v13 = vpop.eup %7442  ;;  %5892 = vrot.lane.b32.xlu0 %v7441_v11, %s7473_s18 }
0x549a   :  { %5916 = vrot.lane.b32.xlu1 %v7443_v13, %s7473_s18  ;;  %v7445_v44 = vpop.eup %7444 }
0x549b   :  { %v7447_v56 = vpop.eup %7446  ;;  %v5882_v61 = vadd.f32 1.0, %v7445_v44 }
0x549c   :  { %v5910_v19 = vadd.f32 1.0, %v7447_v56 }
0x549d   :  { %5887 = vrot.lane.b32.xlu0 %v5878_v15, %s7473_s18  ;;  %7448 = vrcp.f32 %v5882_v61 }
0x549e   :  { %7450 = vrcp.f32 %v5910_v19 }
0x54a7   :  { %v7449_v42 = vpop.eup %7448 }
0x54a8   :  { %v7451_v3 = vpop.eup %7450 }
0x54a9   :  { %v5914_v60 = vmul.f32 %v7451_v3, %v5878_v15 }
0x550b   :  { %v5893_v1 = vpop.permute.xlu0 %5892 }
0x550c   :  { %v5895_v58 = vmul.f32 %v7449_v42, %v5893_v1  ;;  %v5917_v59 = vpop.permute.xlu1 %5916 }
0x550d   :  { %v5919_v8 = vmul.f32 %v7451_v3, %v5917_v59 }
0x550e   :  { %5897 = vrot.lane.b32.xlu1 %v5895_v58, %s7473_s18 }
0x550f   :  { %5921 = vrot.lane.b32.xlu0 %v5919_v8, %s7473_s18  ;;  %v5888_v25 = vpop.permute.xlu0 %5887 }
0x5510   :  { %v5890_v45 = vmul.f32 %v7449_v42, %v5888_v25 }
0x5580   :  { %v5898_v50 = vpop.permute.xlu1 %5897 }
0x5581   :  { %v5900_v55 = vadd.f32 %v5898_v50, %v5890_v45  ;;  %v5922_v53 = vpop.permute.xlu0 %5921 }
0x5582   :  { %v5924_v17 = vadd.f32 %v5922_v53, %v5914_v60 }
0x5583   :  { %7452 = vtanh.f32 %v5900_v55 }
0x5584   :  { %7454 = vtanh.f32 %v5924_v17 }
0x558d   :  { %v7453_v18 = vpop.eup %7452 }
0x558e   :  { %v7455_v20 = vpop.eup %7454  ;;  %5903 = vrot.lane.b32.xlu1 %v7453_v18, %s7473_s18 }
0x558f   :  { %5927 = vrot.lane.b32.xlu0 %v7455_v20, %s7473_s18 }
0x5600   :  { %v5904_v22 = vpop.permute.xlu1 %5903 }
0x5601   :  { %v5906_v21 = vmul.f32 %v7449_v42, %v5904_v22  ;;  %v5928_v24 = vpop.permute.xlu0 %5927 }
0x5602   :  { %v8811_v27 = vmul.f32 %v7451_v3, %v5928_v24 }
0x5603   :  { %5932 = vrot.lane.b32.xlu1 %v5906_v21, %s7475_s3 }
0x5604   :  { %5937 = vrot.lane.b32.xlu0 %v8811_v27, %s7476_s27 }
0x5608   :  { %5942 = vrot.lane.b32.xlu0 %v5900_v55, %s7476_s27 }
0x5675   :  { %v5933_v29 = vpop.permute.xlu1 %5932 }
0x5676   :  { %5935 = vst.msk [vmem:[#allocation5] sm:$0x3] %vm438_vm2, %v5933_v29  ;;  %5947 = vst.msk [vmem:[#allocation3 + $0x1c] sm:$0x3] %vm438_vm2, %v5933_v29  ;;  %v5938_v31 = vpop.permute.xlu0 %5937 }
0x5677   :  { %5940 = vst.msk [vmem:[#allocation5] sm:$0x3] %vm444_vm3, %v5938_v31 }
0x567a   :  { %v5943_v46 = vpop.permute.xlu0 %5942 }
0x567b   :  { %5945 = vst.msk [vmem:[#allocation6] sm:$0x3] %vm438_vm2, %v5943_v46 }
0x567c   :  { %5946 = vst.msk [vmem:[#allocation6] sm:$0x3] %vm444_vm3, %v5924_v17 }
0x567d   :  { %v6129_v32 = vld [vmem:[#allocation3 + $0x1c] sm:$0x3] }
0x567e   :  { %v5952_v41 = vld [vmem:[#allocation5] sm:$0x3]  ;;  %6145 = vst.msk [vmem:[%s8984_s7 + $0x1c] sm:$0x3] %vm438_vm2, %v6129_v32 }
0x567f   :  { %6399 = vmatmul.mubr.msk.f32.vlgmr.msra.gmra.mrb[38].mxu1 %vm58_vm1, %v5952_v41 }
0x5683   :  { %v6041_v54 = vld [vmem:[#allocation6] sm:$0x3] }
0x5752   :  { %v6022_v12 = vpop.f32.mrb[38].mxu1 }
0x5753   :  { %v6024_v14 = vpop.f32.mrb[39].mxu1  ;;  %v6029_v48 = vadd.f32 %v6027_v47, %v6022_v12 }
0x5754   :  { %v6040_v52 = vadd.f32 %v6038_v35, %v6024_v14 }
0x5755   :  { %v6401_v2 = vmul.f32 -1.442695, %v6029_v48 }
0x5756   :  { %7456 = vtanh.f32 %v6040_v52  ;;  %v6402_v63 = vmul.f32 -1.442695, %v6040_v52 }
0x5757   :  { %7458 = vtanh.f32 %v6029_v48 }
0x5758   :  { %7460 = vpow2.f32 %v6402_v63 }
0x5759   :  { %7462 = vpow2.f32 %v6401_v2 }
0x5760   :  { %v7457_v5 = vpop.eup %7456 }
0x5761   :  { %6079 = vrot.lane.b32.xlu1 %v7457_v5, %s7473_s18  ;;  %v7459_v49 = vpop.eup %7458 }
0x5762   :  { %v7461_v4 = vpop.eup %7460 }
0x5763   :  { %v6073_v6 = vadd.f32 1.0, %v7461_v4  ;;  %v7463_v9 = vpop.eup %7462 }
0x5764   :  { %v6045_v30 = vadd.f32 1.0, %v7463_v9 }
0x5765   :  { %6055 = vrot.lane.b32.xlu1 %v7459_v49, %s7473_s18  ;;  %7464 = vrcp.f32 %v6073_v6 }
0x5766   :  { %7466 = vrcp.f32 %v6045_v30 }
0x5769   :  { %6050 = vrot.lane.b32.xlu1 %v6041_v54, %s7473_s18 }
0x576f   :  { %v7465_v36 = vpop.eup %7464 }
0x5770   :  { %v7467_v15 = vpop.eup %7466  ;;  %v6077_v44 = vmul.f32 %v7465_v36, %v6041_v54 }
0x57d3   :  { %v6080_v11 = vpop.permute.xlu1 %6079 }
0x57d4   :  { %v6082_v13 = vmul.f32 %v7465_v36, %v6080_v11 }
0x57d6   :  { %6084 = vrot.lane.b32.xlu0 %v6082_v13, %s7473_s18 }
0x57d7   :  { %v6056_v7 = vpop.permute.xlu1 %6055 }
0x57d8   :  { %v6058_v57 = vmul.f32 %v7467_v15, %v6056_v7 }
0x57da   :  { %6060 = vrot.lane.b32.xlu0 %v6058_v57, %s7473_s18 }
0x57db   :  { %v6051_v56 = vpop.permute.xlu1 %6050 }
0x57dc   :  { %v6053_v42 = vmul.f32 %v7467_v15, %v6051_v56 }
0x5848   :  { %v6085_v61 = vpop.permute.xlu0 %6084 }
0x5849   :  { %v8832_v19 = vadd.f32 %v6085_v61, %v6077_v44 }
0x584b   :  { %7468 = vtanh.f32 %v8832_v19 }
0x584c   :  { %v6061_v1 = vpop.permute.xlu0 %6060 }
0x584d   :  { %v6063_v3 = vadd.f32 %v6061_v1, %v6053_v42 }
0x584f   :  { %7470 = vtanh.f32 %v6063_v3 }
0x5855   :  { %v7469_v58 = vpop.eup %7468 }
0x5856   :  { %6090 = vrot.lane.b32.xlu1 %v7469_v58, %s7473_s18 }
0x5859   :  { %v7471_v59 = vpop.eup %7470 }
0x585a   :  { %6066 = vrot.lane.b32.xlu0 %v7471_v59, %s7473_s18  ;;  %3666 = vrot.lane.b32.xlu1 %v8376_v0, %s7475_s3 }
0x585e   :  { %3829 = vrot.lane.b32.xlu0 %v8406_v62, %s7475_s3  ;;  %3992 = vrot.lane.b32.xlu1 %v8438_v37, %s7475_s3 }
0x5862   :  { %4155 = vrot.lane.b32.xlu0 %v8470_v23, %s7475_s3  ;;  %4318 = vrot.lane.b32.xlu1 %v8502_v28, %s7475_s3 }
0x5866   :  { %4481 = vrot.lane.b32.xlu0 %v8534_v38, %s7475_s3  ;;  %4644 = vrot.lane.b32.xlu1 %v8566_v51, %s7475_s3 }
0x586a   :  { %4807 = vrot.lane.b32.xlu0 %v8598_v34, %s7475_s3  ;;  %4970 = vrot.lane.b32.xlu1 %v8630_v26, %s7475_s3 }
0x586e   :  { %5133 = vrot.lane.b32.xlu0 %v8662_v40, %s7475_s3  ;;  %5296 = vrot.lane.b32.xlu1 %v8694_v39, %s7475_s3 }
0x5872   :  { %5459 = vrot.lane.b32.xlu0 %v8726_v16, %s7475_s3  ;;  %5622 = vrot.lane.b32.xlu1 %v8757_v10, %s7475_s3 }
0x5876   :  { %5785 = vrot.lane.b32.xlu0 %v8788_v43, %s7475_s3  ;;  %5948 = vrot.lane.b32.xlu1 %v8811_v27, %s7475_s3 }
0x58c8   :  { %v6091_v0 = vpop.permute.xlu1 %6090 }
0x58c9   :  { %v6093_v62 = vmul.f32 %v7465_v36, %v6091_v0 }
0x58cb   :  { %6111 = vrot.lane.b32.xlu0 %v6093_v62, %s7475_s3 }
0x58cc   :  { %v6067_v37 = vpop.permute.xlu0 %6066  ;;  %v3667_v23 = vpop.permute.xlu1 %3666 }
0x58cd   :  { %v6069_v28 = vmul.f32 %v7467_v15, %v6067_v37  ;;  %3669 = vst.msk [vmem:[#allocation4 + $0x1e] sm:$0x3] %vm438_vm2, %v3667_v23 }
0x58cf   :  { %6095 = vrot.lane.b32.xlu1 %v6069_v28, %s7475_s3  ;;  %6105 = vrot.lane.b32.xlu0 %v6063_v3, %s7476_s27 }
0x58d0   :  { %v3830_v38 = vpop.permute.xlu0 %3829  ;;  %v3993_v51 = vpop.permute.xlu1 %3992 }
0x58d1   :  { %3832 = vst.msk [vmem:[#allocation4 + $0x1c] sm:$0x3] %vm438_vm2, %v3830_v38  ;;  %3995 = vst.msk [vmem:[#allocation4 + $0x1a] sm:$0x3] %vm438_vm2, %v3993_v51 }
0x58d4   :  { %v4156_v34 = vpop.permute.xlu0 %4155  ;;  %v4319_v26 = vpop.permute.xlu1 %4318  ;;  %v6162_v41 = vld [vmem:[#allocation4 + $0x1e] sm:$0x3] }
0x58d5   :  { %4158 = vst.msk [vmem:[#allocation4 + $0x18] sm:$0x3] %vm438_vm2, %v4156_v34  ;;  %4321 = vst.msk [vmem:[#allocation4 + $0x16] sm:$0x3] %vm438_vm2, %v4319_v26 }
0x58d8   :  { %v4482_v40 = vpop.permute.xlu0 %4481  ;;  %v4645_v39 = vpop.permute.xlu1 %4644  ;;  %v6160_v32 = vld [vmem:[#allocation4 + $0x1a] sm:$0x3]  ;;  %v6161_v52 = vld [vmem:[#allocation4 + $0x1c] sm:$0x3] }
0x58d9   :  { %4484 = vst.msk [vmem:[#allocation4 + $0x14] sm:$0x3] %vm438_vm2, %v4482_v40  ;;  %4647 = vst.msk [vmem:[#allocation4 + $0x12] sm:$0x3] %vm438_vm2, %v4645_v39 }
0x58dc   :  { %v4808_v16 = vpop.permute.xlu0 %4807  ;;  %v4971_v10 = vpop.permute.xlu1 %4970  ;;  %v6159_v31 = vld [vmem:[#allocation4 + $0x18] sm:$0x3]  ;;  %v6158_v46 = vld [vmem:[#allocation4 + $0x16] sm:$0x3] }
0x58dd   :  { %4810 = vst.msk [vmem:[#allocation4 + $0x10] sm:$0x3] %vm438_vm2, %v4808_v16  ;;  %4973 = vst.msk [vmem:[#allocation4 + $0xe] sm:$0x3] %vm438_vm2, %v4971_v10 }
0x58e0   :  { %v5134_v43 = vpop.permute.xlu0 %5133  ;;  %v5297_v8 = vpop.permute.xlu1 %5296  ;;  %v6157_v27 = vld [vmem:[#allocation4 + $0x14] sm:$0x3]  ;;  %v6156_v29 = vld [vmem:[#allocation4 + $0x12] sm:$0x3] }
0x58e1   :  { %5136 = vst.msk [vmem:[#allocation4 + $0xc] sm:$0x3] %vm438_vm2, %v5134_v43  ;;  %5299 = vst.msk [vmem:[#allocation4 + $0xa] sm:$0x3] %vm438_vm2, %v5297_v8 }
0x58e4   :  { %v5460_v25 = vpop.permute.xlu0 %5459  ;;  %v5623_v45 = vpop.permute.xlu1 %5622  ;;  %v6155_v21 = vld [vmem:[#allocation4 + $0x10] sm:$0x3]  ;;  %v6154_v24 = vld [vmem:[#allocation4 + $0xe] sm:$0x3] }
0x58e5   :  { %5462 = vst.msk [vmem:[#allocation4 + $0x8] sm:$0x3] %vm438_vm2, %v5460_v25  ;;  %5625 = vst.msk [vmem:[#allocation4 + $0x6] sm:$0x3] %vm438_vm2, %v5623_v45 }
0x58e8   :  { %v5786_v50 = vpop.permute.xlu0 %5785  ;;  %v5949_v60 = vpop.permute.xlu1 %5948  ;;  %v6153_v20 = vld [vmem:[#allocation4 + $0xc] sm:$0x3]  ;;  %v6152_v22 = vld [vmem:[#allocation4 + $0xa] sm:$0x3] }
0x58e9   :  { %5788 = vst.msk [vmem:[#allocation4 + $0x4] sm:$0x3] %vm438_vm2, %v5786_v50  ;;  %5951 = vst.msk [vmem:[#allocation4 + $0x2] sm:$0x3] %vm438_vm2, %v5949_v60 }
0x58ec   :  { %v6151_v17 = vld [vmem:[#allocation4 + $0x8] sm:$0x3]  ;;  %v6150_v18 = vld [vmem:[#allocation4 + $0x6] sm:$0x3] }
0x58f0   :  { %v6149_v55 = vld [vmem:[#allocation4 + $0x4] sm:$0x3]  ;;  %v6148_v53 = vld [vmem:[#allocation4 + $0x2] sm:$0x3] }
0x58f1   :  { %6183 = vrot.lane.b32.xlu0 %v6149_v55, %s7473_s18  ;;  %6181 = vrot.lane.b32.xlu1 %v6148_v53, %s7473_s18 }
0x58f5   :  { %6187 = vrot.lane.b32.xlu0 %v6151_v17, %s7473_s18  ;;  %6185 = vrot.lane.b32.xlu1 %v6150_v18, %s7473_s18 }
0x58f9   :  { %6191 = vrot.lane.b32.xlu0 %v6153_v20, %s7473_s18  ;;  %6189 = vrot.lane.b32.xlu1 %v6152_v22, %s7473_s18 }
0x58fd   :  { %6195 = vrot.lane.b32.xlu0 %v6155_v21, %s7473_s18  ;;  %6193 = vrot.lane.b32.xlu1 %v6154_v24, %s7473_s18 }
0x5901   :  { %6199 = vrot.lane.b32.xlu0 %v6157_v27, %s7473_s18  ;;  %6197 = vrot.lane.b32.xlu1 %v6156_v29, %s7473_s18 }
0x5905   :  { %6203 = vrot.lane.b32.xlu0 %v6159_v31, %s7473_s18  ;;  %6201 = vrot.lane.b32.xlu1 %v6158_v46, %s7473_s18 }
0x5909   :  { %6205 = vrot.lane.b32.xlu1 %v6160_v32, %s7473_s18 }
0x590d   :  { %6100 = vrot.lane.b32.xlu1 %v6093_v62, %s7476_s27 }
0x5911   :  { %6209 = vrot.lane.b32.xlu1 %v6162_v41, %s7473_s18 }
0x593d   :  { %v6112_v33 = vpop.permute.xlu0 %6111 }
0x593e   :  { %6114 = vst.msk [vmem:[#allocation4] sm:$0x3] %vm438_vm2, %v6112_v33 }
0x5941   :  { %v6106_v12 = vpop.permute.xlu0 %6105  ;;  %v6096_v35 = vpop.permute.xlu1 %6095 }
0x5942   :  { %6108 = vst.msk [vmem:[#allocation6] sm:$0x3] %vm438_vm2, %v6106_v12  ;;  %6098 = vst.msk [vmem:[#allocation5] sm:$0x3] %vm438_vm2, %v6096_v35 }
0x5943   :  { %6110 = vst.msk [vmem:[#allocation3 + $0x1e] sm:$0x3] %vm438_vm2, %v6096_v35 }
0x5944   :  { %6109 = vst.msk [vmem:[#allocation6] sm:$0x3] %vm444_vm3, %v8832_v19 }
0x5945   :  { %v6147_v14 = vld [vmem:[#allocation4] sm:$0x3] }
0x5946   :  { %6179 = vrot.lane.b32.xlu0 %v6147_v14, %s7473_s18 }
0x594a   :  { %v6130_v47 = vld [vmem:[#allocation3 + $0x1e] sm:$0x3]  ;;  %6207 = vrot.lane.b32.xlu0 %v6161_v52, %s7473_s18 }
0x594b   :  { %6146 = vst.msk [vmem:[%s8984_s7 + $0x1e] sm:$0x3] %vm438_vm2, %v6130_v47 }
0x5963   :  { %v6184_v48 = vpop.permute.xlu0 %6183  ;;  %v6182_v5 = vpop.permute.xlu1 %6181 }
0x5964   :  { %6229 = vst.msk [vmem:[%s8984_s7 + $0x4] sm:$0x3] %vm444_vm3, %v6184_v48  ;;  %6228 = vst.msk [vmem:[%s8984_s7 + $0x2] sm:$0x3] %vm444_vm3, %v6182_v5 }
0x5967   :  { %v6188_v49 = vpop.permute.xlu0 %6187  ;;  %v6186_v54 = vpop.permute.xlu1 %6185 }
0x5968   :  { %6231 = vst.msk [vmem:[%s8984_s7 + $0x8] sm:$0x3] %vm444_vm3, %v6188_v49  ;;  %6230 = vst.msk [vmem:[%s8984_s7 + $0x6] sm:$0x3] %vm444_vm3, %v6186_v54 }
0x596b   :  { %v6192_v63 = vpop.permute.xlu0 %6191  ;;  %v6190_v2 = vpop.permute.xlu1 %6189 }
0x596c   :  { %6233 = vst.msk [vmem:[%s8984_s7 + $0xc] sm:$0x3] %vm444_vm3, %v6192_v63  ;;  %6232 = vst.msk [vmem:[%s8984_s7 + $0xa] sm:$0x3] %vm444_vm3, %v6190_v2 }
0x596f   :  { %v6196_v4 = vpop.permute.xlu0 %6195  ;;  %v6194_v6 = vpop.permute.xlu1 %6193 }
0x5970   :  { %6235 = vst.msk [vmem:[%s8984_s7 + $0x10] sm:$0x3] %vm444_vm3, %v6196_v4  ;;  %6234 = vst.msk [vmem:[%s8984_s7 + $0xe] sm:$0x3] %vm444_vm3, %v6194_v6 }
0x5973   :  { %v6200_v9 = vpop.permute.xlu0 %6199  ;;  %v6198_v30 = vpop.permute.xlu1 %6197 }
0x5974   :  { %6237 = vst.msk [vmem:[%s8984_s7 + $0x14] sm:$0x3] %vm444_vm3, %v6200_v9  ;;  %6236 = vst.msk [vmem:[%s8984_s7 + $0x12] sm:$0x3] %vm444_vm3, %v6198_v30 }
0x5977   :  { %v6204_v36 = vpop.permute.xlu0 %6203  ;;  %v6202_v11 = vpop.permute.xlu1 %6201 }
0x5978   :  { %6239 = vst.msk [vmem:[%s8984_s7 + $0x18] sm:$0x3] %vm444_vm3, %v6204_v36  ;;  %6238 = vst.msk [vmem:[%s8984_s7 + $0x16] sm:$0x3] %vm444_vm3, %v6202_v11 }
0x597b   :  { %v6206_v13 = vpop.permute.xlu1 %6205 }
0x597c   :  { %6240 = vst.msk [vmem:[%s8984_s7 + $0x1a] sm:$0x3] %vm444_vm3, %v6206_v13 }
0x597f   :  { %v6101_v15 = vpop.permute.xlu1 %6100 }
0x5980   :  { %6103 = vst.msk [vmem:[#allocation5] sm:$0x3] %vm444_vm3, %v6101_v15 }
0x5983   :  { %v6210_v7 = vpop.permute.xlu1 %6209 }
0x5984   :  { %6242 = vst.msk [vmem:[%s8984_s7 + $0x1e] sm:$0x3] %vm444_vm3, %v6210_v7 }
0x59b8   :  { %v6180_v57 = vpop.permute.xlu0 %6179 }
0x59b9   :  { %6227 = vst.msk [vmem:[%s8984_s7] sm:$0x3] %vm444_vm3, %v6180_v57 }
0x59bc   :  { %v6208_v44 = vpop.permute.xlu0 %6207 }
0x59bd   :  { %6241 = vst.msk [vmem:[%s8984_s7 + $0x1c] sm:$0x3] %vm444_vm3, %v6208_v44 }

</bundles_post_ra>
